<compile_context>
chip_gen: v7x
topology: tpu7x:2x2x1
jax: 0.10.0
libtpu: 0.0.40
codegen_flags: <defaults>
</compile_context>

<pallas_src>
import functools

import jax
import jax.numpy as jnp
from jax.experimental import pallas as pl
from jax.experimental.pallas import tpu as pltpu


def _round_up(x, m):
    return (x + m - 1) // m * m


# --------------------------- fused Pallas kernel -----------------------------

def _conv_in_lrelu_kernel(patch_ref, w_ref, o_ref, acc_ref, s_ref, ss_ref,
                          *, p_true, n_tiles, tile_p):
    # patch_ref: (1, K, TP) bf16    w_ref: (Cout, K) bf16
    # o_ref:     (1, Cout, Ppad)    acc_ref: (nP, Cout, TP) f32
    # s_ref/ss_ref: (Cout, 1) f32 per-channel sum / sum-of-squares accumulators.
    p_idx = pl.program_id(1)

    @pl.when(p_idx == 0)
    def _init():
        s_ref[...] = jnp.zeros_like(s_ref)
        ss_ref[...] = jnp.zeros_like(ss_ref)

    # (Cout, K) @ (K, TP) -> (Cout, TP): lane-dense output, f32 MXU accumulation.
    y = jnp.dot(w_ref[...], patch_ref[0], preferred_element_type=jnp.float32)
    acc_ref[p_idx] = y
    s_ref[...] += jnp.sum(y, axis=1, keepdims=True)
    ss_ref[...] += jnp.sum(y * y, axis=1, keepdims=True)

    @pl.when(p_idx == n_tiles - 1)
    def _finalize():
        inv_n = 1.0 / float(p_true)            # true (unpadded) pixel count
        mean = s_ref[...] * inv_n              # (Cout, 1)
        var = jnp.maximum(ss_ref[...] * inv_n - mean * mean, 0.0)
        scale = jax.lax.rsqrt(var + 1e-5)      # (Cout, 1)
        for j in range(n_tiles):               # static unroll, static lane offsets
            yn = (acc_ref[j] - mean) * scale
            o_ref[0, :, j * tile_p:(j + 1) * tile_p] = jnp.where(
                yn >= 0.0, yn, 0.2 * yn).astype(o_ref.dtype)


def conv_in_lrelu(patches, w_mat, p_true, tile_p, out_dtype):
    """patches: (N, K, Ppad) bf16; w_mat: (Cout, K) bf16 -> (N, Cout, Ppad)."""
    n, k, p_pad = patches.shape
    cout = w_mat.shape[0]
    n_tiles = p_pad // tile_p
    kernel = functools.partial(
        _conv_in_lrelu_kernel, p_true=p_true, n_tiles=n_tiles, tile_p=tile_p)
    return pl.pallas_call(
        kernel,
        out_shape=jax.ShapeDtypeStruct((n, cout, p_pad), out_dtype),
        grid=(n, n_tiles),
        in_specs=[
            pl.BlockSpec((1, k, tile_p), lambda i, j: (i, 0, j)),
            pl.BlockSpec((cout, k), lambda i, j: (0, 0)),
        ],
        out_specs=pl.BlockSpec((1, cout, p_pad), lambda i, j: (i, 0, 0)),
        scratch_shapes=[
            pltpu.VMEM((n_tiles, cout, tile_p), jnp.float32),  # raw conv (f32)
            pltpu.VMEM((cout, 1), jnp.float32),                # per-channel sum
            pltpu.VMEM((cout, 1), jnp.float32),                # per-channel sumsq
        ],
        compiler_params=pltpu.CompilerParams(
            dimension_semantics=("parallel", "arbitrary")),
    )(patches, w_mat)


# ------------------------------ JAX glue --------------------------------------

def _im2col_s2_k3(x):
    """3x3 / stride-2 / no-pad patch extraction. x: (N,C,H,W) -> (N, 9C, Ho*Wo)."""
    n, c, h, w = x.shape
    ho = (h - 3) // 2 + 1
    wo = (w - 3) // 2 + 1
    taps = []
    for kh in range(3):
        for kw in range(3):
            taps.append(jax.lax.slice(
                x, (0, 0, kh, kw),
                (n, c, kh + 2 * (ho - 1) + 1, kw + 2 * (wo - 1) + 1),
                (1, 1, 2, 2)))                     # (N, C, Ho, Wo)
    pat = jnp.stack(taps, axis=1)                  # (N, 9, C, Ho, Wo)
    return pat.reshape(n, 9 * c, ho * wo), ho, wo


def pixel_discriminator_forward(x_nchw, conv_params):
    """PixelDiscriminator: 4 x [Conv2d(3,s=2,p=0) + InstanceNorm + LeakyReLU(0.2)]."""
    x = x_nchw.astype(jnp.float32)
    n = x.shape[0]
    n_layers = len(conv_params)
    for li, (w, _b) in enumerate(conv_params):
        # Conv bias is a per-channel constant -> exactly cancelled by the
        # InstanceNorm(affine=False) mean subtraction; dropped (no-op, exact).
        cout = w.shape[0]
        patches, ho, wo = _im2col_s2_k3(x)             # (N, K, P), K = 9*Cin
        p = ho * wo
        tile_p = min(512, _round_up(p, 128))
        p_pad = _round_up(p, tile_p)
        patches = jnp.pad(patches, ((0, 0), (0, 0), (0, p_pad - p)))
        patches = patches.astype(jnp.bfloat16)
        # (Cout, Cin, 3, 3) -> (Cout, kh, kw, Cin) -> (Cout, 9*Cin): matches K order.
        w_mat = jnp.transpose(w, (0, 2, 3, 1)).reshape(cout, -1).astype(jnp.bfloat16)
        out_dtype = jnp.float32 if li == n_layers - 1 else jnp.bfloat16
        y = conv_in_lrelu(patches, w_mat, p, tile_p, out_dtype)  # (N, Cout, Ppad)
        x = y[:, :, :p].reshape(n, cout, ho, wo)       # NCHW, bf16 except last layer
    return x


# ------------------------- pure-JAX reference ---------------------------------

def _reference_forward(x_nchw, conv_params):
    """Same math (incl. bias + InstanceNorm + LeakyReLU) with matching bf16 casts."""
    x = x_nchw.astype(jnp.float32)
    n_layers = len(conv_params)
    for li, (w, b) in enumerate(conv_params):
        xq = x.astype(jnp.bfloat16).astype(jnp.float32)
        wq = w.astype(jnp.bfloat16).astype(jnp.float32)
        y = jax.lax.conv_general_dilated(
            xq, wq, window_strides=(2, 2), padding="VALID",
            dimension_numbers=("NCHW", "OIHW", "NCHW"),
            precision=jax.lax.Precision.HIGHEST)
        y = y + b[None, :, None, None]
        mean = jnp.mean(y, axis=(2, 3), keepdims=True)
        var = jnp.mean(jnp.square(y - mean), axis=(2, 3), keepdims=True)
        y = (y - mean) * jax.lax.rsqrt(var + 1e-5)
        y = jnp.where(y >= 0.0, y, 0.2 * y)
        x = y.astype(jnp.bfloat16).astype(jnp.float32) if li < n_layers - 1 else y
    return x


# --------------------- deterministic parameters / main -------------------------

def init_pixel_discriminator(key, input_dim, ndf=32, depth=4):
    convs = []
    cin, cout = input_dim, ndf
    for _ in range(depth):
        key, kw_key, kb_key = jax.random.split(key, 3)
        w = 0.05 * jax.random.normal(kw_key, (cout, cin, 3, 3), jnp.float32)
        b = 0.05 * jax.random.normal(kb_key, (cout,), jnp.float32)
        convs.append((w, b))
        cin, cout = cout, cout * 2
    return convs


if __name__ == "__main__":
    key = jax.random.PRNGKey(0)
    k_x, k_p = jax.random.split(key)

    N, C, H, W = 2, 4, 64, 64          # spatial: 64 -> 31 -> 15 -> 7 -> 3
    x = jax.random.normal(k_x, (N, C, H, W), jnp.float32)
    params = init_pixel_discriminator(k_p, C, ndf=32, depth=4)

    fwd = jax.jit(pixel_discriminator_forward)
    out = jax.block_until_ready(fwd(x, params))

    assert out.shape == (N, 256, 3, 3) and out.dtype == jnp.float32
    assert bool(jnp.all(jnp.isfinite(out)))

    ref = _reference_forward(x, params)
    max_err = float(jnp.max(jnp.abs(out - ref)))
    assert max_err < 3e-2, f"mismatch vs reference: {max_err}"
    print("KERNEL_OK")
</pallas_src>

<mosaic_0001>
module attributes {stable_mosaic.version = 11 : i64} {
  func.func @_conv_in_lrelu_kernel(%arg0: i32, %arg1: i32, %arg2: memref<1x36x512xbf16, #tpu.memory_space<vmem>>, %arg3: memref<32x36xbf16, #tpu.memory_space<vmem>>, %arg4: memref<1x32x1024xbf16, #tpu.memory_space<vmem>>, %arg5: memref<2x32x512xf32, #tpu.memory_space<vmem>>, %arg6: memref<32x1xf32, #tpu.memory_space<vmem>>, %arg7: memref<32x1xf32, #tpu.memory_space<vmem>>) attributes {dimension_semantics = [#tpu.dimension_semantics<parallel>, #tpu.dimension_semantics<arbitrary>], iteration_bounds = array<i64: 2, 2>, scalar_prefetch = 0 : i64, scratch_operands = 3 : i64, tpu.core_type = #tpu.core_type<tc>, window_params = [{transform_indices = @transform_0, window_bounds = array<i64: 1, 36, 512>}, {pipeline_mode = #tpu.pipeline_mode<synchronous>, transform_indices = @transform_1, window_bounds = array<i64: 32, 36>}, {transform_indices = @transform_2, window_bounds = array<i64: 1, 32, 1024>}]} {
    %c0_i32 = arith.constant 0 : i32
    %0 = arith.cmpi eq, %arg1, %c0_i32 : i32
    %1 = arith.extui %0 : i1 to i32
    %c0_i32_0 = arith.constant 0 : i32
    %2 = arith.cmpi ne, %1, %c0_i32_0 : i32
    scf.if %2 {
      %cst_18 = arith.constant 0.000000e+00 : f32
      %25 = vector.broadcast %cst_18 : f32 to vector<32x1xf32>
      %c0_19 = arith.constant 0 : index
      %c0_20 = arith.constant 0 : index
      %26 = vector.load %arg6[%c0_19, %c0_20] : memref<32x1xf32, #tpu.memory_space<vmem>>, vector<32x1xf32>
      tpu.vector_store %arg6[%c0_19, %c0_20], %25 {strides = array<i32>} : memref<32x1xf32, #tpu.memory_space<vmem>>, vector<32x1xf32>,
      %cst_21 = arith.constant 0.000000e+00 : f32
      %27 = vector.broadcast %cst_21 : f32 to vector<32x1xf32>
      %c0_22 = arith.constant 0 : index
      %c0_23 = arith.constant 0 : index
      %28 = vector.load %arg7[%c0_22, %c0_23] : memref<32x1xf32, #tpu.memory_space<vmem>>, vector<32x1xf32>
      tpu.vector_store %arg7[%c0_22, %c0_23], %27 {strides = array<i32>} : memref<32x1xf32, #tpu.memory_space<vmem>>, vector<32x1xf32>,
    } else {
    }
    %c0 = arith.constant 0 : index
    %c0_1 = arith.constant 0 : index
    %3 = vector.load %arg3[%c0, %c0_1] : memref<32x36xbf16, #tpu.memory_space<vmem>>, vector<32x36xbf16>
    %c0_2 = arith.constant 0 : index
    %c0_3 = arith.constant 0 : index
    %c0_4 = arith.constant 0 : index
    %4 = vector.load %arg2[%c0_2, %c0_3, %c0_4] : memref<1x36x512xbf16, #tpu.memory_space<vmem>>, vector<1x36x512xbf16>
    %5 = vector.shape_cast %4 : vector<1x36x512xbf16> to vector<36x512xbf16>
    %cst = arith.constant dense<0.000000e+00> : vector<32x512xf32>
    %6 = tpu.matmul %3, %5, %cst {dimension_numbers = #tpu.dot_dimension_numbers<[1], [0], [0], [1], [0, 0, 1, 1], [], []>} : vector<32x36xbf16>, vector<36x512xbf16>, vector<32x512xf32> -> vector<32x512xf32>
    %7 = arith.index_cast %arg1 : i32 to index
    %c0_5 = arith.constant 0 : index
    %c0_6 = arith.constant 0 : index
    %8 = vector.load %arg5[%7, %c0_5, %c0_6] : memref<2x32x512xf32, #tpu.memory_space<vmem>>, vector<1x32x512xf32>
    %9 = vector.shape_cast %8 : vector<1x32x512xf32> to vector<32x512xf32>
    %10 = vector.shape_cast %6 : vector<32x512xf32> to vector<1x32x512xf32>
    tpu.vector_store %arg5[%7, %c0_5, %c0_6], %10 {strides = array<i32>} : memref<2x32x512xf32, #tpu.memory_space<vmem>>, vector<1x32x512xf32>,
    %c0_7 = arith.constant 0 : index
    %c0_8 = arith.constant 0 : index
    %11 = vector.load %arg6[%c0_7, %c0_8] : memref<32x1xf32, #tpu.memory_space<vmem>>, vector<32x1xf32>
    %cst_9 = arith.constant dense<0.000000e+00> : vector<32xf32>
    %12 = vector.multi_reduction <add>, %6, %cst_9 [1] : vector<32x512xf32> to vector<32xf32>
    %13 = vector.shape_cast %12 : vector<32xf32> to vector<32x1xf32>
    %14 = arith.addf %11, %13 : vector<32x1xf32>
    %c0_10 = arith.constant 0 : index
    %c0_11 = arith.constant 0 : index
    %15 = vector.load %arg6[%c0_10, %c0_11] : memref<32x1xf32, #tpu.memory_space<vmem>>, vector<32x1xf32>
    tpu.vector_store %arg6[%c0_10, %c0_11], %14 {strides = array<i32>} : memref<32x1xf32, #tpu.memory_space<vmem>>, vector<32x1xf32>,
    %c0_12 = arith.constant 0 : index
    %c0_13 = arith.constant 0 : index
    %16 = vector.load %arg7[%c0_12, %c0_13] : memref<32x1xf32, #tpu.memory_space<vmem>>, vector<32x1xf32>
    %17 = arith.mulf %6, %6 : vector<32x512xf32>
    %cst_14 = arith.constant dense<0.000000e+00> : vector<32xf32>
    %18 = vector.multi_reduction <add>, %17, %cst_14 [1] : vector<32x512xf32> to vector<32xf32>
    %19 = vector.shape_cast %18 : vector<32xf32> to vector<32x1xf32>
    %20 = arith.addf %16, %19 : vector<32x1xf32>
    %c0_15 = arith.constant 0 : index
    %c0_16 = arith.constant 0 : index
    %21 = vector.load %arg7[%c0_15, %c0_16] : memref<32x1xf32, #tpu.memory_space<vmem>>, vector<32x1xf32>
    tpu.vector_store %arg7[%c0_15, %c0_16], %20 {strides = array<i32>} : memref<32x1xf32, #tpu.memory_space<vmem>>, vector<32x1xf32>,
    %c1_i32 = arith.constant 1 : i32
    %22 = arith.cmpi eq, %arg1, %c1_i32 : i32
    %23 = arith.extui %22 : i1 to i32
    %c0_i32_17 = arith.constant 0 : i32
    %24 = arith.cmpi ne, %23, %c0_i32_17 : i32
    scf.if %24 {
      %c0_18 = arith.constant 0 : index
      %c0_19 = arith.constant 0 : index
      %25 = vector.load %arg6[%c0_18, %c0_19] : memref<32x1xf32, #tpu.memory_space<vmem>>, vector<32x1xf32>
      %cst_20 = arith.constant 0.00104058278 : f32
      %26 = vector.broadcast %cst_20 : f32 to vector<32x1xf32>
      %27 = arith.mulf %25, %26 : vector<32x1xf32>
      %c0_21 = arith.constant 0 : index
      %c0_22 = arith.constant 0 : index
      %28 = vector.load %arg7[%c0_21, %c0_22] : memref<32x1xf32, #tpu.memory_space<vmem>>, vector<32x1xf32>
      %cst_23 = arith.constant 0.00104058278 : f32
      %29 = vector.broadcast %cst_23 : f32 to vector<32x1xf32>
      %30 = arith.mulf %28, %29 : vector<32x1xf32>
      %31 = arith.mulf %27, %27 : vector<32x1xf32>
      %32 = arith.subf %30, %31 : vector<32x1xf32>
      %cst_24 = arith.constant 0.000000e+00 : f32
      %33 = vector.broadcast %cst_24 : f32 to vector<32x1xf32>
      %34 = arith.maximumf %32, %33 : vector<32x1xf32>
      %cst_25 = arith.constant 9.99999974E-6 : f32
      %35 = vector.broadcast %cst_25 : f32 to vector<32x1xf32>
      %36 = arith.addf %34, %35 : vector<32x1xf32>
      %37 = math.rsqrt %36 : vector<32x1xf32>
      %c0_26 = arith.constant 0 : index
      %c0_27 = arith.constant 0 : index
      %c0_28 = arith.constant 0 : index
      %38 = vector.load %arg5[%c0_26, %c0_27, %c0_28] : memref<2x32x512xf32, #tpu.memory_space<vmem>>, vector<1x32x512xf32>
      %39 = vector.shape_cast %38 : vector<1x32x512xf32> to vector<32x512xf32>
      %40 = vector.broadcast %27 : vector<32x1xf32> to vector<32x512xf32>
      %41 = arith.subf %39, %40 : vector<32x512xf32>
      %42 = vector.broadcast %37 : vector<32x1xf32> to vector<32x512xf32>
      %43 = arith.mulf %41, %42 : vector<32x512xf32>
      %cst_29 = arith.constant 0.000000e+00 : f32
      %44 = vector.broadcast %cst_29 : f32 to vector<32x512xf32>
      %45 = arith.cmpf oge, %43, %44 : vector<32x512xf32>
      %cst_30 = arith.constant 2.000000e-01 : f32
      %46 = vector.broadcast %cst_30 : f32 to vector<32x512xf32>
      %47 = arith.mulf %46, %43 : vector<32x512xf32>
      %48 = arith.select %45, %43, %47 : vector<32x512xi1>, vector<32x512xf32>
      %49 = arith.truncf %48 : vector<32x512xf32> to vector<32x512xbf16>
      %c0_31 = arith.constant 0 : index
      %c0_32 = arith.constant 0 : index
      %c0_33 = arith.constant 0 : index
      %50 = vector.load %arg4[%c0_31, %c0_32, %c0_33] : memref<1x32x1024xbf16, #tpu.memory_space<vmem>>, vector<1x32x512xbf16>
      %51 = vector.shape_cast %50 : vector<1x32x512xbf16> to vector<32x512xbf16>
      %52 = vector.shape_cast %49 : vector<32x512xbf16> to vector<1x32x512xbf16>
      tpu.vector_store %arg4[%c0_31, %c0_32, %c0_33], %52 {strides = array<i32>} : memref<1x32x1024xbf16, #tpu.memory_space<vmem>>, vector<1x32x512xbf16>,
      %c1 = arith.constant 1 : index
      %c0_34 = arith.constant 0 : index
      %c0_35 = arith.constant 0 : index
      %53 = vector.load %arg5[%c1, %c0_34, %c0_35] : memref<2x32x512xf32, #tpu.memory_space<vmem>>, vector<1x32x512xf32>
      %54 = vector.shape_cast %53 : vector<1x32x512xf32> to vector<32x512xf32>
      %55 = vector.broadcast %27 : vector<32x1xf32> to vector<32x512xf32>
      %56 = arith.subf %54, %55 : vector<32x512xf32>
      %57 = vector.broadcast %37 : vector<32x1xf32> to vector<32x512xf32>
      %58 = arith.mulf %56, %57 : vector<32x512xf32>
      %cst_36 = arith.constant 0.000000e+00 : f32
      %59 = vector.broadcast %cst_36 : f32 to vector<32x512xf32>
      %60 = arith.cmpf oge, %58, %59 : vector<32x512xf32>
      %cst_37 = arith.constant 2.000000e-01 : f32
      %61 = vector.broadcast %cst_37 : f32 to vector<32x512xf32>
      %62 = arith.mulf %61, %58 : vector<32x512xf32>
      %63 = arith.select %60, %58, %62 : vector<32x512xi1>, vector<32x512xf32>
      %64 = arith.truncf %63 : vector<32x512xf32> to vector<32x512xbf16>
      %c0_38 = arith.constant 0 : index
      %c0_39 = arith.constant 0 : index
      %c512 = arith.constant 512 : index
      %65 = vector.load %arg4[%c0_38, %c0_39, %c512] : memref<1x32x1024xbf16, #tpu.memory_space<vmem>>, vector<1x32x512xbf16>
      %66 = vector.shape_cast %65 : vector<1x32x512xbf16> to vector<32x512xbf16>
      %67 = vector.shape_cast %64 : vector<32x512xbf16> to vector<1x32x512xbf16>
      tpu.vector_store %arg4[%c0_38, %c0_39, %c512], %67 {strides = array<i32>} : memref<1x32x1024xbf16, #tpu.memory_space<vmem>>, vector<1x32x512xbf16>,
    } else {
    }
    return
  }
  func.func @transform_0(%arg0: i32, %arg1: i32) -> (i32, i32, i32) {
    %c0_i32 = arith.constant 0 : i32
    %c0_i32_0 = arith.constant 0 : i32
    return %arg0, %c0_i32, %arg1 : i32, i32, i32
  }
  func.func @transform_1(%arg0: i32, %arg1: i32) -> (i32, i32) {
    %c0_i32 = arith.constant 0 : i32
    %c0_i32_0 = arith.constant 0 : i32
    %c0_i32_1 = arith.constant 0 : i32
    return %c0_i32, %c0_i32_0 : i32, i32
  }
  func.func @transform_2(%arg0: i32, %arg1: i32) -> (i32, i32, i32) {
    %c0_i32 = arith.constant 0 : i32
    %c0_i32_0 = arith.constant 0 : i32
    %c0_i32_1 = arith.constant 0 : i32
    return %arg0, %c0_i32, %c0_i32_0 : i32, i32, i32
  }
}

module attributes {stable_mosaic.version = 11 : i64} {
  func.func @_conv_in_lrelu_kernel(%arg0: i32, %arg1: i32, %arg2: memref<1x288x256xbf16, #tpu.memory_space<vmem>>, %arg3: memref<64x288xbf16, #tpu.memory_space<vmem>>, %arg4: memref<1x64x256xbf16, #tpu.memory_space<vmem>>, %arg5: memref<1x64x256xf32, #tpu.memory_space<vmem>>, %arg6: memref<64x1xf32, #tpu.memory_space<vmem>>, %arg7: memref<64x1xf32, #tpu.memory_space<vmem>>) attributes {dimension_semantics = [#tpu.dimension_semantics<parallel>, #tpu.dimension_semantics<arbitrary>], iteration_bounds = array<i64: 2, 1>, scalar_prefetch = 0 : i64, scratch_operands = 3 : i64, tpu.core_type = #tpu.core_type<tc>, window_params = [{transform_indices = @transform_0, window_bounds = array<i64: 1, 288, 256>}, {pipeline_mode = #tpu.pipeline_mode<synchronous>, transform_indices = @transform_1, window_bounds = array<i64: 64, 288>}, {transform_indices = @transform_2, window_bounds = array<i64: 1, 64, 256>}]} {
    %c0_i32 = arith.constant 0 : i32
    %0 = arith.cmpi eq, %arg1, %c0_i32 : i32
    %1 = arith.extui %0 : i1 to i32
    %c0_i32_0 = arith.constant 0 : i32
    %2 = arith.cmpi ne, %1, %c0_i32_0 : i32
    scf.if %2 {
      %cst_19 = arith.constant 0.000000e+00 : f32
      %25 = vector.broadcast %cst_19 : f32 to vector<64x1xf32>
      %c0_20 = arith.constant 0 : index
      %c0_21 = arith.constant 0 : index
      %26 = vector.load %arg6[%c0_20, %c0_21] : memref<64x1xf32, #tpu.memory_space<vmem>>, vector<64x1xf32>
      tpu.vector_store %arg6[%c0_20, %c0_21], %25 {strides = array<i32>} : memref<64x1xf32, #tpu.memory_space<vmem>>, vector<64x1xf32>,
      %cst_22 = arith.constant 0.000000e+00 : f32
      %27 = vector.broadcast %cst_22 : f32 to vector<64x1xf32>
      %c0_23 = arith.constant 0 : index
      %c0_24 = arith.constant 0 : index
      %28 = vector.load %arg7[%c0_23, %c0_24] : memref<64x1xf32, #tpu.memory_space<vmem>>, vector<64x1xf32>
      tpu.vector_store %arg7[%c0_23, %c0_24], %27 {strides = array<i32>} : memref<64x1xf32, #tpu.memory_space<vmem>>, vector<64x1xf32>,
    } else {
    }
    %c0 = arith.constant 0 : index
    %c0_1 = arith.constant 0 : index
    %3 = vector.load %arg3[%c0, %c0_1] : memref<64x288xbf16, #tpu.memory_space<vmem>>, vector<64x288xbf16>
    %c0_2 = arith.constant 0 : index
    %c0_3 = arith.constant 0 : index
    %c0_4 = arith.constant 0 : index
    %4 = vector.load %arg2[%c0_2, %c0_3, %c0_4] : memref<1x288x256xbf16, #tpu.memory_space<vmem>>, vector<1x288x256xbf16>
    %5 = vector.shape_cast %4 : vector<1x288x256xbf16> to vector<288x256xbf16>
    %cst = arith.constant dense<0.000000e+00> : vector<64x256xf32>
    %6 = tpu.matmul %3, %5, %cst {dimension_numbers = #tpu.dot_dimension_numbers<[1], [0], [0], [1], [0, 0, 1, 1], [], []>} : vector<64x288xbf16>, vector<288x256xbf16>, vector<64x256xf32> -> vector<64x256xf32>
    %7 = arith.index_cast %arg1 : i32 to index
    %c0_5 = arith.constant 0 : index
    %c0_6 = arith.constant 0 : index
    %8 = vector.load %arg5[%7, %c0_5, %c0_6] : memref<1x64x256xf32, #tpu.memory_space<vmem>>, vector<1x64x256xf32>
    %9 = vector.shape_cast %8 : vector<1x64x256xf32> to vector<64x256xf32>
    %10 = vector.shape_cast %6 : vector<64x256xf32> to vector<1x64x256xf32>
    tpu.vector_store %arg5[%7, %c0_5, %c0_6], %10 {strides = array<i32>} : memref<1x64x256xf32, #tpu.memory_space<vmem>>, vector<1x64x256xf32>,
    %c0_7 = arith.constant 0 : index
    %c0_8 = arith.constant 0 : index
    %11 = vector.load %arg6[%c0_7, %c0_8] : memref<64x1xf32, #tpu.memory_space<vmem>>, vector<64x1xf32>
    %cst_9 = arith.constant dense<0.000000e+00> : vector<64xf32>
    %12 = vector.multi_reduction <add>, %6, %cst_9 [1] : vector<64x256xf32> to vector<64xf32>
    %13 = vector.shape_cast %12 : vector<64xf32> to vector<64x1xf32>
    %14 = arith.addf %11, %13 : vector<64x1xf32>
    %c0_10 = arith.constant 0 : index
    %c0_11 = arith.constant 0 : index
    %15 = vector.load %arg6[%c0_10, %c0_11] : memref<64x1xf32, #tpu.memory_space<vmem>>, vector<64x1xf32>
    tpu.vector_store %arg6[%c0_10, %c0_11], %14 {strides = array<i32>} : memref<64x1xf32, #tpu.memory_space<vmem>>, vector<64x1xf32>,
    %c0_12 = arith.constant 0 : index
    %c0_13 = arith.constant 0 : index
    %16 = vector.load %arg7[%c0_12, %c0_13] : memref<64x1xf32, #tpu.memory_space<vmem>>, vector<64x1xf32>
    %17 = arith.mulf %6, %6 : vector<64x256xf32>
    %cst_14 = arith.constant dense<0.000000e+00> : vector<64xf32>
    %18 = vector.multi_reduction <add>, %17, %cst_14 [1] : vector<64x256xf32> to vector<64xf32>
    %19 = vector.shape_cast %18 : vector<64xf32> to vector<64x1xf32>
    %20 = arith.addf %16, %19 : vector<64x1xf32>
    %c0_15 = arith.constant 0 : index
    %c0_16 = arith.constant 0 : index
    %21 = vector.load %arg7[%c0_15, %c0_16] : memref<64x1xf32, #tpu.memory_space<vmem>>, vector<64x1xf32>
    tpu.vector_store %arg7[%c0_15, %c0_16], %20 {strides = array<i32>} : memref<64x1xf32, #tpu.memory_space<vmem>>, vector<64x1xf32>,
    %c0_i32_17 = arith.constant 0 : i32
    %22 = arith.cmpi eq, %arg1, %c0_i32_17 : i32
    %23 = arith.extui %22 : i1 to i32
    %c0_i32_18 = arith.constant 0 : i32
    %24 = arith.cmpi ne, %23, %c0_i32_18 : i32
    scf.if %24 {
      %c0_19 = arith.constant 0 : index
      %c0_20 = arith.constant 0 : index
      %25 = vector.load %arg6[%c0_19, %c0_20] : memref<64x1xf32, #tpu.memory_space<vmem>>, vector<64x1xf32>
      %cst_21 = arith.constant 0.00444444455 : f32
      %26 = vector.broadcast %cst_21 : f32 to vector<64x1xf32>
      %27 = arith.mulf %25, %26 : vector<64x1xf32>
      %c0_22 = arith.constant 0 : index
      %c0_23 = arith.constant 0 : index
      %28 = vector.load %arg7[%c0_22, %c0_23] : memref<64x1xf32, #tpu.memory_space<vmem>>, vector<64x1xf32>
      %cst_24 = arith.constant 0.00444444455 : f32
      %29 = vector.broadcast %cst_24 : f32 to vector<64x1xf32>
      %30 = arith.mulf %28, %29 : vector<64x1xf32>
      %31 = arith.mulf %27, %27 : vector<64x1xf32>
      %32 = arith.subf %30, %31 : vector<64x1xf32>
      %cst_25 = arith.constant 0.000000e+00 : f32
      %33 = vector.broadcast %cst_25 : f32 to vector<64x1xf32>
      %34 = arith.maximumf %32, %33 : vector<64x1xf32>
      %cst_26 = arith.constant 9.99999974E-6 : f32
      %35 = vector.broadcast %cst_26 : f32 to vector<64x1xf32>
      %36 = arith.addf %34, %35 : vector<64x1xf32>
      %37 = math.rsqrt %36 : vector<64x1xf32>
      %c0_27 = arith.constant 0 : index
      %c0_28 = arith.constant 0 : index
      %c0_29 = arith.constant 0 : index
      %38 = vector.load %arg5[%c0_27, %c0_28, %c0_29] : memref<1x64x256xf32, #tpu.memory_space<vmem>>, vector<1x64x256xf32>
      %39 = vector.shape_cast %38 : vector<1x64x256xf32> to vector<64x256xf32>
      %40 = vector.broadcast %27 : vector<64x1xf32> to vector<64x256xf32>
      %41 = arith.subf %39, %40 : vector<64x256xf32>
      %42 = vector.broadcast %37 : vector<64x1xf32> to vector<64x256xf32>
      %43 = arith.mulf %41, %42 : vector<64x256xf32>
      %cst_30 = arith.constant 0.000000e+00 : f32
      %44 = vector.broadcast %cst_30 : f32 to vector<64x256xf32>
      %45 = arith.cmpf oge, %43, %44 : vector<64x256xf32>
      %cst_31 = arith.constant 2.000000e-01 : f32
      %46 = vector.broadcast %cst_31 : f32 to vector<64x256xf32>
      %47 = arith.mulf %46, %43 : vector<64x256xf32>
      %48 = arith.select %45, %43, %47 : vector<64x256xi1>, vector<64x256xf32>
      %49 = arith.truncf %48 : vector<64x256xf32> to vector<64x256xbf16>
      %c0_32 = arith.constant 0 : index
      %c0_33 = arith.constant 0 : index
      %c0_34 = arith.constant 0 : index
      %50 = vector.load %arg4[%c0_32, %c0_33, %c0_34] : memref<1x64x256xbf16, #tpu.memory_space<vmem>>, vector<1x64x256xbf16>
      %51 = vector.shape_cast %50 : vector<1x64x256xbf16> to vector<64x256xbf16>
      %52 = vector.shape_cast %49 : vector<64x256xbf16> to vector<1x64x256xbf16>
      tpu.vector_store %arg4[%c0_32, %c0_33, %c0_34], %52 {strides = array<i32>} : memref<1x64x256xbf16, #tpu.memory_space<vmem>>, vector<1x64x256xbf16>,
    } else {
    }
    return
  }
  func.func @transform_0(%arg0: i32, %arg1: i32) -> (i32, i32, i32) {
    %c0_i32 = arith.constant 0 : i32
    %c0_i32_0 = arith.constant 0 : i32
    return %arg0, %c0_i32, %arg1 : i32, i32, i32
  }
  func.func @transform_1(%arg0: i32, %arg1: i32) -> (i32, i32) {
    %c0_i32 = arith.constant 0 : i32
    %c0_i32_0 = arith.constant 0 : i32
    %c0_i32_1 = arith.constant 0 : i32
    return %c0_i32, %c0_i32_0 : i32, i32
  }
  func.func @transform_2(%arg0: i32, %arg1: i32) -> (i32, i32, i32) {
    %c0_i32 = arith.constant 0 : i32
    %c0_i32_0 = arith.constant 0 : i32
    %c0_i32_1 = arith.constant 0 : i32
    return %arg0, %c0_i32, %c0_i32_0 : i32, i32, i32
  }
}

module attributes {stable_mosaic.version = 11 : i64} {
  func.func @_conv_in_lrelu_kernel(%arg0: i32, %arg1: i32, %arg2: memref<1x576x128xbf16, #tpu.memory_space<vmem>>, %arg3: memref<128x576xbf16, #tpu.memory_space<vmem>>, %arg4: memref<1x128x128xbf16, #tpu.memory_space<vmem>>, %arg5: memref<1x128x128xf32, #tpu.memory_space<vmem>>, %arg6: memref<128x1xf32, #tpu.memory_space<vmem>>, %arg7: memref<128x1xf32, #tpu.memory_space<vmem>>) attributes {dimension_semantics = [#tpu.dimension_semantics<parallel>, #tpu.dimension_semantics<arbitrary>], iteration_bounds = array<i64: 2, 1>, scalar_prefetch = 0 : i64, scratch_operands = 3 : i64, tpu.core_type = #tpu.core_type<tc>, window_params = [{transform_indices = @transform_0, window_bounds = array<i64: 1, 576, 128>}, {pipeline_mode = #tpu.pipeline_mode<synchronous>, transform_indices = @transform_1, window_bounds = array<i64: 128, 576>}, {transform_indices = @transform_2, window_bounds = array<i64: 1, 128, 128>}]} {
    %c0_i32 = arith.constant 0 : i32
    %0 = arith.cmpi eq, %arg1, %c0_i32 : i32
    %1 = arith.extui %0 : i1 to i32
    %c0_i32_0 = arith.constant 0 : i32
    %2 = arith.cmpi ne, %1, %c0_i32_0 : i32
    scf.if %2 {
      %cst_19 = arith.constant 0.000000e+00 : f32
      %25 = vector.broadcast %cst_19 : f32 to vector<128x1xf32>
      %c0_20 = arith.constant 0 : index
      %c0_21 = arith.constant 0 : index
      %26 = vector.load %arg6[%c0_20, %c0_21] : memref<128x1xf32, #tpu.memory_space<vmem>>, vector<128x1xf32>
      tpu.vector_store %arg6[%c0_20, %c0_21], %25 {strides = array<i32>} : memref<128x1xf32, #tpu.memory_space<vmem>>, vector<128x1xf32>,
      %cst_22 = arith.constant 0.000000e+00 : f32
      %27 = vector.broadcast %cst_22 : f32 to vector<128x1xf32>
      %c0_23 = arith.constant 0 : index
      %c0_24 = arith.constant 0 : index
      %28 = vector.load %arg7[%c0_23, %c0_24] : memref<128x1xf32, #tpu.memory_space<vmem>>, vector<128x1xf32>
      tpu.vector_store %arg7[%c0_23, %c0_24], %27 {strides = array<i32>} : memref<128x1xf32, #tpu.memory_space<vmem>>, vector<128x1xf32>,
    } else {
    }
    %c0 = arith.constant 0 : index
    %c0_1 = arith.constant 0 : index
    %3 = vector.load %arg3[%c0, %c0_1] : memref<128x576xbf16, #tpu.memory_space<vmem>>, vector<128x576xbf16>
    %c0_2 = arith.constant 0 : index
    %c0_3 = arith.constant 0 : index
    %c0_4 = arith.constant 0 : index
    %4 = vector.load %arg2[%c0_2, %c0_3, %c0_4] : memref<1x576x128xbf16, #tpu.memory_space<vmem>>, vector<1x576x128xbf16>
    %5 = vector.shape_cast %4 : vector<1x576x128xbf16> to vector<576x128xbf16>
    %cst = arith.constant dense<0.000000e+00> : vector<128x128xf32>
    %6 = tpu.matmul %3, %5, %cst {dimension_numbers = #tpu.dot_dimension_numbers<[1], [0], [0], [1], [0, 0, 1, 1], [], []>} : vector<128x576xbf16>, vector<576x128xbf16>, vector<128x128xf32> -> vector<128x128xf32>
    %7 = arith.index_cast %arg1 : i32 to index
    %c0_5 = arith.constant 0 : index
    %c0_6 = arith.constant 0 : index
    %8 = vector.load %arg5[%7, %c0_5, %c0_6] : memref<1x128x128xf32, #tpu.memory_space<vmem>>, vector<1x128x128xf32>
    %9 = vector.shape_cast %8 : vector<1x128x128xf32> to vector<128x128xf32>
    %10 = vector.shape_cast %6 : vector<128x128xf32> to vector<1x128x128xf32>
    tpu.vector_store %arg5[%7, %c0_5, %c0_6], %10 {strides = array<i32>} : memref<1x128x128xf32, #tpu.memory_space<vmem>>, vector<1x128x128xf32>,
    %c0_7 = arith.constant 0 : index
    %c0_8 = arith.constant 0 : index
    %11 = vector.load %arg6[%c0_7, %c0_8] : memref<128x1xf32, #tpu.memory_space<vmem>>, vector<128x1xf32>
    %cst_9 = arith.constant dense<0.000000e+00> : vector<128xf32>
    %12 = vector.multi_reduction <add>, %6, %cst_9 [1] : vector<128x128xf32> to vector<128xf32>
    %13 = vector.shape_cast %12 : vector<128xf32> to vector<128x1xf32>
    %14 = arith.addf %11, %13 : vector<128x1xf32>
    %c0_10 = arith.constant 0 : index
    %c0_11 = arith.constant 0 : index
    %15 = vector.load %arg6[%c0_10, %c0_11] : memref<128x1xf32, #tpu.memory_space<vmem>>, vector<128x1xf32>
    tpu.vector_store %arg6[%c0_10, %c0_11], %14 {strides = array<i32>} : memref<128x1xf32, #tpu.memory_space<vmem>>, vector<128x1xf32>,
    %c0_12 = arith.constant 0 : index
    %c0_13 = arith.constant 0 : index
    %16 = vector.load %arg7[%c0_12, %c0_13] : memref<128x1xf32, #tpu.memory_space<vmem>>, vector<128x1xf32>
    %17 = arith.mulf %6, %6 : vector<128x128xf32>
    %cst_14 = arith.constant dense<0.000000e+00> : vector<128xf32>
    %18 = vector.multi_reduction <add>, %17, %cst_14 [1] : vector<128x128xf32> to vector<128xf32>
    %19 = vector.shape_cast %18 : vector<128xf32> to vector<128x1xf32>
    %20 = arith.addf %16, %19 : vector<128x1xf32>
    %c0_15 = arith.constant 0 : index
    %c0_16 = arith.constant 0 : index
    %21 = vector.load %arg7[%c0_15, %c0_16] : memref<128x1xf32, #tpu.memory_space<vmem>>, vector<128x1xf32>
    tpu.vector_store %arg7[%c0_15, %c0_16], %20 {strides = array<i32>} : memref<128x1xf32, #tpu.memory_space<vmem>>, vector<128x1xf32>,
    %c0_i32_17 = arith.constant 0 : i32
    %22 = arith.cmpi eq, %arg1, %c0_i32_17 : i32
    %23 = arith.extui %22 : i1 to i32
    %c0_i32_18 = arith.constant 0 : i32
    %24 = arith.cmpi ne, %23, %c0_i32_18 : i32
    scf.if %24 {
      %c0_19 = arith.constant 0 : index
      %c0_20 = arith.constant 0 : index
      %25 = vector.load %arg6[%c0_19, %c0_20] : memref<128x1xf32, #tpu.memory_space<vmem>>, vector<128x1xf32>
      %cst_21 = arith.constant 0.0204081628 : f32
      %26 = vector.broadcast %cst_21 : f32 to vector<128x1xf32>
      %27 = arith.mulf %25, %26 : vector<128x1xf32>
      %c0_22 = arith.constant 0 : index
      %c0_23 = arith.constant 0 : index
      %28 = vector.load %arg7[%c0_22, %c0_23] : memref<128x1xf32, #tpu.memory_space<vmem>>, vector<128x1xf32>
      %cst_24 = arith.constant 0.0204081628 : f32
      %29 = vector.broadcast %cst_24 : f32 to vector<128x1xf32>
      %30 = arith.mulf %28, %29 : vector<128x1xf32>
      %31 = arith.mulf %27, %27 : vector<128x1xf32>
      %32 = arith.subf %30, %31 : vector<128x1xf32>
      %cst_25 = arith.constant 0.000000e+00 : f32
      %33 = vector.broadcast %cst_25 : f32 to vector<128x1xf32>
      %34 = arith.maximumf %32, %33 : vector<128x1xf32>
      %cst_26 = arith.constant 9.99999974E-6 : f32
      %35 = vector.broadcast %cst_26 : f32 to vector<128x1xf32>
      %36 = arith.addf %34, %35 : vector<128x1xf32>
      %37 = math.rsqrt %36 : vector<128x1xf32>
      %c0_27 = arith.constant 0 : index
      %c0_28 = arith.constant 0 : index
      %c0_29 = arith.constant 0 : index
      %38 = vector.load %arg5[%c0_27, %c0_28, %c0_29] : memref<1x128x128xf32, #tpu.memory_space<vmem>>, vector<1x128x128xf32>
      %39 = vector.shape_cast %38 : vector<1x128x128xf32> to vector<128x128xf32>
      %40 = vector.broadcast %27 : vector<128x1xf32> to vector<128x128xf32>
      %41 = arith.subf %39, %40 : vector<128x128xf32>
      %42 = vector.broadcast %37 : vector<128x1xf32> to vector<128x128xf32>
      %43 = arith.mulf %41, %42 : vector<128x128xf32>
      %cst_30 = arith.constant 0.000000e+00 : f32
      %44 = vector.broadcast %cst_30 : f32 to vector<128x128xf32>
      %45 = arith.cmpf oge, %43, %44 : vector<128x128xf32>
      %cst_31 = arith.constant 2.000000e-01 : f32
      %46 = vector.broadcast %cst_31 : f32 to vector<128x128xf32>
      %47 = arith.mulf %46, %43 : vector<128x128xf32>
      %48 = arith.select %45, %43, %47 : vector<128x128xi1>, vector<128x128xf32>
      %49 = arith.truncf %48 : vector<128x128xf32> to vector<128x128xbf16>
      %c0_32 = arith.constant 0 : index
      %c0_33 = arith.constant 0 : index
      %c0_34 = arith.constant 0 : index
      %50 = vector.load %arg4[%c0_32, %c0_33, %c0_34] : memref<1x128x128xbf16, #tpu.memory_space<vmem>>, vector<1x128x128xbf16>
      %51 = vector.shape_cast %50 : vector<1x128x128xbf16> to vector<128x128xbf16>
      %52 = vector.shape_cast %49 : vector<128x128xbf16> to vector<1x128x128xbf16>
      tpu.vector_store %arg4[%c0_32, %c0_33, %c0_34], %52 {strides = array<i32>} : memref<1x128x128xbf16, #tpu.memory_space<vmem>>, vector<1x128x128xbf16>,
    } else {
    }
    return
  }
  func.func @transform_0(%arg0: i32, %arg1: i32) -> (i32, i32, i32) {
    %c0_i32 = arith.constant 0 : i32
    %c0_i32_0 = arith.constant 0 : i32
    return %arg0, %c0_i32, %arg1 : i32, i32, i32
  }
  func.func @transform_1(%arg0: i32, %arg1: i32) -> (i32, i32) {
    %c0_i32 = arith.constant 0 : i32
    %c0_i32_0 = arith.constant 0 : i32
    %c0_i32_1 = arith.constant 0 : i32
    return %c0_i32, %c0_i32_0 : i32, i32
  }
  func.func @transform_2(%arg0: i32, %arg1: i32) -> (i32, i32, i32) {
    %c0_i32 = arith.constant 0 : i32
    %c0_i32_0 = arith.constant 0 : i32
    %c0_i32_1 = arith.constant 0 : i32
    return %arg0, %c0_i32, %c0_i32_0 : i32, i32, i32
  }
}

module attributes {stable_mosaic.version = 11 : i64} {
  func.func @_conv_in_lrelu_kernel(%arg0: i32, %arg1: i32, %arg2: memref<1x1152x128xbf16, #tpu.memory_space<vmem>>, %arg3: memref<256x1152xbf16, #tpu.memory_space<vmem>>, %arg4: memref<1x256x128xf32, #tpu.memory_space<vmem>>, %arg5: memref<1x256x128xf32, #tpu.memory_space<vmem>>, %arg6: memref<256x1xf32, #tpu.memory_space<vmem>>, %arg7: memref<256x1xf32, #tpu.memory_space<vmem>>) attributes {dimension_semantics = [#tpu.dimension_semantics<parallel>, #tpu.dimension_semantics<arbitrary>], iteration_bounds = array<i64: 2, 1>, scalar_prefetch = 0 : i64, scratch_operands = 3 : i64, tpu.core_type = #tpu.core_type<tc>, window_params = [{transform_indices = @transform_0, window_bounds = array<i64: 1, 1152, 128>}, {pipeline_mode = #tpu.pipeline_mode<synchronous>, transform_indices = @transform_1, window_bounds = array<i64: 256, 1152>}, {transform_indices = @transform_2, window_bounds = array<i64: 1, 256, 128>}]} {
    %c0_i32 = arith.constant 0 : i32
    %0 = arith.cmpi eq, %arg1, %c0_i32 : i32
    %1 = arith.extui %0 : i1 to i32
    %c0_i32_0 = arith.constant 0 : i32
    %2 = arith.cmpi ne, %1, %c0_i32_0 : i32
    scf.if %2 {
      %cst_19 = arith.constant 0.000000e+00 : f32
      %25 = vector.broadcast %cst_19 : f32 to vector<256x1xf32>
      %c0_20 = arith.constant 0 : index
      %c0_21 = arith.constant 0 : index
      %26 = vector.load %arg6[%c0_20, %c0_21] : memref<256x1xf32, #tpu.memory_space<vmem>>, vector<256x1xf32>
      tpu.vector_store %arg6[%c0_20, %c0_21], %25 {strides = array<i32>} : memref<256x1xf32, #tpu.memory_space<vmem>>, vector<256x1xf32>,
      %cst_22 = arith.constant 0.000000e+00 : f32
      %27 = vector.broadcast %cst_22 : f32 to vector<256x1xf32>
      %c0_23 = arith.constant 0 : index
      %c0_24 = arith.constant 0 : index
      %28 = vector.load %arg7[%c0_23, %c0_24] : memref<256x1xf32, #tpu.memory_space<vmem>>, vector<256x1xf32>
      tpu.vector_store %arg7[%c0_23, %c0_24], %27 {strides = array<i32>} : memref<256x1xf32, #tpu.memory_space<vmem>>, vector<256x1xf32>,
    } else {
    }
    %c0 = arith.constant 0 : index
    %c0_1 = arith.constant 0 : index
    %3 = vector.load %arg3[%c0, %c0_1] : memref<256x1152xbf16, #tpu.memory_space<vmem>>, vector<256x1152xbf16>
    %c0_2 = arith.constant 0 : index
    %c0_3 = arith.constant 0 : index
    %c0_4 = arith.constant 0 : index
    %4 = vector.load %arg2[%c0_2, %c0_3, %c0_4] : memref<1x1152x128xbf16, #tpu.memory_space<vmem>>, vector<1x1152x128xbf16>
    %5 = vector.shape_cast %4 : vector<1x1152x128xbf16> to vector<1152x128xbf16>
    %cst = arith.constant dense<0.000000e+00> : vector<256x128xf32>
    %6 = tpu.matmul %3, %5, %cst {dimension_numbers = #tpu.dot_dimension_numbers<[1], [0], [0], [1], [0, 0, 1, 1], [], []>} : vector<256x1152xbf16>, vector<1152x128xbf16>, vector<256x128xf32> -> vector<256x128xf32>
    %7 = arith.index_cast %arg1 : i32 to index
    %c0_5 = arith.constant 0 : index
    %c0_6 = arith.constant 0 : index
    %8 = vector.load %arg5[%7, %c0_5, %c0_6] : memref<1x256x128xf32, #tpu.memory_space<vmem>>, vector<1x256x128xf32>
    %9 = vector.shape_cast %8 : vector<1x256x128xf32> to vector<256x128xf32>
    %10 = vector.shape_cast %6 : vector<256x128xf32> to vector<1x256x128xf32>
    tpu.vector_store %arg5[%7, %c0_5, %c0_6], %10 {strides = array<i32>} : memref<1x256x128xf32, #tpu.memory_space<vmem>>, vector<1x256x128xf32>,
    %c0_7 = arith.constant 0 : index
    %c0_8 = arith.constant 0 : index
    %11 = vector.load %arg6[%c0_7, %c0_8] : memref<256x1xf32, #tpu.memory_space<vmem>>, vector<256x1xf32>
    %cst_9 = arith.constant dense<0.000000e+00> : vector<256xf32>
    %12 = vector.multi_reduction <add>, %6, %cst_9 [1] : vector<256x128xf32> to vector<256xf32>
    %13 = vector.shape_cast %12 : vector<256xf32> to vector<256x1xf32>
    %14 = arith.addf %11, %13 : vector<256x1xf32>
    %c0_10 = arith.constant 0 : index
    %c0_11 = arith.constant 0 : index
    %15 = vector.load %arg6[%c0_10, %c0_11] : memref<256x1xf32, #tpu.memory_space<vmem>>, vector<256x1xf32>
    tpu.vector_store %arg6[%c0_10, %c0_11], %14 {strides = array<i32>} : memref<256x1xf32, #tpu.memory_space<vmem>>, vector<256x1xf32>,
    %c0_12 = arith.constant 0 : index
    %c0_13 = arith.constant 0 : index
    %16 = vector.load %arg7[%c0_12, %c0_13] : memref<256x1xf32, #tpu.memory_space<vmem>>, vector<256x1xf32>
    %17 = arith.mulf %6, %6 : vector<256x128xf32>
    %cst_14 = arith.constant dense<0.000000e+00> : vector<256xf32>
    %18 = vector.multi_reduction <add>, %17, %cst_14 [1] : vector<256x128xf32> to vector<256xf32>
    %19 = vector.shape_cast %18 : vector<256xf32> to vector<256x1xf32>
    %20 = arith.addf %16, %19 : vector<256x1xf32>
    %c0_15 = arith.constant 0 : index
    %c0_16 = arith.constant 0 : index
    %21 = vector.load %arg7[%c0_15, %c0_16] : memref<256x1xf32, #tpu.memory_space<vmem>>, vector<256x1xf32>
    tpu.vector_store %arg7[%c0_15, %c0_16], %20 {strides = array<i32>} : memref<256x1xf32, #tpu.memory_space<vmem>>, vector<256x1xf32>,
    %c0_i32_17 = arith.constant 0 : i32
    %22 = arith.cmpi eq, %arg1, %c0_i32_17 : i32
    %23 = arith.extui %22 : i1 to i32
    %c0_i32_18 = arith.constant 0 : i32
    %24 = arith.cmpi ne, %23, %c0_i32_18 : i32
    scf.if %24 {
      %c0_19 = arith.constant 0 : index
      %c0_20 = arith.constant 0 : index
      %25 = vector.load %arg6[%c0_19, %c0_20] : memref<256x1xf32, #tpu.memory_space<vmem>>, vector<256x1xf32>
      %cst_21 = arith.constant 0.111111112 : f32
      %26 = vector.broadcast %cst_21 : f32 to vector<256x1xf32>
      %27 = arith.mulf %25, %26 : vector<256x1xf32>
      %c0_22 = arith.constant 0 : index
      %c0_23 = arith.constant 0 : index
      %28 = vector.load %arg7[%c0_22, %c0_23] : memref<256x1xf32, #tpu.memory_space<vmem>>, vector<256x1xf32>
      %cst_24 = arith.constant 0.111111112 : f32
      %29 = vector.broadcast %cst_24 : f32 to vector<256x1xf32>
      %30 = arith.mulf %28, %29 : vector<256x1xf32>
      %31 = arith.mulf %27, %27 : vector<256x1xf32>
      %32 = arith.subf %30, %31 : vector<256x1xf32>
      %cst_25 = arith.constant 0.000000e+00 : f32
      %33 = vector.broadcast %cst_25 : f32 to vector<256x1xf32>
      %34 = arith.maximumf %32, %33 : vector<256x1xf32>
      %cst_26 = arith.constant 9.99999974E-6 : f32
      %35 = vector.broadcast %cst_26 : f32 to vector<256x1xf32>
      %36 = arith.addf %34, %35 : vector<256x1xf32>
      %37 = math.rsqrt %36 : vector<256x1xf32>
      %c0_27 = arith.constant 0 : index
      %c0_28 = arith.constant 0 : index
      %c0_29 = arith.constant 0 : index
      %38 = vector.load %arg5[%c0_27, %c0_28, %c0_29] : memref<1x256x128xf32, #tpu.memory_space<vmem>>, vector<1x256x128xf32>
      %39 = vector.shape_cast %38 : vector<1x256x128xf32> to vector<256x128xf32>
      %40 = vector.broadcast %27 : vector<256x1xf32> to vector<256x128xf32>
      %41 = arith.subf %39, %40 : vector<256x128xf32>
      %42 = vector.broadcast %37 : vector<256x1xf32> to vector<256x128xf32>
      %43 = arith.mulf %41, %42 : vector<256x128xf32>
      %cst_30 = arith.constant 0.000000e+00 : f32
      %44 = vector.broadcast %cst_30 : f32 to vector<256x128xf32>
      %45 = arith.cmpf oge, %43, %44 : vector<256x128xf32>
      %cst_31 = arith.constant 2.000000e-01 : f32
      %46 = vector.broadcast %cst_31 : f32 to vector<256x128xf32>
      %47 = arith.mulf %46, %43 : vector<256x128xf32>
      %48 = arith.select %45, %43, %47 : vector<256x128xi1>, vector<256x128xf32>
      %c0_32 = arith.constant 0 : index
      %c0_33 = arith.constant 0 : index
      %c0_34 = arith.constant 0 : index
      %49 = vector.load %arg4[%c0_32, %c0_33, %c0_34] : memref<1x256x128xf32, #tpu.memory_space<vmem>>, vector<1x256x128xf32>
      %50 = vector.shape_cast %49 : vector<1x256x128xf32> to vector<256x128xf32>
      %51 = vector.shape_cast %48 : vector<256x128xf32> to vector<1x256x128xf32>
      tpu.vector_store %arg4[%c0_32, %c0_33, %c0_34], %51 {strides = array<i32>} : memref<1x256x128xf32, #tpu.memory_space<vmem>>, vector<1x256x128xf32>,
    } else {
    }
    return
  }
  func.func @transform_0(%arg0: i32, %arg1: i32) -> (i32, i32, i32) {
    %c0_i32 = arith.constant 0 : i32
    %c0_i32_0 = arith.constant 0 : i32
    return %arg0, %c0_i32, %arg1 : i32, i32, i32
  }
  func.func @transform_1(%arg0: i32, %arg1: i32) -> (i32, i32) {
    %c0_i32 = arith.constant 0 : i32
    %c0_i32_0 = arith.constant 0 : i32
    %c0_i32_1 = arith.constant 0 : i32
    return %c0_i32, %c0_i32_0 : i32, i32
  }
  func.func @transform_2(%arg0: i32, %arg1: i32) -> (i32, i32, i32) {
    %c0_i32 = arith.constant 0 : i32
    %c0_i32_0 = arith.constant 0 : i32
    %c0_i32_1 = arith.constant 0 : i32
    return %arg0, %c0_i32, %c0_i32_0 : i32, i32, i32
  }
}

</mosaic_0001>

<bundles_post_ra>
// kernel: pixel_discriminator_forward.4
= control target key start
LH: loop header
LB: loop body
LE: loop exit
PB: predicated region body
PF: predicated region fallthrough
CT: control target
= control target key end

     0   :  { %s1208_s9 = smov 0   ;;  %s1210_s10 = smov 0   ;;  %s1599_s0 = inlined_call_operand.vmem [shape: bf16[2,36,1024], index: 0, kind: input, shape index: {}]   ;;  %s1600_s1 = inlined_call_operand.vmem [shape: bf16[32,36], index: 1, kind: input, shape index: {}]   ;;  %s1601_s2 = inlined_call_operand.vmem [shape: bf16[2,32,1024], index: 2, kind: output, shape index: {}]  }
   0x1   :  { %s1212_s11 = smov 0   ;;  %s1214_s12 = smov 0  }
   0x2   :  { %s1216_s13 = smov 0   ;;  %s1218_s14 = smov 0  }
   0x3   :  { %s1220_s15 = smov 0  }
   0x4 LB: > { %s21_s16 = sadd.s32 1, %s1180_s13  ;;  %s24_s17 = sadd.s32 1, %s1184_s14  ;;  %s1188_s15 = sphi %s1220_s15, %s12_s15   ;;  %s1184_s14 = sphi %s1218_s14, %s1609_s14   ;;  %s1180_s13 = sphi %s1216_s13, %s1608_s13   ;;  %s1176_s12 = sphi %s1214_s12, %s1607_s12   ;;  %s1172_s11 = sphi %s1212_s11, %s1606_s11   ;;  %s1168_s10 = sphi %s1210_s10, %s1605_s10   ;;  %s1164_s9 = sphi %s1208_s9, %s1604_s9  }
   0x5   : > { %p22_p0 = scmp.ge.s32.totalorder %s21_s16, 2  ;;  %p40_p1 = scmp.ne.s32.totalorder %s1168_s10, %s1164_s9 }
   0x6   : > { %p41_p2 = scmp.eq.s32.totalorder %s1188_s15, 0  ;;  %s33_s21 = sadd.s32 1, %s1168_s10 }
   0x7   : > { %s1611_s16 = smov (%p22_p0, %s21_s16), 0  ;;  %s1613_s17 = smov (!%p22_p0, %s24_s17), %s1184_s14 }
   0x8   : > { %p42_p3 = por %p41_p2, %p40_p1  ;;  %p26_p4 = scmp.ge.s32.totalorder %s1613_s17, 2 }
   0x9   : > { %s29_s18 = ssub.s32 %s1180_s13, %s1611_s16  ;;  %p978_p6 = scmp.ge.s32.totalorder %s1188_s15, 4 }
   0xa   : > { %s1615_s17 = smov (%p26_p4, %s1613_s17), 0 }
   0xb   : > { %s28_s19 = ssub.s32 %s1184_s14, %s1615_s17  ;;  %116 = sbr.rel (%p978_p6) target bundleno = 31 (0x1f), region = 20 }
   0xc   : > { %s30_s20 = sor.u32 %s29_s18, %s28_s19 }
   0xd   : > { %p31_p5 = scmp.eq.s32.totalorder %s30_s20, 0 }
   0xf   : > { %s1259_s22 = scalar_select %p31_p5, %s1168_s10, %s33_s21  }
  0x12   : > { %119 = sbr.rel (!%p42_p3) target bundleno = 31 (0x1f), region = 24  ;;  %s121_s23 = sand.u32 (%p42_p3), 1, %s1168_s10  }
  0x13   : > { %s1044_s24 = smul.u32 (%p42_p3), 80, %s121_s23  ;;  %s979_s25 = sshll.u32 (%p42_p3), %s1180_s13, 2 }
  0x14   : > { %s1045_s26 = smul.u32 (%p42_p3), 40, %s1184_s14 }
  0x15   : > { %s123_s4 = scalar_lea.vmem (%p42_p3), [#allocation5], %s1044_s24 }
  0x16   : > { %s126_s27 = sadd.s32 (%p42_p3), %s1045_s26, %s979_s25 }
  0x17   : > { %s980_s28 = sshll.u32 (%p42_p3), %s126_s27, 2 }
  0x18   : > { %s128_s3 = scalar_lea.vmem (%p42_p3), %s1599_s0, %s980_s28 }
  0x19   : > { %v141_v0 = vld [vmem:[%s128_s3] sm:$0xff]  ;;  %v143_v1 = vld [vmem:[%s128_s3 + $0x8] sm:$0xff] }
  0x1a   : > { %v145_v2 = vld [vmem:[%s128_s3 + $0x20] sm:$0xff]  ;;  %142 = vst [vmem:[%s123_s4] sm:$0xff] %v141_v0  ;;  %144 = vst [vmem:[%s123_s4 + $0x8] sm:$0xff] %v143_v1  ;;  %v147_v3 = vld [vmem:[%s128_s3 + $0x28] sm:$0xff] }
  0x1b   : > { %146 = vst [vmem:[%s123_s4 + $0x10] sm:$0xff] %v145_v2  ;;  %v149_v4 = vld [vmem:[%s128_s3 + $0x40] sm:$0xff]  ;;  %v151_v5 = vld [vmem:[%s128_s3 + $0x48] sm:$0xff]  ;;  %148 = vst [vmem:[%s123_s4 + $0x18] sm:$0xff] %v147_v3 }
  0x1c   : > { %150 = vst [vmem:[%s123_s4 + $0x20] sm:$0xff] %v149_v4  ;;  %152 = vst [vmem:[%s123_s4 + $0x28] sm:$0xff] %v151_v5  ;;  %v153_v6 = vld [vmem:[%s128_s3 + $0x60] sm:$0xff]  ;;  %v155_v7 = vld [vmem:[%s128_s3 + $0x68] sm:$0xff] }
  0x1d   : > { %v157_v8 = vld [vmem:[%s128_s3 + $0x80] sm:$0xff]  ;;  %154 = vst [vmem:[%s123_s4 + $0x30] sm:$0xff] %v153_v6  ;;  %156 = vst [vmem:[%s123_s4 + $0x38] sm:$0xff] %v155_v7  ;;  %v159_v9 = vld [vmem:[%s128_s3 + $0x88] sm:$0xff] }
  0x1e   : > { %158 = vst [vmem:[%s123_s4 + $0x40] sm:$0xff] %v157_v8  ;;  %160 = vst [vmem:[%s123_s4 + $0x48] sm:$0xff] %v159_v9 }
  0x1f PF: > { %p981_p7 = scmp.ge.s32.totalorder %s1188_s15, 1  ;;  %p165_p8 = scmp.lt.s32.totalorder %s1188_s15, 5 }
  0x21   : > { %p166_p9 = pnand %p981_p7, %p165_p8 }
  0x22   : > { %s172_s5 = sand.u32 (!%p166_p9), 1, %s1164_s9   ;;  %p194_p10 = scmp.lt.s32.totalorder (!%p166_p9), %s1176_s12, 1 }
  0x23   : > { %169 = sbr.rel (%p166_p9) target bundleno = 630 (0x276), region = 47  ;;  %p984_p11 = scmp.ne.s32.totalorder (!%p166_p9), %s1172_s11, 0 }
  0x24   : > { %s1046_s6 = smul.u32 (!%p166_p9), 80, %s172_s5 }
  0x26   : > { %s1278_s20 = scalar_lea.vmem (!%p166_p9), [#allocation5], %s1046_s6 }
  0x2a   : > { %s1617_s12 = smov (!%p194_p10, %s1176_s12), 1  ;;  %203 = sbr.rel (%p984_p11) target bundleno = 49 (0x31), region = 55 }
  0x2b   : > { %s1026_s7 = sshll.u32 %s1617_s12, 7  ;;  %vm204_vm0 = vcmask (!%p984_p11), 7168   ;;  %v1190_v10 = vmov (!%p984_p11), 0.0  }
  0x2c   : > { %s1276_s19 = scalar_lea.vmem %s1601_s2, %s1026_s7  ;;  %205 = vst.msk [vmem:[#allocation3] sm:$0xff] (!%p984_p11), %vm204_vm0, %v1190_v10  ;;  %206 = vst.msk [vmem:[#allocation3 + $0x8] sm:$0xff] (!%p984_p11), %vm204_vm0, %v1190_v10 }
  0x2d   : > { %207 = vst.msk [vmem:[#allocation3 + $0x10] sm:$0xff] (!%p984_p11), %vm204_vm0, %v1190_v10  ;;  %208 = vst.msk [vmem:[#allocation3 + $0x18] sm:$0xff] (!%p984_p11), %vm204_vm0, %v1190_v10 }
  0x2e   : > { %209 = vst.msk [vmem:[#allocation4] sm:$0xff] (!%p984_p11), %vm204_vm0, %v1190_v10  ;;  %210 = vst.msk [vmem:[#allocation4 + $0x8] sm:$0xff] (!%p984_p11), %vm204_vm0, %v1190_v10 }
  0x2f   : > { %211 = vst.msk [vmem:[#allocation4 + $0x10] sm:$0xff] (!%p984_p11), %vm204_vm0, %v1190_v10  ;;  %212 = vst.msk [vmem:[#allocation4 + $0x18] sm:$0xff] (!%p984_p11), %vm204_vm0, %v1190_v10 }
  0x31 PF: > { %v1106_v11 = vld [vmem:[%s1278_s20 + $0x4] ss:$16 sps:$4 sm:$0xff]   ;;  %v1108_v12 = vld [vmem:[%s1278_s20 + $0xc] ss:$16 sps:$4 sm:$0xff]   ;;  %v1191_v13 = vmov 0   ;;  %vm294_vm1 = vcmask 1041408  }
  0x32   : > { %339 = vmatprep.mubr.bf16.mxu0 %v1191_v13  ;;  %392 = vmatprep.mubr.bf16.mxu1 %v1191_v13  ;;  %v1110_v14 = vld [vmem:[%s1278_s20] ss:$16 sps:$4 sm:$0xff]   ;;  %v1111_v15 = vld [vmem:[%s1278_s20 + $0x8] ss:$16 sps:$4 sm:$0xff]   ;;  %v1112_v16 = vld [vmem:[%s1278_s20 + $0x24] ss:$16 sps:$4 sm:$0xff]  }
  0x33   : > { %307 = vmatprep.subr.bf16.mxu0 %v1106_v11  ;;  %360 = vmatprep.subr.bf16.mxu1 %v1108_v12  ;;  %v1114_v17 = vld [vmem:[%s1278_s20 + $0x2c] ss:$16 sps:$4 sm:$0xff]   ;;  %v1116_v18 = vld [vmem:[%s1278_s20 + $0x20] ss:$16 sps:$4 sm:$0xff]   ;;  %v1117_v19 = vld [vmem:[%s1278_s20 + $0x28] ss:$16 sps:$4 sm:$0xff]  }
  0x34   : > { %308 = vmatpush1.bf16.msra.mxu0 %v1110_v14  ;;  %361 = vmatpush1.bf16.msra.mxu1 %v1111_v15  ;;  %v225_v20 = vld [vmem:[%s1278_s20 + $0x40] sm:$0x33]  ;;  %v226_v21 = vld [vmem:[%s1278_s20 + $0x48] sm:$0x33]  ;;  %vm287_vm2 = vcmask 293888   ;;  %s1027_s24 = sshll.u32 %s1172_s11, 7 }
  0x35   : > { %309 = vmatprep.subr.bf16.mxu0 %v1112_v16  ;;  %362 = vmatprep.subr.bf16.mxu1 %v1114_v17  ;;  %v996_v22 = vcombine.high %v225_v20, %v225_v20  ;;  %v998_v23 = vcombine.high %v226_v21, %v226_v21  ;;  %v995_v24 = vcombine.low %v225_v20, %v225_v20  ;;  %v1122_v28 = vld [vmem:[%s1600_s1] sm:$0xff]   ;;  %v1123_v29 = vld [vmem:[%s1600_s1 + $0x8] sm:$0xff]   ;;  %s1298_s25 = scalar_lea.vmem [#allocation2], %s1027_s24  ;;  %vm460_vm3 = vcmask 7168   ;;  %p1007_p12 = scmp.ne.s32.totalorder %s1172_s11, 1 }
  0x36   : > { %v997_v25 = vcombine.low %v226_v21, %v226_v21 }
  0x37   : > { %v296_v26 = vsel %vm294_vm1, %v995_v24, 0 }
  0x38   : > { %310 = vmatpush1.bf16.msra.mxu0 %v1116_v18  ;;  %363 = vmatpush1.bf16.msra.mxu1 %v1117_v19  ;;  %v302_v27 = vsel %vm294_vm1, %v997_v25, 0  ;;  %v466_v25 = vld [vmem:[#allocation4 + $0x8] sm:$0xff] }
  0x39   : > { %999 = vmatprep.subr.msk.bf16.mxu0 %vm294_vm1, %v996_v22  ;;  %1002 = vmatprep.subr.msk.bf16.mxu1 %vm294_vm1, %v998_v23  ;;  %v432_v22 = vld [vmem:[#allocation3] sm:$0xff] }
  0x3c   : > { %312 = vmatpush1.bf16.msra.mxu0 %v296_v26  ;;  %365 = vmatpush1.bf16.msra.mxu1 %v302_v27  ;;  %v433_v26 = vld [vmem:[#allocation3 + $0x8] sm:$0xff] }
  0x3f   : > { %1000 = vmatmul.mubr.msk.bf16.vlgmr.msra.gmra.mrb[0].mxu0 %vm287_vm2, %v1122_v28  ;;  %1003 = vmatmul.mubr.msk.bf16.vlgmr.msra.gmra.mrb[0].mxu1 %vm287_vm2, %v1122_v28 }
  0x40   : > { %349 = vmatprep.mubr.bf16.mxu0 %v1191_v13  ;;  %402 = vmatprep.mubr.bf16.mxu1 %v1191_v13 }
  0x47   : > { %1001 = vmatmul.mubr.msk.bf16.gmra.mrb[4].mxu0 %vm287_vm2, %v1123_v29  ;;  %1004 = vmatmul.mubr.msk.bf16.gmra.mrb[4].mxu1 %vm287_vm2, %v1123_v29 }
 0x112   : > { %v341_v30 = vpop.f32.mrb[0].mxu0  ;;  %v394_v31 = vpop.f32.mrb[0].mxu1 }
 0x113   : > { %416 = vst [vmem:[%s1298_s25] sm:$0xff] %v341_v30  ;;  %v469_v32 = vmul.f32 %v341_v30, %v341_v30  ;;  %418 = vst [vmem:[%s1298_s25 + $0x10] sm:$0xff] %v394_v31  ;;  %v343_v33 = vpop.f32.mrb[1].mxu0  ;;  %v396_v34 = vpop.f32.mrb[1].mxu1  ;;  %v471_v39 = vmul.f32 %v394_v31, %v394_v31 }
 0x114   : > { %417 = vst [vmem:[%s1298_s25 + $0x8] sm:$0xff] %v343_v33  ;;  %v436_v35 = vadd.f32 %v343_v33, %v341_v30  ;;  %v470_v36 = vmul.f32 %v343_v33, %v343_v33  ;;  %419 = vst [vmem:[%s1298_s25 + $0x18] sm:$0xff] %v396_v34  ;;  %v345_v37 = vpop.f32.mrb[2].mxu0  ;;  %v398_v38 = vpop.f32.mrb[2].mxu1  ;;  %v472_v51 = vmul.f32 %v396_v34, %v396_v34 }
 0x115   : > { %420 = vst [vmem:[%s1298_s25 + $0x20] sm:$0xff] %v345_v37  ;;  %v473_v40 = vmul.f32 %v345_v37, %v345_v37  ;;  %422 = vst [vmem:[%s1298_s25 + $0x30] sm:$0xff] %v398_v38  ;;  %v347_v41 = vpop.f32.mrb[3].mxu0  ;;  %v400_v42 = vpop.f32.mrb[3].mxu1  ;;  %v475_v47 = vmul.f32 %v398_v38, %v398_v38 }
 0x116   : > { %421 = vst [vmem:[%s1298_s25 + $0x28] sm:$0xff] %v347_v41  ;;  %v441_v43 = vadd.f32 %v347_v41, %v345_v37  ;;  %v474_v44 = vmul.f32 %v347_v41, %v347_v41  ;;  %423 = vst [vmem:[%s1298_s25 + $0x38] sm:$0xff] %v400_v42  ;;  %v437_v45 = vadd.f32 %v436_v35, %v394_v31  ;;  %v465_v31 = vld [vmem:[#allocation4] sm:$0xff]  ;;  %v467_v37 = vld [vmem:[#allocation4 + $0x10] sm:$0xff] }
 0x117   : > { %v485_v46 = vadd.f32 %v470_v36, %v469_v32  ;;  %v476_v55 = vmul.f32 %v400_v42, %v400_v42  ;;  %v434_v32 = vld [vmem:[#allocation3 + $0x10] sm:$0xff] }
 0x118   : > { %v438_v48 = vadd.f32 %v437_v45, %v396_v34  ;;  %v490_v49 = vadd.f32 %v474_v44, %v473_v40  ;;  %v442_v50 = vadd.f32 %v441_v43, %v398_v38  ;;  %v435_v38 = vld [vmem:[#allocation3 + $0x18] sm:$0xff] }
 0x119   : > { %v486_v52 = vadd.f32 %v485_v46, %v471_v39  ;;  %v468_v43 = vld [vmem:[#allocation4 + $0x18] sm:$0xff] }
 0x11a   : > { %v404_v53 = vpop.f32.mrb[4].mxu1  ;;  %439 = vadd.xlane.f32.xlu0 %v438_v48  ;;  %v351_v54 = vpop.f32.mrb[4].mxu0  ;;  %v491_v56 = vadd.f32 %v490_v49, %v475_v47  ;;  %v443_v57 = vadd.f32 %v442_v50, %v400_v42  ;;  %v1192_v49 = vmov (!%p1007_p12), 0  }
 0x11b   : > { %426 = vst [vmem:[%s1298_s25 + $0x50] sm:$0xff] %v404_v53  ;;  %424 = vst [vmem:[%s1298_s25 + $0x40] sm:$0xff] %v351_v54  ;;  %v477_v58 = vmul.f32 %v351_v54, %v351_v54  ;;  %v353_v59 = vpop.f32.mrb[5].mxu0  ;;  %v406_v60 = vpop.f32.mrb[5].mxu1  ;;  %v487_v61 = vadd.f32 %v486_v52, %v472_v51  ;;  %v479_v3 = vmul.f32 %v404_v53, %v404_v53  ;;  %1125 = vset.pattern.permute.xlu1 (!%p1007_p12), %v1192_v49 }
 0x11c   : > { %425 = vst [vmem:[%s1298_s25 + $0x48] sm:$0xff] %v353_v59  ;;  %v446_v62 = vadd.f32 %v353_v59, %v351_v54  ;;  %v478_v63 = vmul.f32 %v353_v59, %v353_v59  ;;  %427 = vst [vmem:[%s1298_s25 + $0x58] sm:$0xff] %v406_v60  ;;  %v355_v0 = vpop.f32.mrb[6].mxu0  ;;  %v408_v1 = vpop.f32.mrb[6].mxu1  ;;  %v492_v2 = vadd.f32 %v491_v56, %v476_v55  ;;  %1124 = vset.pattern.permute.xlu0 (!%p1007_p12), %v1192_v49 }
 0x11d   : > { %428 = vst [vmem:[%s1298_s25 + $0x60] sm:$0xff] %v355_v0  ;;  %v481_v4 = vmul.f32 %v355_v0, %v355_v0  ;;  %430 = vst [vmem:[%s1298_s25 + $0x70] sm:$0xff] %v408_v1  ;;  %v357_v5 = vpop.f32.mrb[7].mxu0  ;;  %v410_v6 = vpop.f32.mrb[7].mxu1  ;;  %v483_v11 = vmul.f32 %v408_v1, %v408_v1  ;;  %v480_v15 = vmul.f32 %v406_v60, %v406_v60 }
 0x11e   : > { %429 = vst [vmem:[%s1298_s25 + $0x68] sm:$0xff] %v357_v5  ;;  %v451_v7 = vadd.f32 %v357_v5, %v355_v0  ;;  %v482_v8 = vmul.f32 %v357_v5, %v357_v5  ;;  %431 = vst [vmem:[%s1298_s25 + $0x78] sm:$0xff] %v410_v6  ;;  %493 = vadd.xlane.f32.xlu1 %v492_v2  ;;  %444 = vadd.xlane.f32.xlu0 %v443_v57 }
 0x11f   : > { %v447_v9 = vadd.f32 %v446_v62, %v404_v53  ;;  %v495_v10 = vadd.f32 %v478_v63, %v477_v58  ;;  %v484_v17 = vmul.f32 %v410_v6, %v410_v6 }
 0x120   : > { %v500_v12 = vadd.f32 %v482_v8, %v481_v4  ;;  %v452_v13 = vadd.f32 %v451_v7, %v408_v1 }
 0x121   : > { %v448_v14 = vadd.f32 %v447_v9, %v406_v60  ;;  %v496_v16 = vadd.f32 %v495_v10, %v479_v3 }
 0x122   : > { %488 = vadd.xlane.f32.xlu0 %v487_v61  ;;  %v453_v18 = vadd.f32 %v452_v13, %v410_v6  ;;  %v501_v19 = vadd.f32 %v500_v12, %v483_v11 }
 0x123   : > { %449 = vadd.xlane.f32.xlu1 %v448_v14  ;;  %v497_v20 = vadd.f32 %v496_v16, %v480_v15 }
 0x124   : > { %v502_v21 = vadd.f32 %v501_v19, %v484_v17 }
 0x125   : > { %v1325_v19 = vld [vmem:[#allocation2] sm:$0xff] (!%p1007_p12) }
 0x126   : > { %498 = vadd.xlane.f32.xlu0 %v497_v20  ;;  %v750_v49 = vld [vmem:[#allocation2 + $0xa0] sm:$0xff] (!%p1007_p12) }
 0x127   : > { %454 = vadd.xlane.f32.xlu1 %v453_v18 }
 0x12b   : > { %503 = vadd.xlane.f32.xlu1 %v502_v21  ;;  %v1329_v21 = vld [vmem:[#allocation2 + $0x8] sm:$0xff] (!%p1007_p12) }
 0x1a7   : > { %v440_v23 = vpop.xlane.xlu0 %439 }
 0x1a8   : > { %v456_v24 = vadd.f32 %v440_v23, %v432_v22  ;;  %v1331_v22 = vld [vmem:[#allocation2 + $0x10] sm:$0xff] (!%p1007_p12)  ;;  %v1333_v23 = vld [vmem:[#allocation2 + $0x18] sm:$0xff] (!%p1007_p12) }
 0x1aa   : > { %461 = vst.msk [vmem:[#allocation3] sm:$0xff] %vm460_vm3, %v456_v24 }
 0x1ab   : > { %v494_v27 = vpop.xlane.xlu1 %493  ;;  %v445_v28 = vpop.xlane.xlu0 %444 }
 0x1ac   : > { %v506_v29 = vadd.f32 %v494_v27, %v466_v25  ;;  %v457_v30 = vadd.f32 %v445_v28, %v433_v26  ;;  %v1337_v25 = vld [vmem:[#allocation2 + $0x80] sm:$0xff] (!%p1007_p12)  ;;  %v1339_v26 = vld [vmem:[#allocation2 + $0x88] sm:$0xff] (!%p1007_p12)  ;;  %v1341_v27 = vld [vmem:[#allocation2 + $0x90] sm:$0xff] (!%p1007_p12) }
 0x1ad   : > { %v1343_v28 = vld [vmem:[#allocation2 + $0x98] sm:$0xff] (!%p1007_p12) }
 0x1ae   : > { %510 = vst.msk [vmem:[#allocation4 + $0x8] sm:$0xff] %vm460_vm3, %v506_v29  ;;  %462 = vst.msk [vmem:[#allocation3 + $0x8] sm:$0xff] %vm460_vm3, %v457_v30  ;;  %v1345_v29 = vld [vmem:[#allocation2 + $0x40] sm:$0xff] (!%p1007_p12)  ;;  %v1347_v30 = vld [vmem:[#allocation2 + $0x48] sm:$0xff] (!%p1007_p12) }
 0x1af   : > { %v489_v33 = vpop.xlane.xlu0 %488 }
 0x1b0   : > { %v505_v34 = vadd.f32 %v489_v33, %v465_v31  ;;  %v450_v35 = vpop.xlane.xlu1 %449  ;;  %v1349_v31 = vld [vmem:[#allocation2 + $0x20] sm:$0xff] (!%p1007_p12)  ;;  %v1353_v33 = vld [vmem:[#allocation2 + $0x30] sm:$0xff] (!%p1007_p12) }
 0x1b1   : > { %v458_v36 = vadd.f32 %v450_v35, %v434_v32  ;;  %v517_v48 = vld [vmem:[#allocation3] sm:$0xff] (!%p1007_p12)  ;;  %v1351_v32 = vld [vmem:[#allocation2 + $0x28] sm:$0xff] (!%p1007_p12)  ;;  %v1357_v35 = vld [vmem:[#allocation2 + $0x50] sm:$0xff] (!%p1007_p12) }
 0x1b2   : > { %509 = vst.msk [vmem:[#allocation4] sm:$0xff] %vm460_vm3, %v505_v34  ;;  %v521_v52 = vmul.f32 (!%p1007_p12), 0.0010405828, %v517_v48  ;;  %v1355_v34 = vld [vmem:[#allocation2 + $0x38] sm:$0xff] (!%p1007_p12) }
 0x1b3   : > { %463 = vst.msk [vmem:[#allocation3 + $0x10] sm:$0xff] %vm460_vm3, %v458_v36  ;;  %v499_v39 = vpop.xlane.xlu0 %498  ;;  %v1359_v36 = vld [vmem:[#allocation2 + $0x58] sm:$0xff] (!%p1007_p12) }
 0x1b4   : > { %v507_v40 = vadd.f32 %v499_v39, %v467_v37  ;;  %v455_v41 = vpop.xlane.xlu1 %454  ;;  %571 = vperm.xlu0 (!%p1007_p12), %1124, %v521_v52   ;;  %v533_v58 = vmul.f32 (!%p1007_p12), %v521_v52, %v521_v52  ;;  %v1361_v37 = vld [vmem:[#allocation2 + $0xc0] sm:$0xff] (!%p1007_p12) }
 0x1b5   : > { %v459_v42 = vadd.f32 %v455_v41, %v435_v38  ;;  %516 = sbr.rel (%p1007_p12) target bundleno = 630 (0x276), region = 59  ;;  %v518_v60 = vld [vmem:[#allocation3 + $0x8] sm:$0xff] (!%p1007_p12) }
 0x1b6   : > { %511 = vst.msk [vmem:[#allocation4 + $0x10] sm:$0xff] %vm460_vm3, %v507_v40  ;;  %v526_v61 = vld [vmem:[#allocation4 + $0x8] sm:$0xff] (!%p1007_p12)  ;;  %v522_v63 = vmul.f32 (!%p1007_p12), 0.0010405828, %v518_v60 }
 0x1b7   : > { %464 = vst.msk [vmem:[#allocation3 + $0x18] sm:$0xff] %vm460_vm3, %v459_v42  ;;  %v530_v0 = vmul.f32 (!%p1007_p12), 0.0010405828, %v526_v61  ;;  %v1371_v42 = vld [vmem:[#allocation2 + $0xc8] sm:$0xff] (!%p1007_p12)  ;;  %v1399_v61 = vld [vmem:[#allocation2 + $0x70] sm:$0xff] (!%p1007_p12) }
 0x1b8   : > { %v504_v44 = vpop.xlane.xlu1 %503  ;;  %v534_v4 = vmul.f32 (!%p1007_p12), %v522_v63, %v522_v63  ;;  %576 = vperm.xlu0 (!%p1007_p12), %1124, %v522_v63   ;;  %v1403_v63 = vld [vmem:[#allocation2 + $0xe0] sm:$0xff] (!%p1007_p12) }
 0x1b9   : > { %v508_v45 = vadd.f32 %v504_v44, %v468_v43  ;;  %v525_v53 = vld [vmem:[#allocation4] sm:$0xff] (!%p1007_p12)  ;;  %v1373_v43 = vld [vmem:[#allocation2 + $0xd0] sm:$0xff] (!%p1007_p12)  ;;  %v1375_v44 = vld [vmem:[#allocation2 + $0xd8] sm:$0xff] (!%p1007_p12) }
 0x1ba   : > { %v519_v46 = vld [vmem:[#allocation3 + $0x10] sm:$0xff] (!%p1007_p12)  ;;  %v529_v57 = vmul.f32 (!%p1007_p12), 0.0010405828, %v525_v53  ;;  %v538_v8 = vsub.f32 (!%p1007_p12), %v530_v0, %v534_v4  ;;  %v753_v53 = vld [vmem:[#allocation2 + $0xb8] sm:$0xff] (!%p1007_p12) }
 0x1bb   : > { %512 = vst.msk [vmem:[#allocation4 + $0x18] sm:$0xff] %vm460_vm3, %v508_v45  ;;  %v523_v50 = vmul.f32 (!%p1007_p12), 0.0010405828, %v519_v46 }
 0x1bc   : > { %v537_v2 = vsub.f32 %v529_v57, %v533_v58  ;;  %v542_v12 = vmax.f32 %v538_v8, 0.0  ;;  %v1417_v8 = vld [vmem:[#allocation2 + $0xe8] sm:$0xff] }
 0x1bd   : > { %v527_v47 = vld [vmem:[#allocation4 + $0x10] sm:$0xff]  ;;  %581 = vperm.xlu1 %1125, %v523_v50   ;;  %v535_v56 = vmul.f32 %v523_v50, %v523_v50  ;;  %v751_v50 = vld [vmem:[#allocation2 + $0xa8] sm:$0xff] }
 0x1be   : > { %v531_v51 = vmul.f32 0.0010405828, %v527_v47  ;;  %v520_v54 = vld [vmem:[#allocation3 + $0x18] sm:$0xff]  ;;  %v541_v6 = vmax.f32 %v537_v2, 0.0  ;;  %v546_v14 = vadd.f32 1e-05, %v542_v12 }
 0x1bf   : > { %v524_v59 = vmul.f32 0.0010405828, %v520_v54  ;;  %v1385_v54 = vld [vmem:[#allocation2 + $0x60] sm:$0xff] }
 0x1c0   : > { %v539_v1 = vsub.f32 %v531_v51, %v535_v56  ;;  %v545_v10 = vadd.f32 1e-05, %v541_v6  ;;  %v752_v51 = vld [vmem:[#allocation2 + $0xb0] sm:$0xff] }
 0x1c1   : > { %v536_v3 = vmul.f32 %v524_v59, %v524_v59  ;;  %586 = vperm.xlu1 %1125, %v524_v59  }
 0x1c2   : > { %v528_v55 = vld [vmem:[#allocation4 + $0x18] sm:$0xff]  ;;  %v543_v5 = vmax.f32 %v539_v1, 0.0  ;;  %1126 = vrsqrt.f32 %v545_v10 }
 0x1c3   : > { %v532_v62 = vmul.f32 0.0010405828, %v528_v55  ;;  %v1387_v55 = vld [vmem:[#allocation2 + $0x68] sm:$0xff]  ;;  %v1421_v10 = vld [vmem:[#allocation2 + $0xf8] sm:$0xff] }
 0x1c4   : > { %v547_v9 = vadd.f32 1e-05, %v543_v5 }
 0x1c5   : > { %v540_v7 = vsub.f32 %v532_v62, %v536_v3  ;;  %v1401_v62 = vld [vmem:[#allocation2 + $0x78] sm:$0xff] }
 0x1c6   : > { %1128 = vrsqrt.f32 %v547_v9  ;;  %v1419_v9 = vld [vmem:[#allocation2 + $0xf0] sm:$0xff] }
 0x1c7   : > { %v544_v11 = vmax.f32 %v540_v7, 0.0  ;;  %1130 = vrsqrt.f32 %v546_v14 }
 0x1c9   : > { %v548_v13 = vadd.f32 1e-05, %v544_v11 }
 0x1cb   : > { %1132 = vrsqrt.f32 %v548_v13 }
 0x1cc   : > { %v1127_v15 = vpop.eup %1126 }
 0x1cd   : > { %607 = vperm.xlu0 %1124, %v1127_v15  }
 0x1d0   : > { %v1129_v16 = vpop.eup %1128 }
 0x1d1   : > { %v1131_v17 = vpop.eup %1130  ;;  %617 = vperm.xlu0 %1124, %v1129_v16  }
 0x1d2   : > { %612 = vperm.xlu1 %1125, %v1131_v17  }
 0x1d5   : > { %v1133_v18 = vpop.eup %1132 }
 0x1d6   : > { %622 = vperm.xlu1 %1125, %v1133_v18  }
 0x233   : > { %v1327_v20 = vpop.permute.xlu0 %571 }
 0x234   : > { %v589_v38 = vsub.f32 %v1325_v19, %v1327_v20  ;;  %v590_v39 = vsub.f32 %v1329_v21, %v1327_v20  ;;  %v591_v40 = vsub.f32 %v1331_v22, %v1327_v20  ;;  %v592_v41 = vsub.f32 %v1333_v23, %v1327_v20 }
 0x235   : > { %v762_v45 = vsub.f32 %v1337_v25, %v1327_v20  ;;  %v763_v46 = vsub.f32 %v1339_v26, %v1327_v20  ;;  %v764_v47 = vsub.f32 %v1341_v27, %v1327_v20  ;;  %v765_v48 = vsub.f32 %v1343_v28, %v1327_v20 }
 0x237   : > { %v577_v52 = vpop.permute.xlu0 %576 }
 0x238   : > { %v593_v4 = vsub.f32 %v1349_v31, %v577_v52  ;;  %v594_v5 = vsub.f32 %v1351_v32, %v577_v52  ;;  %v595_v6 = vsub.f32 %v1353_v33, %v577_v52  ;;  %v596_v7 = vsub.f32 %v1355_v34, %v577_v52 }
 0x239   : > { %v766_v11 = vsub.f32 %v750_v49, %v577_v52  ;;  %v767_v12 = vsub.f32 %v751_v50, %v577_v52  ;;  %v768_v13 = vsub.f32 %v752_v51, %v577_v52  ;;  %v769_v14 = vsub.f32 %v753_v53, %v577_v52 }
 0x23c   : > { %v1335_v24 = vpop.permute.xlu1 %581 }
 0x23d   : > { %v597_v56 = vsub.f32 %v1345_v29, %v1335_v24  ;;  %v598_v57 = vsub.f32 %v1347_v30, %v1335_v24  ;;  %v599_v58 = vsub.f32 %v1357_v35, %v1335_v24  ;;  %v600_v59 = vsub.f32 %v1359_v36, %v1335_v24 }
 0x23e   : > { %v770_v0 = vsub.f32 %v1361_v37, %v1335_v24  ;;  %v771_v1 = vsub.f32 %v1371_v42, %v1335_v24 }
 0x240   : > { %v1397_v60 = vpop.permute.xlu1 %586 }
 0x241   : > { %v601_v15 = vsub.f32 %v1385_v54, %v1397_v60  ;;  %v602_v16 = vsub.f32 %v1387_v55, %v1397_v60  ;;  %v603_v17 = vsub.f32 %v1399_v61, %v1397_v60  ;;  %v604_v18 = vsub.f32 %v1401_v62, %v1397_v60 }
 0x242   : > { %v774_v20 = vsub.f32 %v1403_v63, %v1397_v60  ;;  %v775_v21 = vsub.f32 %v1417_v8, %v1397_v60  ;;  %v776_v22 = vsub.f32 %v1419_v9, %v1397_v60  ;;  %v777_v23 = vsub.f32 %v1421_v10, %v1397_v60 }
 0x24c   : > { %v608_v19 = vpop.permute.xlu0 %607 }
 0x24d   : > { %v1439_v25 = vmul.f32 %v608_v19, %v589_v38  ;;  %v1441_v26 = vmul.f32 %v608_v19, %v590_v39  ;;  %v1443_v27 = vmul.f32 %v608_v19, %v591_v40  ;;  %v1445_v28 = vmul.f32 %v608_v19, %v592_v41 }
 0x24e   : > { %v1447_v31 = vmul.f32 %v762_v45, %v608_v19  ;;  %v1449_v32 = vmul.f32 %v763_v46, %v608_v19  ;;  %v1451_v33 = vmul.f32 %v764_v47, %v608_v19  ;;  %v1453_v34 = vmul.f32 %v765_v48, %v608_v19 }
 0x24f   : > { %vm641_vm12 = vcmp.ge.f32.partialorder %v1439_v25, 0.0  ;;  %vm642_vm13 = vcmp.ge.f32.partialorder %v1441_v26, 0.0  ;;  %vm643_vm14 = vcmp.ge.f32.partialorder %v1443_v27, 0.0  ;;  %vm644_vm15 = vcmp.ge.f32.partialorder %v1445_v28, 0.0 }
 0x250   : > { %v1455_v3 = vpop.permute.xlu0 %617  ;;  %vm794_vm0 = vcmp.ge.f32.partialorder %v1447_v31, 0.0  ;;  %vm795_vm1 = vcmp.ge.f32.partialorder %v1449_v32, 0.0  ;;  %vm796_vm2 = vcmp.ge.f32.partialorder %v1451_v33, 0.0  ;;  %vm797_vm3 = vcmp.ge.f32.partialorder %v1453_v34, 0.0 }
 0x251   : > { %v613_v29 = vpop.permute.xlu1 %612  ;;  %v1458_v47 = vmul.f32 %v1455_v3, %v597_v56  ;;  %v634_v60 = vmul.f32 %v1455_v3, %v598_v57  ;;  %v786_v36 = vmul.f32 %v770_v0, %v1455_v3 }
 0x252   : > { %v629_v49 = vmul.f32 %v613_v29, %v593_v4  ;;  %v630_v50 = vmul.f32 %v613_v29, %v594_v5  ;;  %v631_v51 = vmul.f32 %v613_v29, %v595_v6  ;;  %v632_v38 = vmul.f32 %v613_v29, %v596_v7 }
 0x253   : > { %v782_v52 = vmul.f32 %v766_v11, %v613_v29  ;;  %v783_v39 = vmul.f32 %v767_v12, %v613_v29  ;;  %v784_v53 = vmul.f32 %v768_v13, %v613_v29  ;;  %v785_v40 = vmul.f32 %v769_v14, %v613_v29 }
 0x254   : > { %vm645_vm4 = vcmp.ge.f32.partialorder %v629_v49, 0.0  ;;  %vm646_vm5 = vcmp.ge.f32.partialorder %v630_v50, 0.0  ;;  %vm647_vm6 = vcmp.ge.f32.partialorder %v631_v51, 0.0  ;;  %vm648_vm7 = vcmp.ge.f32.partialorder %v632_v38, 0.0 }
 0x255   : > { %v661_v41 = vmul.f32 0.2, %v629_v49  ;;  %v662_v45 = vmul.f32 0.2, %v630_v50  ;;  %v663_v46 = vmul.f32 0.2, %v631_v51 }
 0x256   : > { %v664_v48 = vmul.f32 0.2, %v632_v38  ;;  %vm798_vm8 = vcmp.ge.f32.partialorder %v782_v52, 0.0  ;;  %vm799_vm9 = vcmp.ge.f32.partialorder %v783_v39, 0.0  ;;  %vm800_vm10 = vcmp.ge.f32.partialorder %v784_v53, 0.0 }
 0x257   : > { %v677_v4 = vsel %vm645_vm4, %v629_v49, %v661_v41  ;;  %v678_v5 = vsel %vm646_vm5, %v630_v50, %v662_v45  ;;  %v679_v6 = vsel %vm647_vm6, %v631_v51, %v663_v46  ;;  %vm801_vm11 = vcmp.ge.f32.partialorder %v785_v40, 0.0 }
 0x258   : > { %v680_v7 = vsel %vm648_vm7, %v632_v38, %v664_v48  ;;  %v1030_v11 = vpack.c.bf16 %v678_v5, %v677_v4  ;;  %v814_v12 = vmul.f32 0.2, %v782_v52  ;;  %v815_v13 = vmul.f32 0.2, %v783_v39 }
 0x259   : > { %v1031_v14 = vpack.c.bf16 %v680_v7, %v679_v6  ;;  %v816_v19 = vmul.f32 0.2, %v784_v53  ;;  %v817_v29 = vmul.f32 0.2, %v785_v40  ;;  %v657_v41 = vmul.f32 0.2, %v1439_v25 }
 0x25a   : > { %739 = vst [vmem:[%s1276_s19 + $0x20] sm:$0xff] %v1030_v11  ;;  %v830_v56 = vsel %vm798_vm8, %v782_v52, %v814_v12  ;;  %v831_v2 = vsel %vm799_vm9, %v783_v39, %v815_v13  ;;  %v658_v52 = vmul.f32 0.2, %v1441_v26  ;;  %v659_v39 = vmul.f32 0.2, %v1443_v27 }
 0x25b   : > { %740 = vst [vmem:[%s1276_s19 + $0x28] sm:$0xff] %v1031_v14  ;;  %v832_v49 = vsel %vm800_vm10, %v784_v53, %v816_v19  ;;  %v833_v50 = vsel %vm801_vm11, %v785_v40, %v817_v29  ;;  %v1038_v51 = vpack.c.bf16 %v831_v2, %v830_v56  ;;  %v660_v45 = vmul.f32 0.2, %v1445_v28  ;;  %v623_v2 = vpop.permute.xlu1 %622 }
 0x25c   : > { %v1039_v38 = vpack.c.bf16 %v833_v50, %v832_v49  ;;  %v673_v53 = vsel %vm641_vm12, %v1439_v25, %v657_v41  ;;  %v674_v40 = vsel %vm642_vm13, %v1441_v26, %v658_v52  ;;  %v675_v46 = vsel %vm643_vm14, %v1443_v27, %v659_v39 }
 0x25d   : > { %892 = vst [vmem:[%s1276_s19 + $0x30] sm:$0xff] %v1038_v51  ;;  %v676_v48 = vsel %vm644_vm15, %v1445_v28, %v660_v45  ;;  %v1028_v4 = vpack.c.bf16 %v674_v40, %v673_v53  ;;  %v810_v5 = vmul.f32 0.2, %v1447_v31  ;;  %v811_v25 = vmul.f32 0.2, %v1449_v32 }
 0x25e   : > { %893 = vst [vmem:[%s1276_s19 + $0x38] sm:$0xff] %v1039_v38  ;;  %v1029_v6 = vpack.c.bf16 %v676_v48, %v675_v46  ;;  %v812_v7 = vmul.f32 0.2, %v1451_v33  ;;  %v813_v26 = vmul.f32 0.2, %v1453_v34  ;;  %v637_v27 = vmul.f32 %v623_v2, %v601_v15 }
 0x25f   : > { %737 = vst [vmem:[%s1276_s19] sm:$0xff] %v1028_v4  ;;  %v826_v28 = vsel %vm794_vm0, %v1447_v31, %v810_v5  ;;  %v827_v11 = vsel %vm795_vm1, %v1449_v32, %v811_v25  ;;  %v638_v12 = vmul.f32 %v623_v2, %v602_v16  ;;  %v639_v54 = vmul.f32 %v623_v2, %v603_v17 }
 0x260   : > { %738 = vst [vmem:[%s1276_s19 + $0x8] sm:$0xff] %v1029_v6  ;;  %v828_v15 = vsel %vm796_vm2, %v1451_v33, %v812_v7  ;;  %v829_v31 = vsel %vm797_vm3, %v1453_v34, %v813_v26  ;;  %v1036_v13 = vpack.c.bf16 %v827_v11, %v826_v28  ;;  %v640_v55 = vmul.f32 %v623_v2, %v604_v18 }
 0x261   : > { %v1037_v16 = vpack.c.bf16 %v829_v31, %v828_v15  ;;  %vm653_vm4 = vcmp.ge.f32.partialorder %v637_v27, 0.0  ;;  %vm654_vm5 = vcmp.ge.f32.partialorder %v638_v12, 0.0  ;;  %vm655_vm6 = vcmp.ge.f32.partialorder %v639_v54, 0.0 }
 0x262   : > { %890 = vst [vmem:[%s1276_s19 + $0x10] sm:$0xff] %v1036_v13  ;;  %vm656_vm7 = vcmp.ge.f32.partialorder %v640_v55, 0.0  ;;  %v669_v61 = vmul.f32 0.2, %v637_v27  ;;  %v670_v17 = vmul.f32 0.2, %v638_v12  ;;  %v790_v32 = vmul.f32 %v774_v20, %v623_v2 }
 0x263   : > { %891 = vst [vmem:[%s1276_s19 + $0x18] sm:$0xff] %v1037_v16  ;;  %v671_v33 = vmul.f32 0.2, %v639_v54  ;;  %v672_v34 = vmul.f32 0.2, %v640_v55  ;;  %v791_v62 = vmul.f32 %v775_v21, %v623_v2  ;;  %v792_v18 = vmul.f32 %v776_v22, %v623_v2 }
 0x264   : > { %v685_v14 = vsel %vm653_vm4, %v637_v27, %v669_v61  ;;  %v686_v19 = vsel %vm654_vm5, %v638_v12, %v670_v17  ;;  %v793_v63 = vmul.f32 %v777_v23, %v623_v2  ;;  %vm806_vm8 = vcmp.ge.f32.partialorder %v790_v32, 0.0 }
 0x265   : > { %v687_v20 = vsel %vm655_vm6, %v639_v54, %v671_v33  ;;  %v688_v29 = vsel %vm656_vm7, %v640_v55, %v672_v34  ;;  %v1034_v56 = vpack.c.bf16 %v686_v19, %v685_v14  ;;  %vm807_vm9 = vcmp.ge.f32.partialorder %v791_v62, 0.0 }
 0x266   : > { %v1035_v49 = vpack.c.bf16 %v688_v29, %v687_v20  ;;  %vm808_vm10 = vcmp.ge.f32.partialorder %v792_v18, 0.0  ;;  %vm809_vm11 = vcmp.ge.f32.partialorder %v793_v63, 0.0  ;;  %v822_v8 = vmul.f32 0.2, %v790_v32 }
 0x267   : > { %743 = vst [vmem:[%s1276_s19 + $0x60] sm:$0xff] %v1034_v56  ;;  %v823_v21 = vmul.f32 0.2, %v791_v62  ;;  %v824_v9 = vmul.f32 0.2, %v792_v18  ;;  %v635_v23 = vmul.f32 %v1455_v3, %v599_v58  ;;  %v636_v50 = vmul.f32 %v1455_v3, %v600_v59 }
 0x268   : > { %v825_v22 = vmul.f32 0.2, %v793_v63  ;;  %744 = vst [vmem:[%s1276_s19 + $0x68] sm:$0xff] %v1035_v49  ;;  %v838_v10 = vsel %vm806_vm8, %v790_v32, %v822_v8  ;;  %vm649_vm12 = vcmp.ge.f32.partialorder %v1458_v47, 0.0  ;;  %vm650_vm13 = vcmp.ge.f32.partialorder %v634_v60, 0.0 }
 0x269   : > { %v839_v51 = vsel %vm807_vm9, %v791_v62, %v823_v21  ;;  %v840_v30 = vsel %vm808_vm10, %v792_v18, %v824_v9  ;;  %vm651_vm14 = vcmp.ge.f32.partialorder %v635_v23, 0.0  ;;  %vm652_vm15 = vcmp.ge.f32.partialorder %v636_v50, 0.0 }
 0x26a   : > { %v841_v38 = vsel %vm809_vm11, %v793_v63, %v825_v22  ;;  %v1042_v57 = vpack.c.bf16 %v839_v51, %v838_v10  ;;  %v665_v35 = vmul.f32 0.2, %v1458_v47  ;;  %v666_v52 = vmul.f32 0.2, %v634_v60 }
 0x26b   : > { %v1043_v41 = vpack.c.bf16 %v841_v38, %v840_v30  ;;  %v667_v58 = vmul.f32 0.2, %v635_v23  ;;  %v668_v59 = vmul.f32 0.2, %v636_v50  ;;  %v787_v39 = vmul.f32 %v771_v1, %v1455_v3 }
 0x26c   : > { %896 = vst [vmem:[%s1276_s19 + $0x70] sm:$0xff] %v1042_v57  ;;  %v1602_v45 = vsub.f32 %v1373_v43, %v1335_v24  ;;  %v1603_v53 = vsub.f32 %v1375_v44, %v1335_v24  ;;  %v681_v0 = vsel %vm649_vm12, %v1458_v47, %v665_v35  ;;  %v682_v40 = vsel %vm650_vm13, %v634_v60, %v666_v52 }
 0x26d   : > { %897 = vst [vmem:[%s1276_s19 + $0x78] sm:$0xff] %v1043_v41  ;;  %v683_v42 = vsel %vm651_vm14, %v635_v23, %v667_v58  ;;  %vm802_vm0 = vcmp.ge.f32.partialorder %v786_v36, 0.0  ;;  %v684_v1 = vsel %vm652_vm15, %v636_v50, %v668_v59  ;;  %v1032_v46 = vpack.c.bf16 %v682_v40, %v681_v0 }
 0x26e   : > { %v788_v2 = vmul.f32 %v1602_v45, %v1455_v3  ;;  %v789_v37 = vmul.f32 %v1603_v53, %v1455_v3  ;;  %vm803_vm1 = vcmp.ge.f32.partialorder %v787_v39, 0.0  ;;  %v1033_v43 = vpack.c.bf16 %v684_v1, %v683_v42 }
 0x26f   : > { %v818_v48 = vmul.f32 0.2, %v786_v36  ;;  %v819_v24 = vmul.f32 0.2, %v787_v39  ;;  %741 = vst [vmem:[%s1276_s19 + $0x40] sm:$0xff] %v1032_v46 }
 0x270   : > { %vm804_vm2 = vcmp.ge.f32.partialorder %v788_v2, 0.0  ;;  %vm805_vm3 = vcmp.ge.f32.partialorder %v789_v37, 0.0  ;;  %v820_v44 = vmul.f32 0.2, %v788_v2  ;;  %v821_v3 = vmul.f32 0.2, %v789_v37 }
 0x271   : > { %742 = vst [vmem:[%s1276_s19 + $0x48] sm:$0xff] %v1033_v43  ;;  %v834_v4 = vsel %vm802_vm0, %v786_v36, %v818_v48  ;;  %v835_v47 = vsel %vm803_vm1, %v787_v39, %v819_v24 }
 0x272   : > { %v836_v5 = vsel %vm804_vm2, %v788_v2, %v820_v44  ;;  %v837_v25 = vsel %vm805_vm3, %v789_v37, %v821_v3  ;;  %v1040_v6 = vpack.c.bf16 %v835_v47, %v834_v4 }
 0x273   : > { %v1041_v7 = vpack.c.bf16 %v837_v25, %v836_v5 }
 0x274   : > { %894 = vst [vmem:[%s1276_s19 + $0x50] sm:$0xff] %v1040_v6 }
 0x275   : > { %895 = vst [vmem:[%s1276_s19 + $0x58] sm:$0xff] %v1041_v7 }
 0x276 PF: > { %s12_s15 = sadd.s32 1, %s1188_s15   ;;  %s1604_s9 = smov %s1168_s10 }
 0x277   : > { %p9_p13 = scmp.ge.s32.totalorder %s12_s15, 6   ;;  %s1605_s10 = smov %s1259_s22 }
 0x278   : > { %s1606_s11 = smov %s1180_s13  ;;  %s1607_s12 = smov %s1184_s14 }
 0x279   : > { %s1608_s13 = smov %s1611_s16  ;;  %s1609_s14 = smov %s1615_s17 }
 0x27a   :  { %11 = sbr.rel (!%p9_p13) target bundleno = 4 (0x4), region = 96 }

// kernel: pixel_discriminator_forward.5
= control target key start
LH: loop header
LB: loop body
LE: loop exit
PB: predicated region body
PF: predicated region fallthrough
CT: control target
= control target key end

     0   :  { %s1406_s9 = smov 0   ;;  %s1408_s10 = smov 0   ;;  %s1683_s0 = inlined_call_operand.vmem [shape: bf16[2,288,256], index: 0, kind: input, shape index: {}]   ;;  %s1684_s1 = inlined_call_operand.vmem [shape: bf16[64,288], index: 1, kind: input, shape index: {}]   ;;  %s1685_s2 = inlined_call_operand.vmem [shape: bf16[2,64,256], index: 2, kind: output, shape index: {}]  }
   0x1   :  { %s1410_s11 = smov 0  }
   0x2 LB: > { %s24_s12 = sadd.s32 1, %s1383_s10  ;;  %p1159_p0 = scmp.ge.s32.totalorder %s1387_s11, 1  ;;  %s1387_s11 = sphi %s1410_s11, %s12_s11   ;;  %s1383_s10 = sphi %s1408_s10, %s1687_s10   ;;  %s1379_s9 = sphi %s1406_s9, %s1686_s9  }
   0x3   : > { %p26_p1 = scmp.ge.s32.totalorder %s24_s12, 2  ;;  %p131_p2 = scmp.lt.s32.totalorder %s1387_s11, 3 }
   0x5   : > { %s1689_s12 = smov (%p26_p1, %s24_s12), 0  ;;  %p132_p3 = pnand %p1159_p0, %p131_p2 }
   0x6   : > { %p158_p4 = scmp.lt.s32.totalorder (!%p132_p3), %s1379_s9, 1  ;;  %v1389_v0 = vmov (!%p132_p3), 0   ;;  %v1336_v1 = vld [vmem:[%s1684_s1 + $0x4] ss:$12 sps:$4 sm:$0xff] (!%p132_p3)   ;;  %v1333_v21 = vld [vmem:[%s1684_s1 + $0x8] ss:$12 sps:$4 sm:$0xff] (!%p132_p3)  }
   0x7   : > { %135 = sbr.rel (%p132_p3) target bundleno = 640 (0x280), region = 28  ;;  %604 = vmatprep.mubr.bf16.mxu0 (!%p132_p3), %v1389_v0  ;;  %1277 = vset.pattern.permute.xlu0 (!%p132_p3), %v1389_v0  ;;  %vm486_vm0 = vcmask (!%p132_p3), 261120   ;;  %v1337_v26 = vld [vmem:[%s1684_s1 + $0x20] ss:$12 sps:$4 sm:$0xff] (!%p132_p3)   ;;  %v1343_v31 = vld [vmem:[%s1684_s1 + $0x38] ss:$12 sps:$4 sm:$0xff] (!%p132_p3)  }
   0x8   : > { %1278 = vset.pattern.permute.xlu1 (!%p132_p3), %v1389_v0  ;;  %531 = vmatprep.mubr.bf16.mxu1 (!%p132_p3), %v1336_v1  ;;  %v1347_v36 = vld [vmem:[%s1684_s1 + $0x50] ss:$12 sps:$4 sm:$0xff] (!%p132_p3)   ;;  %v1334_v42 = vld [vmem:[%s1684_s1] ss:$12 sps:$4 sm:$0xff] (!%p132_p3)   ;;  %v1340_v44 = vld [vmem:[%s1684_s1 + $0x18] ss:$12 sps:$4 sm:$0xff] (!%p132_p3)  }
   0x9   : > { %v1338_v43 = vld [vmem:[%s1684_s1 + $0x1c] ss:$12 sps:$4 sm:$0xff] (!%p132_p3)   ;;  %v1341_v45 = vld [vmem:[%s1684_s1 + $0x34] ss:$12 sps:$4 sm:$0xff] (!%p132_p3)   ;;  %v1345_v47 = vld [vmem:[%s1684_s1 + $0x4c] ss:$12 sps:$4 sm:$0xff] (!%p132_p3)  }
   0xa   : > { %v1344_v46 = vld [vmem:[%s1684_s1 + $0x30] ss:$12 sps:$4 sm:$0xff] (!%p132_p3)   ;;  %v1348_v48 = vld [vmem:[%s1684_s1 + $0x48] ss:$12 sps:$4 sm:$0xff] (!%p132_p3)   ;;  %vm177_vm1 = vcmask (!%p132_p3), 7168   ;;  %v1390_v49 = vmov (!%p132_p3), 0.0  }
   0xb   : > { %178 = vst.msk [vmem:[#allocation3] sm:$0xff] (!%p132_p3), %vm177_vm1, %v1390_v49  ;;  %179 = vst.msk [vmem:[#allocation3 + $0x8] sm:$0xff] (!%p132_p3), %vm177_vm1, %v1390_v49 }
   0xc   : > { %180 = vst.msk [vmem:[#allocation3 + $0x10] sm:$0xff] (!%p132_p3), %vm177_vm1, %v1390_v49  ;;  %181 = vst.msk [vmem:[#allocation3 + $0x18] sm:$0xff] (!%p132_p3), %vm177_vm1, %v1390_v49 }
   0xd   : > { %182 = vst.msk [vmem:[#allocation3 + $0x20] sm:$0xff] (!%p132_p3), %vm177_vm1, %v1390_v49  ;;  %183 = vst.msk [vmem:[#allocation3 + $0x28] sm:$0xff] (!%p132_p3), %vm177_vm1, %v1390_v49 }
   0xe   : > { %s1691_s9 = smov (!%p158_p4, %s1379_s9), 1  ;;  %184 = vst.msk [vmem:[#allocation3 + $0x30] sm:$0xff] %vm177_vm1, %v1390_v49  ;;  %185 = vst.msk [vmem:[#allocation3 + $0x38] sm:$0xff] %vm177_vm1, %v1390_v49 }
   0xf   : > { %s1250_s15 = smul.u32 288, %s1691_s9  ;;  %186 = vst.msk [vmem:[#allocation4] sm:$0xff] %vm177_vm1, %v1390_v49  ;;  %187 = vst.msk [vmem:[#allocation4 + $0x8] sm:$0xff] %vm177_vm1, %v1390_v49  ;;  %s1225_s17 = sshll.u32 %s1691_s9, 6 }
  0x10   : > { %188 = vst.msk [vmem:[#allocation4 + $0x10] sm:$0xff] %vm177_vm1, %v1390_v49  ;;  %189 = vst.msk [vmem:[#allocation4 + $0x18] sm:$0xff] %vm177_vm1, %v1390_v49  ;;  %s1644_s20 = scalar_lea.vmem %s1685_s2, %s1225_s17 }
  0x11   : > { %s1436_s18 = scalar_lea.vmem %s1683_s0, %s1250_s15  ;;  %190 = vst.msk [vmem:[#allocation4 + $0x20] sm:$0xff] %vm177_vm1, %v1390_v49  ;;  %191 = vst.msk [vmem:[#allocation4 + $0x28] sm:$0xff] %vm177_vm1, %v1390_v49 }
  0x12   : > { %v1279_v2 = vld [vmem:[%s1436_s18 + $0x4] ss:$8 sps:$4 sm:$0xff]   ;;  %v1281_v3 = vld [vmem:[%s1436_s18] ss:$8 sps:$4 sm:$0xff]   ;;  %v1282_v4 = vld [vmem:[%s1436_s18 + $0x14] ss:$8 sps:$4 sm:$0xff]  }
  0x13   : > { %499 = vmatprep.subr.bf16.mxu1 %v1279_v2  ;;  %v1284_v5 = vld [vmem:[%s1436_s18 + $0x10] ss:$8 sps:$4 sm:$0xff]   ;;  %v1285_v6 = vld [vmem:[%s1436_s18 + $0x24] ss:$8 sps:$4 sm:$0xff]   ;;  %v1287_v7 = vld [vmem:[%s1436_s18 + $0x20] ss:$8 sps:$4 sm:$0xff]  }
  0x14   : > { %500 = vmatpush1.bf16.msra.mxu1 %v1281_v3  ;;  %v1288_v8 = vld [vmem:[%s1436_s18 + $0x34] ss:$8 sps:$4 sm:$0xff]   ;;  %v1290_v9 = vld [vmem:[%s1436_s18 + $0x30] ss:$8 sps:$4 sm:$0xff]   ;;  %v1291_v10 = vld [vmem:[%s1436_s18 + $0x44] ss:$8 sps:$4 sm:$0xff]  }
  0x15   : > { %501 = vmatprep.subr.bf16.mxu1 %v1282_v4  ;;  %v1293_v11 = vld [vmem:[%s1436_s18 + $0x40] ss:$8 sps:$4 sm:$0xff]   ;;  %v1294_v12 = vld [vmem:[%s1436_s18 + $0x54] ss:$8 sps:$4 sm:$0xff]   ;;  %v1296_v13 = vld [vmem:[%s1436_s18 + $0x50] ss:$8 sps:$4 sm:$0xff]  }
  0x16   : > { %v1321_v14 = vld [vmem:[%s1436_s18 + $0x104] ss:$8 sps:$4 sm:$0xff]   ;;  %v1323_v15 = vld [vmem:[%s1436_s18 + $0x100] ss:$8 sps:$4 sm:$0xff]   ;;  %v1327_v17 = vld [vmem:[%s1436_s18 + $0x114] ss:$8 sps:$4 sm:$0xff]  }
  0x17   : > { %v1297_v16 = vld [vmem:[%s1436_s18 + $0x64] ss:$8 sps:$4 sm:$0xff]   ;;  %572 = vmatprep.subr.bf16.mxu0 %v1321_v14  ;;  %v1329_v18 = vld [vmem:[%s1436_s18 + $0x110] ss:$8 sps:$4 sm:$0xff]   ;;  %v1299_v19 = vld [vmem:[%s1436_s18 + $0x60] ss:$8 sps:$4 sm:$0xff]  }
  0x18   : > { %502 = vmatpush1.bf16.msra.mxu1 %v1284_v5  ;;  %573 = vmatpush1.bf16.msra.mxu0 %v1323_v15  ;;  %v1300_v20 = vld [vmem:[%s1436_s18 + $0x74] ss:$8 sps:$4 sm:$0xff]   ;;  %v1302_v22 = vld [vmem:[%s1436_s18 + $0x70] ss:$8 sps:$4 sm:$0xff]   ;;  %v1303_v23 = vld [vmem:[%s1436_s18 + $0x84] ss:$8 sps:$4 sm:$0xff]  }
  0x19   : > { %503 = vmatprep.subr.bf16.mxu1 %v1285_v6  ;;  %574 = vmatprep.subr.bf16.mxu0 %v1327_v17  ;;  %v1305_v24 = vld [vmem:[%s1436_s18 + $0x80] ss:$8 sps:$4 sm:$0xff]   ;;  %v1306_v25 = vld [vmem:[%s1436_s18 + $0x94] ss:$8 sps:$4 sm:$0xff]   ;;  %v1308_v27 = vld [vmem:[%s1436_s18 + $0x90] ss:$8 sps:$4 sm:$0xff]  }
  0x1a   : > { %v1309_v28 = vld [vmem:[%s1436_s18 + $0xa4] ss:$8 sps:$4 sm:$0xff]   ;;  %v1311_v29 = vld [vmem:[%s1436_s18 + $0xa0] ss:$8 sps:$4 sm:$0xff]   ;;  %v1312_v30 = vld [vmem:[%s1436_s18 + $0xb4] ss:$8 sps:$4 sm:$0xff]  }
  0x1b   : > { %v1314_v32 = vld [vmem:[%s1436_s18 + $0xb0] ss:$8 sps:$4 sm:$0xff]   ;;  %v1315_v33 = vld [vmem:[%s1436_s18 + $0xc4] ss:$8 sps:$4 sm:$0xff]   ;;  %v1317_v34 = vld [vmem:[%s1436_s18 + $0xc0] ss:$8 sps:$4 sm:$0xff]  }
  0x1c   : > { %504 = vmatpush1.bf16.msra.mxu1 %v1287_v7  ;;  %575 = vmatpush1.bf16.msra.mxu0 %v1329_v18  ;;  %v1318_v35 = vld [vmem:[%s1436_s18 + $0xd4] ss:$8 sps:$4 sm:$0xff]   ;;  %v1320_v37 = vld [vmem:[%s1436_s18 + $0xd0] ss:$8 sps:$4 sm:$0xff]   ;;  %v1324_v38 = vld [vmem:[%s1436_s18 + $0xe4] ss:$8 sps:$4 sm:$0xff]  }
  0x1d   : > { %505 = vmatprep.subr.bf16.mxu1 %v1288_v8  ;;  %v1326_v39 = vld [vmem:[%s1436_s18 + $0xe0] ss:$8 sps:$4 sm:$0xff]   ;;  %v1330_v40 = vld [vmem:[%s1436_s18 + $0xf4] ss:$8 sps:$4 sm:$0xff]   ;;  %v1332_v41 = vld [vmem:[%s1436_s18 + $0xf0] ss:$8 sps:$4 sm:$0xff]  }
  0x1e   : > { %192 = vst.msk [vmem:[#allocation4 + $0x30] sm:$0xff] %vm177_vm1, %v1390_v49  ;;  %193 = vst.msk [vmem:[#allocation4 + $0x38] sm:$0xff] %vm177_vm1, %v1390_v49 }
  0x1f   : > { %1211 = vmatmul.mubr.msk.bf16.vlgmr.msra.gmra.mrb[0].mxu0 %vm486_vm0, %v1333_v21 }
  0x20   : > { %506 = vmatpush1.bf16.msra.mxu1 %v1290_v9  ;;  %614 = vmatprep.mubr.bf16.mxu0 %v1389_v0 }
  0x21   : > { %507 = vmatprep.subr.bf16.mxu1 %v1291_v10 }
  0x24   : > { %508 = vmatpush1.bf16.msra.mxu1 %v1293_v11 }
  0x25   : > { %509 = vmatprep.subr.bf16.mxu1 %v1294_v12 }
  0x27   : > { %1212 = vmatmul.mubr.msk.bf16.gmra.mrb[4].mxu0 %vm486_vm0, %v1337_v26 }
  0x28   : > { %510 = vmatpush1.bf16.msra.mxu1 %v1296_v13  ;;  %624 = vmatprep.mubr.bf16.mxu0 %v1389_v0 }
  0x29   : > { %511 = vmatprep.subr.bf16.mxu1 %v1297_v16 }
  0x2c   : > { %512 = vmatpush1.bf16.msra.mxu1 %v1299_v19 }
  0x2d   : > { %513 = vmatprep.subr.bf16.mxu1 %v1300_v20 }
  0x2f   : > { %1213 = vmatmul.mubr.msk.bf16.gmra.mrb[8].mxu0 %vm486_vm0, %v1343_v31 }
  0x30   : > { %514 = vmatpush1.bf16.msra.mxu1 %v1302_v22  ;;  %634 = vmatprep.mubr.bf16.mxu0 %v1389_v0 }
  0x31   : > { %515 = vmatprep.subr.bf16.mxu1 %v1303_v23 }
  0x34   : > { %516 = vmatpush1.bf16.msra.mxu1 %v1305_v24 }
  0x35   : > { %517 = vmatprep.subr.bf16.mxu1 %v1306_v25 }
  0x37   : > { %1214 = vmatmul.mubr.msk.bf16.gmra.mrb[12].mxu0 %vm486_vm0, %v1347_v36 }
  0x38   : > { %518 = vmatpush1.bf16.msra.mxu1 %v1308_v27 }
  0x39   : > { %519 = vmatprep.subr.bf16.mxu1 %v1309_v28 }
  0x3c   : > { %520 = vmatpush1.bf16.msra.mxu1 %v1311_v29 }
  0x3d   : > { %521 = vmatprep.subr.bf16.mxu1 %v1312_v30 }
  0x40   : > { %522 = vmatpush1.bf16.msra.mxu1 %v1314_v32 }
  0x41   : > { %523 = vmatprep.subr.bf16.mxu1 %v1315_v33 }
  0x44   : > { %524 = vmatpush1.bf16.msra.mxu1 %v1317_v34 }
  0x45   : > { %525 = vmatprep.subr.bf16.mxu1 %v1318_v35 }
  0x48   : > { %526 = vmatpush1.bf16.msra.mxu1 %v1320_v37 }
  0x49   : > { %527 = vmatprep.subr.bf16.mxu1 %v1324_v38 }
  0x4c   : > { %528 = vmatpush1.bf16.msra.mxu1 %v1326_v39 }
  0x4d   : > { %529 = vmatprep.subr.bf16.mxu1 %v1330_v40 }
  0x50   : > { %530 = vmatpush1.bf16.msra.mxu1 %v1332_v41 }
  0x53   : > { %532 = vmatmul.mubr.bf16.vlgmr.msra.gmra.mrb[0].mxu1 %v1334_v42 }
  0x54   : > { %541 = vmatprep.mubr.bf16.mxu1 %v1338_v43 }
  0x5b   : > { %542 = vmatmul.mubr.bf16.gmra.mrb[4].mxu1 %v1340_v44 }
  0x5c   : > { %551 = vmatprep.mubr.bf16.mxu1 %v1341_v45 }
  0x63   : > { %552 = vmatmul.mubr.bf16.gmra.mrb[8].mxu1 %v1344_v46 }
  0x64   : > { %561 = vmatprep.mubr.bf16.mxu1 %v1345_v47 }
  0x6b   : > { %562 = vmatmul.mubr.bf16.gmra.mrb[12].mxu1 %v1348_v48 }
  0xf2   : > { %v606_v50 = vpop.f32.mrb[0].mxu0 }
  0xf3   : > { %v608_v51 = vpop.f32.mrb[1].mxu0 }
  0xf4   : > { %v610_v52 = vpop.f32.mrb[2].mxu0 }
  0xf5   : > { %v612_v53 = vpop.f32.mrb[3].mxu0 }
  0xfa   : > { %v616_v54 = vpop.f32.mrb[4].mxu0 }
  0xfb   : > { %v618_v55 = vpop.f32.mrb[5].mxu0 }
  0xfc   : > { %v620_v56 = vpop.f32.mrb[6].mxu0 }
  0xfd   : > { %v622_v57 = vpop.f32.mrb[7].mxu0 }
 0x102   : > { %v626_v58 = vpop.f32.mrb[8].mxu0 }
 0x103   : > { %v628_v59 = vpop.f32.mrb[9].mxu0 }
 0x104   : > { %v630_v60 = vpop.f32.mrb[10].mxu0 }
 0x105   : > { %v632_v61 = vpop.f32.mrb[11].mxu0 }
 0x10a   : > { %v636_v62 = vpop.f32.mrb[12].mxu0 }
 0x10b   : > { %v638_v63 = vpop.f32.mrb[13].mxu0 }
 0x10c   : > { %v1530_v0 = vpop.f32.mrb[14].mxu0 }
 0x10d   : > { %v1532_v1 = vpop.f32.mrb[15].mxu0 }
 0x126   : > { %v533_v2 = vpop.f32.mrb[0].mxu1 }
 0x127   : > { %v1534_v3 = vadd.f32 %v606_v50, %v533_v2  ;;  %v535_v4 = vpop.f32.mrb[1].mxu1  ;;  %v664_v2 = vld [vmem:[#allocation3] sm:$0xff] }
 0x128   : > { %v1536_v5 = vadd.f32 %v608_v51, %v535_v4  ;;  %v537_v6 = vpop.f32.mrb[2].mxu1 }
 0x129   : > { %v1538_v7 = vadd.f32 %v610_v52, %v537_v6  ;;  %v539_v8 = vpop.f32.mrb[3].mxu1  ;;  %v721_v13 = vmul.f32 %v1534_v3, %v1534_v3 }
 0x12a   : > { %v1540_v9 = vadd.f32 %v612_v53, %v539_v8  ;;  %v672_v10 = vadd.f32 %v1536_v5, %v1534_v3  ;;  %v722_v14 = vmul.f32 %v1536_v5, %v1536_v5  ;;  %v714_v8 = vld [vmem:[#allocation4 + $0x8] sm:$0xff] }
 0x12b   : > { %v723_v11 = vmul.f32 %v1538_v7, %v1538_v7 }
 0x12c   : > { %673 = vadd.xlane.f32.xlu0 %v672_v10  ;;  %v724_v12 = vmul.f32 %v1540_v9, %v1540_v9  ;;  %v675_v17 = vadd.f32 %v1540_v9, %v1538_v7  ;;  %v737_v24 = vadd.f32 %v722_v14, %v721_v13  ;;  %v665_v10 = vld [vmem:[#allocation3 + $0x8] sm:$0xff] }
 0x12e   : > { %v543_v15 = vpop.f32.mrb[4].mxu1  ;;  %v740_v16 = vadd.f32 %v724_v12, %v723_v11 }
 0x12f   : > { %v1554_v18 = vadd.f32 %v616_v54, %v543_v15  ;;  %v545_v19 = vpop.f32.mrb[5].mxu1  ;;  %v713_v15 = vld [vmem:[#allocation4] sm:$0xff] }
 0x130   : > { %v1556_v20 = vadd.f32 %v618_v55, %v545_v19  ;;  %741 = vadd.xlane.f32.xlu1 %v740_v16  ;;  %676 = vadd.xlane.f32.xlu0 %v675_v17  ;;  %v547_v21 = vpop.f32.mrb[6].mxu1  ;;  %v666_v16 = vld [vmem:[#allocation3 + $0x10] sm:$0xff] }
 0x131   : > { %v1558_v22 = vadd.f32 %v620_v56, %v547_v21  ;;  %v549_v23 = vpop.f32.mrb[7].mxu1  ;;  %v725_v27 = vmul.f32 %v1554_v18, %v1554_v18 }
 0x132   : > { %v1560_v25 = vadd.f32 %v622_v57, %v549_v23  ;;  %v678_v26 = vadd.f32 %v1556_v20, %v1554_v18  ;;  %v726_v28 = vmul.f32 %v1556_v20, %v1556_v20 }
 0x133   : > { %v727_v32 = vmul.f32 %v1558_v22, %v1558_v22 }
 0x134   : > { %738 = vadd.xlane.f32.xlu0 %v737_v24  ;;  %679 = vadd.xlane.f32.xlu1 %v678_v26  ;;  %v743_v30 = vadd.f32 %v726_v28, %v725_v27  ;;  %v681_v31 = vadd.f32 %v1560_v25, %v1558_v22  ;;  %v728_v33 = vmul.f32 %v1560_v25, %v1560_v25  ;;  %v715_v24 = vld [vmem:[#allocation4 + $0x10] sm:$0xff]  ;;  %v667_v26 = vld [vmem:[#allocation3 + $0x18] sm:$0xff] }
 0x136   : > { %v553_v29 = vpop.f32.mrb[8].mxu1  ;;  %v746_v42 = vadd.f32 %v728_v33, %v727_v32  ;;  %v716_v33 = vld [vmem:[#allocation4 + $0x18] sm:$0xff] }
 0x137   : > { %v1574_v34 = vadd.f32 %v626_v58, %v553_v29  ;;  %v555_v35 = vpop.f32.mrb[9].mxu1 }
 0x138   : > { %v1576_v36 = vadd.f32 %v628_v59, %v555_v35  ;;  %744 = vadd.xlane.f32.xlu0 %v743_v30  ;;  %682 = vadd.xlane.f32.xlu1 %v681_v31  ;;  %v557_v37 = vpop.f32.mrb[10].mxu1  ;;  %v668_v35 = vld [vmem:[#allocation3 + $0x20] sm:$0xff] }
 0x139   : > { %v1578_v38 = vadd.f32 %v630_v60, %v557_v37  ;;  %v559_v39 = vpop.f32.mrb[11].mxu1  ;;  %v729_v40 = vmul.f32 %v1574_v34, %v1574_v34 }
 0x13a   : > { %v1582_v41 = vadd.f32 %v632_v61, %v559_v39  ;;  %v684_v43 = vadd.f32 %v1576_v36, %v1574_v34  ;;  %v730_v44 = vmul.f32 %v1576_v36, %v1576_v36 }
 0x13b   : > { %v731_v48 = vmul.f32 %v1578_v38, %v1578_v38 }
 0x13c   : > { %747 = vadd.xlane.f32.xlu1 %v746_v42  ;;  %685 = vadd.xlane.f32.xlu0 %v684_v43  ;;  %v749_v45 = vadd.f32 %v730_v44, %v729_v40  ;;  %v687_v47 = vadd.f32 %v1582_v41, %v1578_v38  ;;  %v732_v49 = vmul.f32 %v1582_v41, %v1582_v41 }
 0x13e   : > { %v563_v46 = vpop.f32.mrb[12].mxu1  ;;  %v752_v58 = vadd.f32 %v732_v49, %v731_v48  ;;  %v717_v48 = vld [vmem:[#allocation4 + $0x20] sm:$0xff] }
 0x13f   : > { %v1594_v50 = vadd.f32 %v636_v62, %v563_v46  ;;  %v565_v51 = vpop.f32.mrb[13].mxu1 }
 0x140   : > { %v1596_v52 = vadd.f32 %v638_v63, %v565_v51  ;;  %750 = vadd.xlane.f32.xlu0 %v749_v45  ;;  %688 = vadd.xlane.f32.xlu1 %v687_v47  ;;  %v567_v53 = vpop.f32.mrb[14].mxu1  ;;  %v669_v51 = vld [vmem:[#allocation3 + $0x28] sm:$0xff] }
 0x141   : > { %v1599_v54 = vadd.f32 %v1530_v0, %v567_v53  ;;  %v569_v55 = vpop.f32.mrb[15].mxu1  ;;  %v733_v56 = vmul.f32 %v1594_v50, %v1594_v50 }
 0x142   : > { %v1604_v57 = vadd.f32 %v1532_v1, %v569_v55  ;;  %v690_v59 = vadd.f32 %v1596_v52, %v1594_v50  ;;  %v734_v60 = vmul.f32 %v1596_v52, %v1596_v52 }
 0x143   : > { %v735_v63 = vmul.f32 %v1599_v54, %v1599_v54 }
 0x144   : > { %753 = vadd.xlane.f32.xlu1 %v752_v58  ;;  %691 = vadd.xlane.f32.xlu0 %v690_v59  ;;  %v755_v61 = vadd.f32 %v734_v60, %v733_v56  ;;  %v693_v62 = vadd.f32 %v1604_v57, %v1599_v54  ;;  %v736_v0 = vmul.f32 %v1604_v57, %v1604_v57 }
 0x146   : > { %v758_v1 = vadd.f32 %v736_v0, %v735_v63 }
 0x148   : > { %756 = vadd.xlane.f32.xlu0 %v755_v61  ;;  %694 = vadd.xlane.f32.xlu1 %v693_v62 }
 0x14c   : > { %759 = vadd.xlane.f32.xlu1 %v758_v1 }
 0x1b9   : > { %v674_v4 = vpop.xlane.xlu0 %673 }
 0x1ba   : > { %v696_v6 = vadd.f32 %v674_v4, %v664_v2  ;;  %v718_v4 = vld [vmem:[#allocation4 + $0x28] sm:$0xff] }
 0x1bc   : > { %705 = vst.msk [vmem:[#allocation3] sm:$0xff] %vm177_vm1, %v696_v6 }
 0x1bd   : > { %v742_v11 = vpop.xlane.xlu1 %741  ;;  %v677_v12 = vpop.xlane.xlu0 %676 }
 0x1be   : > { %v762_v13 = vadd.f32 %v742_v11, %v714_v8  ;;  %v697_v14 = vadd.f32 %v677_v12, %v665_v10  ;;  %v670_v12 = vld [vmem:[#allocation3 + $0x30] sm:$0xff] }
 0x1c0   : > { %770 = vst.msk [vmem:[#allocation4 + $0x8] sm:$0xff] %vm177_vm1, %v762_v13  ;;  %706 = vst.msk [vmem:[#allocation3 + $0x8] sm:$0xff] %vm177_vm1, %v697_v14 }
 0x1c1   : > { %v739_v17 = vpop.xlane.xlu0 %738  ;;  %v680_v19 = vpop.xlane.xlu1 %679 }
 0x1c2   : > { %v761_v21 = vadd.f32 %v739_v17, %v713_v15  ;;  %v698_v23 = vadd.f32 %v680_v19, %v666_v16 }
 0x1c3   : > { %v780_v27 = vld [vmem:[#allocation3] sm:$0xff] }
 0x1c4   : > { %769 = vst.msk [vmem:[#allocation4] sm:$0xff] %vm177_vm1, %v761_v21  ;;  %707 = vst.msk [vmem:[#allocation3 + $0x10] sm:$0xff] %vm177_vm1, %v698_v23  ;;  %v788_v28 = vmul.f32 0.0044444446, %v780_v27  ;;  %v719_v21 = vld [vmem:[#allocation4 + $0x30] sm:$0xff]  ;;  %v671_v27 = vld [vmem:[#allocation3 + $0x38] sm:$0xff] }
 0x1c5   : > { %v745_v29 = vpop.xlane.xlu0 %744  ;;  %v683_v30 = vpop.xlane.xlu1 %682 }
 0x1c6   : > { %v763_v31 = vadd.f32 %v745_v29, %v715_v24  ;;  %v699_v32 = vadd.f32 %v683_v30, %v667_v26  ;;  %870 = vperm.xlu0 %1277, %v788_v28   ;;  %v812_v56 = vmul.f32 %v788_v28, %v788_v28 }
 0x1c7   : > { %v781_v37 = vld [vmem:[#allocation3 + $0x8] sm:$0xff] }
 0x1c8   : > { %v797_v39 = vld [vmem:[#allocation4 + $0x8] sm:$0xff]  ;;  %771 = vst.msk [vmem:[#allocation4 + $0x10] sm:$0xff] %vm177_vm1, %v763_v31  ;;  %708 = vst.msk [vmem:[#allocation3 + $0x18] sm:$0xff] %vm177_vm1, %v699_v32  ;;  %v789_v40 = vmul.f32 0.0044444446, %v781_v37 }
 0x1c9   : > { %v748_v42 = vpop.xlane.xlu1 %747  ;;  %v686_v43 = vpop.xlane.xlu0 %685  ;;  %v805_v46 = vmul.f32 0.0044444446, %v797_v39 }
 0x1ca   : > { %v764_v44 = vadd.f32 %v748_v42, %v716_v33  ;;  %v700_v45 = vadd.f32 %v686_v43, %v668_v35  ;;  %v813_v47 = vmul.f32 %v789_v40, %v789_v40  ;;  %875 = vperm.xlu1 %1278, %v789_v40  }
 0x1cb   : > { %v796_v49 = vld [vmem:[#allocation4] sm:$0xff]  ;;  %v782_v53 = vld [vmem:[#allocation3 + $0x10] sm:$0xff] }
 0x1cc   : > { %v804_v55 = vmul.f32 0.0044444446, %v796_v49  ;;  %772 = vst.msk [vmem:[#allocation4 + $0x18] sm:$0xff] %vm177_vm1, %v764_v44  ;;  %709 = vst.msk [vmem:[#allocation3 + $0x20] sm:$0xff] %vm177_vm1, %v700_v45  ;;  %v821_v58 = vsub.f32 %v805_v46, %v813_v47  ;;  %v790_v59 = vmul.f32 0.0044444446, %v782_v53 }
 0x1cd   : > { %v751_v60 = vpop.xlane.xlu0 %750  ;;  %v689_v61 = vpop.xlane.xlu1 %688  ;;  %v720_v44 = vld [vmem:[#allocation4 + $0x38] sm:$0xff] }
 0x1ce   : > { %v820_v62 = vsub.f32 %v804_v55, %v812_v56  ;;  %v829_v63 = vmax.f32 %v821_v58, 0.0  ;;  %v765_v0 = vadd.f32 %v751_v60, %v717_v48  ;;  %v701_v1 = vadd.f32 %v689_v61, %v669_v51  ;;  %880 = vperm.xlu1 %1278, %v790_v59  }
 0x1cf   : > { %v798_v2 = vld [vmem:[#allocation4 + $0x10] sm:$0xff]  ;;  %v783_v6 = vld [vmem:[#allocation3 + $0x18] sm:$0xff]  ;;  %v814_v13 = vmul.f32 %v790_v59, %v790_v59 }
 0x1d0   : > { %v828_v8 = vmax.f32 %v820_v62, 0.0  ;;  %v837_v10 = vadd.f32 1e-05, %v829_v63  ;;  %773 = vst.msk [vmem:[#allocation4 + $0x20] sm:$0xff] %vm177_vm1, %v765_v0  ;;  %710 = vst.msk [vmem:[#allocation3 + $0x28] sm:$0xff] %vm177_vm1, %v701_v1 }
 0x1d1   : > { %v806_v11 = vmul.f32 0.0044444446, %v798_v2  ;;  %v754_v14 = vpop.xlane.xlu1 %753  ;;  %v692_v15 = vpop.xlane.xlu0 %691  ;;  %v791_v16 = vmul.f32 0.0044444446, %v783_v6 }
 0x1d2   : > { %v836_v17 = vadd.f32 1e-05, %v828_v8  ;;  %1349 = vrsqrt.f32 %v837_v10  ;;  %v766_v19 = vadd.f32 %v754_v14, %v718_v4  ;;  %v702_v24 = vadd.f32 %v692_v15, %v670_v12 }
 0x1d3   : > { %v822_v23 = vsub.f32 %v806_v11, %v814_v13  ;;  %v799_v26 = vld [vmem:[#allocation4 + $0x18] sm:$0xff]  ;;  %885 = vperm.xlu1 %1278, %v791_v16   ;;  %v784_v28 = vld [vmem:[#allocation3 + $0x20] sm:$0xff]  ;;  %v815_v30 = vmul.f32 %v791_v16, %v791_v16 }
 0x1d4   : > { %1351 = vrsqrt.f32 %v836_v17  ;;  %774 = vst.msk [vmem:[#allocation4 + $0x28] sm:$0xff] %vm177_vm1, %v766_v19  ;;  %v807_v29 = vmul.f32 0.0044444446, %v799_v26  ;;  %v792_v31 = vmul.f32 0.0044444446, %v784_v28  ;;  %711 = vst.msk [vmem:[#allocation3 + $0x30] sm:$0xff] %vm177_vm1, %v702_v24 }
 0x1d5   : > { %v757_v32 = vpop.xlane.xlu0 %756  ;;  %v695_v33 = vpop.xlane.xlu1 %694  ;;  %v830_v40 = vmax.f32 %v822_v23, 0.0 }
 0x1d6   : > { %v823_v35 = vsub.f32 %v807_v29, %v815_v30  ;;  %v767_v37 = vadd.f32 %v757_v32, %v719_v21  ;;  %v703_v39 = vadd.f32 %v695_v33, %v671_v27  ;;  %v816_v43 = vmul.f32 %v792_v31, %v792_v31 }
 0x1d7   : > { %v800_v42 = vld [vmem:[#allocation4 + $0x20] sm:$0xff]  ;;  %890 = vperm.xlu1 %1278, %v792_v31   ;;  %v785_v45 = vld [vmem:[#allocation3 + $0x28] sm:$0xff]  ;;  %v838_v56 = vadd.f32 1e-05, %v830_v40 }
 0x1d8   : > { %v831_v46 = vmax.f32 %v823_v35, 0.0  ;;  %775 = vst.msk [vmem:[#allocation4 + $0x30] sm:$0xff] %vm177_vm1, %v767_v37  ;;  %712 = vst.msk [vmem:[#allocation3 + $0x38] sm:$0xff] %vm177_vm1, %v703_v39  ;;  %v808_v47 = vmul.f32 0.0044444446, %v800_v42 }
 0x1d9   : > { %v793_v48 = vmul.f32 0.0044444446, %v785_v45  ;;  %v760_v49 = vpop.xlane.xlu1 %759 }
 0x1da   : > { %v839_v51 = vadd.f32 1e-05, %v831_v46  ;;  %v824_v53 = vsub.f32 %v808_v47, %v816_v43  ;;  %v768_v55 = vadd.f32 %v760_v49, %v720_v44 }
 0x1db   : > { %v801_v58 = vld [vmem:[#allocation4 + $0x28] sm:$0xff]  ;;  %895 = vperm.xlu1 %1278, %v793_v48   ;;  %v817_v62 = vmul.f32 %v793_v48, %v793_v48  ;;  %v786_v63 = vld [vmem:[#allocation3 + $0x30] sm:$0xff] }
 0x1dc   : > { %v1350_v59 = vpop.eup %1349  ;;  %1353 = vrsqrt.f32 %v839_v51  ;;  %v832_v60 = vmax.f32 %v824_v53, 0.0  ;;  %776 = vst.msk [vmem:[#allocation4 + $0x38] sm:$0xff] %vm177_vm1, %v768_v55  ;;  %v809_v61 = vmul.f32 0.0044444446, %v801_v58  ;;  %v794_v0 = vmul.f32 0.0044444446, %v786_v63 }
 0x1dd   : > { %931 = vperm.xlu0 %1277, %v1350_v59   ;;  %1355 = vrsqrt.f32 %v838_v56 }
 0x1de   : > { %v1352_v1 = vpop.eup %1351  ;;  %v825_v2 = vsub.f32 %v809_v61, %v817_v62  ;;  %v840_v4 = vadd.f32 1e-05, %v832_v60  ;;  %v818_v8 = vmul.f32 %v794_v0, %v794_v0 }
 0x1df   : > { %926 = vperm.xlu1 %1278, %v1352_v1   ;;  %v802_v6 = vld [vmem:[#allocation4 + $0x30] sm:$0xff]  ;;  %v787_v10 = vld [vmem:[#allocation3 + $0x38] sm:$0xff] }
 0x1e0   : > { %v833_v11 = vmax.f32 %v825_v2, 0.0  ;;  %v810_v12 = vmul.f32 0.0044444446, %v802_v6  ;;  %v795_v13 = vmul.f32 0.0044444446, %v787_v10  ;;  %1357 = vrsqrt.f32 %v840_v4 }
 0x1e2   : > { %v841_v14 = vadd.f32 1e-05, %v833_v11  ;;  %v826_v15 = vsub.f32 %v810_v12, %v818_v8  ;;  %v819_v21 = vmul.f32 %v795_v13, %v795_v13 }
 0x1e3   : > { %900 = vperm.xlu1 %1278, %v794_v0   ;;  %v803_v16 = vld [vmem:[#allocation4 + $0x38] sm:$0xff] }
 0x1e4   : > { %1359 = vrsqrt.f32 %v841_v14  ;;  %v834_v17 = vmax.f32 %v826_v15, 0.0  ;;  %v811_v19 = vmul.f32 0.0044444446, %v803_v16 }
 0x1e6   : > { %v1354_v23 = vpop.eup %1353  ;;  %v842_v24 = vadd.f32 1e-05, %v834_v17  ;;  %v827_v26 = vsub.f32 %v811_v19, %v819_v21 }
 0x1e7   : > { %941 = vperm.xlu0 %1277, %v1354_v23   ;;  %905 = vperm.xlu1 %1278, %v795_v13   ;;  %v1356_v28 = vpop.eup %1355 }
 0x1e8   : > { %1361 = vrsqrt.f32 %v842_v24  ;;  %v835_v27 = vmax.f32 %v827_v26, 0.0 }
 0x1ea   : > { %v843_v29 = vadd.f32 1e-05, %v835_v27  ;;  %v1358_v30 = vpop.eup %1357 }
 0x1eb   : > { %936 = vperm.xlu1 %1278, %v1356_v28  }
 0x1ec   : > { %1363 = vrsqrt.f32 %v843_v29 }
 0x1ee   : > { %v1360_v31 = vpop.eup %1359 }
 0x1ef   : > { %951 = vperm.xlu0 %1277, %v1360_v31   ;;  %946 = vperm.xlu1 %1278, %v1358_v30  }
 0x1f2   : > { %v1362_v32 = vpop.eup %1361 }
 0x1f3   : > { %956 = vperm.xlu1 %1278, %v1362_v32  }
 0x1f6   : > { %v1364_v33 = vpop.eup %1363 }
 0x1f7   : > { %961 = vperm.xlu0 %1277, %v1364_v33  }
 0x245   : > { %v871_v42 = vpop.permute.xlu0 %870 }
 0x246   : > { %v908_v49 = vsub.f32 %v1534_v3, %v871_v42  ;;  %v909_v51 = vsub.f32 %v1536_v5, %v871_v42 }
 0x249   : > { %v876_v35 = vpop.permute.xlu1 %875 }
 0x24a   : > { %v910_v44 = vsub.f32 %v1538_v7, %v876_v35  ;;  %v911_v45 = vsub.f32 %v1540_v9, %v876_v35 }
 0x24d   : > { %v881_v37 = vpop.permute.xlu1 %880 }
 0x24e   : > { %v912_v11 = vsub.f32 %v1554_v18, %v881_v37  ;;  %v913_v12 = vsub.f32 %v1556_v20, %v881_v37 }
 0x252   : > { %v886_v39 = vpop.permute.xlu1 %885 }
 0x253   : > { %v914_v63 = vsub.f32 %v1558_v22, %v886_v39  ;;  %v915_v0 = vsub.f32 %v1560_v25, %v886_v39 }
 0x256   : > { %v1632_v40 = vpop.permute.xlu1 %890 }
 0x257   : > { %v916_v24 = vsub.f32 %v1574_v34, %v1632_v40  ;;  %v917_v26 = vsub.f32 %v1576_v36, %v1632_v40 }
 0x25a   : > { %v1634_v43 = vpop.permute.xlu1 %895 }
 0x25b   : > { %v918_v19 = vsub.f32 %v1578_v38, %v1634_v43  ;;  %v919_v21 = vsub.f32 %v1582_v41, %v1634_v43 }
 0x25c   : > { %v932_v46 = vpop.permute.xlu0 %931 }
 0x25d   : > { %v966_v47 = vmul.f32 %v932_v46, %v910_v44  ;;  %v967_v48 = vmul.f32 %v932_v46, %v911_v45 }
 0x25e   : > { %v927_v53 = vpop.permute.xlu1 %926 }
 0x25f   : > { %vm982_vm2 = vcmp.ge.f32.partialorder %v966_v47, 0.0  ;;  %vm983_vm3 = vcmp.ge.f32.partialorder %v967_v48, 0.0  ;;  %v998_v55 = vmul.f32 0.2, %v966_v47  ;;  %v999_v56 = vmul.f32 0.2, %v967_v48 }
 0x260   : > { %v964_v58 = vmul.f32 %v927_v53, %v908_v49  ;;  %v965_v59 = vmul.f32 %v927_v53, %v909_v51 }
 0x261   : > { %v1014_v7 = vsel %vm982_vm2, %v966_v47, %v998_v55  ;;  %v1015_v9 = vsel %vm983_vm3, %v967_v48, %v999_v56 }
 0x262   : > { %v1227_v60 = vpack.c.bf16 %v1015_v9, %v1014_v7  ;;  %vm980_vm4 = vcmp.ge.f32.partialorder %v964_v58, 0.0  ;;  %vm981_vm5 = vcmp.ge.f32.partialorder %v965_v59, 0.0  ;;  %v996_v3 = vmul.f32 0.2, %v964_v58  ;;  %v901_v5 = vpop.permute.xlu1 %900 }
 0x263   : > { %v997_v61 = vmul.f32 0.2, %v965_v59  ;;  %v920_v27 = vsub.f32 %v1594_v50, %v901_v5  ;;  %v921_v28 = vsub.f32 %v1596_v52, %v901_v5 }
 0x264   : > { %1077 = vst [vmem:[%s1644_s20 + $0x8] sm:$0xff] %v1227_v60  ;;  %v1012_v62 = vsel %vm980_vm4, %v964_v58, %v996_v3 }
 0x265   : > { %v1013_v1 = vsel %vm981_vm5, %v965_v59, %v997_v61 }
 0x266   : > { %v1226_v2 = vpack.c.bf16 %v1013_v1, %v1012_v62  ;;  %v942_v4 = vpop.permute.xlu0 %941  ;;  %v1649_v6 = vpop.permute.xlu1 %905 }
 0x267   : > { %v970_v8 = vmul.f32 %v942_v4, %v914_v63  ;;  %v971_v10 = vmul.f32 %v942_v4, %v915_v0  ;;  %v922_v33 = vsub.f32 %v1599_v54, %v1649_v6  ;;  %v923_v54 = vsub.f32 %v1604_v57, %v1649_v6 }
 0x268   : > { %1076 = vst [vmem:[%s1644_s20] sm:$0xff] %v1226_v2 }
 0x269   : > { %vm986_vm6 = vcmp.ge.f32.partialorder %v970_v8, 0.0  ;;  %vm987_vm7 = vcmp.ge.f32.partialorder %v971_v10, 0.0  ;;  %v1002_v13 = vmul.f32 0.2, %v970_v8  ;;  %v1003_v14 = vmul.f32 0.2, %v971_v10 }
 0x26a   : > { %v937_v15 = vpop.permute.xlu1 %936 }
 0x26b   : > { %v1018_v22 = vsel %vm986_vm6, %v970_v8, %v1002_v13  ;;  %v1019_v25 = vsel %vm987_vm7, %v971_v10, %v1003_v14  ;;  %v968_v16 = vmul.f32 %v937_v15, %v912_v11  ;;  %v969_v17 = vmul.f32 %v937_v15, %v913_v12 }
 0x26c   : > { %v1229_v18 = vpack.c.bf16 %v1019_v25, %v1018_v22 }
 0x26d   : > { %vm984_vm8 = vcmp.ge.f32.partialorder %v968_v16, 0.0  ;;  %vm985_vm9 = vcmp.ge.f32.partialorder %v969_v17, 0.0  ;;  %v1000_v20 = vmul.f32 0.2, %v968_v16  ;;  %v1001_v23 = vmul.f32 0.2, %v969_v17 }
 0x26e   : > { %1079 = vst [vmem:[%s1644_s20 + $0x18] sm:$0xff] %v1229_v18  ;;  %v952_v38 = vpop.permute.xlu0 %951  ;;  %v947_v29 = vpop.permute.xlu1 %946 }
 0x26f   : > { %v1016_v41 = vsel %vm984_vm8, %v968_v16, %v1000_v20  ;;  %v1017_v30 = vsel %vm985_vm9, %v969_v17, %v1001_v23  ;;  %v974_v31 = vmul.f32 %v952_v38, %v918_v19  ;;  %v975_v32 = vmul.f32 %v952_v38, %v919_v21 }
 0x270   : > { %v1228_v35 = vpack.c.bf16 %v1017_v30, %v1016_v41  ;;  %v972_v34 = vmul.f32 %v947_v29, %v916_v24  ;;  %v973_v37 = vmul.f32 %v947_v29, %v917_v26 }
 0x271   : > { %vm990_vm10 = vcmp.ge.f32.partialorder %v974_v31, 0.0  ;;  %vm991_vm11 = vcmp.ge.f32.partialorder %v975_v32, 0.0  ;;  %v1006_v36 = vmul.f32 0.2, %v974_v31  ;;  %v1007_v50 = vmul.f32 0.2, %v975_v32 }
 0x272   : > { %1078 = vst [vmem:[%s1644_s20 + $0x10] sm:$0xff] %v1228_v35  ;;  %vm988_vm12 = vcmp.ge.f32.partialorder %v972_v34, 0.0  ;;  %vm989_vm13 = vcmp.ge.f32.partialorder %v973_v37, 0.0  ;;  %v1004_v52 = vmul.f32 0.2, %v972_v34  ;;  %v957_v40 = vpop.permute.xlu1 %956 }
 0x273   : > { %v1005_v39 = vmul.f32 0.2, %v973_v37  ;;  %v1022_v42 = vsel %vm990_vm10, %v974_v31, %v1006_v36  ;;  %v1023_v43 = vsel %vm991_vm11, %v975_v32, %v1007_v50  ;;  %v976_v44 = vmul.f32 %v957_v40, %v920_v27 }
 0x274   : > { %v977_v45 = vmul.f32 %v957_v40, %v921_v28  ;;  %v1231_v46 = vpack.c.bf16 %v1023_v43, %v1022_v42  ;;  %v1020_v47 = vsel %vm988_vm12, %v972_v34, %v1004_v52 }
 0x275   : > { %v1021_v48 = vsel %vm989_vm13, %v973_v37, %v1005_v39  ;;  %vm992_vm14 = vcmp.ge.f32.partialorder %v976_v44, 0.0  ;;  %v1008_v51 = vmul.f32 0.2, %v976_v44 }
 0x276   : > { %v1230_v49 = vpack.c.bf16 %v1021_v48, %v1020_v47  ;;  %vm993_vm15 = vcmp.ge.f32.partialorder %v977_v45, 0.0  ;;  %1081 = vst [vmem:[%s1644_s20 + $0x28] sm:$0xff] %v1231_v46  ;;  %v1009_v53 = vmul.f32 0.2, %v977_v45  ;;  %v962_v55 = vpop.permute.xlu0 %961 }
 0x277   : > { %v1024_v56 = vsel %vm992_vm14, %v976_v44, %v1008_v51  ;;  %v978_v58 = vmul.f32 %v962_v55, %v922_v33  ;;  %v979_v59 = vmul.f32 %v962_v55, %v923_v54 }
 0x278   : > { %1080 = vst [vmem:[%s1644_s20 + $0x20] sm:$0xff] %v1230_v49  ;;  %v1025_v7 = vsel %vm993_vm15, %v977_v45, %v1009_v53 }
 0x279   : > { %v1232_v9 = vpack.c.bf16 %v1025_v7, %v1024_v56  ;;  %vm994_vm0 = vcmp.ge.f32.partialorder %v978_v58, 0.0  ;;  %vm995_vm1 = vcmp.ge.f32.partialorder %v979_v59, 0.0  ;;  %v1010_v57 = vmul.f32 0.2, %v978_v58 }
 0x27a   : > { %v1011_v60 = vmul.f32 0.2, %v979_v59 }
 0x27b   : > { %1082 = vst [vmem:[%s1644_s20 + $0x30] sm:$0xff] %v1232_v9  ;;  %v1026_v3 = vsel %vm994_vm0, %v978_v58, %v1010_v57 }
 0x27c   : > { %v1027_v5 = vsel %vm995_vm1, %v979_v59, %v1011_v60 }
 0x27d   : > { %v1233_v61 = vpack.c.bf16 %v1027_v5, %v1026_v3 }
 0x27f   : > { %1083 = vst [vmem:[%s1644_s20 + $0x38] sm:$0xff] %v1233_v61 }
 0x280 PF: > { %s12_s11 = sadd.s32 1, %s1387_s11   ;;  %s1686_s9 = smov %s1383_s10 }
 0x281   : > { %p9_p5 = scmp.ge.s32.totalorder %s12_s11, 4   ;;  %s1687_s10 = smov %s1689_s12 }
 0x283   :  { %11 = sbr.rel (!%p9_p5) target bundleno = 2 (0x2), region = 67 }

// kernel: pixel_discriminator_forward.6
= control target key start
LH: loop header
LB: loop body
LE: loop exit
PB: predicated region body
PF: predicated region fallthrough
CT: control target
= control target key end

     0   :  { %s2346_s9 = smov 0   ;;  %s2348_s10 = smov 0   ;;  %s2817_s0 = inlined_call_operand.vmem [shape: bf16[2,576,128], index: 0, kind: input, shape index: {}]   ;;  %s2818_s1 = inlined_call_operand.vmem [shape: bf16[128,576], index: 1, kind: input, shape index: {}]   ;;  %s2819_s2 = inlined_call_operand.vmem [shape: bf16[2,128,128], index: 2, kind: output, shape index: {}]  }
   0x1   :  { %s2350_s11 = smov 0  }
   0x2 LB: > { %s24_s12 = sadd.s32 1, %s2323_s10  ;;  %p1810_p0 = scmp.ge.s32.totalorder %s2327_s11, 1  ;;  %s2327_s11 = sphi %s2350_s11, %s12_s11   ;;  %s2323_s10 = sphi %s2348_s10, %s2821_s10   ;;  %s2319_s9 = sphi %s2346_s9, %s2820_s9  }
   0x3   : > { %p26_p1 = scmp.ge.s32.totalorder %s24_s12, 2  ;;  %p129_p2 = scmp.lt.s32.totalorder %s2327_s11, 3 }
   0x5   : > { %s2823_s12 = smov (%p26_p1, %s24_s12), 0  ;;  %p130_p3 = pnand %p1810_p0, %p129_p2 }
   0x6   : > { %p154_p4 = scmp.lt.s32.totalorder (!%p130_p3), %s2319_s9, 1  ;;  %v2215_v0 = vld [vmem:[%s2818_s1 + $0x4] ss:$20 sps:$4 sm:$0xff] (!%p130_p3)   ;;  %v2218_v1 = vld [vmem:[%s2818_s1 + $0xc] ss:$20 sps:$4 sm:$0xff] (!%p130_p3)   ;;  %vm741_vm0 = vcmask (!%p130_p3), 523264  }
   0x7   : > { %133 = sbr.rel (%p130_p3) target bundleno = 705 (0x2c1), region = 28  ;;  %798 = vmatprep.mubr.bf16.mxu0 (!%p130_p3), %v2215_v0  ;;  %895 = vmatprep.mubr.bf16.mxu1 (!%p130_p3), %v2218_v1  ;;  %v2213_v32 = vld [vmem:[%s2818_s1] ss:$20 sps:$4 sm:$0xff] (!%p130_p3)   ;;  %v2216_v34 = vld [vmem:[%s2818_s1 + $0x8] ss:$20 sps:$4 sm:$0xff] (!%p130_p3)   ;;  %vm172_vm1 = vcmask (!%p130_p3), 7168  }
   0x8   : > { %v2220_v37 = vld [vmem:[%s2818_s1 + $0x2c] ss:$20 sps:$4 sm:$0xff] (!%p130_p3)   ;;  %v2222_v38 = vld [vmem:[%s2818_s1 + $0x34] ss:$20 sps:$4 sm:$0xff] (!%p130_p3)   ;;  %v2225_v41 = vld [vmem:[%s2818_s1 + $0x30] ss:$20 sps:$4 sm:$0xff] (!%p130_p3)  }
   0x9   : > { %v2224_v40 = vld [vmem:[%s2818_s1 + $0x28] ss:$20 sps:$4 sm:$0xff] (!%p130_p3)   ;;  %v2230_v45 = vld [vmem:[%s2818_s1 + $0x50] ss:$20 sps:$4 sm:$0xff] (!%p130_p3)   ;;  %v2231_v46 = vld [vmem:[%s2818_s1 + $0x58] ss:$20 sps:$4 sm:$0xff] (!%p130_p3)  }
   0xa   : > { %v2226_v42 = vld [vmem:[%s2818_s1 + $0x54] ss:$20 sps:$4 sm:$0xff] (!%p130_p3)   ;;  %v2228_v43 = vld [vmem:[%s2818_s1 + $0x5c] ss:$20 sps:$4 sm:$0xff] (!%p130_p3)   ;;  %v2235_v49 = vld [vmem:[%s2818_s1 + $0x84] ss:$20 sps:$4 sm:$0xff] (!%p130_p3)  }
   0xb   : > { %v2233_v48 = vld [vmem:[%s2818_s1 + $0x7c] ss:$20 sps:$4 sm:$0xff] (!%p130_p3)   ;;  %v2237_v50 = vld [vmem:[%s2818_s1 + $0x78] ss:$20 sps:$4 sm:$0xff] (!%p130_p3)   ;;  %v2238_v51 = vld [vmem:[%s2818_s1 + $0x80] ss:$20 sps:$4 sm:$0xff] (!%p130_p3)  }
   0xc   : > { %v2239_v52 = vld [vmem:[%s2818_s1 + $0xa4] ss:$20 sps:$4 sm:$0xff] (!%p130_p3)   ;;  %v2241_v53 = vld [vmem:[%s2818_s1 + $0xac] ss:$20 sps:$4 sm:$0xff] (!%p130_p3)   ;;  %v2244_v55 = vld [vmem:[%s2818_s1 + $0xa8] ss:$20 sps:$4 sm:$0xff] (!%p130_p3)  }
   0xd   : > { %v2243_v54 = vld [vmem:[%s2818_s1 + $0xa0] ss:$20 sps:$4 sm:$0xff] (!%p130_p3)   ;;  %v2250_v58 = vld [vmem:[%s2818_s1 + $0xc8] ss:$20 sps:$4 sm:$0xff] (!%p130_p3)   ;;  %v2251_v59 = vld [vmem:[%s2818_s1 + $0xd0] ss:$20 sps:$4 sm:$0xff] (!%p130_p3)  }
   0xe   : > { %s2825_s9 = smov (!%p154_p4, %s2319_s9), 1  ;;  %v2246_v56 = vld [vmem:[%s2818_s1 + $0xcc] ss:$20 sps:$4 sm:$0xff]   ;;  %v2248_v57 = vld [vmem:[%s2818_s1 + $0xd4] ss:$20 sps:$4 sm:$0xff]  }
   0xf   : > { %s2152_s17 = smul.u32 288, %s2825_s9  ;;  %v2252_v60 = vld [vmem:[%s2818_s1 + $0xf4] ss:$20 sps:$4 sm:$0xff]   ;;  %v2254_v61 = vld [vmem:[%s2818_s1 + $0xfc] ss:$20 sps:$4 sm:$0xff]   ;;  %s1916_s25 = sshll.u32 %s2825_s9, 6 }
  0x10   : > { %v2256_v62 = vld [vmem:[%s2818_s1 + $0xf0] ss:$20 sps:$4 sm:$0xff]   ;;  %v2257_v63 = vld [vmem:[%s2818_s1 + $0xf8] ss:$20 sps:$4 sm:$0xff]   ;;  %s2779_s28 = scalar_lea.vmem %s2819_s2, %s1916_s25 }
  0x11   : > { %s2376_s20 = scalar_lea.vmem %s2817_s0, %s2152_s17  ;;  %v2259_v0 = vld [vmem:[%s2818_s1 + $0x11c] ss:$20 sps:$4 sm:$0xff]   ;;  %v2261_v1 = vld [vmem:[%s2818_s1 + $0x124] ss:$20 sps:$4 sm:$0xff]  }
  0x12   : > { %v2181_v2 = vld [vmem:[%s2376_s20 + $0x40] sm:$0xff]   ;;  %v2185_v6 = vld [vmem:[%s2376_s20 + $0x48] sm:$0xff]   ;;  %v2189_v10 = vld [vmem:[%s2376_s20 + $0x50] sm:$0xff]  }
  0x13   : > { %v2182_v3 = vld [vmem:[%s2376_s20 + $0xc0] sm:$0xff]   ;;  %1980 = vmatprep.subr.bf16.mxu0 %v2181_v2  ;;  %v2186_v7 = vld [vmem:[%s2376_s20 + $0xc8] sm:$0xff]   ;;  %v2190_v11 = vld [vmem:[%s2376_s20 + $0xd0] sm:$0xff]  }
  0x14   : > { %v2183_v4 = vld [vmem:[%s2376_s20] sm:$0xff]   ;;  %2044 = vmatprep.subr.bf16.mxu1 %v2182_v3  ;;  %v2187_v8 = vld [vmem:[%s2376_s20 + $0x8] sm:$0xff]   ;;  %v2191_v12 = vld [vmem:[%s2376_s20 + $0x10] sm:$0xff]  }
  0x15   : > { %v2184_v5 = vld [vmem:[%s2376_s20 + $0x80] sm:$0xff]   ;;  %1981 = vmatpush3.bf16.msra.mxu0 %v2183_v4  ;;  %v2188_v9 = vld [vmem:[%s2376_s20 + $0x88] sm:$0xff]   ;;  %v2192_v13 = vld [vmem:[%s2376_s20 + $0x90] sm:$0xff]  }
  0x16   : > { %2045 = vmatpush3.bf16.msra.mxu1 %v2184_v5  ;;  %1982 = vmatprep.subr.bf16.mxu0 %v2185_v6  ;;  %v2193_v14 = vld [vmem:[%s2376_s20 + $0x58] sm:$0xff]   ;;  %v2197_v18 = vld [vmem:[%s2376_s20 + $0x60] sm:$0xff]   ;;  %v2201_v22 = vld [vmem:[%s2376_s20 + $0x68] sm:$0xff]  }
  0x17   : > { %2046 = vmatprep.subr.bf16.mxu1 %v2186_v7  ;;  %v2194_v15 = vld [vmem:[%s2376_s20 + $0xd8] sm:$0xff]   ;;  %v2198_v19 = vld [vmem:[%s2376_s20 + $0xe0] sm:$0xff]   ;;  %v2202_v23 = vld [vmem:[%s2376_s20 + $0xe8] sm:$0xff]  }
  0x18   : > { %v2195_v16 = vld [vmem:[%s2376_s20 + $0x18] sm:$0xff]   ;;  %v2199_v20 = vld [vmem:[%s2376_s20 + $0x20] sm:$0xff]   ;;  %v2203_v24 = vld [vmem:[%s2376_s20 + $0x28] sm:$0xff]  }
  0x19   : > { %1983 = vmatpush3.bf16.msra.mxu0 %v2187_v8  ;;  %v2196_v17 = vld [vmem:[%s2376_s20 + $0x98] sm:$0xff]   ;;  %v2200_v21 = vld [vmem:[%s2376_s20 + $0xa0] sm:$0xff]   ;;  %v2204_v25 = vld [vmem:[%s2376_s20 + $0xa8] sm:$0xff]  }
  0x1a   : > { %2047 = vmatpush3.bf16.msra.mxu1 %v2188_v9  ;;  %1984 = vmatprep.subr.bf16.mxu0 %v2189_v10  ;;  %v2205_v26 = vld [vmem:[%s2376_s20 + $0x70] sm:$0xff]   ;;  %v2209_v30 = vld [vmem:[%s2376_s20 + $0x78] sm:$0xff]   ;;  %v2219_v36 = vld [vmem:[%s2376_s20 + $0x100] sm:$0xff]  }
  0x1b   : > { %2048 = vmatprep.subr.bf16.mxu1 %v2190_v11  ;;  %v2206_v27 = vld [vmem:[%s2376_s20 + $0xf0] sm:$0xff]   ;;  %v2210_v31 = vld [vmem:[%s2376_s20 + $0xf8] sm:$0xff]   ;;  %v2232_v39 = vld [vmem:[%s2376_s20 + $0x108] sm:$0xff]  }
  0x1c   : > { %v2207_v28 = vld [vmem:[%s2376_s20 + $0x30] sm:$0xff]   ;;  %v2211_v33 = vld [vmem:[%s2376_s20 + $0x38] sm:$0xff]  }
  0x1d   : > { %1985 = vmatpush3.bf16.msra.mxu0 %v2191_v12  ;;  %v2208_v29 = vld [vmem:[%s2376_s20 + $0xb0] sm:$0xff]   ;;  %v2212_v35 = vld [vmem:[%s2376_s20 + $0xb8] sm:$0xff]  }
  0x1e   : > { %2049 = vmatpush3.bf16.msra.mxu1 %v2192_v13  ;;  %1986 = vmatprep.subr.bf16.mxu0 %v2193_v14  ;;  %v2245_v44 = vld [vmem:[%s2376_s20 + $0x110] sm:$0xff]   ;;  %v2258_v47 = vld [vmem:[%s2376_s20 + $0x118] sm:$0xff]  }
  0x1f   : > { %2050 = vmatprep.subr.bf16.mxu1 %v2194_v15  ;;  %v2263_v2 = vld [vmem:[%s2818_s1 + $0x118] ss:$20 sps:$4 sm:$0xff]   ;;  %v2264_v3 = vld [vmem:[%s2818_s1 + $0x120] ss:$20 sps:$4 sm:$0xff]   ;;  %v2265_v4 = vld [vmem:[%s2818_s1 + $0x10] ss:$20 sps:$4 sm:$0xff]  }
  0x20   : > { %v2266_v5 = vld [vmem:[%s2818_s1 + $0xb0] ss:$20 sps:$4 sm:$0xff]   ;;  %v2267_v6 = vld [vmem:[%s2818_s1 + $0x38] ss:$20 sps:$4 sm:$0xff]   ;;  %v2269_v8 = vld [vmem:[%s2818_s1 + $0x60] ss:$20 sps:$4 sm:$0xff]  }
  0x21   : > { %1987 = vmatpush3.bf16.msra.mxu0 %v2195_v16  ;;  %v2268_v7 = vld [vmem:[%s2818_s1 + $0xd8] ss:$20 sps:$4 sm:$0xff]   ;;  %v2270_v9 = vld [vmem:[%s2818_s1 + $0x100] ss:$20 sps:$4 sm:$0xff]   ;;  %v2271_v10 = vld [vmem:[%s2818_s1 + $0x88] ss:$20 sps:$4 sm:$0xff]  }
  0x22   : > { %2051 = vmatpush3.bf16.msra.mxu1 %v2196_v17  ;;  %1988 = vmatprep.subr.bf16.mxu0 %v2197_v18  ;;  %v2272_v11 = vld [vmem:[%s2818_s1 + $0x128] ss:$20 sps:$4 sm:$0xff]   ;;  %v2329_v15 = vmov 0.0  }
  0x23   : > { %2052 = vmatprep.subr.bf16.mxu1 %v2198_v19  ;;  %183 = vst.msk [vmem:[#allocation3 + $0x50] sm:$0xff] %vm172_vm1, %v2329_v15  ;;  %173 = vst.msk [vmem:[#allocation3] sm:$0xff] %vm172_vm1, %v2329_v15 }
  0x24   : > { %174 = vst.msk [vmem:[#allocation3 + $0x8] sm:$0xff] %vm172_vm1, %v2329_v15  ;;  %175 = vst.msk [vmem:[#allocation3 + $0x10] sm:$0xff] %vm172_vm1, %v2329_v15 }
  0x25   : > { %1989 = vmatpush3.bf16.msra.mxu0 %v2199_v20  ;;  %176 = vst.msk [vmem:[#allocation3 + $0x18] sm:$0xff] %vm172_vm1, %v2329_v15  ;;  %177 = vst.msk [vmem:[#allocation3 + $0x20] sm:$0xff] %vm172_vm1, %v2329_v15 }
  0x26   : > { %2053 = vmatpush3.bf16.msra.mxu1 %v2200_v21  ;;  %1990 = vmatprep.subr.bf16.mxu0 %v2201_v22  ;;  %178 = vst.msk [vmem:[#allocation3 + $0x28] sm:$0xff] %vm172_vm1, %v2329_v15  ;;  %179 = vst.msk [vmem:[#allocation3 + $0x30] sm:$0xff] %vm172_vm1, %v2329_v15 }
  0x27   : > { %2054 = vmatprep.subr.bf16.mxu1 %v2202_v23  ;;  %180 = vst.msk [vmem:[#allocation3 + $0x38] sm:$0xff] %vm172_vm1, %v2329_v15  ;;  %181 = vst.msk [vmem:[#allocation3 + $0x40] sm:$0xff] %vm172_vm1, %v2329_v15 }
  0x28   : > { %182 = vst.msk [vmem:[#allocation3 + $0x48] sm:$0xff] %vm172_vm1, %v2329_v15  ;;  %184 = vst.msk [vmem:[#allocation3 + $0x58] sm:$0xff] %vm172_vm1, %v2329_v15 }
  0x29   : > { %1991 = vmatpush3.bf16.msra.mxu0 %v2203_v24  ;;  %185 = vst.msk [vmem:[#allocation3 + $0x60] sm:$0xff] %vm172_vm1, %v2329_v15  ;;  %186 = vst.msk [vmem:[#allocation3 + $0x68] sm:$0xff] %vm172_vm1, %v2329_v15 }
  0x2a   : > { %2055 = vmatpush3.bf16.msra.mxu1 %v2204_v25  ;;  %1992 = vmatprep.subr.bf16.mxu0 %v2205_v26  ;;  %187 = vst.msk [vmem:[#allocation3 + $0x70] sm:$0xff] %vm172_vm1, %v2329_v15  ;;  %188 = vst.msk [vmem:[#allocation3 + $0x78] sm:$0xff] %vm172_vm1, %v2329_v15 }
  0x2b   : > { %2056 = vmatprep.subr.bf16.mxu1 %v2206_v27  ;;  %189 = vst.msk [vmem:[#allocation4] sm:$0xff] %vm172_vm1, %v2329_v15  ;;  %190 = vst.msk [vmem:[#allocation4 + $0x8] sm:$0xff] %vm172_vm1, %v2329_v15 }
  0x2c   : > { %191 = vst.msk [vmem:[#allocation4 + $0x10] sm:$0xff] %vm172_vm1, %v2329_v15  ;;  %192 = vst.msk [vmem:[#allocation4 + $0x18] sm:$0xff] %vm172_vm1, %v2329_v15 }
  0x2d   : > { %1993 = vmatpush3.bf16.msra.mxu0 %v2207_v28  ;;  %193 = vst.msk [vmem:[#allocation4 + $0x20] sm:$0xff] %vm172_vm1, %v2329_v15  ;;  %194 = vst.msk [vmem:[#allocation4 + $0x28] sm:$0xff] %vm172_vm1, %v2329_v15 }
  0x2e   : > { %2057 = vmatpush3.bf16.msra.mxu1 %v2208_v29  ;;  %1994 = vmatprep.subr.bf16.mxu0 %v2209_v30  ;;  %195 = vst.msk [vmem:[#allocation4 + $0x30] sm:$0xff] %vm172_vm1, %v2329_v15  ;;  %196 = vst.msk [vmem:[#allocation4 + $0x38] sm:$0xff] %vm172_vm1, %v2329_v15 }
  0x2f   : > { %2058 = vmatprep.subr.bf16.mxu1 %v2210_v31  ;;  %197 = vst.msk [vmem:[#allocation4 + $0x40] sm:$0xff] %vm172_vm1, %v2329_v15  ;;  %198 = vst.msk [vmem:[#allocation4 + $0x48] sm:$0xff] %vm172_vm1, %v2329_v15 }
  0x30   : > { %199 = vst.msk [vmem:[#allocation4 + $0x50] sm:$0xff] %vm172_vm1, %v2329_v15  ;;  %200 = vst.msk [vmem:[#allocation4 + $0x58] sm:$0xff] %vm172_vm1, %v2329_v15 }
  0x31   : > { %1995 = vmatpush3.bf16.msra.mxu0 %v2211_v33  ;;  %201 = vst.msk [vmem:[#allocation4 + $0x60] sm:$0xff] %vm172_vm1, %v2329_v15  ;;  %202 = vst.msk [vmem:[#allocation4 + $0x68] sm:$0xff] %vm172_vm1, %v2329_v15 }
  0x32   : > { %2059 = vmatpush3.bf16.msra.mxu1 %v2212_v35  ;;  %2120 = vmatprep.subr.bf16.mxu0 %v2219_v36  ;;  %203 = vst.msk [vmem:[#allocation4 + $0x70] sm:$0xff] %vm172_vm1, %v2329_v15  ;;  %204 = vst.msk [vmem:[#allocation4 + $0x78] sm:$0xff] %vm172_vm1, %v2329_v15 }
  0x33   : > { %2144 = vmatprep.subr.bf16.mxu1 %v2219_v36 }
  0x34   : > { %799 = vmatmul.mubr.bf16.vlgmr.msra.gmra.mrb[0].mxu0 %v2213_v32 }
  0x35   : > { %896 = vmatmul.mubr.bf16.vlgmr.msra.gmra.mrb[0].mxu1 %v2216_v34  ;;  %2121 = vmatpush3.bf16.msra.mxu0 %v2219_v36 }
  0x36   : > { %2148 = vmatpush3.bf16.msra.mxu1 %v2219_v36  ;;  %806 = vmatprep.mubr.bf16.mxu0 %v2220_v37 }
  0x37   : > { %903 = vmatprep.mubr.bf16.mxu1 %v2222_v38  ;;  %2145 = vmatprep.subr.bf16.mxu1 %v2232_v39 }
  0x38   : > { %2122 = vmatprep.subr.bf16.mxu0 %v2232_v39 }
  0x39   : > { %2123 = vmatpush3.bf16.msra.mxu0 %v2232_v39 }
  0x3a   : > { %2149 = vmatpush3.bf16.msra.mxu1 %v2232_v39  ;;  %2124 = vmatprep.subr.bf16.mxu0 %v2245_v44 }
  0x3b   : > { %2146 = vmatprep.subr.bf16.mxu1 %v2245_v44 }
  0x3c   : > { %807 = vmatmul.mubr.bf16.gmra.mrb[4].mxu0 %v2224_v40 }
  0x3d   : > { %904 = vmatmul.mubr.bf16.gmra.mrb[4].mxu1 %v2225_v41  ;;  %814 = vmatprep.mubr.bf16.mxu0 %v2226_v42 }
  0x3e   : > { %911 = vmatprep.mubr.bf16.mxu1 %v2228_v43  ;;  %2150 = vmatpush3.bf16.msra.mxu1 %v2245_v44 }
  0x3f   : > { %2125 = vmatpush3.bf16.msra.mxu0 %v2245_v44  ;;  %2147 = vmatprep.subr.bf16.mxu1 %v2258_v47 }
  0x40   : > { %2126 = vmatprep.subr.bf16.mxu0 %v2258_v47 }
  0x42   : > { %2151 = vmatpush3.bf16.msra.mxu1 %v2258_v47 }
  0x43   : > { %2127 = vmatpush3.bf16.msra.mxu0 %v2258_v47 }
  0x44   : > { %815 = vmatmul.mubr.bf16.gmra.mrb[8].mxu0 %v2230_v45 }
  0x45   : > { %912 = vmatmul.mubr.bf16.gmra.mrb[8].mxu1 %v2231_v46  ;;  %822 = vmatprep.mubr.bf16.mxu0 %v2233_v48 }
  0x46   : > { %919 = vmatprep.mubr.bf16.mxu1 %v2235_v49 }
  0x4c   : > { %823 = vmatmul.mubr.bf16.gmra.mrb[12].mxu0 %v2237_v50 }
  0x4d   : > { %920 = vmatmul.mubr.bf16.gmra.mrb[12].mxu1 %v2238_v51  ;;  %830 = vmatprep.mubr.bf16.mxu0 %v2239_v52 }
  0x4e   : > { %927 = vmatprep.mubr.bf16.mxu1 %v2241_v53 }
  0x54   : > { %831 = vmatmul.mubr.bf16.gmra.mrb[16].mxu0 %v2243_v54 }
  0x55   : > { %928 = vmatmul.mubr.bf16.gmra.mrb[16].mxu1 %v2244_v55  ;;  %838 = vmatprep.mubr.bf16.mxu0 %v2246_v56 }
  0x56   : > { %935 = vmatprep.mubr.bf16.mxu1 %v2248_v57 }
  0x5c   : > { %839 = vmatmul.mubr.bf16.gmra.mrb[20].mxu0 %v2250_v58 }
  0x5d   : > { %936 = vmatmul.mubr.bf16.gmra.mrb[20].mxu1 %v2251_v59  ;;  %846 = vmatprep.mubr.bf16.mxu0 %v2252_v60 }
  0x5e   : > { %943 = vmatprep.mubr.bf16.mxu1 %v2254_v61 }
  0x64   : > { %847 = vmatmul.mubr.bf16.gmra.mrb[24].mxu0 %v2256_v62 }
  0x65   : > { %944 = vmatmul.mubr.bf16.gmra.mrb[24].mxu1 %v2257_v63  ;;  %854 = vmatprep.mubr.bf16.mxu0 %v2259_v0 }
  0x66   : > { %951 = vmatprep.mubr.bf16.mxu1 %v2261_v1 }
  0x6c   : > { %855 = vmatmul.mubr.bf16.gmra.mrb[28].mxu0 %v2263_v2 }
  0x6d   : > { %952 = vmatmul.mubr.bf16.gmra.mrb[28].mxu1 %v2264_v3  ;;  %2128 = vmatprep.mubr.msk.bf16.mxu0 %vm741_vm0, %v2265_v4 }
  0x6e   : > { %2136 = vmatprep.mubr.msk.bf16.mxu1 %vm741_vm0, %v2266_v5 }
  0x74   : > { %2129 = vmatmul.mubr.msk.bf16.vlgmr.msra.gmra.mrb[32].mxu0 %vm741_vm0, %v2267_v6 }
  0x75   : > { %2137 = vmatmul.mubr.msk.bf16.vlgmr.msra.gmra.mrb[32].mxu1 %vm741_vm0, %v2268_v7  ;;  %2132 = vmatprep.mubr.msk.bf16.mxu0 %vm741_vm0, %v2269_v8 }
  0x76   : > { %2140 = vmatprep.mubr.msk.bf16.mxu1 %vm741_vm0, %v2270_v9 }
  0x7c   : > { %2133 = vmatmul.mubr.msk.bf16.gmra.mrb[36].mxu0 %vm741_vm0, %v2271_v10 }
  0x7d   : > { %2141 = vmatmul.mubr.msk.bf16.gmra.mrb[36].mxu1 %vm741_vm0, %v2272_v11 }
 0x107   : > { %v1996_v12 = vpop.f32.mrb[0].mxu0 }
 0x108   : > { %v2060_v13 = vpop.f32.mrb[0].mxu1  ;;  %v1997_v14 = vpop.f32.mrb[1].mxu0 }
 0x109   : > { %v1998_v16 = vadd.f32 %v1997_v14, %v1996_v12  ;;  %v2061_v17 = vpop.f32.mrb[1].mxu1  ;;  %v1999_v18 = vpop.f32.mrb[2].mxu0 }
 0x10a   : > { %v2062_v19 = vadd.f32 %v2061_v17, %v2060_v13  ;;  %v2063_v20 = vpop.f32.mrb[2].mxu1  ;;  %v2000_v21 = vpop.f32.mrb[3].mxu0 }
 0x10b   : > { %v2001_v22 = vadd.f32 %v2000_v21, %v1999_v18  ;;  %v2064_v23 = vpop.f32.mrb[3].mxu1 }
 0x10c   : > { %v2065_v24 = vadd.f32 %v2064_v23, %v2063_v20  ;;  %v2568_v25 = vadd.f32 %v2062_v19, %v1998_v16 }
 0x10e   : > { %v2570_v26 = vadd.f32 %v2065_v24, %v2001_v22 }
 0x10f   : > { %v2002_v27 = vpop.f32.mrb[4].mxu0 }
 0x110   : > { %v2066_v28 = vpop.f32.mrb[4].mxu1  ;;  %v2003_v29 = vpop.f32.mrb[5].mxu0 }
 0x111   : > { %v2004_v30 = vadd.f32 %v2003_v29, %v2002_v27  ;;  %v2067_v31 = vpop.f32.mrb[5].mxu1  ;;  %v2005_v32 = vpop.f32.mrb[6].mxu0 }
 0x112   : > { %v2068_v33 = vadd.f32 %v2067_v31, %v2066_v28  ;;  %v2069_v34 = vpop.f32.mrb[6].mxu1  ;;  %v2006_v35 = vpop.f32.mrb[7].mxu0 }
 0x113   : > { %v2007_v36 = vadd.f32 %v2006_v35, %v2005_v32  ;;  %v2070_v37 = vpop.f32.mrb[7].mxu1 }
 0x114   : > { %v2071_v38 = vadd.f32 %v2070_v37, %v2069_v34  ;;  %v2572_v39 = vadd.f32 %v2068_v33, %v2004_v30 }
 0x116   : > { %v2574_v40 = vadd.f32 %v2071_v38, %v2007_v36 }
 0x117   : > { %v2008_v41 = vpop.f32.mrb[8].mxu0 }
 0x118   : > { %v2072_v42 = vpop.f32.mrb[8].mxu1  ;;  %v2009_v43 = vpop.f32.mrb[9].mxu0 }
 0x119   : > { %v2010_v44 = vadd.f32 %v2009_v43, %v2008_v41  ;;  %v2073_v45 = vpop.f32.mrb[9].mxu1  ;;  %v2011_v46 = vpop.f32.mrb[10].mxu0 }
 0x11a   : > { %v2074_v47 = vadd.f32 %v2073_v45, %v2072_v42  ;;  %v2075_v48 = vpop.f32.mrb[10].mxu1  ;;  %v2012_v49 = vpop.f32.mrb[11].mxu0 }
 0x11b   : > { %v2013_v50 = vadd.f32 %v2012_v49, %v2011_v46  ;;  %v2076_v51 = vpop.f32.mrb[11].mxu1 }
 0x11c   : > { %v2077_v52 = vadd.f32 %v2076_v51, %v2075_v48  ;;  %v2576_v53 = vadd.f32 %v2074_v47, %v2010_v44 }
 0x11e   : > { %v2578_v54 = vadd.f32 %v2077_v52, %v2013_v50 }
 0x11f   : > { %v2014_v55 = vpop.f32.mrb[12].mxu0 }
 0x120   : > { %v2078_v56 = vpop.f32.mrb[12].mxu1  ;;  %v2015_v57 = vpop.f32.mrb[13].mxu0 }
 0x121   : > { %v2016_v58 = vadd.f32 %v2015_v57, %v2014_v55  ;;  %v2079_v59 = vpop.f32.mrb[13].mxu1  ;;  %v2017_v60 = vpop.f32.mrb[14].mxu0 }
 0x122   : > { %v2080_v61 = vadd.f32 %v2079_v59, %v2078_v56  ;;  %v2081_v62 = vpop.f32.mrb[14].mxu1  ;;  %v2018_v63 = vpop.f32.mrb[15].mxu0 }
 0x123   : > { %v2019_v0 = vadd.f32 %v2018_v63, %v2017_v60  ;;  %v2082_v1 = vpop.f32.mrb[15].mxu1 }
 0x124   : > { %v2083_v2 = vadd.f32 %v2082_v1, %v2081_v62  ;;  %v2580_v3 = vadd.f32 %v2080_v61, %v2016_v58 }
 0x126   : > { %v2582_v4 = vadd.f32 %v2083_v2, %v2019_v0 }
 0x127   : > { %v2020_v5 = vpop.f32.mrb[16].mxu0 }
 0x128   : > { %v2084_v6 = vpop.f32.mrb[16].mxu1  ;;  %v2021_v7 = vpop.f32.mrb[17].mxu0 }
 0x129   : > { %v2022_v8 = vadd.f32 %v2021_v7, %v2020_v5  ;;  %v2085_v9 = vpop.f32.mrb[17].mxu1  ;;  %v2023_v10 = vpop.f32.mrb[18].mxu0 }
 0x12a   : > { %v2086_v11 = vadd.f32 %v2085_v9, %v2084_v6  ;;  %v2087_v12 = vpop.f32.mrb[18].mxu1  ;;  %v2024_v13 = vpop.f32.mrb[19].mxu0 }
 0x12b   : > { %v2025_v14 = vadd.f32 %v2024_v13, %v2023_v10  ;;  %v2088_v15 = vpop.f32.mrb[19].mxu1 }
 0x12c   : > { %v2089_v16 = vadd.f32 %v2088_v15, %v2087_v12  ;;  %v930_v17 = vadd.f32 %v2086_v11, %v2022_v8 }
 0x12e   : > { %v933_v18 = vadd.f32 %v2089_v16, %v2025_v14 }
 0x12f   : > { %v2026_v19 = vpop.f32.mrb[20].mxu0 }
 0x130   : > { %v2090_v20 = vpop.f32.mrb[20].mxu1  ;;  %v2027_v21 = vpop.f32.mrb[21].mxu0 }
 0x131   : > { %v2028_v22 = vadd.f32 %v2027_v21, %v2026_v19  ;;  %v2091_v23 = vpop.f32.mrb[21].mxu1  ;;  %v2029_v24 = vpop.f32.mrb[22].mxu0 }
 0x132   : > { %v2092_v27 = vadd.f32 %v2091_v23, %v2090_v20  ;;  %v2093_v28 = vpop.f32.mrb[22].mxu1  ;;  %v2030_v29 = vpop.f32.mrb[23].mxu0 }
 0x133   : > { %v2031_v30 = vadd.f32 %v2030_v29, %v2029_v24  ;;  %v2094_v31 = vpop.f32.mrb[23].mxu1 }
 0x134   : > { %v2095_v32 = vadd.f32 %v2094_v31, %v2093_v28  ;;  %v938_v33 = vadd.f32 %v2092_v27, %v2028_v22 }
 0x136   : > { %v941_v34 = vadd.f32 %v2095_v32, %v2031_v30 }
 0x137   : > { %v2032_v35 = vpop.f32.mrb[24].mxu0 }
 0x138   : > { %v2096_v36 = vpop.f32.mrb[24].mxu1  ;;  %v2033_v37 = vpop.f32.mrb[25].mxu0 }
 0x139   : > { %v2034_v38 = vadd.f32 %v2033_v37, %v2032_v35  ;;  %v2097_v41 = vpop.f32.mrb[25].mxu1  ;;  %v2035_v42 = vpop.f32.mrb[26].mxu0 }
 0x13a   : > { %v2098_v43 = vadd.f32 %v2097_v41, %v2096_v36  ;;  %v2099_v44 = vpop.f32.mrb[26].mxu1  ;;  %v2036_v45 = vpop.f32.mrb[27].mxu0 }
 0x13b   : > { %v2037_v46 = vadd.f32 %v2036_v45, %v2035_v42  ;;  %v2100_v47 = vpop.f32.mrb[27].mxu1 }
 0x13c   : > { %v2101_v48 = vadd.f32 %v2100_v47, %v2099_v44  ;;  %v946_v49 = vadd.f32 %v2098_v43, %v2034_v38  ;;  %v2330_v38 = vmov 0  }
 0x13d   : > { %2179 = vset.pattern.permute.xlu1 %v2330_v38  ;;  %2180 = vset.pattern.permute.xlu0 %v2330_v38  ;;  %v1076_v38 = vld [vmem:[#allocation3 + $0x8] sm:$0xff] }
 0x13e   : > { %v949_v50 = vadd.f32 %v2101_v48, %v2037_v46 }
 0x13f   : > { %v2038_v51 = vpop.f32.mrb[28].mxu0 }
 0x140   : > { %v2102_v52 = vpop.f32.mrb[28].mxu1  ;;  %v2039_v55 = vpop.f32.mrb[29].mxu0 }
 0x141   : > { %v2040_v56 = vadd.f32 %v2039_v55, %v2038_v51  ;;  %v2103_v57 = vpop.f32.mrb[29].mxu1  ;;  %v2041_v58 = vpop.f32.mrb[30].mxu0  ;;  %v1085_v51 = vld [vmem:[#allocation3 + $0x50] sm:$0xff] }
 0x142   : > { %v2104_v59 = vadd.f32 %v2103_v57, %v2102_v52  ;;  %v2105_v60 = vpop.f32.mrb[30].mxu1  ;;  %v2042_v61 = vpop.f32.mrb[31].mxu0 }
 0x143   : > { %v2043_v62 = vadd.f32 %v2042_v61, %v2041_v58  ;;  %v2106_v63 = vpop.f32.mrb[31].mxu1  ;;  %v1078_v58 = vld [vmem:[#allocation3 + $0x18] sm:$0xff] }
 0x144   : > { %v2107_v0 = vadd.f32 %v2106_v63, %v2105_v60  ;;  %v954_v1 = vadd.f32 %v2104_v59, %v2040_v56  ;;  %v1075_v59 = vld [vmem:[#allocation3] sm:$0xff] }
 0x146   : > { %v957_v2 = vadd.f32 %v2107_v0, %v2043_v62  ;;  %v1086_v0 = vld [vmem:[#allocation3 + $0x58] sm:$0xff] }
 0x147   : > { %v2130_v5 = vpop.f32.mrb[32].mxu0 }
 0x148   : > { %v2585_v6 = vadd.f32 %v2130_v5, %v2572_v39  ;;  %v2138_v7 = vpop.f32.mrb[32].mxu1  ;;  %v994_v8 = vpop.f32.mrb[33].mxu0 }
 0x149   : > { %v2587_v9 = vadd.f32 %v2138_v7, %v938_v33  ;;  %v2590_v10 = vadd.f32 %v994_v8, %v2568_v25  ;;  %v1026_v11 = vpop.f32.mrb[33].mxu1  ;;  %v2131_v12 = vpop.f32.mrb[34].mxu0 }
 0x14a   : > { %v2592_v13 = vadd.f32 %v1026_v11, %v930_v17  ;;  %v2595_v14 = vadd.f32 %v2131_v12, %v2574_v40  ;;  %v2139_v15 = vpop.f32.mrb[34].mxu1  ;;  %v997_v16 = vpop.f32.mrb[35].mxu0  ;;  %1095 = vadd.xlane.f32.xlu1 %v2585_v6  ;;  %v1174_v33 = vmul.f32 %v2585_v6, %v2585_v6  ;;  %v1084_v11 = vld [vmem:[#allocation3 + $0x48] sm:$0xff] }
 0x14b   : > { %v2598_v39 = vadd.f32 %v2139_v15, %v941_v34  ;;  %v2601_v19 = vadd.f32 %v997_v16, %v2570_v26  ;;  %v1029_v20 = vpop.f32.mrb[35].mxu1  ;;  %1111 = vadd.xlane.f32.xlu0 %v2587_v9  ;;  %v1182_v34 = vmul.f32 %v2587_v9, %v2587_v9  ;;  %v1172_v36 = vmul.f32 %v2590_v10, %v2590_v10  ;;  %v1158_v15 = vld [vmem:[#allocation4 + $0x10] sm:$0xff] }
 0x14c   : > { %v2604_v25 = vadd.f32 %v1029_v20, %v933_v18  ;;  %v1180_v41 = vmul.f32 %v2592_v13, %v2592_v13 }
 0x14d   : > { %v1173_v35 = vmul.f32 %v2601_v19, %v2601_v19 }
 0x14e   : > { %1097 = vadd.xlane.f32.xlu1 %v2595_v14  ;;  %v1181_v37 = vmul.f32 %v2604_v25, %v2604_v25 }
 0x14f   : > { %1091 = vadd.xlane.f32.xlu0 %v2590_v10  ;;  %v2134_v40 = vpop.f32.mrb[36].mxu0 }
 0x150   : > { %v2609_v17 = vadd.f32 %v2134_v40, %v2580_v3  ;;  %v2142_v21 = vpop.f32.mrb[36].mxu1  ;;  %v1010_v22 = vpop.f32.mrb[37].mxu0 }
 0x151   : > { %v2611_v23 = vadd.f32 %v2142_v21, %v954_v1  ;;  %v2614_v26 = vadd.f32 %v1010_v22, %v2576_v53  ;;  %v1042_v24 = vpop.f32.mrb[37].mxu1  ;;  %v2135_v27 = vpop.f32.mrb[38].mxu0  ;;  %v1083_v1 = vld [vmem:[#allocation3 + $0x40] sm:$0xff] }
 0x152   : > { %v2616_v28 = vadd.f32 %v1042_v24, %v946_v49  ;;  %v2619_v18 = vadd.f32 %v2135_v27, %v2582_v4  ;;  %v2143_v29 = vpop.f32.mrb[38].mxu1  ;;  %v1013_v30 = vpop.f32.mrb[39].mxu0  ;;  %1113 = vadd.xlane.f32.xlu1 %v2598_v39  ;;  %v1175_v4 = vmul.f32 %v2595_v14, %v2595_v14  ;;  %v1178_v43 = vmul.f32 %v2609_v17, %v2609_v17  ;;  %v1159_v27 = vld [vmem:[#allocation4 + $0x18] sm:$0xff] }
 0x153   : > { %v2622_v3 = vadd.f32 %v2143_v29, %v957_v2  ;;  %v2625_v31 = vadd.f32 %v1013_v30, %v2578_v54  ;;  %v1045_v32 = vpop.f32.mrb[39].mxu1  ;;  %1107 = vadd.xlane.f32.xlu0 %v2592_v13  ;;  %v1183_v54 = vmul.f32 %v2598_v39, %v2598_v39  ;;  %v1176_v45 = vmul.f32 %v2614_v26, %v2614_v26  ;;  %v1166_v29 = vld [vmem:[#allocation4 + $0x50] sm:$0xff] }
 0x154   : > { %v2628_v53 = vadd.f32 %v1045_v32, %v949_v50  ;;  %v1179_v42 = vmul.f32 %v2619_v18, %v2619_v18  ;;  %v1184_v47 = vmul.f32 %v2616_v28, %v2616_v28  ;;  %v1186_v49 = vmul.f32 %v2611_v23, %v2611_v23  ;;  %v1077_v50 = vld [vmem:[#allocation3 + $0x10] sm:$0xff] }
 0x155   : > { %v1187_v44 = vmul.f32 %v2622_v3, %v2622_v3  ;;  %v1177_v46 = vmul.f32 %v2625_v31, %v2625_v31 }
 0x156   : > { %1109 = vadd.xlane.f32.xlu1 %v2604_v25  ;;  %v1185_v48 = vmul.f32 %v2628_v53, %v2628_v53 }
 0x157   : > { %1192 = vadd.xlane.f32.xlu0 %v1174_v33 }
 0x15a   : > { %1194 = vadd.xlane.f32.xlu1 %v1175_v4 }
 0x15b   : > { %1208 = vadd.xlane.f32.xlu0 %v1182_v34 }
 0x15e   : > { %1210 = vadd.xlane.f32.xlu1 %v1183_v54 }
 0x15f   : > { %1093 = vadd.xlane.f32.xlu0 %v2601_v19 }
 0x162   : > { %1190 = vadd.xlane.f32.xlu1 %v1173_v35 }
 0x163   : > { %1188 = vadd.xlane.f32.xlu0 %v1172_v36  ;;  %v1167_v36 = vld [vmem:[#allocation4 + $0x58] sm:$0xff] }
 0x166   : > { %1206 = vadd.xlane.f32.xlu1 %v1181_v37 }
 0x167   : > { %1204 = vadd.xlane.f32.xlu0 %v1180_v41 }
 0x16a   : > { %1105 = vadd.xlane.f32.xlu1 %v2619_v18 }
 0x16b   : > { %1103 = vadd.xlane.f32.xlu0 %v2609_v17 }
 0x16e   : > { %1121 = vadd.xlane.f32.xlu1 %v2622_v3 }
 0x16f   : > { %1119 = vadd.xlane.f32.xlu0 %v2611_v23 }
 0x172   : > { %1101 = vadd.xlane.f32.xlu1 %v2625_v31 }
 0x173   : > { %1099 = vadd.xlane.f32.xlu0 %v2614_v26 }
 0x176   : > { %1117 = vadd.xlane.f32.xlu1 %v2628_v53 }
 0x177   : > { %1115 = vadd.xlane.f32.xlu0 %v2616_v28 }
 0x17a   : > { %1202 = vadd.xlane.f32.xlu1 %v1179_v42 }
 0x17b   : > { %1200 = vadd.xlane.f32.xlu0 %v1178_v43 }
 0x17e   : > { %1218 = vadd.xlane.f32.xlu1 %v1187_v44 }
 0x17f   : > { %1196 = vadd.xlane.f32.xlu0 %v1176_v45 }
 0x182   : > { %1198 = vadd.xlane.f32.xlu1 %v1177_v46 }
 0x183   : > { %1212 = vadd.xlane.f32.xlu0 %v1184_v47 }
 0x186   : > { %1214 = vadd.xlane.f32.xlu1 %v1185_v48 }
 0x187   : > { %1216 = vadd.xlane.f32.xlu0 %v1186_v49  ;;  %v1157_v49 = vld [vmem:[#allocation4 + $0x8] sm:$0xff] }
 0x1d7   : > { %v1096_v52 = vpop.xlane.xlu1 %1095 }
 0x1d8   : > { %v1112_v55 = vpop.xlane.xlu0 %1111  ;;  %v1125_v56 = vadd.f32 %v1096_v52, %v1077_v50 }
 0x1d9   : > { %v1133_v57 = vadd.f32 %v1112_v55, %v1085_v51  ;;  %v1156_v51 = vld [vmem:[#allocation4] sm:$0xff] }
 0x1da   : > { %1142 = vst.msk [vmem:[#allocation3 + $0x10] sm:$0xff] %vm172_vm1, %v1125_v56 }
 0x1db   : > { %1150 = vst.msk [vmem:[#allocation3 + $0x50] sm:$0xff] %vm172_vm1, %v1133_v57  ;;  %v1098_v60 = vpop.xlane.xlu1 %1097 }
 0x1dc   : > { %v1126_v61 = vadd.f32 %v1098_v60, %v1078_v58  ;;  %v1092_v62 = vpop.xlane.xlu0 %1091  ;;  %v1165_v60 = vld [vmem:[#allocation4 + $0x48] sm:$0xff] }
 0x1dd   : > { %v1123_v63 = vadd.f32 %v1092_v62, %v1075_v59 }
 0x1de   : > { %1143 = vst.msk [vmem:[#allocation3 + $0x18] sm:$0xff] %vm172_vm1, %v1126_v61  ;;  %v1164_v61 = vld [vmem:[#allocation4 + $0x40] sm:$0xff] }
 0x1df   : > { %1140 = vst.msk [vmem:[#allocation3] sm:$0xff] %vm172_vm1, %v1123_v63  ;;  %v1114_v2 = vpop.xlane.xlu1 %1113 }
 0x1e0   : > { %v1134_v5 = vadd.f32 %v1114_v2, %v1086_v0  ;;  %v1108_v7 = vpop.xlane.xlu0 %1107  ;;  %v1082_v2 = vld [vmem:[#allocation3 + $0x38] sm:$0xff] }
 0x1e1   : > { %v1131_v8 = vadd.f32 %v1108_v7, %v1083_v1  ;;  %v1257_v12 = vld [vmem:[#allocation3 + $0x10] sm:$0xff] }
 0x1e2   : > { %1151 = vst.msk [vmem:[#allocation3 + $0x58] sm:$0xff] %vm172_vm1, %v1134_v5  ;;  %v2677_v16 = vmul.f32 0.020408163, %v1257_v12  ;;  %v1265_v40 = vld [vmem:[#allocation3 + $0x50] sm:$0xff] }
 0x1e3   : > { %1148 = vst.msk [vmem:[#allocation3 + $0x40] sm:$0xff] %vm172_vm1, %v1131_v8  ;;  %v1110_v20 = vpop.xlane.xlu1 %1109  ;;  %v2682_v30 = vmul.f32 0.020408163, %v1265_v40  ;;  %v1081_v7 = vld [vmem:[#allocation3 + $0x30] sm:$0xff] }
 0x1e4   : > { %v1132_v21 = vadd.f32 %v1110_v20, %v1084_v11  ;;  %v1193_v22 = vpop.xlane.xlu0 %1192  ;;  %1427 = vperm.xlu1 %2179, %v2677_v16  }
 0x1e5   : > { %v1222_v24 = vadd.f32 %v1193_v22, %v1158_v15  ;;  %v1258_v47 = vld [vmem:[#allocation3 + $0x18] sm:$0xff] }
 0x1e6   : > { %1149 = vst.msk [vmem:[#allocation3 + $0x48] sm:$0xff] %vm172_vm1, %v1132_v21  ;;  %v1255_v32 = vld [vmem:[#allocation3] sm:$0xff]  ;;  %v1274_v56 = vmul.f32 0.020408163, %v1258_v47 }
 0x1e7   : > { %1238 = vst.msk [vmem:[#allocation4 + $0x10] sm:$0xff] %vm172_vm1, %v1222_v24  ;;  %v1195_v33 = vpop.xlane.xlu1 %1194  ;;  %v2685_v4 = vmul.f32 0.020408163, %v1255_v32  ;;  %v1090_v24 = vld [vmem:[#allocation3 + $0x78] sm:$0xff] }
 0x1e8   : > { %v1223_v34 = vadd.f32 %v1195_v33, %v1159_v27  ;;  %v1209_v54 = vpop.xlane.xlu0 %1208  ;;  %1467 = vperm.xlu1 %2179, %v2682_v30   ;;  %v1089_v27 = vld [vmem:[#allocation3 + $0x70] sm:$0xff] }
 0x1e9   : > { %v1230_v35 = vadd.f32 %v1209_v54, %v1166_v29  ;;  %1417 = vperm.xlu0 %2180, %v2685_v4   ;;  %v1266_v37 = vld [vmem:[#allocation3 + $0x58] sm:$0xff]  ;;  %v1322_v29 = vmul.f32 %v1274_v56, %v1274_v56 }
 0x1ea   : > { %1239 = vst.msk [vmem:[#allocation4 + $0x18] sm:$0xff] %vm172_vm1, %v1223_v34  ;;  %v1263_v41 = vld [vmem:[#allocation3 + $0x40] sm:$0xff]  ;;  %v1282_v42 = vmul.f32 0.020408163, %v1266_v37 }
 0x1eb   : > { %1246 = vst.msk [vmem:[#allocation4 + $0x50] sm:$0xff] %vm172_vm1, %v1230_v35  ;;  %v1211_v43 = vpop.xlane.xlu1 %1210  ;;  %v2691_v44 = vmul.f32 0.020408163, %v1263_v41 }
 0x1ec   : > { %v1231_v45 = vadd.f32 %v1211_v43, %v1167_v36  ;;  %v1094_v46 = vpop.xlane.xlu0 %1093  ;;  %v1330_v41 = vmul.f32 %v1282_v42, %v1282_v42 }
 0x1ed   : > { %v1124_v48 = vadd.f32 %v1094_v46, %v1076_v38  ;;  %1457 = vperm.xlu1 %2179, %v2691_v44   ;;  %1472 = vperm.xlu0 %2180, %v1282_v42   ;;  %v1264_v50 = vld [vmem:[#allocation3 + $0x48] sm:$0xff]  ;;  %v1087_v42 = vld [vmem:[#allocation3 + $0x60] sm:$0xff] }
 0x1ee   : > { %1247 = vst.msk [vmem:[#allocation4 + $0x58] sm:$0xff] %vm172_vm1, %v1231_v45  ;;  %v2695_v52 = vmul.f32 0.020408163, %v1264_v50  ;;  %v1289_v35 = vld [vmem:[#allocation4 + $0x10] sm:$0xff]  ;;  %v1080_v38 = vld [vmem:[#allocation3 + $0x28] sm:$0xff]  ;;  %v1079_v45 = vld [vmem:[#allocation3 + $0x20] sm:$0xff] }
 0x1ef   : > { %1141 = vst.msk [vmem:[#allocation3 + $0x8] sm:$0xff] %vm172_vm1, %v1124_v48  ;;  %v1191_v55 = vpop.xlane.xlu1 %1190  ;;  %v1305_v47 = vmul.f32 0.020408163, %v1289_v35 }
 0x1f0   : > { %v1221_v57 = vadd.f32 %v1191_v55, %v1157_v49  ;;  %v1189_v58 = vpop.xlane.xlu0 %1188 }
 0x1f1   : > { %v1220_v59 = vadd.f32 %v1189_v58, %v1156_v51  ;;  %1432 = vperm.xlu1 %2179, %v1274_v56   ;;  %1462 = vperm.xlu0 %2180, %v2695_v52   ;;  %v1290_v5 = vld [vmem:[#allocation4 + $0x18] sm:$0xff]  ;;  %v1321_v58 = vmul.f32 %v2677_v16, %v2677_v16 }
 0x1f2   : > { %1237 = vst.msk [vmem:[#allocation4 + $0x8] sm:$0xff] %vm172_vm1, %v1221_v57  ;;  %v1306_v21 = vmul.f32 0.020408163, %v1290_v5  ;;  %v1088_v57 = vld [vmem:[#allocation3 + $0x68] sm:$0xff] }
 0x1f3   : > { %1236 = vst.msk [vmem:[#allocation4] sm:$0xff] %vm172_vm1, %v1220_v59  ;;  %v1207_v62 = vpop.xlane.xlu1 %1206 }
 0x1f4   : > { %v1229_v63 = vadd.f32 %v1207_v62, %v1165_v60  ;;  %v1205_v0 = vpop.xlane.xlu0 %1204  ;;  %v1338_v36 = vsub.f32 %v1306_v21, %v1322_v29  ;;  %v1329_v29 = vmul.f32 %v2682_v30, %v2682_v30  ;;  %v1171_v30 = vld [vmem:[#allocation4 + $0x78] sm:$0xff] }
 0x1f5   : > { %v1228_v1 = vadd.f32 %v1205_v0, %v1164_v61  ;;  %v1298_v40 = vld [vmem:[#allocation4 + $0x58] sm:$0xff]  ;;  %v1297_v61 = vld [vmem:[#allocation4 + $0x50] sm:$0xff] }
 0x1f6   : > { %1245 = vst.msk [vmem:[#allocation4 + $0x48] sm:$0xff] %vm172_vm1, %v1229_v63  ;;  %v1256_v8 = vld [vmem:[#allocation3 + $0x8] sm:$0xff]  ;;  %v1314_v33 = vmul.f32 0.020408163, %v1298_v40  ;;  %v1354_v51 = vmax.f32 %v1338_v36, 0.0 }
 0x1f7   : > { %1244 = vst.msk [vmem:[#allocation4 + $0x40] sm:$0xff] %vm172_vm1, %v1228_v1  ;;  %v1106_v11 = vpop.xlane.xlu1 %1105  ;;  %v1272_v12 = vmul.f32 0.020408163, %v1256_v8  ;;  %v1337_v1 = vsub.f32 %v1305_v47, %v1321_v58  ;;  %v1163_v8 = vld [vmem:[#allocation4 + $0x38] sm:$0xff]  ;;  %v1160_v47 = vld [vmem:[#allocation4 + $0x20] sm:$0xff] }
 0x1f8   : > { %v1130_v15 = vadd.f32 %v1106_v11, %v1082_v2  ;;  %v1104_v20 = vpop.xlane.xlu0 %1103  ;;  %v1346_v48 = vsub.f32 %v1314_v33, %v1330_v41  ;;  %v1370_v11 = vadd.f32 1e-05, %v1354_v51 }
 0x1f9   : > { %v1129_v22 = vadd.f32 %v1104_v20, %v1081_v7  ;;  %1422 = vperm.xlu1 %2179, %v1272_v12   ;;  %v1288_v43 = vld [vmem:[#allocation4 + $0x8] sm:$0xff]  ;;  %v1320_v62 = vmul.f32 %v1272_v12, %v1272_v12  ;;  %v1162_v12 = vld [vmem:[#allocation4 + $0x30] sm:$0xff] }
 0x1fa   : > { %1147 = vst.msk [vmem:[#allocation3 + $0x38] sm:$0xff] %vm172_vm1, %v1130_v15  ;;  %v1304_v55 = vmul.f32 0.020408163, %v1288_v43  ;;  %v1362_v2 = vmax.f32 %v1346_v48, 0.0  ;;  %v1287_v21 = vld [vmem:[#allocation4] sm:$0xff]  ;;  %2273 = vrsqrt.f32 %v1370_v11  ;;  %v1327_v11 = vmul.f32 %v2691_v44, %v2691_v44  ;;  %v1170_v44 = vld [vmem:[#allocation4 + $0x70] sm:$0xff] }
 0x1fb   : > { %1146 = vst.msk [vmem:[#allocation3 + $0x30] sm:$0xff] %vm172_vm1, %v1129_v22  ;;  %v1122_v32 = vpop.xlane.xlu1 %1121  ;;  %v1313_v22 = vmul.f32 0.020408163, %v1297_v61 }
 0x1fc   : > { %v1138_v34 = vadd.f32 %v1122_v32, %v1090_v24  ;;  %v1120_v54 = vpop.xlane.xlu0 %1119  ;;  %v1336_v15 = vsub.f32 %v1304_v55, %v1320_v62  ;;  %v1328_v32 = vmul.f32 %v2695_v52, %v2695_v52  ;;  %v1378_v35 = vadd.f32 1e-05, %v1362_v2 }
 0x1fd   : > { %v1137_v37 = vadd.f32 %v1120_v54, %v1089_v27  ;;  %v1296_v60 = vld [vmem:[#allocation4 + $0x48] sm:$0xff]  ;;  %v1353_v54 = vmax.f32 %v1337_v1, 0.0  ;;  %v1345_v52 = vsub.f32 %v1313_v22, %v1329_v29 }
 0x1fe   : > { %1155 = vst.msk [vmem:[#allocation3 + $0x78] sm:$0xff] %vm172_vm1, %v1138_v34  ;;  %v1312_v40 = vmul.f32 0.020408163, %v1296_v60  ;;  %v1352_v41 = vmax.f32 %v1336_v15, 0.0  ;;  %2275 = vrsqrt.f32 %v1378_v35 }
 0x1ff   : > { %1154 = vst.msk [vmem:[#allocation3 + $0x70] sm:$0xff] %vm172_vm1, %v1137_v37  ;;  %v1102_v46 = vpop.xlane.xlu1 %1101  ;;  %v1361_v2 = vmax.f32 %v1345_v52, 0.0 }
 0x200   : > { %v1128_v49 = vadd.f32 %v1102_v46, %v1080_v38  ;;  %v1100_v50 = vpop.xlane.xlu0 %1099  ;;  %v1303_v38 = vmul.f32 0.020408163, %v1287_v21  ;;  %v1319_v46 = vmul.f32 %v2685_v4, %v2685_v4  ;;  %v1368_v61 = vadd.f32 1e-05, %v1352_v41 }
 0x201   : > { %v1127_v56 = vadd.f32 %v1100_v50, %v1079_v45  ;;  %v1344_v45 = vsub.f32 %v1312_v40, %v1328_v32  ;;  %v1262_v55 = vld [vmem:[#allocation3 + $0x38] sm:$0xff] }
 0x202   : > { %1145 = vst.msk [vmem:[#allocation3 + $0x28] sm:$0xff] %vm172_vm1, %v1128_v49  ;;  %v1261_v59 = vld [vmem:[#allocation3 + $0x30] sm:$0xff]  ;;  %v1295_v49 = vld [vmem:[#allocation4 + $0x40] sm:$0xff]  ;;  %v1335_v60 = vsub.f32 %v1303_v38, %v1319_v46  ;;  %2277 = vrsqrt.f32 %v1368_v61 }
 0x203   : > { %1144 = vst.msk [vmem:[#allocation3 + $0x20] sm:$0xff] %vm172_vm1, %v1127_v56  ;;  %v1118_v63 = vpop.xlane.xlu1 %1117  ;;  %v2711_v0 = vmul.f32 0.020408163, %v1261_v59  ;;  %v1369_v56 = vadd.f32 1e-05, %v1353_v54  ;;  %v1168_v59 = vld [vmem:[#allocation4 + $0x60] sm:$0xff] }
 0x204   : > { %v1136_v5 = vadd.f32 %v1118_v63, %v1088_v57  ;;  %v1116_v7 = vpop.xlane.xlu0 %1115  ;;  %v1360_v63 = vmax.f32 %v1344_v45, 0.0  ;;  %v1311_v1 = vmul.f32 0.020408163, %v1295_v49  ;;  %v1351_v21 = vmax.f32 %v1335_v60, 0.0 }
 0x205   : > { %v1135_v16 = vadd.f32 %v1116_v7, %v1087_v42  ;;  %1447 = vperm.xlu1 %2179, %v2711_v0   ;;  %v1270_v20 = vld [vmem:[#allocation3 + $0x78] sm:$0xff]  ;;  %v1161_v42 = vld [vmem:[#allocation4 + $0x28] sm:$0xff]  ;;  %2279 = vrsqrt.f32 %v1369_v56  ;;  %v1325_v38 = vmul.f32 %v2711_v0, %v2711_v0 }
 0x206   : > { %1153 = vst.msk [vmem:[#allocation3 + $0x68] sm:$0xff] %vm172_vm1, %v1136_v5  ;;  %v2715_v24 = vmul.f32 0.020408163, %v1270_v20  ;;  %v1269_v27 = vld [vmem:[#allocation3 + $0x70] sm:$0xff]  ;;  %v1376_v29 = vadd.f32 1e-05, %v1360_v63  ;;  %v1343_v32 = vsub.f32 %v1311_v1, %v1327_v11 }
 0x207   : > { %1152 = vst.msk [vmem:[#allocation3 + $0x60] sm:$0xff] %vm172_vm1, %v1135_v16  ;;  %v1203_v33 = vpop.xlane.xlu1 %1202  ;;  %v2722_v34 = vmul.f32 0.020408163, %v1269_v27 }
 0x208   : > { %v1227_v36 = vadd.f32 %v1203_v33, %v1163_v8  ;;  %v1201_v37 = vpop.xlane.xlu0 %1200  ;;  %1492 = vperm.xlu0 %2180, %v2715_v24   ;;  %v1278_v8 = vmul.f32 0.020408163, %v1262_v55  ;;  %v1377_v33 = vadd.f32 1e-05, %v1361_v2  ;;  %2281 = vrsqrt.f32 %v1376_v29 }
 0x209   : > { %v1226_v43 = vadd.f32 %v1201_v37, %v1162_v12  ;;  %1487 = vperm.xlu1 %2179, %v2722_v34   ;;  %v1169_v12 = vld [vmem:[#allocation4 + $0x68] sm:$0xff]  ;;  %v2274_v37 = vpop.eup %2273  ;;  %v1359_v49 = vmax.f32 %v1343_v32, 0.0 }
 0x20a   : > { %1243 = vst.msk [vmem:[#allocation4 + $0x38] sm:$0xff] %vm172_vm1, %v1227_v36  ;;  %v1259_v48 = vld [vmem:[#allocation3 + $0x20] sm:$0xff]  ;;  %v1326_v35 = vmul.f32 %v1278_v8, %v1278_v8  ;;  %v2276_v55 = vpop.eup %2275  ;;  %2283 = vrsqrt.f32 %v1377_v33 }
 0x20b   : > { %1242 = vst.msk [vmem:[#allocation4 + $0x30] sm:$0xff] %vm172_vm1, %v1226_v43  ;;  %v1219_v50 = vpop.xlane.xlu1 %1218  ;;  %v2730_v51 = vmul.f32 0.020408163, %v1259_v48  ;;  %v1260_v43 = vld [vmem:[#allocation3 + $0x28] sm:$0xff] }
 0x20c   : > { %v1235_v57 = vadd.f32 %v1219_v50, %v1171_v30  ;;  %v1197_v58 = vpop.xlane.xlu0 %1196  ;;  %v2278_v11 = vpop.eup %2277 }
 0x20d   : > { %v1224_v4 = vadd.f32 %v1197_v58, %v1160_v47  ;;  %1437 = vperm.xlu1 %2179, %v2730_v51   ;;  %v1268_v62 = vld [vmem:[#allocation3 + $0x68] sm:$0xff]  ;;  %v1367_v47 = vadd.f32 1e-05, %v1351_v21 }
 0x20e   : > { %1251 = vst.msk [vmem:[#allocation4 + $0x78] sm:$0xff] %vm172_vm1, %v1235_v57  ;;  %v2734_v5 = vmul.f32 0.020408163, %v1268_v62  ;;  %v1267_v7 = vld [vmem:[#allocation3 + $0x60] sm:$0xff]  ;;  %v1276_v57 = vmul.f32 0.020408163, %v1260_v43 }
 0x20f   : > { %1240 = vst.msk [vmem:[#allocation4 + $0x20] sm:$0xff] %vm172_vm1, %v1224_v4  ;;  %v1199_v15 = vpop.xlane.xlu1 %1198  ;;  %v1283_v16 = vmul.f32 0.020408163, %v1267_v7  ;;  %2285 = vrsqrt.f32 %v1367_v47  ;;  %v1375_v62 = vadd.f32 1e-05, %v1359_v49 }
 0x210   : > { %v1225_v20 = vadd.f32 %v1199_v15, %v1161_v42  ;;  %v1213_v40 = vpop.xlane.xlu0 %1212  ;;  %1482 = vperm.xlu0 %2180, %v2734_v5   ;;  %v1334_v15 = vmul.f32 %v2715_v24, %v2715_v24  ;;  %v1332_v32 = vmul.f32 %v2734_v5, %v2734_v5 }
 0x211   : > { %v1232_v22 = vadd.f32 %v1213_v40, %v1168_v59  ;;  %1477 = vperm.xlu1 %2179, %v1283_v16   ;;  %v1294_v27 = vld [vmem:[#allocation4 + $0x38] sm:$0xff]  ;;  %v1323_v59 = vmul.f32 %v2730_v51, %v2730_v51  ;;  %v1331_v40 = vmul.f32 %v1283_v16, %v1283_v16  ;;  %v1333_v16 = vmul.f32 %v2722_v34, %v2722_v34 }
 0x212   : > { %1241 = vst.msk [vmem:[#allocation4 + $0x28] sm:$0xff] %vm172_vm1, %v1225_v20  ;;  %v1310_v54 = vmul.f32 0.020408163, %v1294_v27  ;;  %v1293_v36 = vld [vmem:[#allocation4 + $0x30] sm:$0xff]  ;;  %v2280_v20 = vpop.eup %2279 }
 0x213   : > { %1248 = vst.msk [vmem:[#allocation4 + $0x60] sm:$0xff] %vm172_vm1, %v1232_v22  ;;  %v1215_v41 = vpop.xlane.xlu1 %1214  ;;  %v1309_v30 = vmul.f32 0.020408163, %v1293_v36  ;;  %v2282_v36 = vpop.eup %2281 }
 0x214   : > { %v1233_v45 = vadd.f32 %v1215_v41, %v1169_v12  ;;  %v1217_v52 = vpop.xlane.xlu0 %1216  ;;  %1528 = vperm.xlu0 %2180, %v2274_v37   ;;  %v1342_v46 = vsub.f32 %v1310_v54, %v1326_v35  ;;  %v2284_v37 = vpop.eup %2283 }
 0x215   : > { %v1234_v48 = vadd.f32 %v1217_v52, %v1170_v44  ;;  %1452 = vperm.xlu1 %2179, %v1278_v8   ;;  %v1341_v50 = vsub.f32 %v1309_v30, %v1325_v38  ;;  %v1302_v58 = vld [vmem:[#allocation4 + $0x78] sm:$0xff]  ;;  %v1324_v8 = vmul.f32 %v1276_v57, %v1276_v57 }
 0x216   : > { %v1291_v56 = vld [vmem:[#allocation4 + $0x20] sm:$0xff]  ;;  %1249 = vst.msk [vmem:[#allocation4 + $0x68] sm:$0xff] %vm172_vm1, %v1233_v45  ;;  %v1358_v0 = vmax.f32 %v1342_v46, 0.0  ;;  %v1318_v1 = vmul.f32 0.020408163, %v1302_v58 }
 0x217   : > { %v1307_v42 = vmul.f32 0.020408163, %v1291_v56  ;;  %1250 = vst.msk [vmem:[#allocation4 + $0x70] sm:$0xff] %vm172_vm1, %v1234_v48  ;;  %v1357_v63 = vmax.f32 %v1341_v50, 0.0 }
 0x218   : > { %v1374_v60 = vadd.f32 1e-05, %v1358_v0  ;;  %1568 = vperm.xlu0 %2180, %v2276_v55   ;;  %v1350_v29 = vsub.f32 %v1318_v1, %v1334_v15 }
 0x219   : > { %v1339_v61 = vsub.f32 %v1307_v42, %v1323_v59  ;;  %v1292_v4 = vld [vmem:[#allocation4 + $0x28] sm:$0xff]  ;;  %1442 = vperm.xlu1 %2179, %v1276_v57   ;;  %v1373_v12 = vadd.f32 1e-05, %v1357_v63  ;;  %v2286_v45 = vpop.eup %2285 }
 0x21a   : > { %v1299_v2 = vld [vmem:[#allocation4 + $0x60] sm:$0xff]  ;;  %2287 = vrsqrt.f32 %v1374_v60  ;;  %v1308_v7 = vmul.f32 0.020408163, %v1292_v4  ;;  %v1366_v30 = vmax.f32 %v1350_v29, 0.0 }
 0x21b   : > { %v1315_v51 = vmul.f32 0.020408163, %v1299_v2  ;;  %v1355_v22 = vmax.f32 %v1339_v61, 0.0  ;;  %2289 = vrsqrt.f32 %v1375_v62 }
 0x21c   : > { %v1340_v21 = vsub.f32 %v1308_v7, %v1324_v8  ;;  %1518 = vperm.xlu0 %2180, %v2278_v11   ;;  %2291 = vrsqrt.f32 %v1373_v12  ;;  %v1382_v49 = vadd.f32 1e-05, %v1366_v30 }
 0x21d   : > { %1523 = vperm.xlu1 %2179, %v2280_v20   ;;  %v1300_v27 = vld [vmem:[#allocation4 + $0x68] sm:$0xff]  ;;  %v1347_v33 = vsub.f32 %v1315_v51, %v1331_v40  ;;  %v1371_v43 = vadd.f32 1e-05, %v1355_v22 }
 0x21e   : > { %v1356_v44 = vmax.f32 %v1340_v21, 0.0  ;;  %v1316_v54 = vmul.f32 0.020408163, %v1300_v27  ;;  %v1301_v35 = vld [vmem:[#allocation4 + $0x70] sm:$0xff] }
 0x21f   : > { %v1317_v24 = vmul.f32 0.020408163, %v1301_v35  ;;  %v1363_v52 = vmax.f32 %v1347_v33, 0.0 }
 0x220   : > { %v1372_v38 = vadd.f32 1e-05, %v1356_v44  ;;  %1558 = vperm.xlu0 %2180, %v2282_v36   ;;  %v1348_v41 = vsub.f32 %v1316_v54, %v1332_v32 }
 0x221   : > { %1563 = vperm.xlu1 %2179, %v2284_v37   ;;  %v1349_v46 = vsub.f32 %v1317_v24, %v1333_v16  ;;  %v1379_v50 = vadd.f32 1e-05, %v1363_v52 }
 0x222   : > { %2293 = vrsqrt.f32 %v1372_v38  ;;  %v1364_v5 = vmax.f32 %v1348_v41, 0.0 }
 0x223   : > { %2295 = vrsqrt.f32 %v1371_v43  ;;  %v1365_v34 = vmax.f32 %v1349_v46, 0.0 }
 0x224   : > { %v2288_v47 = vpop.eup %2287  ;;  %v1380_v48 = vadd.f32 1e-05, %v1364_v5 }
 0x225   : > { %1513 = vperm.xlu1 %2179, %v2286_v45   ;;  %1548 = vperm.xlu0 %2180, %v2288_v47   ;;  %v2290_v55 = vpop.eup %2289  ;;  %v1381_v56 = vadd.f32 1e-05, %v1365_v34 }
 0x226   : > { %2297 = vrsqrt.f32 %v1380_v48  ;;  %v2292_v0 = vpop.eup %2291 }
 0x227   : > { %2299 = vrsqrt.f32 %v1382_v49 }
 0x228   : > { %2301 = vrsqrt.f32 %v1379_v50 }
 0x229   : > { %1553 = vperm.xlu1 %2179, %v2290_v55   ;;  %2303 = vrsqrt.f32 %v1381_v56 }
 0x22c   : > { %v2294_v57 = vpop.eup %2293 }
 0x22d   : > { %1543 = vperm.xlu1 %2179, %v2292_v0   ;;  %1538 = vperm.xlu0 %2180, %v2294_v57   ;;  %v2296_v58 = vpop.eup %2295 }
 0x230   : > { %v2298_v42 = vpop.eup %2297 }
 0x231   : > { %1533 = vperm.xlu1 %2179, %v2296_v58   ;;  %1578 = vperm.xlu0 %2180, %v2298_v42   ;;  %v2300_v59 = vpop.eup %2299 }
 0x232   : > { %v2302_v60 = vpop.eup %2301 }
 0x233   : > { %v2304_v61 = vpop.eup %2303 }
 0x235   : > { %1573 = vperm.xlu1 %2179, %v2302_v60   ;;  %1588 = vperm.xlu0 %2180, %v2300_v59  }
 0x239   : > { %1583 = vperm.xlu1 %2179, %v2304_v61  }
 0x263   : > { %v1428_v4 = vpop.permute.xlu1 %1427 }
 0x264   : > { %v1497_v54 = vsub.f32 %v2585_v6, %v1428_v4 }
 0x267   : > { %v1468_v62 = vpop.permute.xlu1 %1467 }
 0x268   : > { %v1418_v1 = vpop.permute.xlu0 %1417  ;;  %v1505_v41 = vsub.f32 %v2587_v9, %v1468_v62 }
 0x26c   : > { %v2754_v63 = vpop.permute.xlu1 %1457  ;;  %v1473_v8 = vpop.permute.xlu0 %1472 }
 0x26d   : > { %v1506_v35 = vsub.f32 %v2598_v39, %v1473_v8 }
 0x270   : > { %v1433_v2 = vpop.permute.xlu1 %1432  ;;  %v1463_v15 = vpop.permute.xlu0 %1462 }
 0x271   : > { %v1498_v29 = vsub.f32 %v2595_v14, %v1433_v2  ;;  %v1504_v47 = vsub.f32 %v2604_v25, %v1463_v15  ;;  %v1503_v25 = vsub.f32 %v2592_v13, %v2754_v63 }
 0x278   : > { %v1423_v7 = vpop.permute.xlu1 %1422 }
 0x279   : > { %v1496_v43 = vsub.f32 %v2601_v19, %v1423_v7  ;;  %v1495_v19 = vsub.f32 %v2590_v10, %v1418_v1 }
 0x284   : > { %v2756_v11 = vpop.permute.xlu1 %1447 }
 0x287   : > { %v2760_v20 = vpop.permute.xlu0 %1492 }
 0x288   : > { %v2758_v51 = vpop.permute.xlu1 %1487 }
 0x28c   : > { %v2762_v40 = vpop.permute.xlu1 %1437 }
 0x28f   : > { %v2764_v21 = vpop.permute.xlu0 %1482 }
 0x290   : > { %v2766_v22 = vpop.permute.xlu1 %1477 }
 0x293   : > { %v1529_v12 = vpop.permute.xlu0 %1528 }
 0x294   : > { %v1453_v27 = vpop.permute.xlu1 %1452  ;;  %v1594_v33 = vmul.f32 %v1529_v12, %v1498_v29 }
 0x295   : > { %v1502_v58 = vsub.f32 %v2619_v18, %v1453_v27  ;;  %v1501_v18 = vsub.f32 %v2609_v17, %v2756_v11  ;;  %v1508_v17 = vsub.f32 %v2628_v53, %v2764_v21 }
 0x296   : > { %v1626_v24 = vmul.f32 0.2, %v1594_v33  ;;  %vm1610_vm2 = vcmp.ge.f32.partialorder %v1594_v33, 0.0 }
 0x297   : > { %v1569_v32 = vpop.permute.xlu0 %1568 }
 0x298   : > { %v2769_v44 = vpop.permute.xlu1 %1442  ;;  %v1602_v16 = vmul.f32 %v1569_v32, %v1506_v35  ;;  %v1642_v45 = vsel %vm1610_vm2, %v1594_v33, %v1626_v24 }
 0x299   : > { %v1500_v7 = vsub.f32 %v2625_v31, %v2769_v44 }
 0x29a   : > { %v1634_v5 = vmul.f32 0.2, %v1602_v16  ;;  %vm1618_vm4 = vcmp.ge.f32.partialorder %v1602_v16, 0.0 }
 0x29b   : > { %v1519_v36 = vpop.permute.xlu0 %1518 }
 0x29c   : > { %v1524_v37 = vpop.permute.xlu1 %1523  ;;  %v1592_v39 = vmul.f32 %v1519_v36, %v1496_v43  ;;  %v1650_v34 = vsel %vm1618_vm4, %v1602_v16, %v1634_v5 }
 0x29d   : > { %v1593_v38 = vmul.f32 %v1524_v37, %v1497_v54  ;;  %v1499_v54 = vsub.f32 %v2614_v26, %v2762_v40  ;;  %v1507_v26 = vsub.f32 %v2616_v28, %v2766_v22 }
 0x29e   : > { %v1624_v55 = vmul.f32 0.2, %v1592_v39  ;;  %vm1608_vm6 = vcmp.ge.f32.partialorder %v1592_v39, 0.0 }
 0x29f   : > { %vm1609_vm3 = vcmp.ge.f32.partialorder %v1593_v38, 0.0  ;;  %v1625_v14 = vmul.f32 0.2, %v1593_v38  ;;  %v1559_v30 = vpop.permute.xlu0 %1558 }
 0x2a0   : > { %v1564_v52 = vpop.permute.xlu1 %1563  ;;  %v1600_v49 = vmul.f32 %v1559_v30, %v1504_v47  ;;  %v1640_v4 = vsel %vm1608_vm6, %v1592_v39, %v1624_v55 }
 0x2a1   : > { %v1641_v6 = vsel %vm1609_vm3, %v1593_v38, %v1625_v14  ;;  %v1601_v46 = vmul.f32 %v1564_v52, %v1505_v41  ;;  %v1510_v41 = vsub.f32 %v2622_v3, %v2760_v20  ;;  %v1509_v3 = vsub.f32 %v2611_v23, %v2758_v51 }
 0x2a2   : > { %v1941_v9 = vpack.c.bf16 %v1642_v45, %v1641_v6  ;;  %v1632_v59 = vmul.f32 0.2, %v1600_v49  ;;  %vm1616_vm8 = vcmp.ge.f32.partialorder %v1600_v49, 0.0 }
 0x2a3   : > { %vm1617_vm5 = vcmp.ge.f32.partialorder %v1601_v46, 0.0  ;;  %v1633_v48 = vmul.f32 0.2, %v1601_v46 }
 0x2a4   : > { %1973 = vst [vmem:[%s2779_s28 + $0x8] sm:$0xff] %v1941_v9   ;;  %v1514_v50 = vpop.permute.xlu1 %1513  ;;  %v1549_v57 = vpop.permute.xlu0 %1548  ;;  %v1648_v63 = vsel %vm1616_vm8, %v1600_v49, %v1632_v59 }
 0x2a5   : > { %v1649_v56 = vsel %vm1617_vm5, %v1601_v46, %v1633_v48  ;;  %v1591_v0 = vmul.f32 %v1514_v50, %v1495_v19  ;;  %v1598_v60 = vmul.f32 %v1549_v57, %v1502_v58 }
 0x2a6   : > { %v1961_v42 = vpack.c.bf16 %v1650_v34, %v1649_v56 }
 0x2a7   : > { %vm1607_vm7 = vcmp.ge.f32.partialorder %v1591_v0, 0.0  ;;  %v1623_v10 = vmul.f32 0.2, %v1591_v0  ;;  %v1630_v8 = vmul.f32 0.2, %v1598_v60  ;;  %vm1614_vm10 = vcmp.ge.f32.partialorder %v1598_v60, 0.0 }
 0x2a8   : > { %1977 = vst [vmem:[%s2779_s28 + $0x28] sm:$0xff] %v1961_v42   ;;  %v1554_v61 = vpop.permute.xlu1 %1553 }
 0x2a9   : > { %v1639_v62 = vsel %vm1607_vm7, %v1591_v0, %v1623_v10  ;;  %v1599_v1 = vmul.f32 %v1554_v61, %v1503_v25  ;;  %v1646_v11 = vsel %vm1614_vm10, %v1598_v60, %v1630_v8 }
 0x2aa   : > { %v1936_v2 = vpack.c.bf16 %v1640_v4, %v1639_v62 }
 0x2ab   : > { %vm1615_vm9 = vcmp.ge.f32.partialorder %v1599_v1, 0.0  ;;  %v1631_v13 = vmul.f32 0.2, %v1599_v1 }
 0x2ac   : > { %1937 = vst [vmem:[%s2779_s28] sm:$0xff] %v1936_v2   ;;  %v1544_v15 = vpop.permute.xlu1 %1543  ;;  %v1539_v12 = vpop.permute.xlu0 %1538 }
 0x2ad   : > { %v1647_v27 = vsel %vm1615_vm9, %v1599_v1, %v1631_v13  ;;  %v1597_v29 = vmul.f32 %v1544_v15, %v1501_v18  ;;  %v1596_v32 = vmul.f32 %v1539_v12, %v1500_v7 }
 0x2ae   : > { %v1956_v33 = vpack.c.bf16 %v1648_v63, %v1647_v27 }
 0x2af   : > { %vm1613_vm11 = vcmp.ge.f32.partialorder %v1597_v29, 0.0  ;;  %v1629_v31 = vmul.f32 0.2, %v1597_v29  ;;  %v1628_v44 = vmul.f32 0.2, %v1596_v32  ;;  %vm1612_vm12 = vcmp.ge.f32.partialorder %v1596_v32, 0.0 }
 0x2b0   : > { %1976 = vst [vmem:[%s2779_s28 + $0x20] sm:$0xff] %v1956_v33   ;;  %v1534_v35 = vpop.permute.xlu1 %1533  ;;  %v1579_v36 = vpop.permute.xlu0 %1578 }
 0x2b1   : > { %v1645_v24 = vsel %vm1613_vm11, %v1597_v29, %v1629_v31  ;;  %v1595_v37 = vmul.f32 %v1534_v35, %v1499_v54  ;;  %v1604_v16 = vmul.f32 %v1579_v36, %v1508_v17  ;;  %v1644_v40 = vsel %vm1612_vm12, %v1596_v32, %v1628_v44 }
 0x2b2   : > { %v1951_v38 = vpack.c.bf16 %v1646_v11, %v1645_v24 }
 0x2b3   : > { %vm1611_vm13 = vcmp.ge.f32.partialorder %v1595_v37, 0.0  ;;  %v1627_v53 = vmul.f32 0.2, %v1595_v37  ;;  %v1636_v30 = vmul.f32 0.2, %v1604_v16  ;;  %vm1620_vm14 = vcmp.ge.f32.partialorder %v1604_v16, 0.0 }
 0x2b4   : > { %1975 = vst [vmem:[%s2779_s28 + $0x18] sm:$0xff] %v1951_v38   ;;  %v1574_v21 = vpop.permute.xlu1 %1573  ;;  %v1589_v43 = vpop.permute.xlu0 %1588 }
 0x2b5   : > { %v1643_v14 = vsel %vm1611_vm13, %v1595_v37, %v1627_v53  ;;  %v1603_v45 = vmul.f32 %v1574_v21, %v1507_v26  ;;  %v1606_v52 = vmul.f32 %v1589_v43, %v1510_v41  ;;  %v1652_v22 = vsel %vm1620_vm14, %v1604_v16, %v1636_v30 }
 0x2b6   : > { %v1946_v5 = vpack.c.bf16 %v1644_v40, %v1643_v14 }
 0x2b7   : > { %vm1619_vm15 = vcmp.ge.f32.partialorder %v1603_v45, 0.0  ;;  %v1635_v28 = vmul.f32 0.2, %v1603_v45  ;;  %v1638_v39 = vmul.f32 0.2, %v1606_v52  ;;  %vm1622_vm0 = vcmp.ge.f32.partialorder %v1606_v52, 0.0 }
 0x2b8   : > { %1974 = vst [vmem:[%s2779_s28 + $0x10] sm:$0xff] %v1946_v5   ;;  %v1584_v20 = vpop.permute.xlu1 %1583 }
 0x2b9   : > { %v1651_v6 = vsel %vm1619_vm15, %v1603_v45, %v1635_v28  ;;  %v1605_v46 = vmul.f32 %v1584_v20, %v1509_v3  ;;  %v1654_v19 = vsel %vm1622_vm0, %v1606_v52, %v1638_v39 }
 0x2ba   : > { %v1966_v47 = vpack.c.bf16 %v1652_v22, %v1651_v6 }
 0x2bb   : > { %vm1621_vm1 = vcmp.ge.f32.partialorder %v1605_v46, 0.0  ;;  %v1637_v9 = vmul.f32 0.2, %v1605_v46 }
 0x2bc   : > { %1978 = vst [vmem:[%s2779_s28 + $0x30] sm:$0xff] %v1966_v47  }
 0x2bd   : > { %v1653_v48 = vsel %vm1621_vm1, %v1605_v46, %v1637_v9 }
 0x2be   : > { %v1971_v49 = vpack.c.bf16 %v1654_v19, %v1653_v48 }
 0x2c0   : > { %1979 = vst [vmem:[%s2779_s28 + $0x38] sm:$0xff] %v1971_v49  }
 0x2c1 PF: > { %s12_s11 = sadd.s32 1, %s2327_s11   ;;  %s2820_s9 = smov %s2323_s10 }
 0x2c2   : > { %p9_p5 = scmp.ge.s32.totalorder %s12_s11, 4   ;;  %s2821_s10 = smov %s2823_s12 }
 0x2c4   :  { %11 = sbr.rel (!%p9_p5) target bundleno = 2 (0x2), region = 67 }

// kernel: pixel_discriminator_forward.7
= control target key start
LH: loop header
LB: loop body
LE: loop exit
PB: predicated region body
PF: predicated region fallthrough
CT: control target
= control target key end

     0   :  { %s4984_s9 = smov 0   ;;  %s4986_s10 = smov 0   ;;  %s6448_s0 = inlined_call_operand.vmem [shape: bf16[2,1152,128], index: 0, kind: input, shape index: {}]   ;;  %s6449_s1 = inlined_call_operand.vmem [shape: bf16[256,1152], index: 1, kind: input, shape index: {}]   ;;  %s6450_s2 = inlined_call_operand.vmem [shape: f32[2,256,128], index: 2, kind: output, shape index: {}]  }
   0x1   :  { %s4988_s11 = smov 0  }
   0x2 LB: > { %s24_s12 = sadd.s32 1, %s4961_s10  ;;  %p3811_p0 = scmp.ge.s32.totalorder %s4965_s11, 1  ;;  %s4965_s11 = sphi %s4988_s11, %s12_s11   ;;  %s4961_s10 = sphi %s4986_s10, %s6452_s10   ;;  %s4957_s9 = sphi %s4984_s9, %s6451_s9  }
   0x3   : > { %p26_p1 = scmp.ge.s32.totalorder %s24_s12, 2  ;;  %p129_p2 = scmp.lt.s32.totalorder %s4965_s11, 3 }
   0x5   : > { %s6454_s12 = smov (%p26_p1, %s24_s12), 0  ;;  %p130_p3 = pnand %p3811_p0, %p129_p2 }
   0x6   : > { %p154_p4 = scmp.lt.s32.totalorder (!%p130_p3), %s4957_s9, 1  ;;  %v4617_v0 = vld [vmem:[%s6449_s1 + $0x4] ss:$36 sps:$4 sm:$0xff] (!%p130_p3)   ;;  %v4627_v23 = vld [vmem:[%s6449_s1 + $0x4c] ss:$36 sps:$4 sm:$0xff] (!%p130_p3)   ;;  %vm172_vm0 = vcmask (!%p130_p3), 7168  }
   0x7   : > { %133 = sbr.rel (%p130_p3) target bundleno = 919 (0x397), region = 28  ;;  %v4620_v1 = vld [vmem:[%s6449_s1 + $0x364] ss:$36 sps:$4 sm:$0xff] (!%p130_p3)   ;;  %1741 = vmatprep.mubr.bf16.mxu0 (!%p130_p3), %v4617_v0  ;;  %v4629_v25 = vld [vmem:[%s6449_s1 + $0x3ac] ss:$36 sps:$4 sm:$0xff] (!%p130_p3)  }
   0x8   : > { %1837 = vmatprep.mubr.bf16.mxu1 (!%p130_p3), %v4620_v1  ;;  %v4615_v18 = vld [vmem:[%s6449_s1] ss:$36 sps:$4 sm:$0xff] (!%p130_p3)   ;;  %v4631_v30 = vld [vmem:[%s6449_s1 + $0x48] ss:$36 sps:$4 sm:$0xff] (!%p130_p3)   ;;  %v4639_v33 = vld [vmem:[%s6449_s1 + $0x94] ss:$36 sps:$4 sm:$0xff] (!%p130_p3)  }
   0x9   : > { %v4618_v21 = vld [vmem:[%s6449_s1 + $0x360] ss:$36 sps:$4 sm:$0xff] (!%p130_p3)   ;;  %v4632_v31 = vld [vmem:[%s6449_s1 + $0x3a8] ss:$36 sps:$4 sm:$0xff] (!%p130_p3)   ;;  %v4641_v37 = vld [vmem:[%s6449_s1 + $0x3f4] ss:$36 sps:$4 sm:$0xff] (!%p130_p3)  }
   0xa   : > { %v4643_v40 = vld [vmem:[%s6449_s1 + $0x90] ss:$36 sps:$4 sm:$0xff] (!%p130_p3)   ;;  %v4649_v46 = vld [vmem:[%s6449_s1 + $0xdc] ss:$36 sps:$4 sm:$0xff] (!%p130_p3)   ;;  %v4661_v57 = vld [vmem:[%s6449_s1 + $0x124] ss:$36 sps:$4 sm:$0xff] (!%p130_p3)  }
   0xb   : > { %v4644_v41 = vld [vmem:[%s6449_s1 + $0x3f0] ss:$36 sps:$4 sm:$0xff] (!%p130_p3)   ;;  %v4651_v48 = vld [vmem:[%s6449_s1 + $0x43c] ss:$36 sps:$4 sm:$0xff] (!%p130_p3)   ;;  %v4663_v62 = vld [vmem:[%s6449_s1 + $0x8] ss:$36 sps:$4 sm:$0xff] (!%p130_p3)  }
   0xc   : > { %v4653_v51 = vld [vmem:[%s6449_s1 + $0xd8] ss:$36 sps:$4 sm:$0xff] (!%p130_p3)   ;;  %v4665_v58 = vld [vmem:[%s6449_s1 + $0xc] ss:$36 sps:$4 sm:$0xff] (!%p130_p3)   ;;  %v4666_v63 = vld [vmem:[%s6449_s1 + $0x120] ss:$36 sps:$4 sm:$0xff] (!%p130_p3)  }
   0xd   : > { %v4654_v52 = vld [vmem:[%s6449_s1 + $0x438] ss:$36 sps:$4 sm:$0xff] (!%p130_p3)   ;;  %v4669_v0 = vld [vmem:[%s6449_s1 + $0x16c] ss:$36 sps:$4 sm:$0xff] (!%p130_p3)  }
   0xe   : > { %s6456_s9 = smov (!%p154_p4, %s4957_s9), 1  ;;  %v4671_v1 = vld [vmem:[%s6449_s1 + $0x54] ss:$36 sps:$4 sm:$0xff]  }
   0xf   : > { %s4570_s17 = smul.u32 576, %s6456_s9  ;;  %s4033_s22 = sshll.u32 %s6456_s9, 8 }
  0x10   : > { %s6318_s25 = scalar_lea.vmem %s6450_s2, %s4033_s22 }
  0x11   : > { %s5014_s20 = scalar_lea.vmem %s6448_s0, %s4570_s17 }
  0x12   : > { %v4599_v2 = vld [vmem:[%s5014_s20 + $0x40] sm:$0xff]   ;;  %v4601_v4 = vld [vmem:[%s5014_s20 + $0x48] sm:$0xff]   ;;  %v4603_v6 = vld [vmem:[%s5014_s20 + $0x50] sm:$0xff]  }
  0x13   : > { %v4600_v3 = vld [vmem:[%s5014_s20] sm:$0xff]   ;;  %4034 = vmatprep.subr.bf16.mxu0 %v4599_v2  ;;  %4554 = vmatprep.subr.bf16.mxu1 %v4599_v2  ;;  %v4602_v5 = vld [vmem:[%s5014_s20 + $0x8] sm:$0xff]   ;;  %v4604_v7 = vld [vmem:[%s5014_s20 + $0x10] sm:$0xff]  }
  0x14   : > { %4035 = vmatpush3.bf16.msra.mxu0 %v4600_v3  ;;  %4562 = vmatpush3.bf16.msra.mxu1 %v4600_v3  ;;  %v4605_v8 = vld [vmem:[%s5014_s20 + $0x58] sm:$0xff]   ;;  %v4607_v10 = vld [vmem:[%s5014_s20 + $0x60] sm:$0xff]   ;;  %v4609_v12 = vld [vmem:[%s5014_s20 + $0x68] sm:$0xff]  }
  0x15   : > { %4036 = vmatprep.subr.bf16.mxu0 %v4601_v4  ;;  %4555 = vmatprep.subr.bf16.mxu1 %v4601_v4  ;;  %v4606_v9 = vld [vmem:[%s5014_s20 + $0x18] sm:$0xff]   ;;  %v4608_v11 = vld [vmem:[%s5014_s20 + $0x20] sm:$0xff]   ;;  %v4610_v13 = vld [vmem:[%s5014_s20 + $0x28] sm:$0xff]  }
  0x16   : > { %v4611_v14 = vld [vmem:[%s5014_s20 + $0x70] sm:$0xff]   ;;  %v4613_v16 = vld [vmem:[%s5014_s20 + $0x78] sm:$0xff]   ;;  %v4621_v19 = vld [vmem:[%s5014_s20 + $0xc0] sm:$0xff]  }
  0x17   : > { %v4612_v15 = vld [vmem:[%s5014_s20 + $0x30] sm:$0xff]   ;;  %v4614_v17 = vld [vmem:[%s5014_s20 + $0x38] sm:$0xff]   ;;  %v4622_v20 = vld [vmem:[%s5014_s20 + $0x140] sm:$0xff]  }
  0x18   : > { %4037 = vmatpush3.bf16.msra.mxu0 %v4602_v5  ;;  %4563 = vmatpush3.bf16.msra.mxu1 %v4602_v5  ;;  %v4623_v22 = vld [vmem:[%s5014_s20 + $0x80] sm:$0xff]   ;;  %v4625_v26 = vld [vmem:[%s5014_s20 + $0xc8] sm:$0xff]   ;;  %v4633_v32 = vld [vmem:[%s5014_s20 + $0xd0] sm:$0xff]  }
  0x19   : > { %4038 = vmatprep.subr.bf16.mxu0 %v4603_v6  ;;  %4556 = vmatprep.subr.bf16.mxu1 %v4603_v6  ;;  %v4624_v24 = vld [vmem:[%s5014_s20 + $0x100] sm:$0xff]   ;;  %v4636_v27 = vld [vmem:[%s5014_s20 + $0x148] sm:$0xff]   ;;  %v4656_v34 = vld [vmem:[%s5014_s20 + $0x150] sm:$0xff]  }
  0x1a   : > { %v4626_v28 = vld [vmem:[%s5014_s20 + $0x88] sm:$0xff]   ;;  %v4634_v35 = vld [vmem:[%s5014_s20 + $0x90] sm:$0xff]   ;;  %v4635_v36 = vld [vmem:[%s5014_s20 + $0xd8] sm:$0xff]  }
  0x1b   : > { %v4638_v29 = vld [vmem:[%s5014_s20 + $0x108] sm:$0xff]   ;;  %v4658_v38 = vld [vmem:[%s5014_s20 + $0x110] sm:$0xff]   ;;  %v4637_v39 = vld [vmem:[%s5014_s20 + $0x98] sm:$0xff]  }
  0x1c   : > { %4039 = vmatpush3.bf16.msra.mxu0 %v4604_v7  ;;  %4564 = vmatpush3.bf16.msra.mxu1 %v4604_v7  ;;  %v4645_v42 = vld [vmem:[%s5014_s20 + $0xe0] sm:$0xff]   ;;  %v4667_v44 = vld [vmem:[%s5014_s20 + $0x158] sm:$0xff]   ;;  %v4647_v47 = vld [vmem:[%s5014_s20 + $0xe8] sm:$0xff]  }
  0x1d   : > { %4040 = vmatprep.subr.bf16.mxu0 %v4605_v8  ;;  %4557 = vmatprep.subr.bf16.mxu1 %v4605_v8  ;;  %v4646_v43 = vld [vmem:[%s5014_s20 + $0xa0] sm:$0xff]   ;;  %v4668_v45 = vld [vmem:[%s5014_s20 + $0x118] sm:$0xff]   ;;  %v4648_v49 = vld [vmem:[%s5014_s20 + $0xa8] sm:$0xff]  }
  0x1e   : > { %v4655_v50 = vld [vmem:[%s5014_s20 + $0xf0] sm:$0xff]   ;;  %v4681_v53 = vld [vmem:[%s5014_s20 + $0x160] sm:$0xff]   ;;  %v4659_v56 = vld [vmem:[%s5014_s20 + $0xf8] sm:$0xff]  }
  0x1f   : > { %v4682_v54 = vld [vmem:[%s5014_s20 + $0x120] sm:$0xff]   ;;  %v4657_v55 = vld [vmem:[%s5014_s20 + $0xb0] sm:$0xff]   ;;  %v4689_v59 = vld [vmem:[%s5014_s20 + $0x168] sm:$0xff]  }
  0x20   : > { %4041 = vmatpush3.bf16.msra.mxu0 %v4606_v9  ;;  %4565 = vmatpush3.bf16.msra.mxu1 %v4606_v9  ;;  %v4690_v60 = vld [vmem:[%s5014_s20 + $0x128] sm:$0xff]   ;;  %v4660_v61 = vld [vmem:[%s5014_s20 + $0xb8] sm:$0xff]   ;;  %v4703_v2 = vld [vmem:[%s5014_s20 + $0x170] sm:$0xff]  }
  0x21   : > { %4042 = vmatprep.subr.bf16.mxu0 %v4607_v10  ;;  %4558 = vmatprep.subr.bf16.mxu1 %v4607_v10  ;;  %v4704_v3 = vld [vmem:[%s5014_s20 + $0x130] sm:$0xff]   ;;  %v4673_v4 = vld [vmem:[%s6449_s1 + $0x168] ss:$36 sps:$4 sm:$0xff]   ;;  %v4677_v7 = vld [vmem:[%s6449_s1 + $0x9c] ss:$36 sps:$4 sm:$0xff]  }
  0x22   : > { %v4674_v5 = vld [vmem:[%s6449_s1 + $0x50] ss:$36 sps:$4 sm:$0xff]   ;;  %v4711_v8 = vld [vmem:[%s5014_s20 + $0x1c0] sm:$0xff]   ;;  %v4713_v10 = vld [vmem:[%s5014_s20 + $0x178] sm:$0xff]  }
  0x23   : > { %v4675_v6 = vld [vmem:[%s6449_s1 + $0x1b4] ss:$36 sps:$4 sm:$0xff]   ;;  %v4712_v9 = vld [vmem:[%s5014_s20 + $0x180] sm:$0xff]  }
  0x24   : > { %4043 = vmatpush3.bf16.msra.mxu0 %v4608_v11  ;;  %4566 = vmatpush3.bf16.msra.mxu1 %v4608_v11  ;;  %v4714_v11 = vld [vmem:[%s5014_s20 + $0x138] sm:$0xff]  }
  0x25   : > { %4044 = vmatprep.subr.bf16.mxu0 %v4609_v12  ;;  %4559 = vmatprep.subr.bf16.mxu1 %v4609_v12  ;;  %v4679_v12 = vld [vmem:[%s6449_s1 + $0x1b0] ss:$36 sps:$4 sm:$0xff]  }
  0x28   : > { %4045 = vmatpush3.bf16.msra.mxu0 %v4610_v13  ;;  %4567 = vmatpush3.bf16.msra.mxu1 %v4610_v13  ;;  %v4680_v13 = vld [vmem:[%s6449_s1 + $0x98] ss:$36 sps:$4 sm:$0xff]  }
  0x29   : > { %4046 = vmatprep.subr.bf16.mxu0 %v4611_v14  ;;  %4560 = vmatprep.subr.bf16.mxu1 %v4611_v14  ;;  %v4683_v14 = vld [vmem:[%s6449_s1 + $0x1fc] ss:$36 sps:$4 sm:$0xff]  }
  0x2c   : > { %4047 = vmatpush3.bf16.msra.mxu0 %v4612_v15  ;;  %4568 = vmatpush3.bf16.msra.mxu1 %v4612_v15  ;;  %v4685_v15 = vld [vmem:[%s6449_s1 + $0xe4] ss:$36 sps:$4 sm:$0xff]  }
  0x2d   : > { %4048 = vmatprep.subr.bf16.mxu0 %v4613_v16  ;;  %4561 = vmatprep.subr.bf16.mxu1 %v4613_v16  ;;  %v5151_v16 = vld [vmem:[%s5014_s20 + $0x200] sm:$0xff]  }
  0x30   : > { %4049 = vmatpush3.bf16.msra.mxu0 %v4614_v17  ;;  %4569 = vmatpush3.bf16.msra.mxu1 %v4614_v17  ;;  %v4728_v17 = vld [vmem:[%s5014_s20 + $0x1c8] sm:$0xff]  }
  0x31   : > { %4146 = vmatprep.subr.bf16.mxu1 %v4621_v19  ;;  %4258 = vmatprep.subr.bf16.mxu0 %v4622_v20  ;;  %v4687_v19 = vld [vmem:[%s6449_s1 + $0x1f8] ss:$36 sps:$4 sm:$0xff]   ;;  %v4688_v20 = vld [vmem:[%s6449_s1 + $0xe0] ss:$36 sps:$4 sm:$0xff]  }
  0x33   : > { %1742 = vmatmul.mubr.bf16.vlgmr.msra.gmra.mrb[0].mxu0 %v4615_v18  ;;  %1838 = vmatmul.mubr.bf16.vlgmr.msra.gmra.mrb[0].mxu1 %v4618_v21  ;;  %v4729_v18 = vld [vmem:[%s5014_s20 + $0x188] sm:$0xff]  }
  0x34   : > { %4147 = vmatpush3.bf16.msra.mxu1 %v4623_v22  ;;  %4259 = vmatpush3.bf16.msra.mxu0 %v4624_v24  ;;  %v4691_v21 = vld [vmem:[%s6449_s1 + $0x244] ss:$36 sps:$4 sm:$0xff]   ;;  %v4693_v22 = vld [vmem:[%s6449_s1 + $0x12c] ss:$36 sps:$4 sm:$0xff]  }
  0x35   : > { %4148 = vmatprep.subr.bf16.mxu1 %v4625_v26  ;;  %1749 = vmatprep.mubr.bf16.mxu0 %v4627_v23  ;;  %v4743_v23 = vld [vmem:[%s5014_s20 + $0x1d0] sm:$0xff]   ;;  %v4696_v26 = vld [vmem:[%s6449_s1 + $0x128] ss:$36 sps:$4 sm:$0xff]  }
  0x36   : > { %1845 = vmatprep.mubr.bf16.mxu1 %v4629_v25  ;;  %4260 = vmatprep.subr.bf16.mxu0 %v4636_v27  ;;  %v4744_v24 = vld [vmem:[%s5014_s20 + $0x190] sm:$0xff]   ;;  %v4695_v25 = vld [vmem:[%s6449_s1 + $0x240] ss:$36 sps:$4 sm:$0xff]  }
  0x37   : > { %v4697_v27 = vld [vmem:[%s6449_s1 + $0x28c] ss:$36 sps:$4 sm:$0xff]  }
  0x38   : > { %4149 = vmatpush3.bf16.msra.mxu1 %v4626_v28  ;;  %4261 = vmatpush3.bf16.msra.mxu0 %v4638_v29  ;;  %v4699_v28 = vld [vmem:[%s6449_s1 + $0x174] ss:$36 sps:$4 sm:$0xff]  }
  0x39   : > { %4150 = vmatprep.subr.bf16.mxu1 %v4633_v32  ;;  %4262 = vmatprep.subr.bf16.mxu0 %v4656_v34  ;;  %v4758_v29 = vld [vmem:[%s5014_s20 + $0x1d8] sm:$0xff]   ;;  %v4702_v32 = vld [vmem:[%s6449_s1 + $0x170] ss:$36 sps:$4 sm:$0xff]  }
  0x3a   : > { %v4707_v34 = vld [vmem:[%s6449_s1 + $0x1bc] ss:$36 sps:$4 sm:$0xff]  }
  0x3b   : > { %1750 = vmatmul.mubr.bf16.gmra.mrb[4].mxu0 %v4631_v30  ;;  %1846 = vmatmul.mubr.bf16.gmra.mrb[4].mxu1 %v4632_v31  ;;  %v4759_v30 = vld [vmem:[%s5014_s20 + $0x198] sm:$0xff]   ;;  %v4701_v31 = vld [vmem:[%s6449_s1 + $0x288] ss:$36 sps:$4 sm:$0xff]  }
  0x3c   : > { %4151 = vmatpush3.bf16.msra.mxu1 %v4634_v35  ;;  %1757 = vmatprep.mubr.bf16.mxu0 %v4639_v33  ;;  %v4705_v33 = vld [vmem:[%s6449_s1 + $0x2d4] ss:$36 sps:$4 sm:$0xff]   ;;  %v4772_v35 = vld [vmem:[%s5014_s20 + $0x1e0] sm:$0xff]  }
  0x3d   : > { %4152 = vmatprep.subr.bf16.mxu1 %v4635_v36  ;;  %1853 = vmatprep.mubr.bf16.mxu1 %v4641_v37  ;;  %v4774_v36 = vld [vmem:[%s5014_s20 + $0x1a0] sm:$0xff]   ;;  %v4775_v37 = vld [vmem:[%s5014_s20 + $0x1e8] sm:$0xff]  }
  0x3e   : > { %4263 = vmatpush3.bf16.msra.mxu0 %v4658_v38  ;;  %v4709_v38 = vld [vmem:[%s6449_s1 + $0x2d0] ss:$36 sps:$4 sm:$0xff]  }
  0x3f   : > { %4264 = vmatprep.subr.bf16.mxu0 %v4667_v44  ;;  %v4784_v44 = vld [vmem:[%s5014_s20 + $0x1b0] sm:$0xff]  }
  0x40   : > { %4153 = vmatpush3.bf16.msra.mxu1 %v4637_v39  ;;  %v4776_v39 = vld [vmem:[%s5014_s20 + $0x1a8] sm:$0xff]  }
  0x41   : > { %4154 = vmatprep.subr.bf16.mxu1 %v4645_v42  ;;  %v4717_v42 = vld [vmem:[%s6449_s1 + $0x204] ss:$36 sps:$4 sm:$0xff]  }
  0x42   : > { %4265 = vmatpush3.bf16.msra.mxu0 %v4668_v45  ;;  %v4785_v45 = vld [vmem:[%s5014_s20 + $0x1f8] sm:$0xff]  }
  0x43   : > { %1758 = vmatmul.mubr.bf16.gmra.mrb[8].mxu0 %v4643_v40  ;;  %1854 = vmatmul.mubr.bf16.gmra.mrb[8].mxu1 %v4644_v41  ;;  %v4710_v40 = vld [vmem:[%s6449_s1 + $0x1b8] ss:$36 sps:$4 sm:$0xff]  }
  0x44   : > { %4155 = vmatpush3.bf16.msra.mxu1 %v4646_v43  ;;  %1765 = vmatprep.mubr.bf16.mxu0 %v4649_v46  ;;  %v4715_v41 = vld [vmem:[%s6449_s1 + $0x31c] ss:$36 sps:$4 sm:$0xff]   ;;  %v4783_v43 = vld [vmem:[%s5014_s20 + $0x1f0] sm:$0xff]  }
  0x45   : > { %4156 = vmatprep.subr.bf16.mxu1 %v4647_v47  ;;  %1861 = vmatprep.mubr.bf16.mxu1 %v4651_v48  ;;  %v4719_v46 = vld [vmem:[%s6449_s1 + $0x318] ss:$36 sps:$4 sm:$0xff]   ;;  %v4720_v48 = vld [vmem:[%s6449_s1 + $0x200] ss:$36 sps:$4 sm:$0xff]  }
  0x46   : > { %4266 = vmatprep.subr.bf16.mxu0 %v4681_v53  ;;  %v4786_v47 = vld [vmem:[%s5014_s20 + $0x1b8] sm:$0xff]  }
  0x47   : > { %4267 = vmatpush3.bf16.msra.mxu0 %v4682_v54  ;;  %v4730_v53 = vld [vmem:[%s6449_s1 + $0x294] ss:$36 sps:$4 sm:$0xff]   ;;  %v4732_v54 = vld [vmem:[%s6449_s1 + $0x5c] ss:$36 sps:$4 sm:$0xff]  }
  0x48   : > { %4157 = vmatpush3.bf16.msra.mxu1 %v4648_v49  ;;  %4268 = vmatprep.subr.bf16.mxu0 %v4689_v59  ;;  %v4721_v49 = vld [vmem:[%s6449_s1 + $0x24c] ss:$36 sps:$4 sm:$0xff]   ;;  %v4736_v59 = vld [vmem:[%s6449_s1 + $0x2dc] ss:$36 sps:$4 sm:$0xff]  }
  0x49   : > { %4158 = vmatprep.subr.bf16.mxu1 %v4655_v50  ;;  %v4725_v50 = vld [vmem:[%s6449_s1 + $0x14] ss:$36 sps:$4 sm:$0xff]  }
  0x4b   : > { %1766 = vmatmul.mubr.bf16.gmra.mrb[12].mxu0 %v4653_v51  ;;  %1862 = vmatmul.mubr.bf16.gmra.mrb[12].mxu1 %v4654_v52  ;;  %v4723_v51 = vld [vmem:[%s6449_s1 + $0x10] ss:$36 sps:$4 sm:$0xff]   ;;  %v4726_v52 = vld [vmem:[%s6449_s1 + $0x248] ss:$36 sps:$4 sm:$0xff]  }
  0x4c   : > { %4159 = vmatpush3.bf16.msra.mxu1 %v4657_v55  ;;  %1773 = vmatprep.mubr.bf16.mxu0 %v4661_v57  ;;  %v4742_v55 = vld [vmem:[%s5014_s20 + $0x208] sm:$0xff]   ;;  %v4734_v57 = vld [vmem:[%s6449_s1 + $0x290] ss:$36 sps:$4 sm:$0xff]  }
  0x4d   : > { %4160 = vmatprep.subr.bf16.mxu1 %v4659_v56  ;;  %1902 = vmatprep.mubr.bf16.mxu1 %v4665_v58  ;;  %v4757_v56 = vld [vmem:[%s5014_s20 + $0x210] sm:$0xff]   ;;  %v4735_v58 = vld [vmem:[%s6449_s1 + $0x58] ss:$36 sps:$4 sm:$0xff]  }
  0x4e   : > { %4269 = vmatpush3.bf16.msra.mxu0 %v4690_v60  ;;  %v4738_v60 = vld [vmem:[%s6449_s1 + $0xa4] ss:$36 sps:$4 sm:$0xff]  }
  0x4f   : > { %4270 = vmatprep.subr.bf16.mxu0 %v4703_v2  ;;  %v4747_v2 = vld [vmem:[%s6449_s1 + $0xec] ss:$36 sps:$4 sm:$0xff]  }
  0x50   : > { %4161 = vmatpush3.bf16.msra.mxu1 %v4660_v61  ;;  %v4773_v61 = vld [vmem:[%s5014_s20 + $0x218] sm:$0xff]  }
  0x51   : > { %4370 = vmatprep.subr.bf16.mxu1 %v4711_v8  ;;  %v4753_v8 = vld [vmem:[%s6449_s1 + $0x134] ss:$36 sps:$4 sm:$0xff]  }
  0x52   : > { %4271 = vmatpush3.bf16.msra.mxu0 %v4704_v3  ;;  %v4806_v3 = vld [vmem:[%s5014_s20 + $0x228] sm:$0xff]  }
  0x53   : > { %1774 = vmatmul.mubr.bf16.gmra.mrb[16].mxu0 %v4666_v63  ;;  %1903 = vmatmul.mubr.bf16.vlgmr.msra.gmra.mrb[16].mxu1 %v4663_v62  ;;  %v4740_v62 = vld [vmem:[%s6449_s1 + $0x2d8] ss:$36 sps:$4 sm:$0xff]   ;;  %v4741_v63 = vld [vmem:[%s6449_s1 + $0xa0] ss:$36 sps:$4 sm:$0xff]  }
  0x54   : > { %1781 = vmatprep.mubr.bf16.mxu0 %v4669_v0  ;;  %1910 = vmatprep.mubr.bf16.mxu1 %v4671_v1  ;;  %v4793_v0 = vld [vmem:[%s5014_s20 + $0x220] sm:$0xff]  }
  0x55   : > { %4371 = vmatpush3.bf16.msra.mxu1 %v4712_v9  ;;  %4272 = vmatprep.subr.bf16.mxu0 %v4713_v10  ;;  %v4745_v1 = vld [vmem:[%s6449_s1 + $0x324] ss:$36 sps:$4 sm:$0xff]   ;;  %v4832_v9 = vld [vmem:[%s5014_s20 + $0x238] sm:$0xff]  }
  0x56   : > { %4273 = vmatpush3.bf16.msra.mxu0 %v4714_v11  ;;  %4372 = vmatprep.subr.bf16.mxu1 %v4728_v17  ;;  %v4755_v10 = vld [vmem:[%s6449_s1 + $0x368] ss:$36 sps:$4 sm:$0xff]   ;;  %v4756_v11 = vld [vmem:[%s6449_s1 + $0x130] ss:$36 sps:$4 sm:$0xff]  }
  0x57   : > { %4506 = vmatprep.subr.bf16.mxu0 %v5151_v16  ;;  %v4768_v17 = vld [vmem:[%s6449_s1 + $0x1c4] ss:$36 sps:$4 sm:$0xff]  }
  0x59   : > { %4373 = vmatpush3.bf16.msra.mxu1 %v4729_v18  ;;  %v4770_v18 = vld [vmem:[%s6449_s1 + $0x3f8] ss:$36 sps:$4 sm:$0xff]  }
  0x5a   : > { %4374 = vmatprep.subr.bf16.mxu1 %v4743_v23  ;;  %v4782_v23 = vld [vmem:[%s6449_s1 + $0x208] ss:$36 sps:$4 sm:$0xff]  }
  0x5b   : > { %1782 = vmatmul.mubr.bf16.gmra.mrb[20].mxu0 %v4673_v4  ;;  %1911 = vmatmul.mubr.bf16.gmra.mrb[20].mxu1 %v4674_v5  ;;  %v4749_v4 = vld [vmem:[%s6449_s1 + $0x320] ss:$36 sps:$4 sm:$0xff]   ;;  %v4750_v5 = vld [vmem:[%s6449_s1 + $0xe8] ss:$36 sps:$4 sm:$0xff]  }
  0x5c   : > { %1789 = vmatprep.mubr.bf16.mxu0 %v4675_v6  ;;  %1918 = vmatprep.mubr.bf16.mxu1 %v4677_v7  ;;  %v4819_v6 = vld [vmem:[%s5014_s20 + $0x230] sm:$0xff]  }
  0x5d   : > { %4375 = vmatpush3.bf16.msra.mxu1 %v4744_v24  ;;  %v4751_v7 = vld [vmem:[%s6449_s1 + $0x36c] ss:$36 sps:$4 sm:$0xff]   ;;  %v4787_v24 = vld [vmem:[%s6449_s1 + $0x254] ss:$36 sps:$4 sm:$0xff]  }
  0x5e   : > { %4376 = vmatprep.subr.bf16.mxu1 %v4758_v29  ;;  %v4796_v29 = vld [vmem:[%s6449_s1 + $0x64] ss:$36 sps:$4 sm:$0xff]  }
  0x61   : > { %4377 = vmatpush3.bf16.msra.mxu1 %v4759_v30  ;;  %v4798_v30 = vld [vmem:[%s6449_s1 + $0x298] ss:$36 sps:$4 sm:$0xff]  }
  0x62   : > { %4378 = vmatprep.subr.bf16.mxu1 %v4772_v35  ;;  %v4805_v35 = vld [vmem:[%s6449_s1 + $0xa8] ss:$36 sps:$4 sm:$0xff]  }
  0x63   : > { %1790 = vmatmul.mubr.bf16.gmra.mrb[24].mxu0 %v4679_v12  ;;  %1919 = vmatmul.mubr.bf16.gmra.mrb[24].mxu1 %v4680_v13  ;;  %v4760_v12 = vld [vmem:[%s6449_s1 + $0x3b4] ss:$36 sps:$4 sm:$0xff]   ;;  %v4762_v13 = vld [vmem:[%s6449_s1 + $0x17c] ss:$36 sps:$4 sm:$0xff]  }
  0x64   : > { %1797 = vmatprep.mubr.bf16.mxu0 %v4683_v14  ;;  %1926 = vmatprep.mubr.bf16.mxu1 %v4685_v15  ;;  %v4764_v14 = vld [vmem:[%s6449_s1 + $0x3b0] ss:$36 sps:$4 sm:$0xff]   ;;  %v4765_v15 = vld [vmem:[%s6449_s1 + $0x178] ss:$36 sps:$4 sm:$0xff]  }
  0x65   : > { %4379 = vmatpush3.bf16.msra.mxu1 %v4774_v36  ;;  %v4807_v36 = vld [vmem:[%s6449_s1 + $0x32c] ss:$36 sps:$4 sm:$0xff]  }
  0x66   : > { %4380 = vmatprep.subr.bf16.mxu1 %v4775_v37  ;;  %v4809_v37 = vld [vmem:[%s6449_s1 + $0xf4] ss:$36 sps:$4 sm:$0xff]  }
  0x69   : > { %4381 = vmatpush3.bf16.msra.mxu1 %v4776_v39  ;;  %v4812_v39 = vld [vmem:[%s6449_s1 + $0xf0] ss:$36 sps:$4 sm:$0xff]  }
  0x6a   : > { %4382 = vmatprep.subr.bf16.mxu1 %v4783_v43  ;;  %v4818_v43 = vld [vmem:[%s6449_s1 + $0x138] ss:$36 sps:$4 sm:$0xff]  }
  0x6b   : > { %1798 = vmatmul.mubr.bf16.gmra.mrb[28].mxu0 %v4687_v19  ;;  %1927 = vmatmul.mubr.bf16.gmra.mrb[28].mxu1 %v4688_v20  ;;  %v4771_v19 = vld [vmem:[%s6449_s1 + $0x1c0] ss:$36 sps:$4 sm:$0xff]  }
  0x6c   : > { %1805 = vmatprep.mubr.bf16.mxu0 %v4691_v21  ;;  %1934 = vmatprep.mubr.bf16.mxu1 %v4693_v22  ;;  %v4777_v20 = vld [vmem:[%s6449_s1 + $0x444] ss:$36 sps:$4 sm:$0xff]   ;;  %v4779_v21 = vld [vmem:[%s6449_s1 + $0x20c] ss:$36 sps:$4 sm:$0xff]  }
  0x6d   : > { %4383 = vmatpush3.bf16.msra.mxu1 %v4784_v44  ;;  %v4781_v22 = vld [vmem:[%s6449_s1 + $0x440] ss:$36 sps:$4 sm:$0xff]  }
  0x6e   : > { %4384 = vmatprep.subr.bf16.mxu1 %v4785_v45  ;;  %v4820_v44 = vld [vmem:[%s6449_s1 + $0x3bc] ss:$36 sps:$4 sm:$0xff]   ;;  %v4822_v45 = vld [vmem:[%s6449_s1 + $0x184] ss:$36 sps:$4 sm:$0xff]  }
  0x71   : > { %4385 = vmatpush3.bf16.msra.mxu1 %v4786_v47  ;;  %v4825_v47 = vld [vmem:[%s6449_s1 + $0x180] ss:$36 sps:$4 sm:$0xff]  }
  0x73   : > { %1806 = vmatmul.mubr.bf16.gmra.mrb[32].mxu0 %v4695_v25  ;;  %1935 = vmatmul.mubr.bf16.gmra.mrb[32].mxu1 %v4696_v26  ;;  %v4791_v25 = vld [vmem:[%s6449_s1 + $0x1c] ss:$36 sps:$4 sm:$0xff]  }
  0x74   : > { %1813 = vmatprep.mubr.bf16.mxu0 %v4697_v27  ;;  %1942 = vmatprep.mubr.bf16.mxu1 %v4699_v28  ;;  %v4789_v26 = vld [vmem:[%s6449_s1 + $0x18] ss:$36 sps:$4 sm:$0xff]   ;;  %v4792_v27 = vld [vmem:[%s6449_s1 + $0x250] ss:$36 sps:$4 sm:$0xff]  }
  0x75   : > { %v4794_v28 = vld [vmem:[%s6449_s1 + $0x29c] ss:$36 sps:$4 sm:$0xff]  }
  0x7b   : > { %1814 = vmatmul.mubr.bf16.gmra.mrb[36].mxu0 %v4701_v31  ;;  %1943 = vmatmul.mubr.bf16.gmra.mrb[36].mxu1 %v4702_v32  ;;  %v4799_v31 = vld [vmem:[%s6449_s1 + $0x60] ss:$36 sps:$4 sm:$0xff]  }
  0x7c   : > { %1821 = vmatprep.mubr.bf16.mxu0 %v4705_v33  ;;  %1950 = vmatprep.mubr.bf16.mxu1 %v4707_v34  ;;  %v4800_v32 = vld [vmem:[%s6449_s1 + $0x2e4] ss:$36 sps:$4 sm:$0xff]   ;;  %v4802_v33 = vld [vmem:[%s6449_s1 + $0xac] ss:$36 sps:$4 sm:$0xff]  }
  0x7d   : > { %v4804_v34 = vld [vmem:[%s6449_s1 + $0x2e0] ss:$36 sps:$4 sm:$0xff]  }
  0x83   : > { %1822 = vmatmul.mubr.bf16.gmra.mrb[40].mxu0 %v4709_v38  ;;  %1951 = vmatmul.mubr.bf16.gmra.mrb[40].mxu1 %v4710_v40  ;;  %v4811_v38 = vld [vmem:[%s6449_s1 + $0x328] ss:$36 sps:$4 sm:$0xff]   ;;  %v4813_v40 = vld [vmem:[%s6449_s1 + $0x374] ss:$36 sps:$4 sm:$0xff]  }
  0x84   : > { %1829 = vmatprep.mubr.bf16.mxu0 %v4715_v41  ;;  %1958 = vmatprep.mubr.bf16.mxu1 %v4717_v42  ;;  %v4815_v41 = vld [vmem:[%s6449_s1 + $0x13c] ss:$36 sps:$4 sm:$0xff]   ;;  %v4817_v42 = vld [vmem:[%s6449_s1 + $0x370] ss:$36 sps:$4 sm:$0xff]  }
  0x8b   : > { %1830 = vmatmul.mubr.bf16.gmra.mrb[44].mxu0 %v4719_v46  ;;  %1959 = vmatmul.mubr.bf16.gmra.mrb[44].mxu1 %v4720_v48  ;;  %v4824_v46 = vld [vmem:[%s6449_s1 + $0x3b8] ss:$36 sps:$4 sm:$0xff]   ;;  %v4826_v48 = vld [vmem:[%s6449_s1 + $0x404] ss:$36 sps:$4 sm:$0xff]  }
  0x8c   : > { %1966 = vmatprep.mubr.bf16.mxu1 %v4721_v49  ;;  %2063 = vmatprep.mubr.bf16.mxu0 %v4725_v50  ;;  %v4828_v49 = vld [vmem:[%s6449_s1 + $0x1cc] ss:$36 sps:$4 sm:$0xff]   ;;  %v4830_v50 = vld [vmem:[%s6449_s1 + $0x400] ss:$36 sps:$4 sm:$0xff]  }
  0x93   : > { %1967 = vmatmul.mubr.bf16.gmra.mrb[48].mxu1 %v4726_v52  ;;  %2064 = vmatmul.mubr.bf16.vlgmr.msra.gmra.mrb[48].mxu0 %v4723_v51  ;;  %v4831_v51 = vld [vmem:[%s6449_s1 + $0x1c8] ss:$36 sps:$4 sm:$0xff]  }
  0x94   : > { %4507 = vmatpush3.bf16.msra.mxu0 %v5151_v16  ;;  %1974 = vmatprep.mubr.bf16.mxu1 %v4730_v53  ;;  %v4766_v16 = vld [vmem:[%s6449_s1 + $0x3fc] ss:$36 sps:$4 sm:$0xff]   ;;  %v4833_v52 = vld [vmem:[%s6449_s1 + $0x44c] ss:$36 sps:$4 sm:$0xff]   ;;  %v4835_v53 = vld [vmem:[%s6449_s1 + $0x214] ss:$36 sps:$4 sm:$0xff]  }
  0x95   : > { %2071 = vmatprep.mubr.bf16.mxu0 %v4732_v54  ;;  %4508 = vmatprep.subr.bf16.mxu0 %v4742_v55 }
  0x98   : > { %4509 = vmatpush3.bf16.msra.mxu0 %v4742_v55 }
  0x99   : > { %4510 = vmatprep.subr.bf16.mxu0 %v4757_v56 }
  0x9b   : > { %1975 = vmatmul.mubr.bf16.gmra.mrb[52].mxu1 %v4734_v57  ;;  %2072 = vmatmul.mubr.bf16.gmra.mrb[52].mxu0 %v4735_v58  ;;  %v4837_v57 = vld [vmem:[%s6449_s1 + $0x448] ss:$36 sps:$4 sm:$0xff]   ;;  %v4838_v58 = vld [vmem:[%s6449_s1 + $0x210] ss:$36 sps:$4 sm:$0xff]  }
  0x9c   : > { %1982 = vmatprep.mubr.bf16.mxu1 %v4736_v59  ;;  %2079 = vmatprep.mubr.bf16.mxu0 %v4738_v60 }
  0x9d   : > { %4511 = vmatpush3.bf16.msra.mxu0 %v4757_v56 }
  0x9e   : > { %4512 = vmatprep.subr.bf16.mxu0 %v4773_v61 }
  0xa1   : > { %4513 = vmatpush3.bf16.msra.mxu0 %v4773_v61 }
  0xa2   : > { %4514 = vmatprep.subr.bf16.mxu0 %v4793_v0 }
  0xa3   : > { %1983 = vmatmul.mubr.bf16.gmra.mrb[56].mxu1 %v4740_v62  ;;  %2080 = vmatmul.mubr.bf16.gmra.mrb[56].mxu0 %v4741_v63  ;;  %v4839_v62 = vld [vmem:[%s6449_s1 + $0x25c] ss:$36 sps:$4 sm:$0xff]  }
  0xa4   : > { %1990 = vmatprep.mubr.bf16.mxu1 %v4745_v1  ;;  %2087 = vmatprep.mubr.bf16.mxu0 %v4747_v2  ;;  %v4841_v63 = vld [vmem:[%s6449_s1 + $0x20] ss:$36 sps:$4 sm:$0xff]  }
  0xa5   : > { %4515 = vmatpush3.bf16.msra.mxu0 %v4793_v0 }
  0xa6   : > { %4516 = vmatprep.subr.bf16.mxu0 %v4806_v3 }
  0xa9   : > { %4517 = vmatpush3.bf16.msra.mxu0 %v4806_v3 }
  0xaa   : > { %4518 = vmatprep.subr.bf16.mxu0 %v4819_v6 }
  0xab   : > { %1991 = vmatmul.mubr.bf16.gmra.mrb[60].mxu1 %v4749_v4  ;;  %2088 = vmatmul.mubr.bf16.gmra.mrb[60].mxu0 %v4750_v5 }
  0xac   : > { %1998 = vmatprep.mubr.bf16.mxu1 %v4751_v7  ;;  %2095 = vmatprep.mubr.bf16.mxu0 %v4753_v8 }
  0xad   : > { %4519 = vmatpush3.bf16.msra.mxu0 %v4819_v6 }
  0xae   : > { %4520 = vmatprep.subr.bf16.mxu0 %v4832_v9 }
  0xb1   : > { %4521 = vmatpush3.bf16.msra.mxu0 %v4832_v9  ;;  %v4842_v9 = vld [vmem:[%s6449_s1 + $0x258] ss:$36 sps:$4 sm:$0xff]  }
  0xb3   : > { %1999 = vmatmul.mubr.bf16.gmra.mrb[64].mxu1 %v4755_v10  ;;  %2096 = vmatmul.mubr.bf16.gmra.mrb[64].mxu0 %v4756_v11  ;;  %v4843_v10 = vld [vmem:[%s6449_s1 + $0x68] ss:$36 sps:$4 sm:$0xff]  }
  0xb4   : > { %2006 = vmatprep.mubr.bf16.mxu1 %v4760_v12  ;;  %2103 = vmatprep.mubr.bf16.mxu0 %v4762_v13 }
  0xbb   : > { %2007 = vmatmul.mubr.bf16.gmra.mrb[68].mxu1 %v4764_v14  ;;  %2104 = vmatmul.mubr.bf16.gmra.mrb[68].mxu0 %v4765_v15  ;;  %v4844_v14 = vld [vmem:[%s6449_s1 + $0x2a4] ss:$36 sps:$4 sm:$0xff]   ;;  %v4846_v15 = vld [vmem:[%s6449_s1 + $0xb0] ss:$36 sps:$4 sm:$0xff]  }
  0xbc   : > { %2014 = vmatprep.mubr.bf16.mxu1 %v4766_v16  ;;  %2111 = vmatprep.mubr.bf16.mxu0 %v4768_v17 }
  0xc3   : > { %2015 = vmatmul.mubr.bf16.gmra.mrb[72].mxu1 %v4770_v18  ;;  %2112 = vmatmul.mubr.bf16.gmra.mrb[72].mxu0 %v4771_v19 }
  0xc4   : > { %2022 = vmatprep.mubr.bf16.mxu1 %v4777_v20  ;;  %2119 = vmatprep.mubr.bf16.mxu0 %v4779_v21 }
  0xcb   : > { %2023 = vmatmul.mubr.bf16.gmra.mrb[76].mxu1 %v4781_v22  ;;  %2120 = vmatmul.mubr.bf16.gmra.mrb[76].mxu0 %v4782_v23 }
  0xcc   : > { %2127 = vmatprep.mubr.bf16.mxu0 %v4787_v24  ;;  %2224 = vmatprep.mubr.bf16.mxu1 %v4791_v25  ;;  %v4847_v25 = vld [vmem:[%s6449_s1 + $0x2a0] ss:$36 sps:$4 sm:$0xff]  }
  0xd3   : > { %2128 = vmatmul.mubr.bf16.gmra.mrb[80].mxu0 %v4792_v27  ;;  %2225 = vmatmul.mubr.bf16.vlgmr.msra.gmra.mrb[80].mxu1 %v4789_v26  ;;  %v4848_v26 = vld [vmem:[%s6449_s1 + $0xf8] ss:$36 sps:$4 sm:$0xff]  }
  0xd4   : > { %2135 = vmatprep.mubr.bf16.mxu0 %v4794_v28  ;;  %2232 = vmatprep.mubr.bf16.mxu1 %v4796_v29 }
  0xdb   : > { %2136 = vmatmul.mubr.bf16.gmra.mrb[84].mxu0 %v4798_v30  ;;  %2233 = vmatmul.mubr.bf16.gmra.mrb[84].mxu1 %v4799_v31 }
  0xdc   : > { %2143 = vmatprep.mubr.bf16.mxu0 %v4800_v32  ;;  %2240 = vmatprep.mubr.bf16.mxu1 %v4802_v33  ;;  %v4849_v32 = vld [vmem:[%s6449_s1 + $0x2ec] ss:$36 sps:$4 sm:$0xff]   ;;  %v4851_v33 = vld [vmem:[%s6449_s1 + $0x140] ss:$36 sps:$4 sm:$0xff]  }
  0xe3   : > { %2144 = vmatmul.mubr.bf16.gmra.mrb[88].mxu0 %v4804_v34  ;;  %2241 = vmatmul.mubr.bf16.gmra.mrb[88].mxu1 %v4805_v35 }
  0xe4   : > { %2151 = vmatprep.mubr.bf16.mxu0 %v4807_v36  ;;  %2248 = vmatprep.mubr.bf16.mxu1 %v4809_v37 }
  0xeb   : > { %2152 = vmatmul.mubr.bf16.gmra.mrb[92].mxu0 %v4811_v38  ;;  %2249 = vmatmul.mubr.bf16.gmra.mrb[92].mxu1 %v4812_v39 }
  0xec   : > { %2159 = vmatprep.mubr.bf16.mxu0 %v4813_v40  ;;  %2256 = vmatprep.mubr.bf16.mxu1 %v4815_v41 }
  0xf3   : > { %2160 = vmatmul.mubr.bf16.gmra.mrb[96].mxu0 %v4817_v42  ;;  %2257 = vmatmul.mubr.bf16.gmra.mrb[96].mxu1 %v4818_v43  ;;  %v4852_v42 = vld [vmem:[%s6449_s1 + $0x2e8] ss:$36 sps:$4 sm:$0xff]  }
  0xf4   : > { %2167 = vmatprep.mubr.bf16.mxu0 %v4820_v44  ;;  %2264 = vmatprep.mubr.bf16.mxu1 %v4822_v45  ;;  %v4853_v43 = vld [vmem:[%s6449_s1 + $0x188] ss:$36 sps:$4 sm:$0xff]  }
  0xfb   : > { %2168 = vmatmul.mubr.bf16.gmra.mrb[100].mxu0 %v4824_v46  ;;  %2265 = vmatmul.mubr.bf16.gmra.mrb[100].mxu1 %v4825_v47 }
  0xfc   : > { %2175 = vmatprep.mubr.bf16.mxu0 %v4826_v48  ;;  %2272 = vmatprep.mubr.bf16.mxu1 %v4828_v49  ;;  %v4854_v48 = vld [vmem:[%s6449_s1 + $0x334] ss:$36 sps:$4 sm:$0xff]  }
  0xfd   : > { %v4856_v49 = vld [vmem:[%s6449_s1 + $0x1d0] ss:$36 sps:$4 sm:$0xff]  }
 0x103   : > { %2176 = vmatmul.mubr.bf16.gmra.mrb[104].mxu0 %v4830_v50  ;;  %2273 = vmatmul.mubr.bf16.gmra.mrb[104].mxu1 %v4831_v51 }
 0x104   : > { %2183 = vmatprep.mubr.bf16.mxu0 %v4833_v52  ;;  %2280 = vmatprep.mubr.bf16.mxu1 %v4835_v53 }
 0x106   : > { %v4050_v54 = vpop.f32.mrb[0].mxu0  ;;  %v4122_v55 = vpop.f32.mrb[0].mxu1 }
 0x107   : > { %v4051_v56 = vpop.f32.mrb[1].mxu0  ;;  %v4123_v59 = vpop.f32.mrb[1].mxu1 }
 0x108   : > { %v5422_v60 = vadd.f32 %v4051_v56, %v4050_v54  ;;  %v4053_v61 = vpop.f32.mrb[2].mxu0  ;;  %v5430_v0 = vadd.f32 %v4123_v59, %v4122_v55  ;;  %v4125_v1 = vpop.f32.mrb[2].mxu1  ;;  %v4858_v59 = vld [vmem:[%s6449_s1 + $0x218] ss:$36 sps:$4 sm:$0xff]  }
 0x109   : > { %v4054_v2 = vpop.f32.mrb[3].mxu0  ;;  %v4126_v3 = vpop.f32.mrb[3].mxu1 }
 0x10a   : > { %v5432_v4 = vadd.f32 %v4054_v2, %v4053_v61  ;;  %v5434_v5 = vadd.f32 %v4126_v3, %v4125_v1  ;;  %v4859_v2 = vld [vmem:[%s6449_s1 + $0x37c] ss:$36 sps:$4 sm:$0xff]  }
 0x10b   : > { %2184 = vmatmul.mubr.bf16.gmra.mrb[108].mxu0 %v4837_v57  ;;  %2281 = vmatmul.mubr.bf16.gmra.mrb[108].mxu1 %v4838_v58  ;;  %v4857_v58 = vld [vmem:[%s6449_s1 + $0x330] ss:$36 sps:$4 sm:$0xff]   ;;  %v4861_v3 = vld [vmem:[%s6449_s1 + $0x260] ss:$36 sps:$4 sm:$0xff]  }
 0x10c   : > { %2288 = vmatprep.mubr.bf16.mxu1 %v4839_v62  ;;  %4522 = vmatprep.mubr.bf16.mxu0 %v4841_v63 }
 0x10e   : > { %v4056_v6 = vpop.f32.mrb[4].mxu0  ;;  %v4128_v7 = vpop.f32.mrb[4].mxu1 }
 0x10f   : > { %v4057_v8 = vpop.f32.mrb[5].mxu0  ;;  %v4129_v11 = vpop.f32.mrb[5].mxu1 }
 0x110   : > { %v5442_v12 = vadd.f32 %v4057_v8, %v4056_v6  ;;  %v4059_v13 = vpop.f32.mrb[6].mxu0  ;;  %v5450_v16 = vadd.f32 %v4129_v11, %v4128_v7  ;;  %v4131_v17 = vpop.f32.mrb[6].mxu1 }
 0x111   : > { %v4060_v18 = vpop.f32.mrb[7].mxu0  ;;  %v4132_v19 = vpop.f32.mrb[7].mxu1 }
 0x112   : > { %v5452_v20 = vadd.f32 %v4060_v18, %v4059_v13  ;;  %v5454_v21 = vadd.f32 %v4132_v19, %v4131_v17  ;;  %v4862_v18 = vld [vmem:[%s6449_s1 + $0x378] ss:$36 sps:$4 sm:$0xff]  }
 0x113   : > { %2289 = vmatmul.mubr.bf16.gmra.mrb[112].mxu1 %v4842_v9  ;;  %4523 = vmatmul.mubr.bf16.vlgmr.msra.gmra.mrb[112].mxu0 %v4843_v10 }
 0x114   : > { %2296 = vmatprep.mubr.bf16.mxu1 %v4844_v14  ;;  %4526 = vmatprep.mubr.bf16.mxu0 %v4846_v15 }
 0x116   : > { %v4062_v22 = vpop.f32.mrb[8].mxu0  ;;  %v4134_v23 = vpop.f32.mrb[8].mxu1 }
 0x117   : > { %v4063_v24 = vpop.f32.mrb[9].mxu0  ;;  %v4135_v27 = vpop.f32.mrb[9].mxu1 }
 0x118   : > { %v5462_v28 = vadd.f32 %v4063_v24, %v4062_v22  ;;  %v4065_v29 = vpop.f32.mrb[10].mxu0  ;;  %v5464_v30 = vadd.f32 %v4135_v27, %v4134_v23  ;;  %v4137_v31 = vpop.f32.mrb[10].mxu1  ;;  %v4864_v24 = vld [vmem:[%s6449_s1 + $0x3c4] ss:$36 sps:$4 sm:$0xff]  }
 0x119   : > { %v4066_v34 = vpop.f32.mrb[11].mxu0  ;;  %v4138_v35 = vpop.f32.mrb[11].mxu1 }
 0x11a   : > { %v5472_v36 = vadd.f32 %v4066_v34, %v4065_v29  ;;  %v5474_v37 = vadd.f32 %v4138_v35, %v4137_v31 }
 0x11b   : > { %2297 = vmatmul.mubr.bf16.gmra.mrb[116].mxu1 %v4847_v25  ;;  %4527 = vmatmul.mubr.bf16.gmra.mrb[116].mxu0 %v4848_v26  ;;  %v4866_v25 = vld [vmem:[%s6449_s1 + $0x2f0] ss:$36 sps:$4 sm:$0xff]  }
 0x11c   : > { %2304 = vmatprep.mubr.bf16.mxu1 %v4849_v32  ;;  %4530 = vmatprep.mubr.bf16.mxu0 %v4851_v33 }
 0x11e   : > { %v4068_v38 = vpop.f32.mrb[12].mxu0  ;;  %v4140_v39 = vpop.f32.mrb[12].mxu1 }
 0x11f   : > { %v4069_v40 = vpop.f32.mrb[13].mxu0  ;;  %v4141_v41 = vpop.f32.mrb[13].mxu1 }
 0x120   : > { %v5482_v44 = vadd.f32 %v4069_v40, %v4068_v38  ;;  %v4071_v45 = vpop.f32.mrb[14].mxu0  ;;  %v5484_v46 = vadd.f32 %v4141_v41, %v4140_v39  ;;  %v4143_v47 = vpop.f32.mrb[14].mxu1  ;;  %v4867_v40 = vld [vmem:[%s6449_s1 + $0x3c0] ss:$36 sps:$4 sm:$0xff]  }
 0x121   : > { %v4072_v50 = vpop.f32.mrb[15].mxu0  ;;  %v4144_v51 = vpop.f32.mrb[15].mxu1 }
 0x122   : > { %v5492_v52 = vadd.f32 %v4072_v50, %v4071_v45  ;;  %v5494_v53 = vadd.f32 %v4144_v51, %v4143_v47  ;;  %v4869_v45 = vld [vmem:[%s6449_s1 + $0x40c] ss:$36 sps:$4 sm:$0xff]   ;;  %v4871_v47 = vld [vmem:[%s6449_s1 + $0x380] ss:$36 sps:$4 sm:$0xff]  }
 0x123   : > { %2305 = vmatmul.mubr.bf16.gmra.mrb[120].mxu1 %v4852_v42  ;;  %4531 = vmatmul.mubr.bf16.gmra.mrb[120].mxu0 %v4853_v43 }
 0x124   : > { %2312 = vmatprep.mubr.bf16.mxu1 %v4854_v48  ;;  %4534 = vmatprep.mubr.bf16.mxu0 %v4856_v49 }
 0x126   : > { %v4074_v54 = vpop.f32.mrb[16].mxu0  ;;  %v4162_v55 = vpop.f32.mrb[16].mxu1 }
 0x127   : > { %v4075_v56 = vpop.f32.mrb[17].mxu0  ;;  %v4163_v57 = vpop.f32.mrb[17].mxu1 }
 0x128   : > { %v5502_v61 = vadd.f32 %v4075_v56, %v4074_v54  ;;  %v4164_v62 = vadd.f32 %v4163_v57, %v4162_v55  ;;  %v4077_v63 = vpop.f32.mrb[18].mxu0  ;;  %v4165_v1 = vpop.f32.mrb[18].mxu1 }
 0x129   : > { %v4078_v6 = vpop.f32.mrb[19].mxu0  ;;  %v4166_v7 = vpop.f32.mrb[19].mxu1 }
 0x12a   : > { %v5511_v8 = vadd.f32 %v4164_v62, %v5422_v60  ;;  %v5513_v9 = vadd.f32 %v4078_v6, %v4077_v63  ;;  %v4167_v10 = vadd.f32 %v4166_v7, %v4165_v1  ;;  %v4863_v60 = vld [vmem:[%s6449_s1 + $0x2a8] ss:$36 sps:$4 sm:$0xff]   ;;  %v4876_v6 = vld [vmem:[%s6449_s1 + $0x410] ss:$36 sps:$4 sm:$0xff]  }
 0x12b   : > { %2313 = vmatmul.mubr.bf16.gmra.mrb[124].mxu1 %v4857_v58  ;;  %4535 = vmatmul.mubr.bf16.gmra.mrb[124].mxu0 %v4858_v59  ;;  %v4872_v62 = vld [vmem:[%s6449_s1 + $0x408] ss:$36 sps:$4 sm:$0xff]  }
 0x12c   : > { %v5516_v11 = vadd.f32 %v4167_v10, %v5432_v4  ;;  %2320 = vmatprep.mubr.bf16.mxu1 %v4859_v2  ;;  %4538 = vmatprep.mubr.bf16.mxu0 %v4861_v3  ;;  %v4874_v3 = vld [vmem:[%s6449_s1 + $0x454] ss:$36 sps:$4 sm:$0xff]  }
 0x12e   : > { %v4080_v13 = vpop.f32.mrb[20].mxu0  ;;  %v4168_v14 = vpop.f32.mrb[20].mxu1 }
 0x12f   : > { %v4081_v15 = vpop.f32.mrb[21].mxu0  ;;  %v4169_v17 = vpop.f32.mrb[21].mxu1 }
 0x130   : > { %v5524_v19 = vadd.f32 %v4081_v15, %v4080_v13  ;;  %v4170_v22 = vadd.f32 %v4169_v17, %v4168_v14  ;;  %v4083_v23 = vpop.f32.mrb[22].mxu0  ;;  %v4171_v4 = vpop.f32.mrb[22].mxu1 }
 0x131   : > { %v4084_v26 = vpop.f32.mrb[23].mxu0  ;;  %v4172_v27 = vpop.f32.mrb[23].mxu1 }
 0x132   : > { %v5533_v29 = vadd.f32 %v4170_v22, %v5442_v12  ;;  %v5535_v31 = vadd.f32 %v4084_v26, %v4083_v23  ;;  %v4173_v32 = vadd.f32 %v4172_v27, %v4171_v4  ;;  %v4868_v12 = vld [vmem:[%s6449_s1 + $0x338] ss:$36 sps:$4 sm:$0xff]   ;;  %v4877_v4 = vld [vmem:[%s6449_s1 + $0x450] ss:$36 sps:$4 sm:$0xff]  }
 0x133   : > { %2321 = vmatmul.mubr.bf16.gmra.mrb[128].mxu1 %v4862_v18  ;;  %4539 = vmatmul.mubr.bf16.gmra.mrb[128].mxu0 %v4863_v60 }
 0x134   : > { %v5538_v33 = vadd.f32 %v4173_v32, %v5452_v20  ;;  %2328 = vmatprep.mubr.bf16.mxu1 %v4864_v24  ;;  %4542 = vmatprep.mubr.bf16.mxu0 %v4866_v25 }
 0x136   : > { %v4086_v34 = vpop.f32.mrb[24].mxu0  ;;  %v4174_v35 = vpop.f32.mrb[24].mxu1 }
 0x137   : > { %v4087_v38 = vpop.f32.mrb[25].mxu0  ;;  %v4175_v39 = vpop.f32.mrb[25].mxu1 }
 0x138   : > { %v5546_v41 = vadd.f32 %v4087_v38, %v4086_v34  ;;  %v4176_v42 = vadd.f32 %v4175_v39, %v4174_v35  ;;  %v4089_v43 = vpop.f32.mrb[26].mxu0  ;;  %v4177_v20 = vpop.f32.mrb[26].mxu1 }
 0x139   : > { %v4090_v48 = vpop.f32.mrb[27].mxu0  ;;  %v4178_v49 = vpop.f32.mrb[27].mxu1 }
 0x13a   : > { %v5555_v50 = vadd.f32 %v4176_v42, %v5462_v28  ;;  %v5557_v51 = vadd.f32 %v4090_v48, %v4089_v43  ;;  %v4179_v54 = vadd.f32 %v4178_v49, %v4177_v20  ;;  %v4873_v28 = vld [vmem:[%s6449_s1 + $0x3c8] ss:$36 sps:$4 sm:$0xff]  }
 0x13b   : > { %2329 = vmatmul.mubr.bf16.gmra.mrb[132].mxu1 %v4867_v40  ;;  %4543 = vmatmul.mubr.bf16.gmra.mrb[132].mxu0 %v4868_v12 }
 0x13c   : > { %v5560_v55 = vadd.f32 %v4179_v54, %v5472_v36  ;;  %2336 = vmatprep.mubr.bf16.mxu1 %v4869_v45  ;;  %4546 = vmatprep.mubr.bf16.mxu0 %v4871_v47 }
 0x13e   : > { %v4092_v56 = vpop.f32.mrb[28].mxu0  ;;  %v4180_v57 = vpop.f32.mrb[28].mxu1 }
 0x13f   : > { %v4093_v58 = vpop.f32.mrb[29].mxu0  ;;  %v4181_v59 = vpop.f32.mrb[29].mxu1 }
 0x140   : > { %v5568_v63 = vadd.f32 %v4093_v58, %v4092_v56  ;;  %v4182_v1 = vadd.f32 %v4181_v59, %v4180_v57  ;;  %v4095_v2 = vpop.f32.mrb[30].mxu0  ;;  %v4183_v36 = vpop.f32.mrb[30].mxu1 }
 0x141   : > { %v4096_v7 = vpop.f32.mrb[31].mxu0  ;;  %v4184_v10 = vpop.f32.mrb[31].mxu1 }
 0x142   : > { %v5577_v13 = vadd.f32 %v4182_v1, %v5482_v44  ;;  %v5579_v14 = vadd.f32 %v4096_v7, %v4095_v2  ;;  %v4185_v15 = vadd.f32 %v4184_v10, %v4183_v36  ;;  %v4878_v44 = vld [vmem:[%s6449_s1 + $0x458] ss:$36 sps:$4 sm:$0xff]  }
 0x143   : > { %2337 = vmatmul.mubr.bf16.gmra.mrb[136].mxu1 %v4872_v62  ;;  %4547 = vmatmul.mubr.bf16.gmra.mrb[136].mxu0 %v4873_v28 }
 0x144   : > { %v5582_v17 = vadd.f32 %v4185_v15, %v5492_v52  ;;  %2344 = vmatprep.mubr.bf16.mxu1 %v4874_v3  ;;  %4550 = vmatprep.mubr.bf16.mxu0 %v4876_v6 }
 0x146   : > { %v4098_v18 = vpop.f32.mrb[32].mxu0  ;;  %v4186_v60 = vpop.f32.mrb[32].mxu1 }
 0x147   : > { %v4099_v22 = vpop.f32.mrb[33].mxu0  ;;  %v4187_v23 = vpop.f32.mrb[33].mxu1 }
 0x148   : > { %v5590_v24 = vadd.f32 %v4099_v22, %v4098_v18  ;;  %v4188_v25 = vadd.f32 %v4187_v23, %v4186_v60  ;;  %v4101_v26 = vpop.f32.mrb[34].mxu0  ;;  %v4189_v52 = vpop.f32.mrb[34].mxu1 }
 0x149   : > { %v4102_v27 = vpop.f32.mrb[35].mxu0  ;;  %v4190_v32 = vpop.f32.mrb[35].mxu1 }
 0x14a   : > { %v5593_v34 = vadd.f32 %v4188_v25, %v5502_v61  ;;  %v4103_v35 = vadd.f32 %v4102_v27, %v4101_v26  ;;  %v4191_v38 = vadd.f32 %v4190_v32, %v4189_v52 }
 0x14b   : > { %2345 = vmatmul.mubr.bf16.gmra.mrb[140].mxu1 %v4877_v4  ;;  %4551 = vmatmul.mubr.bf16.gmra.mrb[140].mxu0 %v4878_v44 }
 0x14c   : > { %v5596_v39 = vadd.f32 %v4191_v38, %v5513_v9 }
 0x14e   : > { %v4104_v40 = vpop.f32.mrb[36].mxu0  ;;  %v4192_v12 = vpop.f32.mrb[36].mxu1 }
 0x14f   : > { %v4105_v42 = vpop.f32.mrb[37].mxu0  ;;  %v4193_v43 = vpop.f32.mrb[37].mxu1 }
 0x150   : > { %v5598_v20 = vadd.f32 %v4105_v42, %v4104_v40  ;;  %v4194_v45 = vadd.f32 %v4193_v43, %v4192_v12  ;;  %v4107_v47 = vpop.f32.mrb[38].mxu0  ;;  %v4195_v48 = vpop.f32.mrb[38].mxu1 }
 0x151   : > { %v4108_v49 = vpop.f32.mrb[39].mxu0  ;;  %v4196_v54 = vpop.f32.mrb[39].mxu1 }
 0x152   : > { %v5601_v61 = vadd.f32 %v4194_v45, %v5524_v19  ;;  %v4109_v56 = vadd.f32 %v4108_v49, %v4107_v47  ;;  %v4197_v57 = vadd.f32 %v4196_v54, %v4195_v48 }
 0x154   : > { %v5604_v58 = vadd.f32 %v4197_v57, %v5535_v31 }
 0x156   : > { %v4110_v9 = vpop.f32.mrb[40].mxu0  ;;  %v4198_v59 = vpop.f32.mrb[40].mxu1 }
 0x157   : > { %v4111_v62 = vpop.f32.mrb[41].mxu0  ;;  %v4199_v28 = vpop.f32.mrb[41].mxu1 }
 0x158   : > { %v5606_v1 = vadd.f32 %v4111_v62, %v4110_v9  ;;  %v4200_v2 = vadd.f32 %v4199_v28, %v4198_v59  ;;  %v4113_v36 = vpop.f32.mrb[42].mxu0  ;;  %v4201_v3 = vpop.f32.mrb[42].mxu1 }
 0x159   : > { %v4114_v6 = vpop.f32.mrb[43].mxu0  ;;  %v4202_v7 = vpop.f32.mrb[43].mxu1 }
 0x15a   : > { %v5609_v10 = vadd.f32 %v4200_v2, %v5546_v41  ;;  %v5611_v19 = vadd.f32 %v4114_v6, %v4113_v36  ;;  %v4203_v15 = vadd.f32 %v4202_v7, %v4201_v3 }
 0x15c   : > { %v5614_v31 = vadd.f32 %v4203_v15, %v5557_v51 }
 0x15e   : > { %v4116_v18 = vpop.f32.mrb[44].mxu0  ;;  %v4204_v60 = vpop.f32.mrb[44].mxu1 }
 0x15f   : > { %v4117_v22 = vpop.f32.mrb[45].mxu0  ;;  %v4205_v23 = vpop.f32.mrb[45].mxu1 }
 0x160   : > { %v5616_v4 = vadd.f32 %v4117_v22, %v4116_v18  ;;  %v4206_v44 = vadd.f32 %v4205_v23, %v4204_v60  ;;  %v4119_v25 = vpop.f32.mrb[46].mxu0  ;;  %v4207_v26 = vpop.f32.mrb[46].mxu1 }
 0x161   : > { %v4120_v52 = vpop.f32.mrb[47].mxu0  ;;  %v4208_v27 = vpop.f32.mrb[47].mxu1 }
 0x162   : > { %v5619_v41 = vadd.f32 %v4206_v44, %v5568_v63  ;;  %v5621_v32 = vadd.f32 %v4120_v52, %v4119_v25  ;;  %v4209_v38 = vadd.f32 %v4208_v27, %v4207_v26 }
 0x164   : > { %v5624_v51 = vadd.f32 %v4209_v38, %v5579_v14 }
 0x166   : > { %v4210_v40 = vpop.f32.mrb[48].mxu1  ;;  %v4274_v12 = vpop.f32.mrb[48].mxu0 }
 0x167   : > { %v4211_v42 = vpop.f32.mrb[49].mxu1  ;;  %v4275_v43 = vpop.f32.mrb[49].mxu0 }
 0x168   : > { %v4212_v45 = vadd.f32 %v4211_v42, %v4210_v40  ;;  %v4276_v47 = vadd.f32 %v4275_v43, %v4274_v12  ;;  %v4213_v48 = vpop.f32.mrb[50].mxu1  ;;  %v4277_v49 = vpop.f32.mrb[50].mxu0 }
 0x169   : > { %v4214_v54 = vpop.f32.mrb[51].mxu1  ;;  %v4278_v57 = vpop.f32.mrb[51].mxu0 }
 0x16a   : > { %v5627_v9 = vadd.f32 %v4212_v45, %v5590_v24  ;;  %v5630_v63 = vadd.f32 %v4276_v47, %v5511_v8  ;;  %v4215_v59 = vadd.f32 %v4214_v54, %v4213_v48  ;;  %v4279_v62 = vadd.f32 %v4278_v57, %v4277_v49 }
 0x16c   : > { %v5632_v14 = vadd.f32 %v4215_v59, %v4103_v35  ;;  %v5635_v28 = vadd.f32 %v4279_v62, %v5516_v11 }
 0x16e   : > { %v4216_v2 = vpop.f32.mrb[52].mxu1  ;;  %v4280_v36 = vpop.f32.mrb[52].mxu0 }
 0x16f   : > { %v4217_v3 = vpop.f32.mrb[53].mxu1  ;;  %v4281_v6 = vpop.f32.mrb[53].mxu0 }
 0x170   : > { %v4218_v7 = vadd.f32 %v4217_v3, %v4216_v2  ;;  %v4282_v15 = vadd.f32 %v4281_v6, %v4280_v36  ;;  %v4219_v18 = vpop.f32.mrb[54].mxu1  ;;  %v4283_v60 = vpop.f32.mrb[54].mxu0 }
 0x171   : > { %v4220_v24 = vpop.f32.mrb[55].mxu1  ;;  %v4284_v22 = vpop.f32.mrb[55].mxu0 }
 0x172   : > { %v5638_v8 = vadd.f32 %v4218_v7, %v5598_v20  ;;  %v5641_v23 = vadd.f32 %v4282_v15, %v5533_v29  ;;  %v4221_v35 = vadd.f32 %v4220_v24, %v4219_v18  ;;  %v4285_v44 = vadd.f32 %v4284_v22, %v4283_v60 }
 0x174   : > { %v5643_v11 = vadd.f32 %v4221_v35, %v4109_v56  ;;  %v5646_v25 = vadd.f32 %v4285_v44, %v5538_v33 }
 0x176   : > { %v4222_v26 = vpop.f32.mrb[56].mxu1  ;;  %v4286_v52 = vpop.f32.mrb[56].mxu0 }
 0x177   : > { %v4223_v27 = vpop.f32.mrb[57].mxu1  ;;  %v4287_v38 = vpop.f32.mrb[57].mxu0 }
 0x178   : > { %v4224_v40 = vadd.f32 %v4223_v27, %v4222_v26  ;;  %v4288_v12 = vadd.f32 %v4287_v38, %v4286_v52  ;;  %v4225_v42 = vpop.f32.mrb[58].mxu1  ;;  %v4289_v43 = vpop.f32.mrb[58].mxu0 }
 0x179   : > { %v4226_v20 = vpop.f32.mrb[59].mxu1  ;;  %v4290_v45 = vpop.f32.mrb[59].mxu0 }
 0x17a   : > { %v5649_v29 = vadd.f32 %v4224_v40, %v5606_v1  ;;  %v5652_v47 = vadd.f32 %v4288_v12, %v5555_v50  ;;  %v4227_v56 = vadd.f32 %v4226_v20, %v4225_v42  ;;  %v4291_v48 = vadd.f32 %v4290_v45, %v4289_v43 }
 0x17c   : > { %v5655_v33 = vadd.f32 %v4227_v56, %v5611_v19  ;;  %v5658_v49 = vadd.f32 %v4291_v48, %v5560_v55 }
 0x17e   : > { %v4228_v54 = vpop.f32.mrb[60].mxu1  ;;  %v4292_v57 = vpop.f32.mrb[60].mxu0 }
 0x17f   : > { %v4229_v59 = vpop.f32.mrb[61].mxu1  ;;  %v4293_v62 = vpop.f32.mrb[61].mxu0 }
 0x180   : > { %v4230_v2 = vadd.f32 %v4229_v59, %v4228_v54  ;;  %v4294_v36 = vadd.f32 %v4293_v62, %v4292_v57  ;;  %v4231_v3 = vpop.f32.mrb[62].mxu1  ;;  %v4295_v1 = vpop.f32.mrb[62].mxu0 }
 0x181   : > { %v4232_v6 = vpop.f32.mrb[63].mxu1  ;;  %v4296_v7 = vpop.f32.mrb[63].mxu0 }
 0x182   : > { %v5661_v50 = vadd.f32 %v4230_v2, %v5616_v4  ;;  %v5664_v15 = vadd.f32 %v4294_v36, %v5577_v13  ;;  %v4233_v19 = vadd.f32 %v4232_v6, %v4231_v3  ;;  %v4297_v18 = vadd.f32 %v4296_v7, %v4295_v1 }
 0x184   : > { %v5667_v55 = vadd.f32 %v4233_v19, %v5621_v32  ;;  %v5670_v60 = vadd.f32 %v4297_v18, %v5582_v17 }
 0x186   : > { %v4234_v24 = vpop.f32.mrb[64].mxu1  ;;  %v4298_v22 = vpop.f32.mrb[64].mxu0 }
 0x187   : > { %v4235_v35 = vpop.f32.mrb[65].mxu1  ;;  %v4299_v44 = vpop.f32.mrb[65].mxu0 }
 0x188   : > { %v4236_v26 = vadd.f32 %v4235_v35, %v4234_v24  ;;  %v4300_v52 = vadd.f32 %v4299_v44, %v4298_v22  ;;  %v4237_v27 = vpop.f32.mrb[66].mxu1  ;;  %v4301_v4 = vpop.f32.mrb[66].mxu0 }
 0x189   : > { %v4238_v38 = vpop.f32.mrb[67].mxu1  ;;  %v4302_v40 = vpop.f32.mrb[67].mxu0 }
 0x18a   : > { %v5673_v13 = vadd.f32 %v4236_v26, %v5430_v0  ;;  %v5676_v12 = vadd.f32 %v4300_v52, %v5593_v34  ;;  %v4239_v32 = vadd.f32 %v4238_v38, %v4237_v27  ;;  %v4303_v42 = vadd.f32 %v4302_v40, %v4301_v4 }
 0x18c   : > { %v5679_v17 = vadd.f32 %v4239_v32, %v5434_v5  ;;  %v5682_v43 = vadd.f32 %v4303_v42, %v5596_v39 }
 0x18e   : > { %v4240_v20 = vpop.f32.mrb[68].mxu1  ;;  %v4304_v45 = vpop.f32.mrb[68].mxu0 }
 0x18f   : > { %v4241_v56 = vpop.f32.mrb[69].mxu1  ;;  %v4305_v48 = vpop.f32.mrb[69].mxu0 }
 0x190   : > { %v4242_v54 = vadd.f32 %v4241_v56, %v4240_v20  ;;  %v4306_v57 = vadd.f32 %v4305_v48, %v4304_v45  ;;  %v4243_v59 = vpop.f32.mrb[70].mxu1  ;;  %v4307_v0 = vpop.f32.mrb[70].mxu0 }
 0x191   : > { %v4244_v62 = vpop.f32.mrb[71].mxu1  ;;  %v4308_v2 = vpop.f32.mrb[71].mxu0 }
 0x192   : > { %v5685_v34 = vadd.f32 %v4242_v54, %v5450_v16  ;;  %v5688_v36 = vadd.f32 %v4306_v57, %v5601_v61  ;;  %v4245_v5 = vadd.f32 %v4244_v62, %v4243_v59  ;;  %v4309_v3 = vadd.f32 %v4308_v2, %v4307_v0 }
 0x194   : > { %v5691_v39 = vadd.f32 %v4245_v5, %v5454_v21  ;;  %v5694_v1 = vadd.f32 %v4309_v3, %v5604_v58 }
 0x196   : > { %v4246_v6 = vpop.f32.mrb[72].mxu1  ;;  %v4310_v7 = vpop.f32.mrb[72].mxu0 }
 0x197   : > { %v4247_v19 = vpop.f32.mrb[73].mxu1  ;;  %v4311_v18 = vpop.f32.mrb[73].mxu0 }
 0x198   : > { %v4248_v24 = vadd.f32 %v4247_v19, %v4246_v6  ;;  %v4312_v22 = vadd.f32 %v4311_v18, %v4310_v7  ;;  %v4249_v35 = vpop.f32.mrb[74].mxu1  ;;  %v4313_v16 = vpop.f32.mrb[74].mxu0 }
 0x199   : > { %v4250_v44 = vpop.f32.mrb[75].mxu1  ;;  %v4314_v26 = vpop.f32.mrb[75].mxu0 }
 0x19a   : > { %v5697_v61 = vadd.f32 %v4248_v24, %v5464_v30  ;;  %v5700_v52 = vadd.f32 %v4312_v22, %v5609_v10  ;;  %v4251_v21 = vadd.f32 %v4250_v44, %v4249_v35  ;;  %v4315_v27 = vadd.f32 %v4314_v26, %v4313_v16 }
 0x19c   : > { %v5703_v58 = vadd.f32 %v4251_v21, %v5474_v37  ;;  %v5706_v4 = vadd.f32 %v4315_v27, %v5614_v31 }
 0x19e   : > { %v4252_v38 = vpop.f32.mrb[76].mxu1  ;;  %v4316_v40 = vpop.f32.mrb[76].mxu0 }
 0x19f   : > { %v4253_v32 = vpop.f32.mrb[77].mxu1  ;;  %v4317_v42 = vpop.f32.mrb[77].mxu0 }
 0x1a0   : > { %v4254_v20 = vadd.f32 %v4253_v32, %v4252_v38  ;;  %v4318_v45 = vadd.f32 %v4317_v42, %v4316_v40  ;;  %v4255_v56 = vpop.f32.mrb[78].mxu1  ;;  %v4319_v30 = vpop.f32.mrb[78].mxu0 }
 0x1a1   : > { %v4256_v48 = vpop.f32.mrb[79].mxu1  ;;  %v4320_v54 = vpop.f32.mrb[79].mxu0 }
 0x1a2   : > { %v5709_v10 = vadd.f32 %v4254_v20, %v5484_v46  ;;  %v5712_v57 = vadd.f32 %v4318_v45, %v5619_v41  ;;  %v4257_v37 = vadd.f32 %v4256_v48, %v4255_v56  ;;  %v4321_v59 = vadd.f32 %v4320_v54, %v4319_v30 }
 0x1a4   : > { %v5715_v31 = vadd.f32 %v4257_v37, %v5494_v53  ;;  %v5718_v0 = vadd.f32 %v4321_v59, %v5624_v51 }
 0x1a6   : > { %v4322_v62 = vpop.f32.mrb[80].mxu0  ;;  %v4386_v2 = vpop.f32.mrb[80].mxu1 }
 0x1a7   : > { %v4323_v5 = vpop.f32.mrb[81].mxu0  ;;  %v4387_v3 = vpop.f32.mrb[81].mxu1 }
 0x1a8   : > { %v4324_v6 = vadd.f32 %v4323_v5, %v4322_v62  ;;  %v4388_v7 = vadd.f32 %v4387_v3, %v4386_v2  ;;  %v4325_v19 = vpop.f32.mrb[82].mxu0  ;;  %v4389_v46 = vpop.f32.mrb[82].mxu1 }
 0x1a9   : > { %v4326_v18 = vpop.f32.mrb[83].mxu0  ;;  %v4390_v24 = vpop.f32.mrb[83].mxu1 }
 0x1aa   : > { %v5721_v41 = vadd.f32 %v4324_v6, %v5627_v9  ;;  %v4327_v22 = vadd.f32 %v4326_v18, %v4325_v19  ;;  %v4391_v35 = vadd.f32 %v4390_v24, %v4389_v46  ;;  %v5724_v53 = vadd.f32 %v4388_v7, %v5630_v63 }
 0x1ac   : > { %v5727_v51 = vadd.f32 %v4327_v22, %v5632_v14  ;;  %v5730_v16 = vadd.f32 %v4391_v35, %v5635_v28 }
 0x1ae   : > { %v4328_v44 = vpop.f32.mrb[84].mxu0  ;;  %v4392_v26 = vpop.f32.mrb[84].mxu1 }
 0x1af   : > { %v4329_v21 = vpop.f32.mrb[85].mxu0  ;;  %v4393_v27 = vpop.f32.mrb[85].mxu1 }
 0x1b0   : > { %v4330_v38 = vadd.f32 %v4329_v21, %v4328_v44  ;;  %v4394_v40 = vadd.f32 %v4393_v27, %v4392_v26  ;;  %v4331_v32 = vpop.f32.mrb[86].mxu0  ;;  %v4395_v9 = vpop.f32.mrb[86].mxu1 }
 0x1b1   : > { %v4332_v42 = vpop.f32.mrb[87].mxu0  ;;  %v4396_v20 = vpop.f32.mrb[87].mxu1 }
 0x1b2   : > { %v5733_v45 = vadd.f32 %v4330_v38, %v5638_v8  ;;  %v4333_v63 = vadd.f32 %v4332_v42, %v4331_v32  ;;  %v4397_v56 = vadd.f32 %v4396_v20, %v4395_v9  ;;  %v5736_v14 = vadd.f32 %v4394_v40, %v5641_v23 }
 0x1b4   : > { %v5739_v28 = vadd.f32 %v4333_v63, %v5643_v11  ;;  %v5742_v30 = vadd.f32 %v4397_v56, %v5646_v25 }
 0x1b6   : > { %v4334_v48 = vpop.f32.mrb[88].mxu0  ;;  %v4398_v54 = vpop.f32.mrb[88].mxu1 }
 0x1b7   : > { %v4335_v37 = vpop.f32.mrb[89].mxu0  ;;  %v4399_v59 = vpop.f32.mrb[89].mxu1 }
 0x1b8   : > { %v4336_v62 = vadd.f32 %v4335_v37, %v4334_v48  ;;  %v4400_v2 = vadd.f32 %v4399_v59, %v4398_v54  ;;  %v4337_v5 = vpop.f32.mrb[90].mxu0  ;;  %v4401_v8 = vpop.f32.mrb[90].mxu1 }
 0x1b9   : > { %v4338_v3 = vpop.f32.mrb[91].mxu0  ;;  %v4402_v6 = vpop.f32.mrb[91].mxu1 }
 0x1ba   : > { %v5745_v7 = vadd.f32 %v4336_v62, %v5649_v29  ;;  %v4339_v23 = vadd.f32 %v4338_v3, %v4337_v5  ;;  %v4403_v19 = vadd.f32 %v4402_v6, %v4401_v8  ;;  %v5748_v11 = vadd.f32 %v4400_v2, %v5652_v47 }
 0x1bc   : > { %v5751_v25 = vadd.f32 %v4339_v23, %v5655_v33  ;;  %v5754_v46 = vadd.f32 %v4403_v19, %v5658_v49 }
 0x1be   : > { %v4340_v18 = vpop.f32.mrb[92].mxu0  ;;  %v4404_v24 = vpop.f32.mrb[92].mxu1 }
 0x1bf   : > { %v4341_v22 = vpop.f32.mrb[93].mxu0  ;;  %v4405_v35 = vpop.f32.mrb[93].mxu1 }
 0x1c0   : > { %v4342_v44 = vadd.f32 %v4341_v22, %v4340_v18  ;;  %v4406_v26 = vadd.f32 %v4405_v35, %v4404_v24  ;;  %v4343_v21 = vpop.f32.mrb[94].mxu0  ;;  %v4407_v29 = vpop.f32.mrb[94].mxu1 }
 0x1c1   : > { %v4344_v27 = vpop.f32.mrb[95].mxu0  ;;  %v4408_v38 = vpop.f32.mrb[95].mxu1 }
 0x1c2   : > { %v5757_v40 = vadd.f32 %v4342_v44, %v5661_v50  ;;  %v4345_v47 = vadd.f32 %v4344_v27, %v4343_v21  ;;  %v4409_v32 = vadd.f32 %v4408_v38, %v4407_v29  ;;  %v5760_v33 = vadd.f32 %v4406_v26, %v5664_v15 }
 0x1c4   : > { %v5763_v49 = vadd.f32 %v4345_v47, %v5667_v55  ;;  %v5766_v9 = vadd.f32 %v4409_v32, %v5670_v60 }
 0x1c6   : > { %v4346_v42 = vpop.f32.mrb[96].mxu0  ;;  %v4410_v20 = vpop.f32.mrb[96].mxu1 }
 0x1c7   : > { %v4347_v63 = vpop.f32.mrb[97].mxu0  ;;  %v4411_v56 = vpop.f32.mrb[97].mxu1 }
 0x1c8   : > { %v4348_v48 = vadd.f32 %v4347_v63, %v4346_v42  ;;  %v4412_v54 = vadd.f32 %v4411_v56, %v4410_v20  ;;  %v4349_v37 = vpop.f32.mrb[98].mxu0  ;;  %v4413_v50 = vpop.f32.mrb[98].mxu1 }
 0x1c9   : > { %v4350_v59 = vpop.f32.mrb[99].mxu0  ;;  %v4414_v62 = vpop.f32.mrb[99].mxu1 }
 0x1ca   : > { %v5769_v2 = vadd.f32 %v4348_v48, %v5673_v13  ;;  %v4351_v15 = vadd.f32 %v4350_v59, %v4349_v37  ;;  %v4415_v5 = vadd.f32 %v4414_v62, %v4413_v50  ;;  %v5772_v55 = vadd.f32 %v4412_v54, %v5676_v12 }
 0x1cc   : > { %v5775_v60 = vadd.f32 %v4351_v15, %v5679_v17  ;;  %v5778_v8 = vadd.f32 %v4415_v5, %v5682_v43 }
 0x1ce   : > { %v4352_v3 = vpop.f32.mrb[100].mxu0  ;;  %v4416_v6 = vpop.f32.mrb[100].mxu1 }
 0x1cf   : > { %v4353_v23 = vpop.f32.mrb[101].mxu0  ;;  %v4417_v19 = vpop.f32.mrb[101].mxu1 }
 0x1d0   : > { %v4354_v18 = vadd.f32 %v4353_v23, %v4352_v3  ;;  %v4418_v24 = vadd.f32 %v4417_v19, %v4416_v6  ;;  %v4355_v22 = vpop.f32.mrb[102].mxu0  ;;  %v4419_v13 = vpop.f32.mrb[102].mxu1 }
 0x1d1   : > { %v4356_v35 = vpop.f32.mrb[103].mxu0  ;;  %v4420_v44 = vpop.f32.mrb[103].mxu1 }
 0x1d2   : > { %v5781_v26 = vadd.f32 %v4354_v18, %v5685_v34  ;;  %v4357_v12 = vadd.f32 %v4356_v35, %v4355_v22  ;;  %v4421_v21 = vadd.f32 %v4420_v44, %v4419_v13  ;;  %v5784_v17 = vadd.f32 %v4418_v24, %v5688_v36 }
 0x1d4   : > { %v5787_v43 = vadd.f32 %v4357_v12, %v5691_v39  ;;  %v5790_v29 = vadd.f32 %v4421_v21, %v5694_v1 }
 0x1d6   : > { %v4358_v27 = vpop.f32.mrb[104].mxu0  ;;  %v4422_v38 = vpop.f32.mrb[104].mxu1 }
 0x1d7   : > { %v4359_v47 = vpop.f32.mrb[105].mxu0  ;;  %v4423_v32 = vpop.f32.mrb[105].mxu1 }
 0x1d8   : > { %v4360_v42 = vadd.f32 %v4359_v47, %v4358_v27  ;;  %v4424_v20 = vadd.f32 %v4423_v32, %v4422_v38  ;;  %v4361_v63 = vpop.f32.mrb[106].mxu0  ;;  %v4425_v34 = vpop.f32.mrb[106].mxu1  ;;  %v4967_v27 = vmov 0.0  }
 0x1d9   : > { %v4362_v56 = vpop.f32.mrb[107].mxu0  ;;  %v4426_v48 = vpop.f32.mrb[107].mxu1  ;;  %175 = vst.msk [vmem:[#allocation3 + $0x10] sm:$0xff] %vm172_vm0, %v4967_v27  ;;  %173 = vst.msk [vmem:[#allocation3] sm:$0xff] %vm172_vm0, %v4967_v27 }
 0x1da   : > { %v5793_v54 = vadd.f32 %v4360_v42, %v5697_v61  ;;  %v4363_v36 = vadd.f32 %v4362_v56, %v4361_v63  ;;  %v4427_v37 = vadd.f32 %v4426_v48, %v4425_v34  ;;  %v5796_v39 = vadd.f32 %v4424_v20, %v5700_v52  ;;  %174 = vst.msk [vmem:[#allocation3 + $0x8] sm:$0xff] %vm172_vm0, %v4967_v27 }
 0x1db   : > { %176 = vst.msk [vmem:[#allocation3 + $0x18] sm:$0xff] %vm172_vm0, %v4967_v27  ;;  %177 = vst.msk [vmem:[#allocation3 + $0x20] sm:$0xff] %vm172_vm0, %v4967_v27 }
 0x1dc   : > { %v5799_v1 = vadd.f32 %v4363_v36, %v5703_v58  ;;  %v5802_v50 = vadd.f32 %v4427_v37, %v5706_v4  ;;  %178 = vst.msk [vmem:[#allocation3 + $0x28] sm:$0xff] %vm172_vm0, %v4967_v27  ;;  %179 = vst.msk [vmem:[#allocation3 + $0x30] sm:$0xff] %vm172_vm0, %v4967_v27 }
 0x1dd   : > { %180 = vst.msk [vmem:[#allocation3 + $0x38] sm:$0xff] %vm172_vm0, %v4967_v27  ;;  %181 = vst.msk [vmem:[#allocation3 + $0x40] sm:$0xff] %vm172_vm0, %v4967_v27 }
 0x1de   : > { %v4364_v59 = vpop.f32.mrb[108].mxu0  ;;  %v4428_v62 = vpop.f32.mrb[108].mxu1  ;;  %182 = vst.msk [vmem:[#allocation3 + $0x48] sm:$0xff] %vm172_vm0, %v4967_v27  ;;  %183 = vst.msk [vmem:[#allocation3 + $0x50] sm:$0xff] %vm172_vm0, %v4967_v27 }
 0x1df   : > { %v4365_v15 = vpop.f32.mrb[109].mxu0  ;;  %v4429_v5 = vpop.f32.mrb[109].mxu1  ;;  %184 = vst.msk [vmem:[#allocation3 + $0x58] sm:$0xff] %vm172_vm0, %v4967_v27  ;;  %185 = vst.msk [vmem:[#allocation3 + $0x60] sm:$0xff] %vm172_vm0, %v4967_v27 }
 0x1e0   : > { %v4366_v3 = vadd.f32 %v4365_v15, %v4364_v59  ;;  %v4430_v6 = vadd.f32 %v4429_v5, %v4428_v62  ;;  %v4367_v23 = vpop.f32.mrb[110].mxu0  ;;  %v4431_v61 = vpop.f32.mrb[110].mxu1  ;;  %186 = vst.msk [vmem:[#allocation3 + $0x68] sm:$0xff] %vm172_vm0, %v4967_v27  ;;  %187 = vst.msk [vmem:[#allocation3 + $0x70] sm:$0xff] %vm172_vm0, %v4967_v27 }
 0x1e1   : > { %v4368_v19 = vpop.f32.mrb[111].mxu0  ;;  %v4432_v18 = vpop.f32.mrb[111].mxu1  ;;  %188 = vst.msk [vmem:[#allocation3 + $0x78] sm:$0xff] %vm172_vm0, %v4967_v27  ;;  %189 = vst.msk [vmem:[#allocation3 + $0x80] sm:$0xff] %vm172_vm0, %v4967_v27 }
 0x1e2   : > { %v5805_v24 = vadd.f32 %v4366_v3, %v5709_v10  ;;  %v4369_v52 = vadd.f32 %v4368_v19, %v4367_v23  ;;  %v4433_v22 = vadd.f32 %v4432_v18, %v4431_v61  ;;  %v5808_v58 = vadd.f32 %v4430_v6, %v5712_v57  ;;  %190 = vst.msk [vmem:[#allocation3 + $0x88] sm:$0xff] %vm172_vm0, %v4967_v27 }
 0x1e3   : > { %191 = vst.msk [vmem:[#allocation3 + $0x90] sm:$0xff] %vm172_vm0, %v4967_v27  ;;  %192 = vst.msk [vmem:[#allocation3 + $0x98] sm:$0xff] %vm172_vm0, %v4967_v27 }
 0x1e4   : > { %v5811_v4 = vadd.f32 %v4369_v52, %v5715_v31  ;;  %v5814_v13 = vadd.f32 %v4433_v22, %v5718_v0  ;;  %193 = vst.msk [vmem:[#allocation3 + $0xa0] sm:$0xff] %vm172_vm0, %v4967_v27  ;;  %194 = vst.msk [vmem:[#allocation3 + $0xa8] sm:$0xff] %vm172_vm0, %v4967_v27 }
 0x1e5   : > { %195 = vst.msk [vmem:[#allocation3 + $0xb0] sm:$0xff] %vm172_vm0, %v4967_v27  ;;  %196 = vst.msk [vmem:[#allocation3 + $0xb8] sm:$0xff] %vm172_vm0, %v4967_v27 }
 0x1e6   : > { %v5816_v35 = vpop.f32.mrb[112].mxu1  ;;  %v4524_v44 = vpop.f32.mrb[112].mxu0  ;;  %197 = vst.msk [vmem:[#allocation3 + $0xc0] sm:$0xff] %vm172_vm0, %v4967_v27  ;;  %198 = vst.msk [vmem:[#allocation3 + $0xc8] sm:$0xff] %vm172_vm0, %v4967_v27 }
 0x1e7   : > { %v5819_v12 = vadd.f32 %v4524_v44, %v5736_v14  ;;  %v5821_v10 = vpop.f32.mrb[113].mxu1  ;;  %v5823_v21 = vpop.f32.mrb[113].mxu0  ;;  %199 = vst.msk [vmem:[#allocation3 + $0xd0] sm:$0xff] %vm172_vm0, %v4967_v27  ;;  %200 = vst.msk [vmem:[#allocation3 + $0xd8] sm:$0xff] %vm172_vm0, %v4967_v27 }
 0x1e8   : > { %201 = vst.msk [vmem:[#allocation3 + $0xe0] sm:$0xff] %vm172_vm0, %v4967_v27  ;;  %202 = vst.msk [vmem:[#allocation3 + $0xe8] sm:$0xff] %vm172_vm0, %v4967_v27  ;;  %v4436_v57 = vadd.f32 %v5821_v10, %v5816_v35  ;;  %v5957_v31 = vadd.f32 %v5823_v21, %v5724_v53  ;;  %v4437_v0 = vpop.f32.mrb[114].mxu1  ;;  %v4525_v14 = vpop.f32.mrb[114].mxu0 }
 0x1e9   : > { %203 = vst.msk [vmem:[#allocation3 + $0xf0] sm:$0xff] %vm172_vm0, %v4967_v27  ;;  %204 = vst.msk [vmem:[#allocation3 + $0xf8] sm:$0xff] %vm172_vm0, %v4967_v27  ;;  %v5960_v38 = vadd.f32 %v4525_v14, %v5742_v30  ;;  %v4438_v47 = vpop.f32.mrb[115].mxu1  ;;  %v2390_v32 = vpop.f32.mrb[115].mxu0  ;;  %2584 = vadd.xlane.f32.xlu1 %v5819_v12  ;;  %v2743_v53 = vmul.f32 %v5819_v12, %v5819_v12 }
 0x1ea   : > { %205 = vst.msk [vmem:[#allocation4] sm:$0xff] %vm172_vm0, %v4967_v27  ;;  %206 = vst.msk [vmem:[#allocation4 + $0x8] sm:$0xff] %vm172_vm0, %v4967_v27  ;;  %v4439_v42 = vadd.f32 %v4438_v47, %v4437_v0  ;;  %v5964_v20 = vadd.f32 %v2390_v32, %v5730_v16  ;;  %2580 = vadd.xlane.f32.xlu0 %v5957_v31  ;;  %v5968_v63 = vadd.f32 %v4436_v57, %v5721_v41 }
 0x1eb   : > { %207 = vst.msk [vmem:[#allocation4 + $0x10] sm:$0xff] %vm172_vm0, %v4967_v27  ;;  %208 = vst.msk [vmem:[#allocation4 + $0x18] sm:$0xff] %vm172_vm0, %v4967_v27  ;;  %v2744_v41 = vmul.f32 %v5960_v38, %v5960_v38  ;;  %v2741_v61 = vmul.f32 %v5957_v31, %v5957_v31 }
 0x1ec   : > { %209 = vst.msk [vmem:[#allocation4 + $0x20] sm:$0xff] %vm172_vm0, %v4967_v27  ;;  %210 = vst.msk [vmem:[#allocation4 + $0x28] sm:$0xff] %vm172_vm0, %v4967_v27  ;;  %v5973_v34 = vadd.f32 %v4439_v42, %v5727_v51 }
 0x1ed   : > { %211 = vst.msk [vmem:[#allocation4 + $0x30] sm:$0xff] %vm172_vm0, %v4967_v27  ;;  %212 = vst.msk [vmem:[#allocation4 + $0x38] sm:$0xff] %vm172_vm0, %v4967_v27  ;;  %2586 = vadd.xlane.f32.xlu1 %v5960_v38 }
 0x1ee   : > { %213 = vst.msk [vmem:[#allocation4 + $0x40] sm:$0xff] %vm172_vm0, %v4967_v27  ;;  %214 = vst.msk [vmem:[#allocation4 + $0x48] sm:$0xff] %vm172_vm0, %v4967_v27  ;;  %v4440_v30 = vpop.f32.mrb[116].mxu1  ;;  %v4528_v56 = vpop.f32.mrb[116].mxu0  ;;  %2777 = vadd.xlane.f32.xlu0 %v2743_v53 }
 0x1ef   : > { %215 = vst.msk [vmem:[#allocation4 + $0x50] sm:$0xff] %vm172_vm0, %v4967_v27  ;;  %216 = vst.msk [vmem:[#allocation4 + $0x58] sm:$0xff] %vm172_vm0, %v4967_v27  ;;  %v5977_v48 = vadd.f32 %v4528_v56, %v5760_v33  ;;  %v4441_v16 = vpop.f32.mrb[117].mxu1  ;;  %v2403_v36 = vpop.f32.mrb[117].mxu0 }
 0x1f0   : > { %217 = vst.msk [vmem:[#allocation4 + $0x60] sm:$0xff] %vm172_vm0, %v4967_v27  ;;  %218 = vst.msk [vmem:[#allocation4 + $0x68] sm:$0xff] %vm172_vm0, %v4967_v27  ;;  %v4442_v37 = vadd.f32 %v4441_v16, %v4440_v30  ;;  %v5982_v59 = vadd.f32 %v2403_v36, %v5748_v11  ;;  %v4443_v62 = vpop.f32.mrb[118].mxu1  ;;  %v4529_v51 = vpop.f32.mrb[118].mxu0  ;;  %v2742_v11 = vmul.f32 %v5964_v20, %v5964_v20 }
 0x1f1   : > { %219 = vst.msk [vmem:[#allocation4 + $0x70] sm:$0xff] %vm172_vm0, %v4967_v27  ;;  %220 = vst.msk [vmem:[#allocation4 + $0x78] sm:$0xff] %vm172_vm0, %v4967_v27  ;;  %v5985_v15 = vadd.f32 %v4529_v51, %v5766_v9  ;;  %v4444_v5 = vpop.f32.mrb[119].mxu1  ;;  %v2406_v3 = vpop.f32.mrb[119].mxu0  ;;  %2779 = vadd.xlane.f32.xlu1 %v2744_v41  ;;  %v2747_v56 = vmul.f32 %v5977_v48, %v5977_v48  ;;  %v4968_v51 = vmov 0  }
 0x1f2   : > { %221 = vst.msk [vmem:[#allocation4 + $0x80] sm:$0xff] %vm172_vm0, %v4967_v27  ;;  %222 = vst.msk [vmem:[#allocation4 + $0x88] sm:$0xff] %vm172_vm0, %v4967_v27  ;;  %v4445_v6 = vadd.f32 %v4444_v5, %v4443_v62  ;;  %v5988_v33 = vadd.f32 %v2406_v3, %v5754_v46  ;;  %2582 = vadd.xlane.f32.xlu0 %v5964_v20  ;;  %v2299_v23 = vadd.f32 %v4442_v37, %v5733_v45 }
 0x1f3   : > { %223 = vst.msk [vmem:[#allocation4 + $0x90] sm:$0xff] %vm172_vm0, %v4967_v27  ;;  %224 = vst.msk [vmem:[#allocation4 + $0x98] sm:$0xff] %vm172_vm0, %v4967_v27  ;;  %4597 = vset.pattern.permute.xlu1 %v4968_v51  ;;  %4598 = vset.pattern.permute.xlu0 %v4968_v51 }
 0x1f4   : > { %225 = vst.msk [vmem:[#allocation4 + $0xa0] sm:$0xff] %vm172_vm0, %v4967_v27  ;;  %226 = vst.msk [vmem:[#allocation4 + $0xa8] sm:$0xff] %vm172_vm0, %v4967_v27  ;;  %v2302_v9 = vadd.f32 %v4445_v6, %v5739_v28 }
 0x1f5   : > { %227 = vst.msk [vmem:[#allocation4 + $0xb0] sm:$0xff] %vm172_vm0, %v4967_v27  ;;  %228 = vst.msk [vmem:[#allocation4 + $0xb8] sm:$0xff] %vm172_vm0, %v4967_v27  ;;  %2775 = vadd.xlane.f32.xlu1 %v2742_v11 }
 0x1f6   : > { %229 = vst.msk [vmem:[#allocation4 + $0xc0] sm:$0xff] %vm172_vm0, %v4967_v27  ;;  %230 = vst.msk [vmem:[#allocation4 + $0xc8] sm:$0xff] %vm172_vm0, %v4967_v27  ;;  %v4446_v19 = vpop.f32.mrb[120].mxu1  ;;  %v4532_v18 = vpop.f32.mrb[120].mxu0  ;;  %2773 = vadd.xlane.f32.xlu0 %v2741_v61 }
 0x1f7   : > { %231 = vst.msk [vmem:[#allocation4 + $0xd0] sm:$0xff] %vm172_vm0, %v4967_v27  ;;  %232 = vst.msk [vmem:[#allocation4 + $0xd8] sm:$0xff] %vm172_vm0, %v4967_v27  ;;  %v5998_v52 = vadd.f32 %v4532_v18, %v5784_v17  ;;  %v4447_v46 = vpop.f32.mrb[121].mxu1  ;;  %v2419_v22 = vpop.f32.mrb[121].mxu0 }
 0x1f8   : > { %233 = vst.msk [vmem:[#allocation4 + $0xe0] sm:$0xff] %vm172_vm0, %v4967_v27  ;;  %234 = vst.msk [vmem:[#allocation4 + $0xe8] sm:$0xff] %vm172_vm0, %v4967_v27  ;;  %v4448_v35 = vadd.f32 %v4447_v46, %v4446_v19  ;;  %v6001_v45 = vadd.f32 %v2419_v22, %v5772_v55  ;;  %v4449_v44 = vpop.f32.mrb[122].mxu1  ;;  %v4533_v10 = vpop.f32.mrb[122].mxu0 }
 0x1f9   : > { %235 = vst.msk [vmem:[#allocation4 + $0xf0] sm:$0xff] %vm172_vm0, %v4967_v27  ;;  %236 = vst.msk [vmem:[#allocation4 + $0xf8] sm:$0xff] %vm172_vm0, %v4967_v27  ;;  %v6004_v21 = vadd.f32 %v4533_v10, %v5790_v29  ;;  %v4450_v27 = vpop.f32.mrb[123].mxu1  ;;  %v2422_v28 = vpop.f32.mrb[123].mxu0  ;;  %2594 = vadd.xlane.f32.xlu1 %v5985_v15 }
 0x1fa   : > { %v4451_v57 = vadd.f32 %v4450_v27, %v4449_v44  ;;  %v6008_v0 = vadd.f32 %v2422_v28, %v5778_v8  ;;  %2592 = vadd.xlane.f32.xlu0 %v5977_v48  ;;  %v2307_v17 = vadd.f32 %v4448_v35, %v5745_v7  ;;  %v2748_v8 = vmul.f32 %v5985_v15, %v5985_v15 }
 0x1fc   : > { %v6013_v55 = vadd.f32 %v4451_v57, %v5751_v25 }
 0x1fd   : > { %2590 = vadd.xlane.f32.xlu1 %v5988_v33 }
 0x1fe   : > { %v4452_v14 = vpop.f32.mrb[124].mxu1  ;;  %v4536_v29 = vpop.f32.mrb[124].mxu0  ;;  %2588 = vadd.xlane.f32.xlu0 %v5982_v59 }
 0x1ff   : > { %v6018_v47 = vadd.f32 %v4536_v29, %v5808_v58  ;;  %v4453_v32 = vpop.f32.mrb[125].mxu1  ;;  %v2435_v42 = vpop.f32.mrb[125].mxu0 }
 0x200   : > { %v4454_v53 = vadd.f32 %v4453_v32, %v4452_v14  ;;  %v6023_v7 = vadd.f32 %v2435_v42, %v5796_v39  ;;  %v4455_v25 = vpop.f32.mrb[126].mxu1  ;;  %v4537_v30 = vpop.f32.mrb[126].mxu0  ;;  %v2746_v39 = vmul.f32 %v5988_v33, %v5988_v33 }
 0x201   : > { %v6028_v16 = vadd.f32 %v4537_v30, %v5814_v13  ;;  %v4456_v36 = vpop.f32.mrb[127].mxu1  ;;  %v2438_v58 = vpop.f32.mrb[127].mxu0  ;;  %2787 = vadd.xlane.f32.xlu1 %v2748_v8  ;;  %v2745_v13 = vmul.f32 %v5982_v59, %v5982_v59 }
 0x202   : > { %v4457_v41 = vadd.f32 %v4456_v36, %v4455_v25  ;;  %v6031_v37 = vadd.f32 %v2438_v58, %v5802_v50  ;;  %2785 = vadd.xlane.f32.xlu0 %v2747_v56  ;;  %v2315_v62 = vadd.f32 %v4454_v53, %v5757_v40  ;;  %v2749_v58 = vmul.f32 %v6001_v45, %v6001_v45 }
 0x204   : > { %v2318_v5 = vadd.f32 %v4457_v41, %v5763_v49 }
 0x205   : > { %2783 = vadd.xlane.f32.xlu1 %v2746_v39 }
 0x206   : > { %v4458_v3 = vpop.f32.mrb[128].mxu1  ;;  %v4540_v6 = vpop.f32.mrb[128].mxu0  ;;  %2781 = vadd.xlane.f32.xlu0 %v2745_v13 }
 0x207   : > { %v6039_v50 = vadd.f32 %v4540_v6, %v2299_v23  ;;  %v4459_v11 = vpop.f32.mrb[129].mxu1  ;;  %v2451_v61 = vpop.f32.mrb[129].mxu0 }
 0x208   : > { %v4460_v40 = vadd.f32 %v4459_v11, %v4458_v3  ;;  %v6042_v19 = vadd.f32 %v2451_v61, %v5968_v63  ;;  %v4461_v18 = vpop.f32.mrb[130].mxu1  ;;  %v4541_v46 = vpop.f32.mrb[130].mxu0 }
 0x209   : > { %v6044_v22 = vadd.f32 %v4541_v46, %v2302_v9  ;;  %v4462_v35 = vpop.f32.mrb[131].mxu1  ;;  %v2454_v44 = vpop.f32.mrb[131].mxu0  ;;  %2602 = vadd.xlane.f32.xlu1 %v6004_v21 }
 0x20a   : > { %v4463_v49 = vadd.f32 %v4462_v35, %v4461_v18  ;;  %v6048_v10 = vadd.f32 %v2454_v44, %v5973_v34  ;;  %2600 = vadd.xlane.f32.xlu0 %v5998_v52  ;;  %v2323_v23 = vadd.f32 %v4460_v40, %v5769_v2  ;;  %v2752_v34 = vmul.f32 %v6004_v21, %v6004_v21 }
 0x20c   : > { %v2326_v27 = vadd.f32 %v4463_v49, %v5775_v60  ;;  %v2751_v60 = vmul.f32 %v5998_v52, %v5998_v52 }
 0x20d   : > { %2598 = vadd.xlane.f32.xlu1 %v6008_v0 }
 0x20e   : > { %v4464_v63 = vpop.f32.mrb[132].mxu1  ;;  %v4544_v28 = vpop.f32.mrb[132].mxu0  ;;  %2596 = vadd.xlane.f32.xlu0 %v6001_v45 }
 0x20f   : > { %v6055_v9 = vadd.f32 %v4544_v28, %v2315_v62  ;;  %v4465_v57 = vpop.f32.mrb[133].mxu1  ;;  %v2467_v14 = vpop.f32.mrb[133].mxu0  ;;  %v2756_v28 = vmul.f32 %v6028_v16, %v6028_v16 }
 0x210   : > { %v4466_v29 = vadd.f32 %v4465_v57, %v4464_v63  ;;  %v6059_v32 = vadd.f32 %v2467_v14, %v2307_v17  ;;  %v4467_v42 = vpop.f32.mrb[134].mxu1  ;;  %v4545_v2 = vpop.f32.mrb[134].mxu0  ;;  %v2750_v17 = vmul.f32 %v6008_v0, %v6008_v0 }
 0x211   : > { %v6063_v8 = vadd.f32 %v4545_v2, %v2318_v5  ;;  %v4468_v53 = vpop.f32.mrb[135].mxu1  ;;  %v2470_v25 = vpop.f32.mrb[135].mxu0  ;;  %2795 = vadd.xlane.f32.xlu1 %v2752_v34 }
 0x212   : > { %v4469_v30 = vadd.f32 %v4468_v53, %v4467_v42  ;;  %v6066_v56 = vadd.f32 %v2470_v25, %v6013_v55  ;;  %2793 = vadd.xlane.f32.xlu0 %v2751_v60  ;;  %v2331_v36 = vadd.f32 %v4466_v29, %v5781_v26  ;;  %v2754_v53 = vmul.f32 %v6031_v37, %v6031_v37 }
 0x214   : > { %v2334_v41 = vadd.f32 %v4469_v30, %v5787_v43  ;;  %v2753_v30 = vmul.f32 %v6023_v7, %v6023_v7 }
 0x215   : > { %2791 = vadd.xlane.f32.xlu1 %v2750_v17 }
 0x216   : > { %v4470_v62 = vpop.f32.mrb[136].mxu1  ;;  %v4548_v39 = vpop.f32.mrb[136].mxu0  ;;  %2789 = vadd.xlane.f32.xlu0 %v2749_v58  ;;  %v2758_v58 = vmul.f32 %v6048_v10, %v6048_v10 }
 0x217   : > { %v6074_v51 = vadd.f32 %v4548_v39, %v2331_v36  ;;  %v4471_v13 = vpop.f32.mrb[137].mxu1  ;;  %v2483_v55 = vpop.f32.mrb[137].mxu0  ;;  %v2763_v39 = vmul.f32 %v6055_v9, %v6055_v9 }
 0x218   : > { %v4472_v5 = vadd.f32 %v4471_v13, %v4470_v62  ;;  %v6076_v3 = vadd.f32 %v2483_v55, %v2323_v23  ;;  %v4473_v26 = vpop.f32.mrb[138].mxu1  ;;  %v4549_v6 = vpop.f32.mrb[138].mxu0  ;;  %v2764_v62 = vmul.f32 %v6063_v8, %v6063_v8  ;;  %v2762_v13 = vmul.f32 %v6066_v56, %v6066_v56 }
 0x219   : > { %v6078_v11 = vadd.f32 %v4549_v6, %v2334_v41  ;;  %v4474_v61 = vpop.f32.mrb[139].mxu1  ;;  %v2486_v40 = vpop.f32.mrb[139].mxu0  ;;  %2610 = vadd.xlane.f32.xlu1 %v6028_v16  ;;  %v2757_v41 = vmul.f32 %v6042_v19, %v6042_v19  ;;  %v2761_v55 = vmul.f32 %v6059_v32, %v6059_v32 }
 0x21a   : > { %v4475_v43 = vadd.f32 %v4474_v61, %v4473_v26  ;;  %v6081_v18 = vadd.f32 %v2486_v40, %v2326_v27  ;;  %2608 = vadd.xlane.f32.xlu0 %v6018_v47  ;;  %v2339_v46 = vadd.f32 %v4472_v5, %v5793_v54  ;;  %v2755_v54 = vmul.f32 %v6018_v47, %v6018_v47 }
 0x21b   : > { %v2768_v5 = vmul.f32 %v6078_v11, %v6078_v11  ;;  %v2767_v26 = vmul.f32 %v6074_v51, %v6074_v51  ;;  %v2765_v61 = vmul.f32 %v6076_v3, %v6076_v3 }
 0x21c   : > { %v2342_v35 = vadd.f32 %v4475_v43, %v5799_v1  ;;  %v2766_v6 = vmul.f32 %v6081_v18, %v6081_v18 }
 0x21d   : > { %2606 = vadd.xlane.f32.xlu1 %v6031_v37 }
 0x21e   : > { %v4476_v44 = vpop.f32.mrb[140].mxu1  ;;  %v4552_v49 = vpop.f32.mrb[140].mxu0  ;;  %2604 = vadd.xlane.f32.xlu0 %v6023_v7 }
 0x21f   : > { %v4477_v23 = vpop.f32.mrb[141].mxu1  ;;  %v2499_v63 = vpop.f32.mrb[141].mxu0 }
 0x220   : > { %v4478_v57 = vadd.f32 %v4477_v23, %v4476_v44  ;;  %v6090_v27 = vadd.f32 %v2499_v63, %v2339_v46  ;;  %v4479_v14 = vpop.f32.mrb[142].mxu1  ;;  %v4553_v34 = vpop.f32.mrb[142].mxu0  ;;  %v2550_v44 = vld [vmem:[#allocation3 + $0x10] sm:$0xff] }
 0x221   : > { %v4480_v1 = vpop.f32.mrb[143].mxu1  ;;  %v2502_v29 = vpop.f32.mrb[143].mxu0  ;;  %2803 = vadd.xlane.f32.xlu1 %v2756_v28 }
 0x222   : > { %v2347_v42 = vadd.f32 %v4478_v57, %v5805_v24  ;;  %v4481_v2 = vadd.f32 %v4480_v1, %v4479_v14  ;;  %v6095_v60 = vadd.f32 %v2502_v29, %v2342_v35  ;;  %2801 = vadd.xlane.f32.xlu0 %v2755_v54  ;;  %v2760_v24 = vmul.f32 %v6044_v22, %v6044_v22  ;;  %v2551_v14 = vld [vmem:[#allocation3 + $0x18] sm:$0xff] }
 0x223   : > { %v2769_v43 = vmul.f32 %v6090_v27, %v6090_v27 }
 0x224   : > { %v2350_v25 = vadd.f32 %v4481_v2, %v5811_v4  ;;  %v6102_v36 = vadd.f32 %v4552_v49, %v2347_v42  ;;  %v2759_v4 = vmul.f32 %v6039_v50, %v6039_v50  ;;  %v2770_v40 = vmul.f32 %v6095_v60, %v6095_v60  ;;  %v2548_v49 = vld [vmem:[#allocation3] sm:$0xff]  ;;  %v2712_v2 = vld [vmem:[#allocation4 + $0x18] sm:$0xff] }
 0x225   : > { %2799 = vadd.xlane.f32.xlu1 %v2754_v53  ;;  %v2549_v53 = vld [vmem:[#allocation3 + $0x8] sm:$0xff] }
 0x226   : > { %2797 = vadd.xlane.f32.xlu0 %v2753_v30  ;;  %v6104_v17 = vadd.f32 %v4553_v34, %v2350_v25  ;;  %v2771_v35 = vmul.f32 %v6102_v36, %v6102_v36  ;;  %v2711_v34 = vld [vmem:[#allocation4 + $0x10] sm:$0xff] }
 0x228   : > { %v2772_v46 = vmul.f32 %v6104_v17, %v6104_v17 }
 0x229   : > { %2618 = vadd.xlane.f32.xlu1 %v6044_v22 }
 0x22a   : > { %2616 = vadd.xlane.f32.xlu0 %v6039_v50 }
 0x22d   : > { %2614 = vadd.xlane.f32.xlu1 %v6048_v10 }
 0x22e   : > { %2612 = vadd.xlane.f32.xlu0 %v6042_v19 }
 0x231   : > { %2811 = vadd.xlane.f32.xlu1 %v2760_v24 }
 0x232   : > { %2809 = vadd.xlane.f32.xlu0 %v2759_v4 }
 0x235   : > { %2807 = vadd.xlane.f32.xlu1 %v2758_v58  ;;  %v2710_v58 = vld [vmem:[#allocation4 + $0x8] sm:$0xff] }
 0x236   : > { %2805 = vadd.xlane.f32.xlu0 %v2757_v41 }
 0x239   : > { %2626 = vadd.xlane.f32.xlu1 %v6063_v8 }
 0x23a   : > { %2624 = vadd.xlane.f32.xlu0 %v6055_v9 }
 0x23d   : > { %2622 = vadd.xlane.f32.xlu1 %v6066_v56 }
 0x23e   : > { %2620 = vadd.xlane.f32.xlu0 %v6059_v32 }
 0x241   : > { %2819 = vadd.xlane.f32.xlu1 %v2764_v62 }
 0x242   : > { %2817 = vadd.xlane.f32.xlu0 %v2763_v39  ;;  %v2709_v39 = vld [vmem:[#allocation4] sm:$0xff] }
 0x245   : > { %2815 = vadd.xlane.f32.xlu1 %v2762_v13 }
 0x246   : > { %2813 = vadd.xlane.f32.xlu0 %v2761_v55 }
 0x249   : > { %2634 = vadd.xlane.f32.xlu1 %v6078_v11 }
 0x24a   : > { %2632 = vadd.xlane.f32.xlu0 %v6074_v51 }
 0x24d   : > { %2630 = vadd.xlane.f32.xlu1 %v6081_v18 }
 0x24e   : > { %2628 = vadd.xlane.f32.xlu0 %v6076_v3 }
 0x251   : > { %2827 = vadd.xlane.f32.xlu1 %v2768_v5 }
 0x252   : > { %2825 = vadd.xlane.f32.xlu0 %v2767_v26 }
 0x255   : > { %2823 = vadd.xlane.f32.xlu1 %v2766_v6 }
 0x256   : > { %2821 = vadd.xlane.f32.xlu0 %v2765_v61 }
 0x259   : > { %2638 = vadd.xlane.f32.xlu1 %v6095_v60 }
 0x25a   : > { %2636 = vadd.xlane.f32.xlu0 %v6090_v27 }
 0x25d   : > { %2831 = vadd.xlane.f32.xlu1 %v2770_v40  ;;  %v2555_v40 = vld [vmem:[#allocation3 + $0x38] sm:$0xff] }
 0x25e   : > { %2829 = vadd.xlane.f32.xlu0 %v2769_v43 }
 0x261   : > { %2642 = vadd.xlane.f32.xlu1 %v6104_v17 }
 0x262   : > { %2640 = vadd.xlane.f32.xlu0 %v6102_v36 }
 0x265   : > { %2835 = vadd.xlane.f32.xlu1 %v2772_v46 }
 0x266   : > { %2833 = vadd.xlane.f32.xlu0 %v2771_v35  ;;  %v2554_v35 = vld [vmem:[#allocation3 + $0x30] sm:$0xff] }
 0x276   : > { %v2585_v23 = vpop.xlane.xlu1 %2584 }
 0x277   : > { %v2646_v63 = vadd.f32 %v2585_v23, %v2550_v44  ;;  %v2581_v28 = vpop.xlane.xlu0 %2580 }
 0x278   : > { %v2644_v57 = vadd.f32 %v2581_v28, %v2548_v49  ;;  %v2553_v28 = vld [vmem:[#allocation3 + $0x28] sm:$0xff] }
 0x279   : > { %2679 = vst.msk [vmem:[#allocation3 + $0x10] sm:$0xff] %vm172_vm0, %v2646_v63 }
 0x27a   : > { %2677 = vst.msk [vmem:[#allocation3] sm:$0xff] %vm172_vm0, %v2644_v57  ;;  %v2587_v54 = vpop.xlane.xlu1 %2586  ;;  %v2552_v57 = vld [vmem:[#allocation3 + $0x20] sm:$0xff] }
 0x27b   : > { %v2647_v1 = vadd.f32 %v2587_v54, %v2551_v14  ;;  %v2778_v29 = vpop.xlane.xlu0 %2777 }
 0x27c   : > { %v2839_v42 = vadd.f32 %v2778_v29, %v2711_v34 }
 0x27d   : > { %2680 = vst.msk [vmem:[#allocation3 + $0x18] sm:$0xff] %vm172_vm0, %v2647_v1 }
 0x27e   : > { %2871 = vst.msk [vmem:[#allocation4 + $0x10] sm:$0xff] %vm172_vm0, %v2839_v42  ;;  %v2780_v25 = vpop.xlane.xlu1 %2779 }
 0x27f   : > { %v2840_v30 = vadd.f32 %v2780_v25, %v2712_v2  ;;  %v2583_v24 = vpop.xlane.xlu0 %2582  ;;  %v2716_v2 = vld [vmem:[#allocation4 + $0x38] sm:$0xff]  ;;  %v2715_v25 = vld [vmem:[#allocation4 + $0x30] sm:$0xff] }
 0x280   : > { %v2645_v4 = vadd.f32 %v2583_v24, %v2549_v53  ;;  %v2906_v41 = vld [vmem:[#allocation3 + $0x10] sm:$0xff] }
 0x281   : > { %2872 = vst.msk [vmem:[#allocation4 + $0x18] sm:$0xff] %vm172_vm0, %v2840_v30  ;;  %v2938_v62 = vmul.f32 0.11111111, %v2906_v41  ;;  %v2904_v13 = vld [vmem:[#allocation3] sm:$0xff] }
 0x282   : > { %2678 = vst.msk [vmem:[#allocation3 + $0x8] sm:$0xff] %vm172_vm0, %v2645_v4  ;;  %v2776_v55 = vpop.xlane.xlu1 %2775  ;;  %v2936_v5 = vmul.f32 0.11111111, %v2904_v13 }
 0x283   : > { %v2838_v26 = vadd.f32 %v2776_v55, %v2710_v58  ;;  %3236 = vperm.xlu1 %4597, %v2938_v62   ;;  %v2774_v6 = vpop.xlane.xlu0 %2773 }
 0x284   : > { %v2837_v61 = vadd.f32 %v2774_v6, %v2709_v39  ;;  %3226 = vperm.xlu0 %4598, %v2936_v5   ;;  %v2907_v43 = vld [vmem:[#allocation3 + $0x18] sm:$0xff] }
 0x285   : > { %2870 = vst.msk [vmem:[#allocation4 + $0x8] sm:$0xff] %vm172_vm0, %v2838_v26  ;;  %v2939_v46 = vmul.f32 0.11111111, %v2907_v43  ;;  %v2970_v30 = vld [vmem:[#allocation4 + $0x10] sm:$0xff]  ;;  %v2714_v26 = vld [vmem:[#allocation4 + $0x28] sm:$0xff]  ;;  %v3034_v43 = vmul.f32 %v2938_v62, %v2938_v62 }
 0x286   : > { %2869 = vst.msk [vmem:[#allocation4] sm:$0xff] %vm172_vm0, %v2837_v61  ;;  %v2595_v44 = vpop.xlane.xlu1 %2594  ;;  %v3002_v6 = vmul.f32 0.11111111, %v2970_v30  ;;  %v2713_v61 = vld [vmem:[#allocation4 + $0x20] sm:$0xff]  ;;  %v2558_v62 = vld [vmem:[#allocation3 + $0x50] sm:$0xff] }
 0x287   : > { %v2651_v49 = vadd.f32 %v2595_v44, %v2555_v40  ;;  %3241 = vperm.xlu1 %4597, %v2939_v46   ;;  %v2593_v23 = vpop.xlane.xlu0 %2592 }
 0x288   : > { %v2650_v63 = vadd.f32 %v2593_v23, %v2554_v35  ;;  %v2971_v53 = vld [vmem:[#allocation4 + $0x18] sm:$0xff]  ;;  %v3035_v35 = vmul.f32 %v2939_v46, %v2939_v46 }
 0x289   : > { %2684 = vst.msk [vmem:[#allocation3 + $0x38] sm:$0xff] %vm172_vm0, %v2651_v49  ;;  %v2905_v14 = vld [vmem:[#allocation3 + $0x8] sm:$0xff]  ;;  %v3003_v39 = vmul.f32 0.11111111, %v2971_v53 }
 0x28a   : > { %2683 = vst.msk [vmem:[#allocation3 + $0x30] sm:$0xff] %vm172_vm0, %v2650_v63  ;;  %v2591_v34 = vpop.xlane.xlu1 %2590  ;;  %v2937_v54 = vmul.f32 0.11111111, %v2905_v14 }
 0x28b   : > { %v2649_v1 = vadd.f32 %v2591_v34, %v2553_v28  ;;  %v2589_v29 = vpop.xlane.xlu0 %2588  ;;  %v3067_v34 = vsub.f32 %v3003_v39, %v3035_v35 }
 0x28c   : > { %v2648_v42 = vadd.f32 %v2589_v29, %v2552_v57  ;;  %3231 = vperm.xlu1 %4597, %v2937_v54   ;;  %v2969_v13 = vld [vmem:[#allocation4 + $0x8] sm:$0xff]  ;;  %v3033_v28 = vmul.f32 %v2937_v54, %v2937_v54  ;;  %v2559_v29 = vld [vmem:[#allocation3 + $0x58] sm:$0xff] }
 0x28d   : > { %2682 = vst.msk [vmem:[#allocation3 + $0x28] sm:$0xff] %vm172_vm0, %v2649_v1  ;;  %v2968_v41 = vld [vmem:[#allocation4] sm:$0xff]  ;;  %v3001_v63 = vmul.f32 0.11111111, %v2969_v13  ;;  %v2557_v13 = vld [vmem:[#allocation3 + $0x48] sm:$0xff] }
 0x28e   : > { %2681 = vst.msk [vmem:[#allocation3 + $0x20] sm:$0xff] %vm172_vm0, %v2648_v42  ;;  %v2788_v24 = vpop.xlane.xlu1 %2787  ;;  %v3000_v23 = vmul.f32 0.11111111, %v2968_v41  ;;  %v3066_v42 = vsub.f32 %v3002_v6, %v3034_v43  ;;  %v3099_v41 = vmax.f32 %v3067_v34, 0.0  ;;  %v2719_v34 = vld [vmem:[#allocation4 + $0x50] sm:$0xff] }
 0x28f   : > { %v2844_v4 = vadd.f32 %v2788_v24, %v2716_v2  ;;  %v2786_v58 = vpop.xlane.xlu0 %2785  ;;  %v3032_v2 = vmul.f32 %v2936_v5, %v2936_v5  ;;  %v3065_v54 = vsub.f32 %v3001_v63, %v3033_v28  ;;  %v2720_v28 = vld [vmem:[#allocation4 + $0x58] sm:$0xff] }
 0x290   : > { %v2843_v55 = vadd.f32 %v2786_v58, %v2715_v25  ;;  %v2911_v58 = vld [vmem:[#allocation3 + $0x38] sm:$0xff]  ;;  %v3098_v5 = vmax.f32 %v3066_v42, 0.0 }
 0x291   : > { %2876 = vst.msk [vmem:[#allocation4 + $0x38] sm:$0xff] %vm172_vm0, %v2844_v4  ;;  %v2910_v40 = vld [vmem:[#allocation3 + $0x30] sm:$0xff]  ;;  %v3064_v30 = vsub.f32 %v3000_v23, %v3032_v2  ;;  %v2943_v6 = vmul.f32 0.11111111, %v2911_v58  ;;  %v3131_v23 = vadd.f32 1e-05, %v3099_v41 }
 0x292   : > { %2875 = vst.msk [vmem:[#allocation4 + $0x30] sm:$0xff] %vm172_vm0, %v2843_v55  ;;  %v2784_v44 = vpop.xlane.xlu1 %2783  ;;  %v6168_v49 = vmul.f32 0.11111111, %v2910_v40  ;;  %v2556_v55 = vld [vmem:[#allocation3 + $0x40] sm:$0xff]  ;;  %v3097_v40 = vmax.f32 %v3065_v54, 0.0 }
 0x293   : > { %v2842_v57 = vadd.f32 %v2784_v44, %v2714_v26  ;;  %v2782_v14 = vpop.xlane.xlu0 %2781  ;;  %4879 = vrsqrt.f32 %v3131_v23 }
 0x294   : > { %v2841_v1 = vadd.f32 %v2782_v14, %v2713_v61  ;;  %3256 = vperm.xlu1 %4597, %v6168_v49   ;;  %v3096_v61 = vmax.f32 %v3064_v30, 0.0  ;;  %v2909_v44 = vld [vmem:[#allocation3 + $0x28] sm:$0xff] }
 0x295   : > { %2874 = vst.msk [vmem:[#allocation4 + $0x28] sm:$0xff] %vm172_vm0, %v2842_v57  ;;  %v2908_v46 = vld [vmem:[#allocation3 + $0x20] sm:$0xff]  ;;  %v3130_v57 = vadd.f32 1e-05, %v3098_v5  ;;  %v2941_v42 = vmul.f32 0.11111111, %v2909_v44 }
 0x296   : > { %2873 = vst.msk [vmem:[#allocation4 + $0x20] sm:$0xff] %vm172_vm0, %v2841_v1  ;;  %v2603_v53 = vpop.xlane.xlu1 %2602  ;;  %v6173_v25 = vmul.f32 0.11111111, %v2908_v46  ;;  %v3128_v2 = vadd.f32 1e-05, %v3096_v61  ;;  %v2718_v30 = vld [vmem:[#allocation4 + $0x48] sm:$0xff]  ;;  %v3039_v61 = vmul.f32 %v2943_v6, %v2943_v6 }
 0x297   : > { %v2655_v24 = vadd.f32 %v2603_v53, %v2559_v29  ;;  %v2601_v4 = vpop.xlane.xlu0 %2600  ;;  %4881 = vrsqrt.f32 %v3130_v57  ;;  %v2717_v5 = vld [vmem:[#allocation4 + $0x40] sm:$0xff] }
 0x298   : > { %v2654_v39 = vadd.f32 %v2601_v4, %v2558_v62  ;;  %3246 = vperm.xlu1 %4597, %v6173_v25   ;;  %v2975_v14 = vld [vmem:[#allocation4 + $0x38] sm:$0xff]  ;;  %v3129_v62 = vadd.f32 1e-05, %v3097_v40 }
 0x299   : > { %2688 = vst.msk [vmem:[#allocation3 + $0x58] sm:$0xff] %vm172_vm0, %v2655_v24  ;;  %v2974_v1 = vld [vmem:[#allocation4 + $0x30] sm:$0xff]  ;;  %v3007_v24 = vmul.f32 0.11111111, %v2975_v14  ;;  %v2563_v14 = vld [vmem:[#allocation3 + $0x78] sm:$0xff] }
 0x29a   : > { %2687 = vst.msk [vmem:[#allocation3 + $0x50] sm:$0xff] %vm172_vm0, %v2654_v39  ;;  %v2599_v26 = vpop.xlane.xlu1 %2598  ;;  %v3006_v39 = vmul.f32 0.11111111, %v2974_v1  ;;  %4883 = vrsqrt.f32 %v3129_v62  ;;  %v3037_v1 = vmul.f32 %v2941_v42, %v2941_v42  ;;  %v2562_v62 = vld [vmem:[#allocation3 + $0x70] sm:$0xff] }
 0x29b   : > { %v2653_v43 = vadd.f32 %v2599_v26, %v2557_v13  ;;  %v2597_v35 = vpop.xlane.xlu0 %2596  ;;  %v3038_v26 = vmul.f32 %v6168_v49, %v6168_v49  ;;  %4885 = vrsqrt.f32 %v3128_v2 }
 0x29c   : > { %v2652_v63 = vadd.f32 %v2597_v35, %v2556_v55  ;;  %3261 = vperm.xlu1 %4597, %v2943_v6   ;;  %v2973_v58 = vld [vmem:[#allocation4 + $0x28] sm:$0xff] }
 0x29d   : > { %2686 = vst.msk [vmem:[#allocation3 + $0x48] sm:$0xff] %vm172_vm0, %v2653_v43  ;;  %v2972_v54 = vld [vmem:[#allocation4 + $0x20] sm:$0xff]  ;;  %v3005_v44 = vmul.f32 0.11111111, %v2973_v58  ;;  %v3070_v6 = vsub.f32 %v3006_v39, %v3038_v26 }
 0x29e   : > { %2685 = vst.msk [vmem:[#allocation3 + $0x40] sm:$0xff] %vm172_vm0, %v2652_v63  ;;  %v2796_v29 = vpop.xlane.xlu1 %2795  ;;  %v3004_v35 = vmul.f32 0.11111111, %v2972_v54  ;;  %v2560_v39 = vld [vmem:[#allocation3 + $0x60] sm:$0xff] }
 0x29f   : > { %v2848_v46 = vadd.f32 %v2796_v29, %v2720_v28  ;;  %v2794_v53 = vpop.xlane.xlu0 %2793  ;;  %v3071_v28 = vsub.f32 %v3007_v24, %v3039_v61  ;;  %v3069_v54 = vsub.f32 %v3005_v44, %v3037_v1 }
 0x2a0   : > { %v2847_v4 = vadd.f32 %v2794_v53, %v2719_v34  ;;  %3251 = vperm.xlu1 %4597, %v2941_v42   ;;  %v2915_v41 = vld [vmem:[#allocation3 + $0x58] sm:$0xff]  ;;  %v3036_v34 = vmul.f32 %v6173_v25, %v6173_v25  ;;  %v2561_v42 = vld [vmem:[#allocation3 + $0x68] sm:$0xff] }
 0x2a1   : > { %2880 = vst.msk [vmem:[#allocation4 + $0x58] sm:$0xff] %vm172_vm0, %v2848_v46  ;;  %v6181_v13 = vmul.f32 0.11111111, %v2915_v41  ;;  %v2914_v55 = vld [vmem:[#allocation3 + $0x50] sm:$0xff]  ;;  %v3103_v58 = vmax.f32 %v3071_v28, 0.0  ;;  %v3102_v41 = vmax.f32 %v3070_v6, 0.0 }
 0x2a2   : > { %2879 = vst.msk [vmem:[#allocation4 + $0x50] sm:$0xff] %vm172_vm0, %v2847_v4  ;;  %v2792_v40 = vpop.xlane.xlu1 %2791  ;;  %v6186_v43 = vmul.f32 0.11111111, %v2914_v55  ;;  %v2724_v28 = vld [vmem:[#allocation4 + $0x78] sm:$0xff]  ;;  %v2723_v6 = vld [vmem:[#allocation4 + $0x70] sm:$0xff] }
 0x2a3   : > { %v2846_v23 = vadd.f32 %v2792_v40, %v2718_v30  ;;  %3281 = vperm.xlu0 %4598, %v6181_v13   ;;  %v2790_v63 = vpop.xlane.xlu0 %2789  ;;  %v3068_v30 = vsub.f32 %v3004_v35, %v3036_v34  ;;  %v3101_v40 = vmax.f32 %v3069_v54, 0.0 }
 0x2a4   : > { %v2845_v57 = vadd.f32 %v2790_v63, %v2717_v5  ;;  %3276 = vperm.xlu1 %4597, %v6186_v43   ;;  %v2913_v49 = vld [vmem:[#allocation3 + $0x48] sm:$0xff]  ;;  %v4880_v5 = vpop.eup %4879 }
 0x2a5   : > { %2878 = vst.msk [vmem:[#allocation4 + $0x48] sm:$0xff] %vm172_vm0, %v2846_v23  ;;  %v6193_v29 = vmul.f32 0.11111111, %v2913_v49  ;;  %v2912_v46 = vld [vmem:[#allocation3 + $0x40] sm:$0xff]  ;;  %v4882_v26 = vpop.eup %4881  ;;  %v3100_v61 = vmax.f32 %v3068_v30, 0.0 }
 0x2a6   : > { %2877 = vst.msk [vmem:[#allocation4 + $0x40] sm:$0xff] %vm172_vm0, %v2845_v57  ;;  %v2611_v2 = vpop.xlane.xlu1 %2610  ;;  %v6196_v53 = vmul.f32 0.11111111, %v2912_v46  ;;  %v3135_v23 = vadd.f32 1e-05, %v3103_v58  ;;  %v4884_v57 = vpop.eup %4883 }
 0x2a7   : > { %v2659_v24 = vadd.f32 %v2611_v2, %v2563_v14  ;;  %3271 = vperm.xlu0 %4598, %v6193_v29   ;;  %v2609_v4 = vpop.xlane.xlu0 %2608  ;;  %v3134_v14 = vadd.f32 1e-05, %v3102_v41  ;;  %v4886_v34 = vpop.eup %4885  ;;  %v3132_v46 = vadd.f32 1e-05, %v3100_v61  ;;  %v3133_v2 = vadd.f32 1e-05, %v3101_v40 }
 0x2a8   : > { %v2658_v25 = vadd.f32 %v2609_v4, %v2562_v62  ;;  %3266 = vperm.xlu1 %4597, %v6196_v53   ;;  %v2979_v49 = vld [vmem:[#allocation4 + $0x58] sm:$0xff]  ;;  %4887 = vrsqrt.f32 %v3135_v23  ;;  %v3043_v61 = vmul.f32 %v6181_v13, %v6181_v13  ;;  %v3042_v40 = vmul.f32 %v6186_v43, %v6186_v43 }
 0x2a9   : > { %2692 = vst.msk [vmem:[#allocation3 + $0x78] sm:$0xff] %vm172_vm0, %v2659_v24  ;;  %v2978_v1 = vld [vmem:[#allocation4 + $0x50] sm:$0xff]  ;;  %v2722_v24 = vld [vmem:[#allocation4 + $0x68] sm:$0xff]  ;;  %v3011_v4 = vmul.f32 0.11111111, %v2979_v49  ;;  %4889 = vrsqrt.f32 %v3134_v14  ;;  %v2567_v13 = vld [vmem:[#allocation3 + $0x98] sm:$0xff] }
 0x2aa   : > { %2691 = vst.msk [vmem:[#allocation3 + $0x70] sm:$0xff] %vm172_vm0, %v2658_v25  ;;  %v2607_v55 = vpop.xlane.xlu1 %2606  ;;  %4891 = vrsqrt.f32 %v3133_v2  ;;  %v2566_v2 = vld [vmem:[#allocation3 + $0x90] sm:$0xff] }
 0x2ab   : > { %v2657_v35 = vadd.f32 %v2607_v55, %v2561_v42  ;;  %3433 = vperm.xlu0 %4598, %v4880_v5   ;;  %v2605_v44 = vpop.xlane.xlu0 %2604  ;;  %v2721_v55 = vld [vmem:[#allocation4 + $0x60] sm:$0xff]  ;;  %4893 = vrsqrt.f32 %v3132_v46  ;;  %v3075_v14 = vsub.f32 %v3011_v4, %v3043_v61 }
 0x2ac   : > { %v2656_v63 = vadd.f32 %v2605_v44, %v2560_v39  ;;  %3428 = vperm.xlu1 %4597, %v4882_v26   ;;  %v2977_v58 = vld [vmem:[#allocation4 + $0x48] sm:$0xff]  ;;  %v3010_v39 = vmul.f32 0.11111111, %v2978_v1  ;;  %v3040_v1 = vmul.f32 %v6196_v53, %v6196_v53 }
 0x2ad   : > { %2690 = vst.msk [vmem:[#allocation3 + $0x68] sm:$0xff] %vm172_vm0, %v2657_v35  ;;  %v2976_v25 = vld [vmem:[#allocation4 + $0x40] sm:$0xff]  ;;  %v3009_v23 = vmul.f32 0.11111111, %v2977_v58  ;;  %v2565_v53 = vld [vmem:[#allocation3 + $0x88] sm:$0xff] }
 0x2ae   : > { %2689 = vst.msk [vmem:[#allocation3 + $0x60] sm:$0xff] %vm172_vm0, %v2656_v63  ;;  %v2804_v62 = vpop.xlane.xlu1 %2803  ;;  %v3008_v63 = vmul.f32 0.11111111, %v2976_v25  ;;  %v3074_v43 = vsub.f32 %v3010_v39, %v3042_v40  ;;  %v3107_v25 = vmax.f32 %v3075_v14, 0.0  ;;  %v2564_v39 = vld [vmem:[#allocation3 + $0x80] sm:$0xff]  ;;  %v2728_v14 = vld [vmem:[#allocation4 + $0x98] sm:$0xff] }
 0x2af   : > { %v2852_v30 = vadd.f32 %v2804_v62, %v2724_v28  ;;  %3423 = vperm.xlu0 %4598, %v4884_v57   ;;  %v2802_v54 = vpop.xlane.xlu0 %2801 }
 0x2b0   : > { %v2851_v42 = vadd.f32 %v2802_v54, %v2723_v6  ;;  %3418 = vperm.xlu1 %4597, %v4886_v34   ;;  %v2919_v41 = vld [vmem:[#allocation3 + $0x78] sm:$0xff]  ;;  %v3041_v34 = vmul.f32 %v6193_v29, %v6193_v29  ;;  %v3072_v4 = vsub.f32 %v3008_v63, %v3040_v1 }
 0x2b1   : > { %2884 = vst.msk [vmem:[#allocation4 + $0x78] sm:$0xff] %vm172_vm0, %v2852_v30  ;;  %v6205_v5 = vmul.f32 0.11111111, %v2919_v41  ;;  %v2918_v26 = vld [vmem:[#allocation3 + $0x70] sm:$0xff]  ;;  %v3106_v41 = vmax.f32 %v3074_v43, 0.0 }
 0x2b2   : > { %2883 = vst.msk [vmem:[#allocation4 + $0x70] sm:$0xff] %vm172_vm0, %v2851_v42  ;;  %v2800_v35 = vpop.xlane.xlu1 %2799  ;;  %v6212_v44 = vmul.f32 0.11111111, %v2918_v26 }
 0x2b3   : > { %v2850_v28 = vadd.f32 %v2800_v35, %v2722_v24  ;;  %3301 = vperm.xlu0 %4598, %v6205_v5   ;;  %v2798_v57 = vpop.xlane.xlu0 %2797  ;;  %v3073_v24 = vsub.f32 %v3009_v23, %v3041_v34  ;;  %v3104_v35 = vmax.f32 %v3072_v4, 0.0  ;;  %v2727_v34 = vld [vmem:[#allocation4 + $0x90] sm:$0xff] }
 0x2b4   : > { %v2849_v49 = vadd.f32 %v2798_v57, %v2721_v55  ;;  %3296 = vperm.xlu1 %4597, %v6212_v44   ;;  %v2917_v6 = vld [vmem:[#allocation3 + $0x68] sm:$0xff]  ;;  %v4888_v55 = vpop.eup %4887 }
 0x2b5   : > { %2882 = vst.msk [vmem:[#allocation4 + $0x68] sm:$0xff] %vm172_vm0, %v2850_v28  ;;  %v6221_v62 = vmul.f32 0.11111111, %v2917_v6  ;;  %v2916_v30 = vld [vmem:[#allocation3 + $0x60] sm:$0xff]  ;;  %v4890_v61 = vpop.eup %4889  ;;  %v3105_v40 = vmax.f32 %v3073_v24, 0.0 }
 0x2b6   : > { %2881 = vst.msk [vmem:[#allocation4 + $0x60] sm:$0xff] %vm172_vm0, %v2849_v49  ;;  %v2619_v46 = vpop.xlane.xlu1 %2618  ;;  %v6224_v54 = vmul.f32 0.11111111, %v2916_v30  ;;  %v3139_v28 = vadd.f32 1e-05, %v3107_v25  ;;  %v4892_v49 = vpop.eup %4891 }
 0x2b7   : > { %v2663_v58 = vadd.f32 %v2619_v46, %v2567_v13  ;;  %3291 = vperm.xlu0 %4598, %v6221_v62   ;;  %v2617_v29 = vpop.xlane.xlu0 %2616  ;;  %v3138_v13 = vadd.f32 1e-05, %v3106_v41  ;;  %v4894_v1 = vpop.eup %4893  ;;  %v3137_v30 = vadd.f32 1e-05, %v3105_v40  ;;  %v3136_v46 = vadd.f32 1e-05, %v3104_v35 }
 0x2b8   : > { %v2662_v42 = vadd.f32 %v2617_v29, %v2566_v2  ;;  %3286 = vperm.xlu1 %4597, %v6224_v54   ;;  %v2983_v6 = vld [vmem:[#allocation4 + $0x78] sm:$0xff]  ;;  %4895 = vrsqrt.f32 %v3139_v28  ;;  %v2725_v41 = vld [vmem:[#allocation4 + $0x80] sm:$0xff]  ;;  %v3047_v40 = vmul.f32 %v6205_v5, %v6205_v5 }
 0x2b9   : > { %2696 = vst.msk [vmem:[#allocation3 + $0x98] sm:$0xff] %vm172_vm0, %v2663_v58  ;;  %v2982_v43 = vld [vmem:[#allocation4 + $0x70] sm:$0xff]  ;;  %v2726_v58 = vld [vmem:[#allocation4 + $0x88] sm:$0xff]  ;;  %v3015_v29 = vmul.f32 0.11111111, %v2983_v6  ;;  %4897 = vrsqrt.f32 %v3138_v13  ;;  %v2571_v5 = vld [vmem:[#allocation3 + $0xb8] sm:$0xff] }
 0x2ba   : > { %2695 = vst.msk [vmem:[#allocation3 + $0x90] sm:$0xff] %vm172_vm0, %v2662_v42  ;;  %v2615_v26 = vpop.xlane.xlu1 %2614  ;;  %v3014_v25 = vmul.f32 0.11111111, %v2982_v43  ;;  %4899 = vrsqrt.f32 %v3137_v30  ;;  %v3045_v30 = vmul.f32 %v6221_v62, %v6221_v62 }
 0x2bb   : > { %v2661_v23 = vadd.f32 %v2615_v26, %v2565_v53  ;;  %3453 = vperm.xlu0 %4598, %v4888_v55   ;;  %v2613_v63 = vpop.xlane.xlu0 %2612  ;;  %4901 = vrsqrt.f32 %v3136_v46 }
 0x2bc   : > { %v2660_v57 = vadd.f32 %v2613_v63, %v2564_v39  ;;  %3448 = vperm.xlu1 %4597, %v4890_v61   ;;  %v2981_v39 = vld [vmem:[#allocation4 + $0x68] sm:$0xff]  ;;  %v3046_v63 = vmul.f32 %v6212_v44, %v6212_v44 }
 0x2bd   : > { %2694 = vst.msk [vmem:[#allocation3 + $0x88] sm:$0xff] %vm172_vm0, %v2661_v23  ;;  %v2980_v55 = vld [vmem:[#allocation4 + $0x60] sm:$0xff] }
 0x2be   : > { %2693 = vst.msk [vmem:[#allocation3 + $0x80] sm:$0xff] %vm172_vm0, %v2660_v57  ;;  %v2812_v2 = vpop.xlane.xlu1 %2811  ;;  %v3012_v13 = vmul.f32 0.11111111, %v2980_v55 }
 0x2bf   : > { %v2856_v24 = vadd.f32 %v2812_v2, %v2728_v14  ;;  %3443 = vperm.xlu0 %4598, %v4892_v49   ;;  %v2810_v4 = vpop.xlane.xlu0 %2809  ;;  %v3079_v14 = vsub.f32 %v3015_v29, %v3047_v40  ;;  %v3013_v49 = vmul.f32 0.11111111, %v2981_v39  ;;  %v2570_v2 = vld [vmem:[#allocation3 + $0xb0] sm:$0xff]  ;;  %v2569_v39 = vld [vmem:[#allocation3 + $0xa8] sm:$0xff] }
 0x2c0   : > { %v2855_v42 = vadd.f32 %v2810_v4, %v2727_v34  ;;  %3438 = vperm.xlu1 %4597, %v4894_v1   ;;  %v2923_v53 = vld [vmem:[#allocation3 + $0x98] sm:$0xff]  ;;  %v3078_v34 = vsub.f32 %v3014_v25, %v3046_v63 }
 0x2c1   : > { %2888 = vst.msk [vmem:[#allocation4 + $0x98] sm:$0xff] %vm172_vm0, %v2856_v24  ;;  %v6233_v26 = vmul.f32 0.11111111, %v2923_v53  ;;  %v2922_v61 = vld [vmem:[#allocation3 + $0x90] sm:$0xff]  ;;  %v3044_v24 = vmul.f32 %v6224_v54, %v6224_v54  ;;  %v3111_v25 = vmax.f32 %v3079_v14, 0.0  ;;  %v2568_v54 = vld [vmem:[#allocation3 + $0xa0] sm:$0xff] }
 0x2c2   : > { %2887 = vst.msk [vmem:[#allocation4 + $0x90] sm:$0xff] %vm172_vm0, %v2855_v42  ;;  %v2808_v35 = vpop.xlane.xlu1 %2807  ;;  %v6238_v23 = vmul.f32 0.11111111, %v2922_v61  ;;  %v3077_v42 = vsub.f32 %v3013_v49, %v3045_v30  ;;  %v3110_v62 = vmax.f32 %v3078_v34, 0.0  ;;  %v4896_v55 = vpop.eup %4895  ;;  %v2731_v34 = vld [vmem:[#allocation4 + $0xb0] sm:$0xff] }
 0x2c3   : > { %v2854_v28 = vadd.f32 %v2808_v35, %v2726_v58  ;;  %3321 = vperm.xlu0 %4598, %v6233_v26   ;;  %v2806_v57 = vpop.xlane.xlu0 %2805  ;;  %v3076_v53 = vsub.f32 %v3012_v13, %v3044_v24  ;;  %v4898_v40 = vpop.eup %4897 }
 0x2c4   : > { %v2853_v6 = vadd.f32 %v2806_v57, %v2725_v41  ;;  %3316 = vperm.xlu1 %4597, %v6238_v23   ;;  %v2921_v43 = vld [vmem:[#allocation3 + $0x88] sm:$0xff]  ;;  %v3109_v57 = vmax.f32 %v3077_v42, 0.0 }
 0x2c5   : > { %2886 = vst.msk [vmem:[#allocation4 + $0x88] sm:$0xff] %vm172_vm0, %v2854_v28  ;;  %v6245_v1 = vmul.f32 0.11111111, %v2921_v43  ;;  %v2920_v44 = vld [vmem:[#allocation3 + $0x80] sm:$0xff]  ;;  %v3143_v28 = vadd.f32 1e-05, %v3111_v25 }
 0x2c6   : > { %2885 = vst.msk [vmem:[#allocation4 + $0x80] sm:$0xff] %vm172_vm0, %v2853_v6  ;;  %v2627_v4 = vpop.xlane.xlu1 %2626  ;;  %v6252_v58 = vmul.f32 0.11111111, %v2920_v44  ;;  %v3108_v14 = vmax.f32 %v3076_v53, 0.0  ;;  %v2732_v6 = vld [vmem:[#allocation4 + $0xb8] sm:$0xff]  ;;  %v2729_v25 = vld [vmem:[#allocation4 + $0xa0] sm:$0xff] }
 0x2c7   : > { %v2667_v29 = vadd.f32 %v2627_v4, %v2571_v5  ;;  %3311 = vperm.xlu0 %4598, %v6245_v1   ;;  %v2625_v46 = vpop.xlane.xlu0 %2624  ;;  %v4900_v5 = vpop.eup %4899  ;;  %v3142_v43 = vadd.f32 1e-05, %v3110_v62  ;;  %4903 = vrsqrt.f32 %v3143_v28  ;;  %v3141_v42 = vadd.f32 1e-05, %v3109_v57 }
 0x2c8   : > { %v2666_v41 = vadd.f32 %v2625_v46, %v2570_v2  ;;  %3306 = vperm.xlu1 %4597, %v6252_v58   ;;  %v2987_v49 = vld [vmem:[#allocation4 + $0x98] sm:$0xff]  ;;  %v4902_v30 = vpop.eup %4901  ;;  %v2730_v46 = vld [vmem:[#allocation4 + $0xa8] sm:$0xff]  ;;  %v3140_v53 = vadd.f32 1e-05, %v3108_v14  ;;  %v3050_v14 = vmul.f32 %v6238_v23, %v6238_v23  ;;  %v2574_v23 = vld [vmem:[#allocation3 + $0xd0] sm:$0xff] }
 0x2c9   : > { %2700 = vst.msk [vmem:[#allocation3 + $0xb8] sm:$0xff] %vm172_vm0, %v2667_v29  ;;  %v2986_v2 = vld [vmem:[#allocation4 + $0x90] sm:$0xff]  ;;  %v3019_v24 = vmul.f32 0.11111111, %v2987_v49  ;;  %4905 = vrsqrt.f32 %v3142_v43  ;;  %v2575_v43 = vld [vmem:[#allocation3 + $0xd8] sm:$0xff] }
 0x2ca   : > { %2699 = vst.msk [vmem:[#allocation3 + $0xb0] sm:$0xff] %vm172_vm0, %v2666_v41  ;;  %v2623_v61 = vpop.xlane.xlu1 %2622  ;;  %4907 = vrsqrt.f32 %v3141_v42 }
 0x2cb   : > { %v2665_v35 = vadd.f32 %v2623_v61, %v2569_v39  ;;  %3473 = vperm.xlu0 %4598, %v4896_v55   ;;  %v2621_v63 = vpop.xlane.xlu0 %2620  ;;  %v3018_v55 = vmul.f32 0.11111111, %v2986_v2  ;;  %4909 = vrsqrt.f32 %v3140_v53 }
 0x2cc   : > { %v2664_v13 = vadd.f32 %v2621_v63, %v2568_v54  ;;  %3468 = vperm.xlu1 %4597, %v4898_v40   ;;  %v2985_v41 = vld [vmem:[#allocation4 + $0x88] sm:$0xff]  ;;  %v3051_v54 = vmul.f32 %v6233_v26, %v6233_v26 }
 0x2cd   : > { %2698 = vst.msk [vmem:[#allocation3 + $0xa8] sm:$0xff] %vm172_vm0, %v2665_v35  ;;  %v2984_v61 = vld [vmem:[#allocation4 + $0x80] sm:$0xff]  ;;  %v3017_v49 = vmul.f32 0.11111111, %v2985_v41  ;;  %v3082_v2 = vsub.f32 %v3018_v55, %v3050_v14 }
 0x2ce   : > { %2697 = vst.msk [vmem:[#allocation3 + $0xa0] sm:$0xff] %vm172_vm0, %v2664_v13  ;;  %v2820_v44 = vpop.xlane.xlu1 %2819  ;;  %v3083_v57 = vsub.f32 %v3019_v24, %v3051_v54  ;;  %v3016_v26 = vmul.f32 0.11111111, %v2984_v61 }
 0x2cf   : > { %v2860_v4 = vadd.f32 %v2820_v44, %v2732_v6  ;;  %3463 = vperm.xlu0 %4598, %v4900_v5   ;;  %v2818_v29 = vpop.xlane.xlu0 %2817  ;;  %v3049_v44 = vmul.f32 %v6245_v1, %v6245_v1  ;;  %v3114_v54 = vmax.f32 %v3082_v2, 0.0 }
 0x2d0   : > { %v2859_v39 = vadd.f32 %v2818_v29, %v2731_v34  ;;  %3458 = vperm.xlu1 %4597, %v4902_v30   ;;  %v2927_v62 = vld [vmem:[#allocation3 + $0xb8] sm:$0xff] }
 0x2d1   : > { %2892 = vst.msk [vmem:[#allocation4 + $0xb8] sm:$0xff] %vm172_vm0, %v2860_v4  ;;  %v2959_v40 = vmul.f32 0.11111111, %v2927_v62  ;;  %v2926_v35 = vld [vmem:[#allocation3 + $0xb0] sm:$0xff]  ;;  %v3048_v4 = vmul.f32 %v6252_v58, %v6252_v58  ;;  %v3081_v42 = vsub.f32 %v3017_v49, %v3049_v44  ;;  %v2573_v62 = vld [vmem:[#allocation3 + $0xc8] sm:$0xff]  ;;  %v2572_v58 = vld [vmem:[#allocation3 + $0xc0] sm:$0xff]  ;;  %v4904_v61 = vpop.eup %4903 }
 0x2d2   : > { %2891 = vst.msk [vmem:[#allocation4 + $0xb0] sm:$0xff] %vm172_vm0, %v2859_v39  ;;  %v2816_v63 = vpop.xlane.xlu1 %2815  ;;  %v6264_v28 = vmul.f32 0.11111111, %v2926_v35  ;;  %v3146_v2 = vadd.f32 1e-05, %v3114_v54 }
 0x2d3   : > { %v2858_v13 = vadd.f32 %v2816_v63, %v2730_v46  ;;  %3341 = vperm.xlu0 %4598, %v2959_v40   ;;  %v2814_v6 = vpop.xlane.xlu0 %2813  ;;  %v3080_v41 = vsub.f32 %v3016_v26, %v3048_v4  ;;  %v3113_v49 = vmax.f32 %v3081_v42, 0.0 }
 0x2d4   : > { %v2857_v5 = vadd.f32 %v2814_v6, %v2729_v25  ;;  %3336 = vperm.xlu1 %4597, %v6264_v28   ;;  %v2925_v34 = vld [vmem:[#allocation3 + $0xa8] sm:$0xff]  ;;  %v3115_v25 = vmax.f32 %v3083_v57, 0.0  ;;  %v4906_v57 = vpop.eup %4905 }
 0x2d5   : > { %2890 = vst.msk [vmem:[#allocation4 + $0xa8] sm:$0xff] %vm172_vm0, %v2858_v13  ;;  %v6272_v30 = vmul.f32 0.11111111, %v2925_v34  ;;  %v2924_v24 = vld [vmem:[#allocation3 + $0xa0] sm:$0xff]  ;;  %v3112_v26 = vmax.f32 %v3080_v41, 0.0  ;;  %v2736_v34 = vld [vmem:[#allocation4 + $0xd8] sm:$0xff]  ;;  %v4908_v4 = vpop.eup %4907  ;;  %v3054_v41 = vmul.f32 %v6264_v28, %v6264_v28 }
 0x2d6   : > { %2889 = vst.msk [vmem:[#allocation4 + $0xa0] sm:$0xff] %vm172_vm0, %v2857_v5  ;;  %v2635_v29 = vpop.xlane.xlu1 %2634  ;;  %v6277_v46 = vmul.f32 0.11111111, %v2924_v24  ;;  %v3147_v14 = vadd.f32 1e-05, %v3115_v25  ;;  %v2735_v24 = vld [vmem:[#allocation4 + $0xd0] sm:$0xff]  ;;  %v4910_v42 = vpop.eup %4909 }
 0x2d7   : > { %v2671_v53 = vadd.f32 %v2635_v29, %v2575_v43  ;;  %3331 = vperm.xlu0 %4598, %v6272_v30   ;;  %v2633_v1 = vpop.xlane.xlu0 %2632  ;;  %v3055_v29 = vmul.f32 %v2959_v40, %v2959_v40  ;;  %v3144_v54 = vadd.f32 1e-05, %v3112_v26  ;;  %v3053_v28 = vmul.f32 %v6272_v30, %v6272_v30 }
 0x2d8   : > { %v2670_v39 = vadd.f32 %v2633_v1, %v2574_v23  ;;  %3326 = vperm.xlu1 %4597, %v6277_v46   ;;  %v2991_v55 = vld [vmem:[#allocation4 + $0xb8] sm:$0xff]  ;;  %4911 = vrsqrt.f32 %v3147_v14  ;;  %v3145_v1 = vadd.f32 1e-05, %v3113_v49  ;;  %v2733_v49 = vld [vmem:[#allocation4 + $0xc0] sm:$0xff] }
 0x2d9   : > { %2704 = vst.msk [vmem:[#allocation3 + $0xd8] sm:$0xff] %vm172_vm0, %v2671_v53  ;;  %v2990_v35 = vld [vmem:[#allocation4 + $0xb0] sm:$0xff]  ;;  %v3023_v5 = vmul.f32 0.11111111, %v2991_v55  ;;  %4913 = vrsqrt.f32 %v3146_v2 }
 0x2da   : > { %2703 = vst.msk [vmem:[#allocation3 + $0xd0] sm:$0xff] %vm172_vm0, %v2670_v39  ;;  %v2631_v63 = vpop.xlane.xlu1 %2630  ;;  %v3022_v44 = vmul.f32 0.11111111, %v2990_v35  ;;  %v2734_v35 = vld [vmem:[#allocation4 + $0xc8] sm:$0xff]  ;;  %4915 = vrsqrt.f32 %v3145_v1 }
 0x2db   : > { %v2669_v13 = vadd.f32 %v2631_v63, %v2573_v62  ;;  %3493 = vperm.xlu0 %4598, %v4904_v61   ;;  %v2629_v6 = vpop.xlane.xlu0 %2628  ;;  %v3087_v55 = vsub.f32 %v3023_v5, %v3055_v29  ;;  %v3052_v5 = vmul.f32 %v6277_v46, %v6277_v46  ;;  %4917 = vrsqrt.f32 %v3144_v54  ;;  %v2738_v54 = vld [vmem:[#allocation4 + $0xe8] sm:$0xff] }
 0x2dc   : > { %v2668_v43 = vadd.f32 %v2629_v6, %v2572_v58  ;;  %3488 = vperm.xlu1 %4597, %v4906_v57   ;;  %v2989_v23 = vld [vmem:[#allocation4 + $0xa8] sm:$0xff]  ;;  %v3086_v63 = vsub.f32 %v3022_v44, %v3054_v41 }
 0x2dd   : > { %2702 = vst.msk [vmem:[#allocation3 + $0xc8] sm:$0xff] %vm172_vm0, %v2669_v13  ;;  %v2988_v53 = vld [vmem:[#allocation4 + $0xa0] sm:$0xff]  ;;  %v3021_v58 = vmul.f32 0.11111111, %v2989_v23  ;;  %v3119_v2 = vmax.f32 %v3087_v55, 0.0 }
 0x2de   : > { %2701 = vst.msk [vmem:[#allocation3 + $0xc0] sm:$0xff] %vm172_vm0, %v2668_v43  ;;  %v2828_v25 = vpop.xlane.xlu1 %2827  ;;  %v3020_v57 = vmul.f32 0.11111111, %v2988_v53  ;;  %v3118_v29 = vmax.f32 %v3086_v63, 0.0 }
 0x2df   : > { %v2864_v39 = vadd.f32 %v2828_v25, %v2736_v34  ;;  %3483 = vperm.xlu0 %4598, %v4908_v4   ;;  %v2826_v62 = vpop.xlane.xlu0 %2825  ;;  %v3085_v44 = vsub.f32 %v3021_v58, %v3053_v28  ;;  %v2576_v25 = vld [vmem:[#allocation3 + $0xe0] sm:$0xff] }
 0x2e0   : > { %v2863_v61 = vadd.f32 %v2826_v62, %v2735_v24  ;;  %3478 = vperm.xlu1 %4597, %v4910_v42   ;;  %v2931_v40 = vld [vmem:[#allocation3 + $0xd8] sm:$0xff]  ;;  %v2577_v24 = vld [vmem:[#allocation3 + $0xe8] sm:$0xff]  ;;  %v3084_v30 = vsub.f32 %v3020_v57, %v3052_v5  ;;  %v3151_v62 = vadd.f32 1e-05, %v3119_v2  ;;  %v3150_v63 = vadd.f32 1e-05, %v3118_v29 }
 0x2e1   : > { %2896 = vst.msk [vmem:[#allocation4 + $0xd8] sm:$0xff] %vm172_vm0, %v2864_v39  ;;  %v2963_v14 = vmul.f32 0.11111111, %v2931_v40  ;;  %v2930_v13 = vld [vmem:[#allocation3 + $0xd0] sm:$0xff]  ;;  %v3117_v55 = vmax.f32 %v3085_v44, 0.0 }
 0x2e2   : > { %2895 = vst.msk [vmem:[#allocation4 + $0xd0] sm:$0xff] %vm172_vm0, %v2863_v61  ;;  %v2824_v6 = vpop.xlane.xlu1 %2823  ;;  %v2962_v26 = vmul.f32 0.11111111, %v2930_v13  ;;  %v4912_v40 = vpop.eup %4911  ;;  %v3116_v57 = vmax.f32 %v3084_v30, 0.0  ;;  %4919 = vrsqrt.f32 %v3151_v62  ;;  %v2579_v30 = vld [vmem:[#allocation3 + $0xf8] sm:$0xff] }
 0x2e3   : > { %v2862_v43 = vadd.f32 %v2824_v6, %v2734_v35  ;;  %3361 = vperm.xlu0 %4598, %v2963_v14   ;;  %v2822_v34 = vpop.xlane.xlu0 %2821  ;;  %v2737_v35 = vld [vmem:[#allocation4 + $0xe0] sm:$0xff]  ;;  %v3059_v28 = vmul.f32 %v2963_v14, %v2963_v14  ;;  %4921 = vrsqrt.f32 %v3150_v63 }
 0x2e4   : > { %v2861_v23 = vadd.f32 %v2822_v34, %v2733_v49  ;;  %3356 = vperm.xlu1 %4597, %v2962_v26   ;;  %v2929_v4 = vld [vmem:[#allocation3 + $0xc8] sm:$0xff]  ;;  %v3058_v34 = vmul.f32 %v2962_v26, %v2962_v26 }
 0x2e5   : > { %2894 = vst.msk [vmem:[#allocation4 + $0xc8] sm:$0xff] %vm172_vm0, %v2862_v43  ;;  %v2961_v53 = vmul.f32 0.11111111, %v2929_v4  ;;  %v2928_v42 = vld [vmem:[#allocation3 + $0xc0] sm:$0xff]  ;;  %v4914_v43 = vpop.eup %4913 }
 0x2e6   : > { %2893 = vst.msk [vmem:[#allocation4 + $0xc0] sm:$0xff] %vm172_vm0, %v2861_v23  ;;  %v2639_v46 = vpop.xlane.xlu1 %2638  ;;  %v2960_v41 = vmul.f32 0.11111111, %v2928_v42  ;;  %v3149_v23 = vadd.f32 1e-05, %v3117_v55 }
 0x2e7   : > { %v2673_v39 = vadd.f32 %v2639_v46, %v2577_v24  ;;  %3351 = vperm.xlu0 %4598, %v2961_v53   ;;  %v2637_v1 = vpop.xlane.xlu0 %2636  ;;  %v3057_v26 = vmul.f32 %v2961_v53, %v2961_v53 }
 0x2e8   : > { %v2995_v58 = vld [vmem:[#allocation4 + $0xd8] sm:$0xff]  ;;  %v2672_v61 = vadd.f32 %v2637_v1, %v2576_v25  ;;  %3346 = vperm.xlu1 %4597, %v2960_v41   ;;  %v3148_v25 = vadd.f32 1e-05, %v3116_v57  ;;  %v4916_v1 = vpop.eup %4915  ;;  %4923 = vrsqrt.f32 %v3149_v23 }
 0x2e9   : > { %v3027_v49 = vmul.f32 0.11111111, %v2995_v58  ;;  %v2994_v13 = vld [vmem:[#allocation4 + $0xd0] sm:$0xff]  ;;  %2706 = vst.msk [vmem:[#allocation3 + $0xe8] sm:$0xff] %vm172_vm0, %v2673_v39  ;;  %v4918_v55 = vpop.eup %4917 }
 0x2ea   : > { %v3026_v6 = vmul.f32 0.11111111, %v2994_v13  ;;  %2705 = vst.msk [vmem:[#allocation3 + $0xe0] sm:$0xff] %vm172_vm0, %v2672_v61  ;;  %v2832_v5 = vpop.xlane.xlu1 %2831  ;;  %v2578_v39 = vld [vmem:[#allocation3 + $0xf0] sm:$0xff]  ;;  %v3056_v61 = vmul.f32 %v2960_v41, %v2960_v41  ;;  %4925 = vrsqrt.f32 %v3148_v25 }
 0x2eb   : > { %v2866_v2 = vadd.f32 %v2832_v5, %v2738_v54  ;;  %3513 = vperm.xlu0 %4598, %v4912_v40   ;;  %v2830_v44 = vpop.xlane.xlu0 %2829  ;;  %v3091_v24 = vsub.f32 %v3027_v49, %v3059_v28  ;;  %v2740_v49 = vld [vmem:[#allocation4 + $0xf8] sm:$0xff]  ;;  %v2739_v5 = vld [vmem:[#allocation4 + $0xf0] sm:$0xff] }
 0x2ec   : > { %v2993_v4 = vld [vmem:[#allocation4 + $0xc8] sm:$0xff]  ;;  %v2865_v29 = vadd.f32 %v2830_v44, %v2737_v35  ;;  %3508 = vperm.xlu1 %4597, %v4914_v43   ;;  %v3090_v42 = vsub.f32 %v3026_v6, %v3058_v34 }
 0x2ed   : > { %v3025_v14 = vmul.f32 0.11111111, %v2993_v4  ;;  %v2992_v46 = vld [vmem:[#allocation4 + $0xc0] sm:$0xff]  ;;  %2898 = vst.msk [vmem:[#allocation4 + $0xe8] sm:$0xff] %vm172_vm0, %v2866_v2  ;;  %v3123_v40 = vmax.f32 %v3091_v24, 0.0 }
 0x2ee   : > { %v3024_v58 = vmul.f32 0.11111111, %v2992_v46  ;;  %2897 = vst.msk [vmem:[#allocation4 + $0xe0] sm:$0xff] %vm172_vm0, %v2865_v29  ;;  %v2643_v62 = vpop.xlane.xlu1 %2642  ;;  %v3122_v28 = vmax.f32 %v3090_v42, 0.0 }
 0x2ef   : > { %v2675_v54 = vadd.f32 %v2643_v62, %v2579_v30  ;;  %3503 = vperm.xlu0 %4598, %v4916_v1   ;;  %v2641_v35 = vpop.xlane.xlu0 %2640  ;;  %v3089_v63 = vsub.f32 %v3025_v14, %v3057_v26  ;;  %v3155_v23 = vadd.f32 1e-05, %v3123_v40 }
 0x2f0   : > { %v2674_v57 = vadd.f32 %v2641_v35, %v2578_v39  ;;  %3498 = vperm.xlu1 %4597, %v4918_v55   ;;  %v2933_v13 = vld [vmem:[#allocation3 + $0xe8] sm:$0xff]  ;;  %v3088_v6 = vsub.f32 %v3024_v58, %v3056_v61  ;;  %v3154_v30 = vadd.f32 1e-05, %v3122_v28  ;;  %v4920_v39 = vpop.eup %4919 }
 0x2f1   : > { %2708 = vst.msk [vmem:[#allocation3 + $0xf8] sm:$0xff] %vm172_vm0, %v2675_v54  ;;  %v2965_v53 = vmul.f32 0.11111111, %v2933_v13  ;;  %v2932_v43 = vld [vmem:[#allocation3 + $0xe0] sm:$0xff]  ;;  %v3121_v24 = vmax.f32 %v3089_v63, 0.0  ;;  %v4922_v58 = vpop.eup %4921  ;;  %4927 = vrsqrt.f32 %v3155_v23 }
 0x2f2   : > { %2707 = vst.msk [vmem:[#allocation3 + $0xf0] sm:$0xff] %vm172_vm0, %v2674_v57  ;;  %v2836_v41 = vpop.xlane.xlu1 %2835  ;;  %v2964_v34 = vmul.f32 0.11111111, %v2932_v43  ;;  %v3120_v25 = vmax.f32 %v3088_v6, 0.0  ;;  %4929 = vrsqrt.f32 %v3154_v30 }
 0x2f3   : > { %v2868_v2 = vadd.f32 %v2836_v41, %v2740_v49  ;;  %3371 = vperm.xlu0 %4598, %v2965_v53   ;;  %v2834_v44 = vpop.xlane.xlu0 %2833  ;;  %v3061_v14 = vmul.f32 %v2965_v53, %v2965_v53  ;;  %v3153_v55 = vadd.f32 1e-05, %v3121_v24  ;;  %v4924_v49 = vpop.eup %4923 }
 0x2f4   : > { %v2997_v4 = vld [vmem:[#allocation4 + $0xe8] sm:$0xff]  ;;  %v2867_v29 = vadd.f32 %v2834_v44, %v2739_v5  ;;  %3366 = vperm.xlu1 %4597, %v2964_v34   ;;  %v3060_v26 = vmul.f32 %v2964_v34, %v2964_v34  ;;  %v3152_v35 = vadd.f32 1e-05, %v3120_v25  ;;  %v4926_v6 = vpop.eup %4925 }
 0x2f5   : > { %2900 = vst.msk [vmem:[#allocation4 + $0xf8] sm:$0xff] %vm172_vm0, %v2868_v2  ;;  %v3029_v42 = vmul.f32 0.11111111, %v2997_v4  ;;  %v2996_v46 = vld [vmem:[#allocation4 + $0xe0] sm:$0xff]  ;;  %4931 = vrsqrt.f32 %v3153_v55 }
 0x2f6   : > { %2899 = vst.msk [vmem:[#allocation4 + $0xf0] sm:$0xff] %vm172_vm0, %v2867_v29  ;;  %v3028_v1 = vmul.f32 0.11111111, %v2996_v46  ;;  %4933 = vrsqrt.f32 %v3152_v35 }
 0x2f7   : > { %v3093_v62 = vsub.f32 %v3029_v42, %v3061_v14  ;;  %3533 = vperm.xlu0 %4598, %v4920_v39  }
 0x2f8   : > { %v3092_v61 = vsub.f32 %v3028_v1, %v3060_v26  ;;  %3528 = vperm.xlu1 %4597, %v4922_v58   ;;  %v2935_v54 = vld [vmem:[#allocation3 + $0xf8] sm:$0xff] }
 0x2f9   : > { %v3125_v40 = vmax.f32 %v3093_v62, 0.0  ;;  %v2967_v63 = vmul.f32 0.11111111, %v2935_v54  ;;  %v2934_v57 = vld [vmem:[#allocation3 + $0xf0] sm:$0xff] }
 0x2fa   : > { %v3124_v13 = vmax.f32 %v3092_v61, 0.0  ;;  %v2966_v28 = vmul.f32 0.11111111, %v2934_v57 }
 0x2fb   : > { %3523 = vperm.xlu0 %4598, %v4924_v49   ;;  %v3157_v53 = vadd.f32 1e-05, %v3125_v40  ;;  %v3063_v34 = vmul.f32 %v2967_v63, %v2967_v63  ;;  %v4928_v30 = vpop.eup %4927 }
 0x2fc   : > { %3518 = vperm.xlu1 %4597, %v4926_v6   ;;  %v2999_v5 = vld [vmem:[#allocation4 + $0xf8] sm:$0xff]  ;;  %v3156_v43 = vadd.f32 1e-05, %v3124_v13  ;;  %v3062_v23 = vmul.f32 %v2966_v28, %v2966_v28  ;;  %v4930_v42 = vpop.eup %4929 }
 0x2fd   : > { %v3031_v41 = vmul.f32 0.11111111, %v2999_v5  ;;  %v2998_v2 = vld [vmem:[#allocation4 + $0xf0] sm:$0xff]  ;;  %4935 = vrsqrt.f32 %v3157_v53 }
 0x2fe   : > { %v3030_v44 = vmul.f32 0.11111111, %v2998_v2  ;;  %4937 = vrsqrt.f32 %v3156_v43 }
 0x2ff   : > { %v3095_v24 = vsub.f32 %v3031_v41, %v3063_v34  ;;  %3381 = vperm.xlu0 %4598, %v2967_v63   ;;  %v4932_v1 = vpop.eup %4931 }
 0x300   : > { %3376 = vperm.xlu1 %4597, %v2966_v28   ;;  %v3094_v4 = vsub.f32 %v3030_v44, %v3062_v23  ;;  %v4934_v26 = vpop.eup %4933 }
 0x301   : > { %v3127_v29 = vmax.f32 %v3095_v24, 0.0 }
 0x302   : > { %v3126_v25 = vmax.f32 %v3094_v4, 0.0  ;;  %v3237_v46 = vpop.permute.xlu1 %3236 }
 0x303   : > { %v3159_v14 = vadd.f32 1e-05, %v3127_v29  ;;  %3553 = vperm.xlu0 %4598, %v4928_v30   ;;  %v3227_v49 = vpop.permute.xlu0 %3226  ;;  %v3386_v41 = vsub.f32 %v5819_v12, %v3237_v46 }
 0x304   : > { %v3158_v39 = vadd.f32 1e-05, %v3126_v25  ;;  %3548 = vperm.xlu1 %4597, %v4930_v42  }
 0x305   : > { %4939 = vrsqrt.f32 %v3159_v14 }
 0x306   : > { %4941 = vrsqrt.f32 %v3158_v39  ;;  %v3242_v58 = vpop.permute.xlu1 %3241 }
 0x307   : > { %3543 = vperm.xlu0 %4598, %v4932_v1   ;;  %v4936_v62 = vpop.eup %4935  ;;  %v3387_v43 = vsub.f32 %v5960_v38, %v3242_v58  ;;  %v3384_v38 = vsub.f32 %v5957_v31, %v3227_v49 }
 0x308   : > { %3538 = vperm.xlu1 %4597, %v4934_v26   ;;  %v4938_v55 = vpop.eup %4937 }
 0x30b   : > { %3563 = vperm.xlu0 %4598, %v4936_v62   ;;  %v3232_v54 = vpop.permute.xlu1 %3231 }
 0x30c   : > { %3558 = vperm.xlu1 %4597, %v4938_v55   ;;  %v3385_v24 = vsub.f32 %v5964_v20, %v3232_v54 }
 0x30f   : > { %v4940_v61 = vpop.eup %4939 }
 0x310   : > { %v4942_v35 = vpop.eup %4941  ;;  %3573 = vperm.xlu0 %4598, %v4940_v61  }
 0x311   : > { %3568 = vperm.xlu1 %4597, %v4942_v35  }
 0x313   : > { %v3257_v40 = vpop.permute.xlu1 %3256 }
 0x314   : > { %v3390_v54 = vsub.f32 %v5977_v48, %v3257_v40 }
 0x317   : > { %v3247_v63 = vpop.permute.xlu1 %3246 }
 0x31b   : > { %v3262_v57 = vpop.permute.xlu1 %3261 }
 0x31c   : > { %v3391_v61 = vsub.f32 %v5985_v15, %v3262_v57 }
 0x31f   : > { %v3252_v13 = vpop.permute.xlu1 %3251 }
 0x322   : > { %v6303_v28 = vpop.permute.xlu0 %3281 }
 0x323   : > { %v6305_v6 = vpop.permute.xlu1 %3276 }
 0x326   : > { %v6307_v53 = vpop.permute.xlu0 %3271 }
 0x327   : > { %v6309_v5 = vpop.permute.xlu1 %3266 }
 0x32a   : > { %v3434_v34 = vpop.permute.xlu0 %3433 }
 0x32b   : > { %v3579_v2 = vmul.f32 %v3434_v34, %v3387_v43  ;;  %v3429_v44 = vpop.permute.xlu1 %3428  ;;  %v3389_v34 = vsub.f32 %v5988_v33, %v3252_v13 }
 0x32c   : > { %v3578_v23 = vmul.f32 %v3429_v44, %v3386_v41  ;;  %v3388_v44 = vsub.f32 %v5982_v59, %v3247_v63 }
 0x32d   : > { %vm3611_vm1 = vcmp.ge.f32.partialorder %v3579_v2, 0.0  ;;  %v3643_v4 = vmul.f32 0.2, %v3579_v2 }
 0x32e   : > { %vm3610_vm2 = vcmp.ge.f32.partialorder %v3578_v23, 0.0  ;;  %v3642_v12 = vmul.f32 0.2, %v3578_v23  ;;  %v3424_v29 = vpop.permute.xlu0 %3423 }
 0x32f   : > { %v3675_v30 = vsel %vm3611_vm1, %v3579_v2, %v3643_v4  ;;  %v3577_v25 = vmul.f32 %v3424_v29, %v3385_v24  ;;  %v3419_v42 = vpop.permute.xlu1 %3418 }
 0x330   : > { %3707 = vst [vmem:[%s6318_s25 + $0x18] sm:$0xff] %v3675_v30  ;;  %v3674_v20 = vsel %vm3610_vm2, %v3578_v23, %v3642_v12  ;;  %v3576_v14 = vmul.f32 %v3419_v42, %v3384_v38  ;;  %v3394_v42 = vsub.f32 %v5998_v52, %v6305_v6 }
 0x331   : > { %3706 = vst [vmem:[%s6318_s25 + $0x10] sm:$0xff] %v3674_v20  ;;  %vm3609_vm3 = vcmp.ge.f32.partialorder %v3577_v25, 0.0  ;;  %v3641_v46 = vmul.f32 0.2, %v3577_v25 }
 0x332   : > { %vm3608_vm4 = vcmp.ge.f32.partialorder %v3576_v14, 0.0  ;;  %v3640_v39 = vmul.f32 0.2, %v3576_v14  ;;  %v6323_v1 = vpop.permute.xlu0 %3301 }
 0x333   : > { %v3673_v26 = vsel %vm3609_vm3, %v3577_v25, %v3641_v46  ;;  %v6325_v31 = vpop.permute.xlu1 %3296  ;;  %v3395_v25 = vsub.f32 %v6004_v21, %v6303_v28 }
 0x334   : > { %3705 = vst [vmem:[%s6318_s25 + $0x8] sm:$0xff] %v3673_v26  ;;  %v3672_v58 = vsel %vm3608_vm4, %v3576_v14, %v3640_v39  ;;  %v3393_v26 = vsub.f32 %v6008_v0, %v6307_v53 }
 0x335   : > { %3704 = vst [vmem:[%s6318_s25] sm:$0xff] %v3672_v58 }
 0x336   : > { %v6329_v62 = vpop.permute.xlu0 %3291 }
 0x337   : > { %v6331_v55 = vpop.permute.xlu1 %3286 }
 0x33a   : > { %v3454_v35 = vpop.permute.xlu0 %3453 }
 0x33b   : > { %v3583_v49 = vmul.f32 %v3454_v35, %v3391_v61  ;;  %v3449_v43 = vpop.permute.xlu1 %3448  ;;  %v3392_v61 = vsub.f32 %v6001_v45, %v6309_v5 }
 0x33c   : > { %v3582_v41 = vmul.f32 %v3449_v43, %v3390_v54 }
 0x33d   : > { %vm3615_vm5 = vcmp.ge.f32.partialorder %v3583_v49, 0.0  ;;  %v3647_v2 = vmul.f32 0.2, %v3583_v49 }
 0x33e   : > { %vm3614_vm6 = vcmp.ge.f32.partialorder %v3582_v41, 0.0  ;;  %v3646_v23 = vmul.f32 0.2, %v3582_v41  ;;  %v3444_v24 = vpop.permute.xlu0 %3443 }
 0x33f   : > { %v3679_v4 = vsel %vm3615_vm5, %v3583_v49, %v3647_v2  ;;  %v3581_v15 = vmul.f32 %v3444_v24, %v3389_v34  ;;  %v3439_v57 = vpop.permute.xlu1 %3438 }
 0x340   : > { %3711 = vst [vmem:[%s6318_s25 + $0x38] sm:$0xff] %v3679_v4  ;;  %v3678_v48 = vsel %vm3614_vm6, %v3582_v41, %v3646_v23  ;;  %v3580_v40 = vmul.f32 %v3439_v57, %v3388_v44  ;;  %v3399_v44 = vsub.f32 %v6028_v16, %v6323_v1  ;;  %v3398_v23 = vsub.f32 %v6018_v47, %v6325_v31 }
 0x341   : > { %3710 = vst [vmem:[%s6318_s25 + $0x30] sm:$0xff] %v3678_v48  ;;  %vm3613_vm7 = vcmp.ge.f32.partialorder %v3581_v15, 0.0  ;;  %v3645_v38 = vmul.f32 0.2, %v3581_v15  ;;  %v3397_v48 = vsub.f32 %v6031_v37, %v6329_v62 }
 0x342   : > { %vm3612_vm8 = vcmp.ge.f32.partialorder %v3580_v40, 0.0  ;;  %v3644_v33 = vmul.f32 0.2, %v3580_v40  ;;  %v6339_v13 = vpop.permute.xlu0 %3321 }
 0x343   : > { %v3677_v12 = vsel %vm3613_vm7, %v3581_v15, %v3645_v38  ;;  %v6341_v59 = vpop.permute.xlu1 %3316  ;;  %v3396_v38 = vsub.f32 %v6023_v7, %v6331_v55 }
 0x344   : > { %3709 = vst [vmem:[%s6318_s25 + $0x28] sm:$0xff] %v3677_v12  ;;  %v3676_v63 = vsel %vm3612_vm8, %v3580_v40, %v3644_v33 }
 0x345   : > { %3708 = vst [vmem:[%s6318_s25 + $0x20] sm:$0xff] %v3676_v63 }
 0x346   : > { %v6345_v29 = vpop.permute.xlu0 %3311 }
 0x347   : > { %v6347_v30 = vpop.permute.xlu1 %3306 }
 0x34a   : > { %v3474_v20 = vpop.permute.xlu0 %3473 }
 0x34b   : > { %v3587_v14 = vmul.f32 %v3474_v20, %v3395_v25  ;;  %v3469_v46 = vpop.permute.xlu1 %3468 }
 0x34c   : > { %v3586_v39 = vmul.f32 %v3469_v46, %v3394_v42  ;;  %v3403_v46 = vsub.f32 %v6044_v22, %v6339_v13 }
 0x34d   : > { %vm3619_vm9 = vcmp.ge.f32.partialorder %v3587_v14, 0.0  ;;  %v3651_v58 = vmul.f32 0.2, %v3587_v14 }
 0x34e   : > { %vm3618_vm10 = vcmp.ge.f32.partialorder %v3586_v39, 0.0  ;;  %v3650_v54 = vmul.f32 0.2, %v3586_v39  ;;  %v3464_v21 = vpop.permute.xlu0 %3463 }
 0x34f   : > { %v3683_v28 = vsel %vm3619_vm9, %v3587_v14, %v3651_v58  ;;  %v3585_v52 = vmul.f32 %v3464_v21, %v3393_v26  ;;  %v3459_v6 = vpop.permute.xlu1 %3458  ;;  %v3401_v21 = vsub.f32 %v6048_v10, %v6345_v29 }
 0x350   : > { %3715 = vst [vmem:[%s6318_s25 + $0x58] sm:$0xff] %v3683_v28  ;;  %v3682_v35 = vsel %vm3618_vm10, %v3586_v39, %v3650_v54  ;;  %v3584_v49 = vmul.f32 %v3459_v6, %v3392_v61  ;;  %v3402_v39 = vsub.f32 %v6039_v50, %v6341_v59 }
 0x351   : > { %3714 = vst [vmem:[%s6318_s25 + $0x50] sm:$0xff] %v3682_v35  ;;  %vm3617_vm11 = vcmp.ge.f32.partialorder %v3585_v52, 0.0  ;;  %v3649_v43 = vmul.f32 0.2, %v3585_v52 }
 0x352   : > { %vm3616_vm12 = vcmp.ge.f32.partialorder %v3584_v49, 0.0  ;;  %v3648_v0 = vmul.f32 0.2, %v3584_v49  ;;  %v6359_v53 = vpop.permute.xlu0 %3341 }
 0x353   : > { %v3681_v41 = vsel %vm3617_vm11, %v3585_v52, %v3649_v43  ;;  %v6361_v45 = vpop.permute.xlu1 %3336  ;;  %v3400_v52 = vsub.f32 %v6042_v19, %v6347_v30 }
 0x354   : > { %3713 = vst [vmem:[%s6318_s25 + $0x48] sm:$0xff] %v3681_v41  ;;  %v3680_v5 = vsel %vm3616_vm12, %v3584_v49, %v3648_v0  ;;  %v3407_v41 = vsub.f32 %v6063_v8, %v6359_v53 }
 0x355   : > { %3712 = vst [vmem:[%s6318_s25 + $0x40] sm:$0xff] %v3680_v5  ;;  %v3406_v5 = vsub.f32 %v6055_v9, %v6361_v45 }
 0x356   : > { %v6365_v34 = vpop.permute.xlu0 %3331 }
 0x357   : > { %v6367_v2 = vpop.permute.xlu1 %3326 }
 0x35a   : > { %v3494_v24 = vpop.permute.xlu0 %3493 }
 0x35b   : > { %v3591_v4 = vmul.f32 %v3494_v24, %v3399_v44  ;;  %v3489_v15 = vpop.permute.xlu1 %3488 }
 0x35c   : > { %v3590_v57 = vmul.f32 %v3489_v15, %v3398_v23  ;;  %v3405_v15 = vsub.f32 %v6066_v56, %v6365_v34 }
 0x35d   : > { %vm3623_vm13 = vcmp.ge.f32.partialorder %v3591_v4, 0.0  ;;  %v3655_v40 = vmul.f32 0.2, %v3591_v4 }
 0x35e   : > { %vm3622_vm14 = vcmp.ge.f32.partialorder %v3590_v57, 0.0  ;;  %v3654_v33 = vmul.f32 0.2, %v3590_v57  ;;  %v3484_v16 = vpop.permute.xlu0 %3483 }
 0x35f   : > { %v3687_v1 = vsel %vm3623_vm13, %v3591_v4, %v3655_v40  ;;  %v3589_v47 = vmul.f32 %v3484_v16, %v3397_v48  ;;  %v3479_v31 = vpop.permute.xlu1 %3478  ;;  %v3404_v48 = vsub.f32 %v6059_v32, %v6367_v2 }
 0x360   : > { %3719 = vst [vmem:[%s6318_s25 + $0x78] sm:$0xff] %v3687_v1  ;;  %v3686_v12 = vsel %vm3622_vm14, %v3590_v57, %v3654_v33  ;;  %v3588_v63 = vmul.f32 %v3479_v31, %v3396_v38 }
 0x361   : > { %3718 = vst [vmem:[%s6318_s25 + $0x70] sm:$0xff] %v3686_v12  ;;  %vm3621_vm15 = vcmp.ge.f32.partialorder %v3589_v47, 0.0  ;;  %v3653_v25 = vmul.f32 0.2, %v3589_v47 }
 0x362   : > { %vm3620_vm0 = vcmp.ge.f32.partialorder %v3588_v63, 0.0  ;;  %v3652_v37 = vmul.f32 0.2, %v3588_v63  ;;  %v6379_v62 = vpop.permute.xlu0 %3361 }
 0x363   : > { %v3685_v42 = vsel %vm3621_vm15, %v3589_v47, %v3653_v25  ;;  %v6381_v7 = vpop.permute.xlu1 %3356  ;;  %v3411_v2 = vsub.f32 %v6078_v11, %v6379_v62 }
 0x364   : > { %3717 = vst [vmem:[%s6318_s25 + $0x68] sm:$0xff] %v3685_v42  ;;  %v3684_v55 = vsel %vm3620_vm0, %v3588_v63, %v3652_v37  ;;  %v3410_v31 = vsub.f32 %v6074_v51, %v6381_v7 }
 0x365   : > { %3716 = vst [vmem:[%s6318_s25 + $0x60] sm:$0xff] %v3684_v55 }
 0x366   : > { %v6385_v20 = vpop.permute.xlu0 %3351 }
 0x367   : > { %v6387_v14 = vpop.permute.xlu1 %3346  ;;  %v3409_v42 = vsub.f32 %v6081_v18, %v6385_v20 }
 0x36a   : > { %v3514_v26 = vpop.permute.xlu0 %3513 }
 0x36b   : > { %v3595_v58 = vmul.f32 %v3514_v26, %v3403_v46  ;;  %v3509_v61 = vpop.permute.xlu1 %3508  ;;  %v3408_v46 = vsub.f32 %v6076_v3, %v6387_v14 }
 0x36c   : > { %v3594_v54 = vmul.f32 %v3509_v61, %v3402_v39 }
 0x36d   : > { %vm3627_vm1 = vcmp.ge.f32.partialorder %v3595_v58, 0.0  ;;  %v3659_v28 = vmul.f32 0.2, %v3595_v58 }
 0x36e   : > { %vm3626_vm2 = vcmp.ge.f32.partialorder %v3594_v54, 0.0  ;;  %v3658_v6 = vmul.f32 0.2, %v3594_v54  ;;  %v3504_v22 = vpop.permute.xlu0 %3503 }
 0x36f   : > { %v3691_v13 = vsel %vm3627_vm1, %v3595_v58, %v3659_v28  ;;  %v3593_v35 = vmul.f32 %v3504_v22, %v3401_v21  ;;  %v3499_v50 = vpop.permute.xlu1 %3498 }
 0x370   : > { %3723 = vst [vmem:[%s6318_s25 + $0x98] sm:$0xff] %v3691_v13  ;;  %v3690_v59 = vsel %vm3626_vm2, %v3594_v54, %v3658_v6  ;;  %v3592_v49 = vmul.f32 %v3499_v50, %v3400_v52 }
 0x371   : > { %3722 = vst [vmem:[%s6318_s25 + $0x90] sm:$0xff] %v3690_v59  ;;  %vm3625_vm3 = vcmp.ge.f32.partialorder %v3593_v35, 0.0  ;;  %v3657_v43 = vmul.f32 0.2, %v3593_v35 }
 0x372   : > { %vm3624_vm4 = vcmp.ge.f32.partialorder %v3592_v49, 0.0  ;;  %v3656_v10 = vmul.f32 0.2, %v3592_v49  ;;  %v6399_v29 = vpop.permute.xlu0 %3371 }
 0x373   : > { %v3689_v0 = vsel %vm3625_vm3, %v3593_v35, %v3657_v43  ;;  %v6401_v19 = vpop.permute.xlu1 %3366  ;;  %v3413_v61 = vsub.f32 %v6095_v60, %v6399_v29 }
 0x374   : > { %3721 = vst [vmem:[%s6318_s25 + $0x88] sm:$0xff] %v3689_v0  ;;  %v3688_v30 = vsel %vm3624_vm4, %v3592_v49, %v3656_v10  ;;  %v3412_v3 = vsub.f32 %v6090_v27, %v6401_v19 }
 0x375   : > { %3720 = vst [vmem:[%s6318_s25 + $0x80] sm:$0xff] %v3688_v30 }
 0x376   : > { %v3534_v44 = vpop.permute.xlu0 %3533 }
 0x377   : > { %v3599_v23 = vmul.f32 %v3534_v44, %v3407_v41  ;;  %v3529_v24 = vpop.permute.xlu1 %3528 }
 0x378   : > { %v3598_v4 = vmul.f32 %v3529_v24, %v3406_v5 }
 0x379   : > { %vm3631_vm5 = vcmp.ge.f32.partialorder %v3599_v23, 0.0  ;;  %v3663_v57 = vmul.f32 0.2, %v3599_v23 }
 0x37a   : > { %vm3630_vm6 = vcmp.ge.f32.partialorder %v3598_v4, 0.0  ;;  %v3662_v8 = vmul.f32 0.2, %v3598_v4  ;;  %v3524_v53 = vpop.permute.xlu0 %3523 }
 0x37b   : > { %v3695_v40 = vsel %vm3631_vm5, %v3599_v23, %v3663_v57  ;;  %v3597_v38 = vmul.f32 %v3524_v53, %v3405_v15  ;;  %v3519_v9 = vpop.permute.xlu1 %3518 }
 0x37c   : > { %3727 = vst [vmem:[%s6318_s25 + $0xb8] sm:$0xff] %v3695_v40  ;;  %v3694_v45 = vsel %vm3630_vm6, %v3598_v4, %v3662_v8  ;;  %v3596_v33 = vmul.f32 %v3519_v9, %v3404_v48 }
 0x37d   : > { %3726 = vst [vmem:[%s6318_s25 + $0xb0] sm:$0xff] %v3694_v45  ;;  %vm3629_vm7 = vcmp.ge.f32.partialorder %v3597_v38, 0.0  ;;  %v3661_v16 = vmul.f32 0.2, %v3597_v38 }
 0x37e   : > { %vm3628_vm8 = vcmp.ge.f32.partialorder %v3596_v33, 0.0  ;;  %v3660_v56 = vmul.f32 0.2, %v3596_v33  ;;  %v3382_v34 = vpop.permute.xlu0 %3381 }
 0x37f   : > { %v3693_v1 = vsel %vm3629_vm7, %v3597_v38, %v3661_v16  ;;  %v3377_v47 = vpop.permute.xlu1 %3376  ;;  %v3415_v22 = vsub.f32 %v6104_v17, %v3382_v34 }
 0x380   : > { %3725 = vst [vmem:[%s6318_s25 + $0xa8] sm:$0xff] %v3693_v1  ;;  %v3692_v32 = vsel %vm3628_vm8, %v3596_v33, %v3660_v56  ;;  %v3414_v27 = vsub.f32 %v6102_v36, %v3377_v47 }
 0x381   : > { %3724 = vst [vmem:[%s6318_s25 + $0xa0] sm:$0xff] %v3692_v32 }
 0x382   : > { %v3554_v12 = vpop.permute.xlu0 %3553 }
 0x383   : > { %v3603_v63 = vmul.f32 %v3554_v12, %v3411_v2  ;;  %v3549_v25 = vpop.permute.xlu1 %3548 }
 0x384   : > { %v3602_v37 = vmul.f32 %v3549_v25, %v3410_v31 }
 0x385   : > { %vm3635_vm9 = vcmp.ge.f32.partialorder %v3603_v63, 0.0  ;;  %v3667_v55 = vmul.f32 0.2, %v3603_v63 }
 0x386   : > { %vm3634_vm10 = vcmp.ge.f32.partialorder %v3602_v37, 0.0  ;;  %v3666_v11 = vmul.f32 0.2, %v3602_v37  ;;  %v3544_v62 = vpop.permute.xlu0 %3543 }
 0x387   : > { %v3699_v39 = vsel %vm3635_vm9, %v3603_v63, %v3667_v55  ;;  %v3601_v26 = vmul.f32 %v3544_v62, %v3409_v42  ;;  %v3539_v51 = vpop.permute.xlu1 %3538 }
 0x388   : > { %3731 = vst [vmem:[%s6318_s25 + $0xd8] sm:$0xff] %v3699_v39  ;;  %v3698_v7 = vsel %vm3634_vm10, %v3602_v37, %v3666_v11  ;;  %v3600_v58 = vmul.f32 %v3539_v51, %v3408_v46 }
 0x389   : > { %3730 = vst [vmem:[%s6318_s25 + $0xd0] sm:$0xff] %v3698_v7  ;;  %vm3633_vm11 = vcmp.ge.f32.partialorder %v3601_v26, 0.0  ;;  %v3665_v18 = vmul.f32 0.2, %v3601_v26 }
 0x38a   : > { %vm3632_vm12 = vcmp.ge.f32.partialorder %v3600_v58, 0.0  ;;  %v3664_v20 = vmul.f32 0.2, %v3600_v58  ;;  %v3564_v14 = vpop.permute.xlu0 %3563 }
 0x38b   : > { %v3697_v54 = vsel %vm3633_vm11, %v3601_v26, %v3665_v18  ;;  %v3605_v21 = vmul.f32 %v3564_v14, %v3413_v61  ;;  %v3559_v28 = vpop.permute.xlu1 %3558 }
 0x38c   : > { %3729 = vst [vmem:[%s6318_s25 + $0xc8] sm:$0xff] %v3697_v54  ;;  %v3696_v52 = vsel %vm3632_vm12, %v3600_v58, %v3664_v20  ;;  %v3604_v6 = vmul.f32 %v3559_v28, %v3412_v3 }
 0x38d   : > { %3728 = vst [vmem:[%s6318_s25 + $0xc0] sm:$0xff] %v3696_v52  ;;  %vm3637_vm13 = vcmp.ge.f32.partialorder %v3605_v21, 0.0  ;;  %v3669_v60 = vmul.f32 0.2, %v3605_v21 }
 0x38e   : > { %vm3636_vm14 = vcmp.ge.f32.partialorder %v3604_v6, 0.0  ;;  %v3668_v13 = vmul.f32 0.2, %v3604_v6 }
 0x38f   : > { %v3701_v35 = vsel %vm3637_vm13, %v3605_v21, %v3669_v60  ;;  %v3574_v50 = vpop.permute.xlu0 %3573 }
 0x390   : > { %3733 = vst [vmem:[%s6318_s25 + $0xe8] sm:$0xff] %v3701_v35  ;;  %v3700_v59 = vsel %vm3636_vm14, %v3604_v6, %v3668_v13  ;;  %v3607_v49 = vmul.f32 %v3574_v50, %v3415_v22  ;;  %v3569_v43 = vpop.permute.xlu1 %3568 }
 0x391   : > { %3732 = vst [vmem:[%s6318_s25 + $0xe0] sm:$0xff] %v3700_v59  ;;  %v3606_v10 = vmul.f32 %v3569_v43, %v3414_v27 }
 0x392   : > { %vm3639_vm15 = vcmp.ge.f32.partialorder %v3607_v49, 0.0  ;;  %v3671_v29 = vmul.f32 0.2, %v3607_v49 }
 0x393   : > { %vm3638_vm0 = vcmp.ge.f32.partialorder %v3606_v10, 0.0  ;;  %v3670_v0 = vmul.f32 0.2, %v3606_v10 }
 0x394   : > { %v3703_v19 = vsel %vm3639_vm15, %v3607_v49, %v3671_v29 }
 0x395   : > { %3735 = vst [vmem:[%s6318_s25 + $0xf8] sm:$0xff] %v3703_v19  ;;  %v3702_v17 = vsel %vm3638_vm0, %v3606_v10, %v3670_v0 }
 0x396   : > { %3734 = vst [vmem:[%s6318_s25 + $0xf0] sm:$0xff] %v3702_v17 }
 0x397 PF: > { %s12_s11 = sadd.s32 1, %s4965_s11   ;;  %s6451_s9 = smov %s4961_s10 }
 0x398   : > { %p9_p5 = scmp.ge.s32.totalorder %s12_s11, 4   ;;  %s6452_s10 = smov %s6454_s12 }
 0x39a   :  { %11 = sbr.rel (!%p9_p5) target bundleno = 2 (0x2), region = 67 }

</bundles_post_ra>
